<compile_context>
chip_gen: v6e
topology: v6e:2x2x1
jax: 0.10.0
libtpu: 0.0.40
codegen_flags: <defaults>
</compile_context>

<pallas_src>
import math
from functools import partial

import jax
import jax.numpy as jnp
import numpy as np
from jax.experimental import pallas as pl
from jax.experimental.pallas import tpu as pltpu


# ---------------------------------------------------------------------------
# Fused CED kernel (one image per grid step)
# ---------------------------------------------------------------------------
def ced_kernel(xsh_ref, wd_ref, s_ref, bb_ref, w1_ref, b1_ref, w2_ref, b2_ref,
               g_ref, o_ref, *, H, W, C, K, G):
    WC = W * C            # 512 lanes: lane index = w*C + c
    CG = C * G            # 128 lanes per group in the C-domain
    ngroups = W // G

    # --- depthwise KxK conv: 49 lane-dense VPU MACs ---------------------------
    # xsh_ref[0, dx, i, w*C + c] == xpad[i, w + dx, c]; tap (dy, dx) therefore
    # only needs a sublane-offset ref slice (no lane shifts at all).
    accs = [jnp.zeros((H, WC), jnp.float32) for _ in range(2)]
    for dy in range(K):
        for dx in range(K):
            t = dy * K + dx
            win = xsh_ref[0, dx, dy:dy + H, :]            # (H, W*C) f32
            accs[t % 2] = accs[t % 2] + win * wd_ref[t]   # per-channel weight
    acc = accs[0] + accs[1]

    # --- folded eval-mode BatchNorm (dwconv bias folded in) -------------------
    y = acc * s_ref[0] + bb_ref[0]                        # (H, W*C) f32

    # --- residual input (x itself = dx=3 view, rows 3..18) --------------------
    x_in = xsh_ref[0, K // 2, K // 2:K // 2 + H, :]       # (H, W*C) f32

    # --- grouped block-diagonal pointwise convs (bf16 MXU, f32 accumulate) ----
    # w1_ref is blockdiag(w1 x G): (G*C, G*4C); w2_ref: (G*4C, G*C).
    for gi in range(ngroups):
        lo, hi_ = gi * CG, (gi + 1) * CG                  # 128-aligned lane window
        y_g = y[:, lo:hi_].astype(jnp.bfloat16)           # (H, G*C)
        h_g = jnp.dot(y_g, w1_ref[...],
                      preferred_element_type=jnp.float32) + b1_ref[0]
        h_g = jnp.maximum(h_g, 0.0).astype(jnp.bfloat16)  # (H, G*4C)
        z_g = jnp.dot(h_g, w2_ref[...],
                      preferred_element_type=jnp.float32) + b2_ref[0]
        z_g = z_g * g_ref[0]                              # layer-scale gamma
        # residual add fused into a 128-aligned, lane-dense store
        o_ref[0, :, lo:hi_] = (x_in[:, lo:hi_] + z_g).astype(o_ref.dtype)


# ---------------------------------------------------------------------------
# Wrapper: builds lane-dense shifted views and calls the kernel
# ---------------------------------------------------------------------------
def ced_forward(x, kparams, *, K=7, G=4):
    wd_t, s_t, bb_t, w1blk, b1_t, w2blk, b2_t, g_t = kparams
    N, H, W, C = x.shape
    P = K // 2
    WC = W * C

    # One fused XLA prep op: zero-pad + 7 lane-dense dx-shifted views.
    # xsh[n, dx, i, w*C + c] = xpad[n, i, w + dx, c]   (shape (N, K, H+2P, W*C))
    xpad = jnp.pad(x, ((0, 0), (P, P), (P, P), (0, 0)))
    xsh = jnp.stack(
        [xpad[:, :, dx:dx + W, :].reshape(N, H + 2 * P, WC) for dx in range(K)],
        axis=1)

    kernel = partial(ced_kernel, H=H, W=W, C=C, K=K, G=G)
    out2d = pl.pallas_call(
        kernel,
        out_shape=jax.ShapeDtypeStruct((N, H, WC), jnp.float32),
        grid=(N,),
        in_specs=[
            pl.BlockSpec((1, K, H + 2 * P, WC), lambda b: (b, 0, 0, 0)),  # xsh
            pl.BlockSpec((K * K, WC), lambda b: (0, 0)),                  # dw weights (tiled)
            pl.BlockSpec((1, WC), lambda b: (0, 0)),                      # BN scale (tiled)
            pl.BlockSpec((1, WC), lambda b: (0, 0)),                      # BN bias  (tiled)
            pl.BlockSpec((G * C, G * 4 * C), lambda b: (0, 0)),           # w1 blockdiag bf16
            pl.BlockSpec((1, G * 4 * C), lambda b: (0, 0)),               # b1 (tiled)
            pl.BlockSpec((G * 4 * C, G * C), lambda b: (0, 0)),           # w2 blockdiag bf16
            pl.BlockSpec((1, G * C), lambda b: (0, 0)),                   # b2 (tiled)
            pl.BlockSpec((1, G * C), lambda b: (0, 0)),                   # gamma (tiled)
        ],
        out_specs=pl.BlockSpec((1, H, WC), lambda b: (b, 0, 0)),
        compiler_params=pltpu.CompilerParams(
            dimension_semantics=("parallel",)),   # v7x: 2 TCs split the batch
    )(xsh, wd_t, s_t, bb_t, w1blk, b1_t, w2blk, b2_t, g_t)

    return out2d.reshape(N, H, W, C)


# ---------------------------------------------------------------------------
# Parameters: raw module parameters + packing into kernel operands
# ---------------------------------------------------------------------------
def make_params(key, C, K=7):
    ks = jax.random.split(key, 11)
    wd = 0.05 * jax.random.normal(ks[0], (K * K, C), jnp.float32)   # dw weights
    bd = 0.05 * jax.random.normal(ks[1], (C,), jnp.float32)         # dw bias
    gamma_bn = 1.0 + 0.1 * jax.random.normal(ks[2], (C,), jnp.float32)
    beta_bn = 0.1 * jax.random.normal(ks[3], (C,), jnp.float32)
    mean_bn = 0.05 * jax.random.normal(ks[4], (C,), jnp.float32)
    var_bn = 1.0 + 0.2 * jax.random.uniform(ks[5], (C,), jnp.float32)
    w1 = jax.random.normal(ks[6], (C, 4 * C), jnp.float32) / math.sqrt(C)
    b1 = 0.1 * jax.random.normal(ks[7], (4 * C,), jnp.float32)
    w2 = jax.random.normal(ks[8], (4 * C, C), jnp.float32) / math.sqrt(4 * C)
    b2 = 0.1 * jax.random.normal(ks[9], (C,), jnp.float32)
    # layer-scale gamma (module init is ls_init_value*ones; randomized so the
    # correctness check exercises the branch)
    g = 0.5 * jax.random.normal(ks[10], (C,), jnp.float32)
    return (wd, bd, gamma_bn, beta_bn, mean_bn, var_bn, w1, b1, w2, b2, g)


def pack_params(params, *, W, G=4, eps=1e-5):
    """Fold BN, tile per-channel vectors to the lane-dense layout, build the
    block-diagonal bf16 MXU weights."""
    wd, bd, gamma_bn, beta_bn, mean_bn, var_bn, w1, b1, w2, b2, g = params
    C = wd.shape[-1]
    s = gamma_bn / jnp.sqrt(var_bn + eps)
    bb = beta_bn + (bd - mean_bn) * s                 # dw bias folded into BN bias
    wd_t = jnp.tile(wd, (1, W))                       # (K*K, W*C): lane w*C+c -> wd[:, c]
    s_t = jnp.tile(s.reshape(1, C), (1, W))           # (1, W*C)
    bb_t = jnp.tile(bb.reshape(1, C), (1, W))         # (1, W*C)
    eye = jnp.eye(G, dtype=w1.dtype)
    w1blk = jnp.kron(eye, w1).astype(jnp.bfloat16)    # (G*C, G*4C) block-diagonal
    w2blk = jnp.kron(eye, w2).astype(jnp.bfloat16)    # (G*4C, G*C) block-diagonal
    b1_t = jnp.tile(b1.reshape(1, 4 * C), (1, G))     # (1, G*4C)
    b2_t = jnp.tile(b2.reshape(1, C), (1, G))         # (1, G*C)
    g_t = jnp.tile(g.reshape(1, C), (1, G))           # (1, G*C)
    return (wd_t, s_t, bb_t, w1blk, b1_t, w2blk, b2_t, g_t)


# ---------------------------------------------------------------------------
# Pure-JAX reference (correctness check only; f32 HIGHEST precision)
# ---------------------------------------------------------------------------
def ref_forward(x, params, *, K=7, eps=1e-5):
    wd, bd, gamma_bn, beta_bn, mean_bn, var_bn, w1, b1, w2, b2, g = params
    N, H, W, C = x.shape
    hi = jax.lax.Precision.HIGHEST
    wd_hwio = wd.reshape(K, K, 1, C)
    y = jax.lax.conv_general_dilated(
        x, wd_hwio, (1, 1), "SAME",
        dimension_numbers=("NHWC", "HWIO", "NHWC"),
        feature_group_count=C, precision=hi) + bd
    y = (y - mean_bn) * (gamma_bn / jnp.sqrt(var_bn + eps)) + beta_bn
    h = jnp.einsum("nhwc,cd->nhwd", y, w1, precision=hi) + b1
    h = jnp.maximum(h, 0.0)
    z = jnp.einsum("nhwd,dc->nhwc", h, w2, precision=hi) + b2
    z = z * g
    # TODO(synk): DropPath (stochastic depth) is a train-time op; drop_path=0.0
    # makes it the identity (implemented).  BatchNorm is eval-mode (running
    # stats), as is standard for a fused inference kernel.
    return x + z


if __name__ == "__main__":
    N, H, W, C = 2, 16, 16, 32     # dim=32 -> 4*dim=128; W*C=512 lane-dense rows
    key = jax.random.PRNGKey(0)
    kx, kp = jax.random.split(key)
    x = jax.random.normal(kx, (N, H, W, C), jnp.float32)
    params = make_params(kp, C)
    kparams = pack_params(params, W=W, G=4)

    fwd = jax.jit(partial(ced_forward, K=7, G=4))
    out = jax.block_until_ready(fwd(x, kparams))
    ref = jax.block_until_ready(ref_forward(x, params))

    assert out.shape == (N, H, W, C)
    # bf16 MXU inputs with f32 accumulation -> loosened tolerance vs f32 reference
    np.testing.assert_allclose(np.asarray(out), np.asarray(ref),
                               rtol=1e-2, atol=1e-2)
    print("KERNEL_OK")
</pallas_src>

<mosaic_0001>
module attributes {stable_mosaic.version = 11 : i64} {
  func.func @ced_kernel(%arg0: i32, %arg1: memref<1x7x22x512xf32, #tpu.memory_space<vmem>>, %arg2: memref<49x512xf32, #tpu.memory_space<vmem>>, %arg3: memref<1x512xf32, #tpu.memory_space<vmem>>, %arg4: memref<1x512xf32, #tpu.memory_space<vmem>>, %arg5: memref<128x512xbf16, #tpu.memory_space<vmem>>, %arg6: memref<1x512xf32, #tpu.memory_space<vmem>>, %arg7: memref<512x128xbf16, #tpu.memory_space<vmem>>, %arg8: memref<1x128xf32, #tpu.memory_space<vmem>>, %arg9: memref<1x128xf32, #tpu.memory_space<vmem>>, %arg10: memref<1x16x512xf32, #tpu.memory_space<vmem>>) attributes {dimension_semantics = [#tpu.dimension_semantics<parallel>], iteration_bounds = array<i64: 2>, scalar_prefetch = 0 : i64, scratch_operands = 0 : i64, tpu.core_type = #tpu.core_type<tc>, window_params = [{transform_indices = @transform_0, window_bounds = array<i64: 1, 7, 22, 512>}, {pipeline_mode = #tpu.pipeline_mode<synchronous>, transform_indices = @transform_1, window_bounds = array<i64: 49, 512>}, {pipeline_mode = #tpu.pipeline_mode<synchronous>, transform_indices = @transform_2, window_bounds = array<i64: 1, 512>}, {pipeline_mode = #tpu.pipeline_mode<synchronous>, transform_indices = @transform_3, window_bounds = array<i64: 1, 512>}, {pipeline_mode = #tpu.pipeline_mode<synchronous>, transform_indices = @transform_4, window_bounds = array<i64: 128, 512>}, {pipeline_mode = #tpu.pipeline_mode<synchronous>, transform_indices = @transform_5, window_bounds = array<i64: 1, 512>}, {pipeline_mode = #tpu.pipeline_mode<synchronous>, transform_indices = @transform_6, window_bounds = array<i64: 512, 128>}, {pipeline_mode = #tpu.pipeline_mode<synchronous>, transform_indices = @transform_7, window_bounds = array<i64: 1, 128>}, {pipeline_mode = #tpu.pipeline_mode<synchronous>, transform_indices = @transform_8, window_bounds = array<i64: 1, 128>}, {transform_indices = @transform_9, window_bounds = array<i64: 1, 16, 512>}]} {
    %cst = arith.constant 0.000000e+00 : f32
    %0 = vector.broadcast %cst : f32 to vector<16x512xf32>
    %cst_0 = arith.constant 0.000000e+00 : f32
    %1 = vector.broadcast %cst_0 : f32 to vector<16x512xf32>
    %c0 = arith.constant 0 : index
    %c0_1 = arith.constant 0 : index
    %c0_2 = arith.constant 0 : index
    %c0_3 = arith.constant 0 : index
    %2 = vector.load %arg1[%c0, %c0_1, %c0_2, %c0_3] : memref<1x7x22x512xf32, #tpu.memory_space<vmem>>, vector<1x1x16x512xf32>
    %3 = vector.shape_cast %2 : vector<1x1x16x512xf32> to vector<16x512xf32>
    %c0_4 = arith.constant 0 : index
    %c0_5 = arith.constant 0 : index
    %4 = vector.load %arg2[%c0_4, %c0_5] : memref<49x512xf32, #tpu.memory_space<vmem>>, vector<1x512xf32>
    %5 = vector.shape_cast %4 : vector<1x512xf32> to vector<512xf32>
    %6 = vector.shape_cast %5 : vector<512xf32> to vector<1x512xf32>
    %7 = vector.broadcast %6 : vector<1x512xf32> to vector<16x512xf32>
    %8 = arith.mulf %3, %7 : vector<16x512xf32>
    %9 = arith.addf %0, %8 : vector<16x512xf32>
    %c0_6 = arith.constant 0 : index
    %c1 = arith.constant 1 : index
    %c0_7 = arith.constant 0 : index
    %c0_8 = arith.constant 0 : index
    %10 = vector.load %arg1[%c0_6, %c1, %c0_7, %c0_8] : memref<1x7x22x512xf32, #tpu.memory_space<vmem>>, vector<1x1x16x512xf32>
    %11 = vector.shape_cast %10 : vector<1x1x16x512xf32> to vector<16x512xf32>
    %c1_9 = arith.constant 1 : index
    %c0_10 = arith.constant 0 : index
    %12 = vector.load %arg2[%c1_9, %c0_10] : memref<49x512xf32, #tpu.memory_space<vmem>>, vector<1x512xf32>
    %13 = vector.shape_cast %12 : vector<1x512xf32> to vector<512xf32>
    %14 = vector.shape_cast %13 : vector<512xf32> to vector<1x512xf32>
    %15 = vector.broadcast %14 : vector<1x512xf32> to vector<16x512xf32>
    %16 = arith.mulf %11, %15 : vector<16x512xf32>
    %17 = arith.addf %1, %16 : vector<16x512xf32>
    %c0_11 = arith.constant 0 : index
    %c2 = arith.constant 2 : index
    %c0_12 = arith.constant 0 : index
    %c0_13 = arith.constant 0 : index
    %18 = vector.load %arg1[%c0_11, %c2, %c0_12, %c0_13] : memref<1x7x22x512xf32, #tpu.memory_space<vmem>>, vector<1x1x16x512xf32>
    %19 = vector.shape_cast %18 : vector<1x1x16x512xf32> to vector<16x512xf32>
    %c2_14 = arith.constant 2 : index
    %c0_15 = arith.constant 0 : index
    %20 = vector.load %arg2[%c2_14, %c0_15] : memref<49x512xf32, #tpu.memory_space<vmem>>, vector<1x512xf32>
    %21 = vector.shape_cast %20 : vector<1x512xf32> to vector<512xf32>
    %22 = vector.shape_cast %21 : vector<512xf32> to vector<1x512xf32>
    %23 = vector.broadcast %22 : vector<1x512xf32> to vector<16x512xf32>
    %24 = arith.mulf %19, %23 : vector<16x512xf32>
    %25 = arith.addf %9, %24 : vector<16x512xf32>
    %c0_16 = arith.constant 0 : index
    %c3 = arith.constant 3 : index
    %c0_17 = arith.constant 0 : index
    %c0_18 = arith.constant 0 : index
    %26 = vector.load %arg1[%c0_16, %c3, %c0_17, %c0_18] : memref<1x7x22x512xf32, #tpu.memory_space<vmem>>, vector<1x1x16x512xf32>
    %27 = vector.shape_cast %26 : vector<1x1x16x512xf32> to vector<16x512xf32>
    %c3_19 = arith.constant 3 : index
    %c0_20 = arith.constant 0 : index
    %28 = vector.load %arg2[%c3_19, %c0_20] : memref<49x512xf32, #tpu.memory_space<vmem>>, vector<1x512xf32>
    %29 = vector.shape_cast %28 : vector<1x512xf32> to vector<512xf32>
    %30 = vector.shape_cast %29 : vector<512xf32> to vector<1x512xf32>
    %31 = vector.broadcast %30 : vector<1x512xf32> to vector<16x512xf32>
    %32 = arith.mulf %27, %31 : vector<16x512xf32>
    %33 = arith.addf %17, %32 : vector<16x512xf32>
    %c0_21 = arith.constant 0 : index
    %c4 = arith.constant 4 : index
    %c0_22 = arith.constant 0 : index
    %c0_23 = arith.constant 0 : index
    %34 = vector.load %arg1[%c0_21, %c4, %c0_22, %c0_23] : memref<1x7x22x512xf32, #tpu.memory_space<vmem>>, vector<1x1x16x512xf32>
    %35 = vector.shape_cast %34 : vector<1x1x16x512xf32> to vector<16x512xf32>
    %c4_24 = arith.constant 4 : index
    %c0_25 = arith.constant 0 : index
    %36 = vector.load %arg2[%c4_24, %c0_25] : memref<49x512xf32, #tpu.memory_space<vmem>>, vector<1x512xf32>
    %37 = vector.shape_cast %36 : vector<1x512xf32> to vector<512xf32>
    %38 = vector.shape_cast %37 : vector<512xf32> to vector<1x512xf32>
    %39 = vector.broadcast %38 : vector<1x512xf32> to vector<16x512xf32>
    %40 = arith.mulf %35, %39 : vector<16x512xf32>
    %41 = arith.addf %25, %40 : vector<16x512xf32>
    %c0_26 = arith.constant 0 : index
    %c5 = arith.constant 5 : index
    %c0_27 = arith.constant 0 : index
    %c0_28 = arith.constant 0 : index
    %42 = vector.load %arg1[%c0_26, %c5, %c0_27, %c0_28] : memref<1x7x22x512xf32, #tpu.memory_space<vmem>>, vector<1x1x16x512xf32>
    %43 = vector.shape_cast %42 : vector<1x1x16x512xf32> to vector<16x512xf32>
    %c5_29 = arith.constant 5 : index
    %c0_30 = arith.constant 0 : index
    %44 = vector.load %arg2[%c5_29, %c0_30] : memref<49x512xf32, #tpu.memory_space<vmem>>, vector<1x512xf32>
    %45 = vector.shape_cast %44 : vector<1x512xf32> to vector<512xf32>
    %46 = vector.shape_cast %45 : vector<512xf32> to vector<1x512xf32>
    %47 = vector.broadcast %46 : vector<1x512xf32> to vector<16x512xf32>
    %48 = arith.mulf %43, %47 : vector<16x512xf32>
    %49 = arith.addf %33, %48 : vector<16x512xf32>
    %c0_31 = arith.constant 0 : index
    %c6 = arith.constant 6 : index
    %c0_32 = arith.constant 0 : index
    %c0_33 = arith.constant 0 : index
    %50 = vector.load %arg1[%c0_31, %c6, %c0_32, %c0_33] : memref<1x7x22x512xf32, #tpu.memory_space<vmem>>, vector<1x1x16x512xf32>
    %51 = vector.shape_cast %50 : vector<1x1x16x512xf32> to vector<16x512xf32>
    %c6_34 = arith.constant 6 : index
    %c0_35 = arith.constant 0 : index
    %52 = vector.load %arg2[%c6_34, %c0_35] : memref<49x512xf32, #tpu.memory_space<vmem>>, vector<1x512xf32>
    %53 = vector.shape_cast %52 : vector<1x512xf32> to vector<512xf32>
    %54 = vector.shape_cast %53 : vector<512xf32> to vector<1x512xf32>
    %55 = vector.broadcast %54 : vector<1x512xf32> to vector<16x512xf32>
    %56 = arith.mulf %51, %55 : vector<16x512xf32>
    %57 = arith.addf %41, %56 : vector<16x512xf32>
    %c0_36 = arith.constant 0 : index
    %c0_37 = arith.constant 0 : index
    %c1_38 = arith.constant 1 : index
    %c0_39 = arith.constant 0 : index
    %58 = vector.load %arg1[%c0_36, %c0_37, %c1_38, %c0_39] : memref<1x7x22x512xf32, #tpu.memory_space<vmem>>, vector<1x1x16x512xf32>
    %59 = vector.shape_cast %58 : vector<1x1x16x512xf32> to vector<16x512xf32>
    %c7 = arith.constant 7 : index
    %c0_40 = arith.constant 0 : index
    %60 = vector.load %arg2[%c7, %c0_40] : memref<49x512xf32, #tpu.memory_space<vmem>>, vector<1x512xf32>
    %61 = vector.shape_cast %60 : vector<1x512xf32> to vector<512xf32>
    %62 = vector.shape_cast %61 : vector<512xf32> to vector<1x512xf32>
    %63 = vector.broadcast %62 : vector<1x512xf32> to vector<16x512xf32>
    %64 = arith.mulf %59, %63 : vector<16x512xf32>
    %65 = arith.addf %49, %64 : vector<16x512xf32>
    %c0_41 = arith.constant 0 : index
    %c1_42 = arith.constant 1 : index
    %c1_43 = arith.constant 1 : index
    %c0_44 = arith.constant 0 : index
    %66 = vector.load %arg1[%c0_41, %c1_42, %c1_43, %c0_44] : memref<1x7x22x512xf32, #tpu.memory_space<vmem>>, vector<1x1x16x512xf32>
    %67 = vector.shape_cast %66 : vector<1x1x16x512xf32> to vector<16x512xf32>
    %c8 = arith.constant 8 : index
    %c0_45 = arith.constant 0 : index
    %68 = vector.load %arg2[%c8, %c0_45] : memref<49x512xf32, #tpu.memory_space<vmem>>, vector<1x512xf32>
    %69 = vector.shape_cast %68 : vector<1x512xf32> to vector<512xf32>
    %70 = vector.shape_cast %69 : vector<512xf32> to vector<1x512xf32>
    %71 = vector.broadcast %70 : vector<1x512xf32> to vector<16x512xf32>
    %72 = arith.mulf %67, %71 : vector<16x512xf32>
    %73 = arith.addf %57, %72 : vector<16x512xf32>
    %c0_46 = arith.constant 0 : index
    %c2_47 = arith.constant 2 : index
    %c1_48 = arith.constant 1 : index
    %c0_49 = arith.constant 0 : index
    %74 = vector.load %arg1[%c0_46, %c2_47, %c1_48, %c0_49] : memref<1x7x22x512xf32, #tpu.memory_space<vmem>>, vector<1x1x16x512xf32>
    %75 = vector.shape_cast %74 : vector<1x1x16x512xf32> to vector<16x512xf32>
    %c9 = arith.constant 9 : index
    %c0_50 = arith.constant 0 : index
    %76 = vector.load %arg2[%c9, %c0_50] : memref<49x512xf32, #tpu.memory_space<vmem>>, vector<1x512xf32>
    %77 = vector.shape_cast %76 : vector<1x512xf32> to vector<512xf32>
    %78 = vector.shape_cast %77 : vector<512xf32> to vector<1x512xf32>
    %79 = vector.broadcast %78 : vector<1x512xf32> to vector<16x512xf32>
    %80 = arith.mulf %75, %79 : vector<16x512xf32>
    %81 = arith.addf %65, %80 : vector<16x512xf32>
    %c0_51 = arith.constant 0 : index
    %c3_52 = arith.constant 3 : index
    %c1_53 = arith.constant 1 : index
    %c0_54 = arith.constant 0 : index
    %82 = vector.load %arg1[%c0_51, %c3_52, %c1_53, %c0_54] : memref<1x7x22x512xf32, #tpu.memory_space<vmem>>, vector<1x1x16x512xf32>
    %83 = vector.shape_cast %82 : vector<1x1x16x512xf32> to vector<16x512xf32>
    %c10 = arith.constant 10 : index
    %c0_55 = arith.constant 0 : index
    %84 = vector.load %arg2[%c10, %c0_55] : memref<49x512xf32, #tpu.memory_space<vmem>>, vector<1x512xf32>
    %85 = vector.shape_cast %84 : vector<1x512xf32> to vector<512xf32>
    %86 = vector.shape_cast %85 : vector<512xf32> to vector<1x512xf32>
    %87 = vector.broadcast %86 : vector<1x512xf32> to vector<16x512xf32>
    %88 = arith.mulf %83, %87 : vector<16x512xf32>
    %89 = arith.addf %73, %88 : vector<16x512xf32>
    %c0_56 = arith.constant 0 : index
    %c4_57 = arith.constant 4 : index
    %c1_58 = arith.constant 1 : index
    %c0_59 = arith.constant 0 : index
    %90 = vector.load %arg1[%c0_56, %c4_57, %c1_58, %c0_59] : memref<1x7x22x512xf32, #tpu.memory_space<vmem>>, vector<1x1x16x512xf32>
    %91 = vector.shape_cast %90 : vector<1x1x16x512xf32> to vector<16x512xf32>
    %c11 = arith.constant 11 : index
    %c0_60 = arith.constant 0 : index
    %92 = vector.load %arg2[%c11, %c0_60] : memref<49x512xf32, #tpu.memory_space<vmem>>, vector<1x512xf32>
    %93 = vector.shape_cast %92 : vector<1x512xf32> to vector<512xf32>
    %94 = vector.shape_cast %93 : vector<512xf32> to vector<1x512xf32>
    %95 = vector.broadcast %94 : vector<1x512xf32> to vector<16x512xf32>
    %96 = arith.mulf %91, %95 : vector<16x512xf32>
    %97 = arith.addf %81, %96 : vector<16x512xf32>
    %c0_61 = arith.constant 0 : index
    %c5_62 = arith.constant 5 : index
    %c1_63 = arith.constant 1 : index
    %c0_64 = arith.constant 0 : index
    %98 = vector.load %arg1[%c0_61, %c5_62, %c1_63, %c0_64] : memref<1x7x22x512xf32, #tpu.memory_space<vmem>>, vector<1x1x16x512xf32>
    %99 = vector.shape_cast %98 : vector<1x1x16x512xf32> to vector<16x512xf32>
    %c12 = arith.constant 12 : index
    %c0_65 = arith.constant 0 : index
    %100 = vector.load %arg2[%c12, %c0_65] : memref<49x512xf32, #tpu.memory_space<vmem>>, vector<1x512xf32>
    %101 = vector.shape_cast %100 : vector<1x512xf32> to vector<512xf32>
    %102 = vector.shape_cast %101 : vector<512xf32> to vector<1x512xf32>
    %103 = vector.broadcast %102 : vector<1x512xf32> to vector<16x512xf32>
    %104 = arith.mulf %99, %103 : vector<16x512xf32>
    %105 = arith.addf %89, %104 : vector<16x512xf32>
    %c0_66 = arith.constant 0 : index
    %c6_67 = arith.constant 6 : index
    %c1_68 = arith.constant 1 : index
    %c0_69 = arith.constant 0 : index
    %106 = vector.load %arg1[%c0_66, %c6_67, %c1_68, %c0_69] : memref<1x7x22x512xf32, #tpu.memory_space<vmem>>, vector<1x1x16x512xf32>
    %107 = vector.shape_cast %106 : vector<1x1x16x512xf32> to vector<16x512xf32>
    %c13 = arith.constant 13 : index
    %c0_70 = arith.constant 0 : index
    %108 = vector.load %arg2[%c13, %c0_70] : memref<49x512xf32, #tpu.memory_space<vmem>>, vector<1x512xf32>
    %109 = vector.shape_cast %108 : vector<1x512xf32> to vector<512xf32>
    %110 = vector.shape_cast %109 : vector<512xf32> to vector<1x512xf32>
    %111 = vector.broadcast %110 : vector<1x512xf32> to vector<16x512xf32>
    %112 = arith.mulf %107, %111 : vector<16x512xf32>
    %113 = arith.addf %97, %112 : vector<16x512xf32>
    %c0_71 = arith.constant 0 : index
    %c0_72 = arith.constant 0 : index
    %c2_73 = arith.constant 2 : index
    %c0_74 = arith.constant 0 : index
    %114 = vector.load %arg1[%c0_71, %c0_72, %c2_73, %c0_74] : memref<1x7x22x512xf32, #tpu.memory_space<vmem>>, vector<1x1x16x512xf32>
    %115 = vector.shape_cast %114 : vector<1x1x16x512xf32> to vector<16x512xf32>
    %c14 = arith.constant 14 : index
    %c0_75 = arith.constant 0 : index
    %116 = vector.load %arg2[%c14, %c0_75] : memref<49x512xf32, #tpu.memory_space<vmem>>, vector<1x512xf32>
    %117 = vector.shape_cast %116 : vector<1x512xf32> to vector<512xf32>
    %118 = vector.shape_cast %117 : vector<512xf32> to vector<1x512xf32>
    %119 = vector.broadcast %118 : vector<1x512xf32> to vector<16x512xf32>
    %120 = arith.mulf %115, %119 : vector<16x512xf32>
    %121 = arith.addf %105, %120 : vector<16x512xf32>
    %c0_76 = arith.constant 0 : index
    %c1_77 = arith.constant 1 : index
    %c2_78 = arith.constant 2 : index
    %c0_79 = arith.constant 0 : index
    %122 = vector.load %arg1[%c0_76, %c1_77, %c2_78, %c0_79] : memref<1x7x22x512xf32, #tpu.memory_space<vmem>>, vector<1x1x16x512xf32>
    %123 = vector.shape_cast %122 : vector<1x1x16x512xf32> to vector<16x512xf32>
    %c15 = arith.constant 15 : index
    %c0_80 = arith.constant 0 : index
    %124 = vector.load %arg2[%c15, %c0_80] : memref<49x512xf32, #tpu.memory_space<vmem>>, vector<1x512xf32>
    %125 = vector.shape_cast %124 : vector<1x512xf32> to vector<512xf32>
    %126 = vector.shape_cast %125 : vector<512xf32> to vector<1x512xf32>
    %127 = vector.broadcast %126 : vector<1x512xf32> to vector<16x512xf32>
    %128 = arith.mulf %123, %127 : vector<16x512xf32>
    %129 = arith.addf %113, %128 : vector<16x512xf32>
    %c0_81 = arith.constant 0 : index
    %c2_82 = arith.constant 2 : index
    %c2_83 = arith.constant 2 : index
    %c0_84 = arith.constant 0 : index
    %130 = vector.load %arg1[%c0_81, %c2_82, %c2_83, %c0_84] : memref<1x7x22x512xf32, #tpu.memory_space<vmem>>, vector<1x1x16x512xf32>
    %131 = vector.shape_cast %130 : vector<1x1x16x512xf32> to vector<16x512xf32>
    %c16 = arith.constant 16 : index
    %c0_85 = arith.constant 0 : index
    %132 = vector.load %arg2[%c16, %c0_85] : memref<49x512xf32, #tpu.memory_space<vmem>>, vector<1x512xf32>
    %133 = vector.shape_cast %132 : vector<1x512xf32> to vector<512xf32>
    %134 = vector.shape_cast %133 : vector<512xf32> to vector<1x512xf32>
    %135 = vector.broadcast %134 : vector<1x512xf32> to vector<16x512xf32>
    %136 = arith.mulf %131, %135 : vector<16x512xf32>
    %137 = arith.addf %121, %136 : vector<16x512xf32>
    %c0_86 = arith.constant 0 : index
    %c3_87 = arith.constant 3 : index
    %c2_88 = arith.constant 2 : index
    %c0_89 = arith.constant 0 : index
    %138 = vector.load %arg1[%c0_86, %c3_87, %c2_88, %c0_89] : memref<1x7x22x512xf32, #tpu.memory_space<vmem>>, vector<1x1x16x512xf32>
    %139 = vector.shape_cast %138 : vector<1x1x16x512xf32> to vector<16x512xf32>
    %c17 = arith.constant 17 : index
    %c0_90 = arith.constant 0 : index
    %140 = vector.load %arg2[%c17, %c0_90] : memref<49x512xf32, #tpu.memory_space<vmem>>, vector<1x512xf32>
    %141 = vector.shape_cast %140 : vector<1x512xf32> to vector<512xf32>
    %142 = vector.shape_cast %141 : vector<512xf32> to vector<1x512xf32>
    %143 = vector.broadcast %142 : vector<1x512xf32> to vector<16x512xf32>
    %144 = arith.mulf %139, %143 : vector<16x512xf32>
    %145 = arith.addf %129, %144 : vector<16x512xf32>
    %c0_91 = arith.constant 0 : index
    %c4_92 = arith.constant 4 : index
    %c2_93 = arith.constant 2 : index
    %c0_94 = arith.constant 0 : index
    %146 = vector.load %arg1[%c0_91, %c4_92, %c2_93, %c0_94] : memref<1x7x22x512xf32, #tpu.memory_space<vmem>>, vector<1x1x16x512xf32>
    %147 = vector.shape_cast %146 : vector<1x1x16x512xf32> to vector<16x512xf32>
    %c18 = arith.constant 18 : index
    %c0_95 = arith.constant 0 : index
    %148 = vector.load %arg2[%c18, %c0_95] : memref<49x512xf32, #tpu.memory_space<vmem>>, vector<1x512xf32>
    %149 = vector.shape_cast %148 : vector<1x512xf32> to vector<512xf32>
    %150 = vector.shape_cast %149 : vector<512xf32> to vector<1x512xf32>
    %151 = vector.broadcast %150 : vector<1x512xf32> to vector<16x512xf32>
    %152 = arith.mulf %147, %151 : vector<16x512xf32>
    %153 = arith.addf %137, %152 : vector<16x512xf32>
    %c0_96 = arith.constant 0 : index
    %c5_97 = arith.constant 5 : index
    %c2_98 = arith.constant 2 : index
    %c0_99 = arith.constant 0 : index
    %154 = vector.load %arg1[%c0_96, %c5_97, %c2_98, %c0_99] : memref<1x7x22x512xf32, #tpu.memory_space<vmem>>, vector<1x1x16x512xf32>
    %155 = vector.shape_cast %154 : vector<1x1x16x512xf32> to vector<16x512xf32>
    %c19 = arith.constant 19 : index
    %c0_100 = arith.constant 0 : index
    %156 = vector.load %arg2[%c19, %c0_100] : memref<49x512xf32, #tpu.memory_space<vmem>>, vector<1x512xf32>
    %157 = vector.shape_cast %156 : vector<1x512xf32> to vector<512xf32>
    %158 = vector.shape_cast %157 : vector<512xf32> to vector<1x512xf32>
    %159 = vector.broadcast %158 : vector<1x512xf32> to vector<16x512xf32>
    %160 = arith.mulf %155, %159 : vector<16x512xf32>
    %161 = arith.addf %145, %160 : vector<16x512xf32>
    %c0_101 = arith.constant 0 : index
    %c6_102 = arith.constant 6 : index
    %c2_103 = arith.constant 2 : index
    %c0_104 = arith.constant 0 : index
    %162 = vector.load %arg1[%c0_101, %c6_102, %c2_103, %c0_104] : memref<1x7x22x512xf32, #tpu.memory_space<vmem>>, vector<1x1x16x512xf32>
    %163 = vector.shape_cast %162 : vector<1x1x16x512xf32> to vector<16x512xf32>
    %c20 = arith.constant 20 : index
    %c0_105 = arith.constant 0 : index
    %164 = vector.load %arg2[%c20, %c0_105] : memref<49x512xf32, #tpu.memory_space<vmem>>, vector<1x512xf32>
    %165 = vector.shape_cast %164 : vector<1x512xf32> to vector<512xf32>
    %166 = vector.shape_cast %165 : vector<512xf32> to vector<1x512xf32>
    %167 = vector.broadcast %166 : vector<1x512xf32> to vector<16x512xf32>
    %168 = arith.mulf %163, %167 : vector<16x512xf32>
    %169 = arith.addf %153, %168 : vector<16x512xf32>
    %c0_106 = arith.constant 0 : index
    %c0_107 = arith.constant 0 : index
    %c3_108 = arith.constant 3 : index
    %c0_109 = arith.constant 0 : index
    %170 = vector.load %arg1[%c0_106, %c0_107, %c3_108, %c0_109] : memref<1x7x22x512xf32, #tpu.memory_space<vmem>>, vector<1x1x16x512xf32>
    %171 = vector.shape_cast %170 : vector<1x1x16x512xf32> to vector<16x512xf32>
    %c21 = arith.constant 21 : index
    %c0_110 = arith.constant 0 : index
    %172 = vector.load %arg2[%c21, %c0_110] : memref<49x512xf32, #tpu.memory_space<vmem>>, vector<1x512xf32>
    %173 = vector.shape_cast %172 : vector<1x512xf32> to vector<512xf32>
    %174 = vector.shape_cast %173 : vector<512xf32> to vector<1x512xf32>
    %175 = vector.broadcast %174 : vector<1x512xf32> to vector<16x512xf32>
    %176 = arith.mulf %171, %175 : vector<16x512xf32>
    %177 = arith.addf %161, %176 : vector<16x512xf32>
    %c0_111 = arith.constant 0 : index
    %c1_112 = arith.constant 1 : index
    %c3_113 = arith.constant 3 : index
    %c0_114 = arith.constant 0 : index
    %178 = vector.load %arg1[%c0_111, %c1_112, %c3_113, %c0_114] : memref<1x7x22x512xf32, #tpu.memory_space<vmem>>, vector<1x1x16x512xf32>
    %179 = vector.shape_cast %178 : vector<1x1x16x512xf32> to vector<16x512xf32>
    %c22 = arith.constant 22 : index
    %c0_115 = arith.constant 0 : index
    %180 = vector.load %arg2[%c22, %c0_115] : memref<49x512xf32, #tpu.memory_space<vmem>>, vector<1x512xf32>
    %181 = vector.shape_cast %180 : vector<1x512xf32> to vector<512xf32>
    %182 = vector.shape_cast %181 : vector<512xf32> to vector<1x512xf32>
    %183 = vector.broadcast %182 : vector<1x512xf32> to vector<16x512xf32>
    %184 = arith.mulf %179, %183 : vector<16x512xf32>
    %185 = arith.addf %169, %184 : vector<16x512xf32>
    %c0_116 = arith.constant 0 : index
    %c2_117 = arith.constant 2 : index
    %c3_118 = arith.constant 3 : index
    %c0_119 = arith.constant 0 : index
    %186 = vector.load %arg1[%c0_116, %c2_117, %c3_118, %c0_119] : memref<1x7x22x512xf32, #tpu.memory_space<vmem>>, vector<1x1x16x512xf32>
    %187 = vector.shape_cast %186 : vector<1x1x16x512xf32> to vector<16x512xf32>
    %c23 = arith.constant 23 : index
    %c0_120 = arith.constant 0 : index
    %188 = vector.load %arg2[%c23, %c0_120] : memref<49x512xf32, #tpu.memory_space<vmem>>, vector<1x512xf32>
    %189 = vector.shape_cast %188 : vector<1x512xf32> to vector<512xf32>
    %190 = vector.shape_cast %189 : vector<512xf32> to vector<1x512xf32>
    %191 = vector.broadcast %190 : vector<1x512xf32> to vector<16x512xf32>
    %192 = arith.mulf %187, %191 : vector<16x512xf32>
    %193 = arith.addf %177, %192 : vector<16x512xf32>
    %c0_121 = arith.constant 0 : index
    %c3_122 = arith.constant 3 : index
    %c3_123 = arith.constant 3 : index
    %c0_124 = arith.constant 0 : index
    %194 = vector.load %arg1[%c0_121, %c3_122, %c3_123, %c0_124] : memref<1x7x22x512xf32, #tpu.memory_space<vmem>>, vector<1x1x16x512xf32>
    %195 = vector.shape_cast %194 : vector<1x1x16x512xf32> to vector<16x512xf32>
    %c24 = arith.constant 24 : index
    %c0_125 = arith.constant 0 : index
    %196 = vector.load %arg2[%c24, %c0_125] : memref<49x512xf32, #tpu.memory_space<vmem>>, vector<1x512xf32>
    %197 = vector.shape_cast %196 : vector<1x512xf32> to vector<512xf32>
    %198 = vector.shape_cast %197 : vector<512xf32> to vector<1x512xf32>
    %199 = vector.broadcast %198 : vector<1x512xf32> to vector<16x512xf32>
    %200 = arith.mulf %195, %199 : vector<16x512xf32>
    %201 = arith.addf %185, %200 : vector<16x512xf32>
    %c0_126 = arith.constant 0 : index
    %c4_127 = arith.constant 4 : index
    %c3_128 = arith.constant 3 : index
    %c0_129 = arith.constant 0 : index
    %202 = vector.load %arg1[%c0_126, %c4_127, %c3_128, %c0_129] : memref<1x7x22x512xf32, #tpu.memory_space<vmem>>, vector<1x1x16x512xf32>
    %203 = vector.shape_cast %202 : vector<1x1x16x512xf32> to vector<16x512xf32>
    %c25 = arith.constant 25 : index
    %c0_130 = arith.constant 0 : index
    %204 = vector.load %arg2[%c25, %c0_130] : memref<49x512xf32, #tpu.memory_space<vmem>>, vector<1x512xf32>
    %205 = vector.shape_cast %204 : vector<1x512xf32> to vector<512xf32>
    %206 = vector.shape_cast %205 : vector<512xf32> to vector<1x512xf32>
    %207 = vector.broadcast %206 : vector<1x512xf32> to vector<16x512xf32>
    %208 = arith.mulf %203, %207 : vector<16x512xf32>
    %209 = arith.addf %193, %208 : vector<16x512xf32>
    %c0_131 = arith.constant 0 : index
    %c5_132 = arith.constant 5 : index
    %c3_133 = arith.constant 3 : index
    %c0_134 = arith.constant 0 : index
    %210 = vector.load %arg1[%c0_131, %c5_132, %c3_133, %c0_134] : memref<1x7x22x512xf32, #tpu.memory_space<vmem>>, vector<1x1x16x512xf32>
    %211 = vector.shape_cast %210 : vector<1x1x16x512xf32> to vector<16x512xf32>
    %c26 = arith.constant 26 : index
    %c0_135 = arith.constant 0 : index
    %212 = vector.load %arg2[%c26, %c0_135] : memref<49x512xf32, #tpu.memory_space<vmem>>, vector<1x512xf32>
    %213 = vector.shape_cast %212 : vector<1x512xf32> to vector<512xf32>
    %214 = vector.shape_cast %213 : vector<512xf32> to vector<1x512xf32>
    %215 = vector.broadcast %214 : vector<1x512xf32> to vector<16x512xf32>
    %216 = arith.mulf %211, %215 : vector<16x512xf32>
    %217 = arith.addf %201, %216 : vector<16x512xf32>
    %c0_136 = arith.constant 0 : index
    %c6_137 = arith.constant 6 : index
    %c3_138 = arith.constant 3 : index
    %c0_139 = arith.constant 0 : index
    %218 = vector.load %arg1[%c0_136, %c6_137, %c3_138, %c0_139] : memref<1x7x22x512xf32, #tpu.memory_space<vmem>>, vector<1x1x16x512xf32>
    %219 = vector.shape_cast %218 : vector<1x1x16x512xf32> to vector<16x512xf32>
    %c27 = arith.constant 27 : index
    %c0_140 = arith.constant 0 : index
    %220 = vector.load %arg2[%c27, %c0_140] : memref<49x512xf32, #tpu.memory_space<vmem>>, vector<1x512xf32>
    %221 = vector.shape_cast %220 : vector<1x512xf32> to vector<512xf32>
    %222 = vector.shape_cast %221 : vector<512xf32> to vector<1x512xf32>
    %223 = vector.broadcast %222 : vector<1x512xf32> to vector<16x512xf32>
    %224 = arith.mulf %219, %223 : vector<16x512xf32>
    %225 = arith.addf %209, %224 : vector<16x512xf32>
    %c0_141 = arith.constant 0 : index
    %c0_142 = arith.constant 0 : index
    %c4_143 = arith.constant 4 : index
    %c0_144 = arith.constant 0 : index
    %226 = vector.load %arg1[%c0_141, %c0_142, %c4_143, %c0_144] : memref<1x7x22x512xf32, #tpu.memory_space<vmem>>, vector<1x1x16x512xf32>
    %227 = vector.shape_cast %226 : vector<1x1x16x512xf32> to vector<16x512xf32>
    %c28 = arith.constant 28 : index
    %c0_145 = arith.constant 0 : index
    %228 = vector.load %arg2[%c28, %c0_145] : memref<49x512xf32, #tpu.memory_space<vmem>>, vector<1x512xf32>
    %229 = vector.shape_cast %228 : vector<1x512xf32> to vector<512xf32>
    %230 = vector.shape_cast %229 : vector<512xf32> to vector<1x512xf32>
    %231 = vector.broadcast %230 : vector<1x512xf32> to vector<16x512xf32>
    %232 = arith.mulf %227, %231 : vector<16x512xf32>
    %233 = arith.addf %217, %232 : vector<16x512xf32>
    %c0_146 = arith.constant 0 : index
    %c1_147 = arith.constant 1 : index
    %c4_148 = arith.constant 4 : index
    %c0_149 = arith.constant 0 : index
    %234 = vector.load %arg1[%c0_146, %c1_147, %c4_148, %c0_149] : memref<1x7x22x512xf32, #tpu.memory_space<vmem>>, vector<1x1x16x512xf32>
    %235 = vector.shape_cast %234 : vector<1x1x16x512xf32> to vector<16x512xf32>
    %c29 = arith.constant 29 : index
    %c0_150 = arith.constant 0 : index
    %236 = vector.load %arg2[%c29, %c0_150] : memref<49x512xf32, #tpu.memory_space<vmem>>, vector<1x512xf32>
    %237 = vector.shape_cast %236 : vector<1x512xf32> to vector<512xf32>
    %238 = vector.shape_cast %237 : vector<512xf32> to vector<1x512xf32>
    %239 = vector.broadcast %238 : vector<1x512xf32> to vector<16x512xf32>
    %240 = arith.mulf %235, %239 : vector<16x512xf32>
    %241 = arith.addf %225, %240 : vector<16x512xf32>
    %c0_151 = arith.constant 0 : index
    %c2_152 = arith.constant 2 : index
    %c4_153 = arith.constant 4 : index
    %c0_154 = arith.constant 0 : index
    %242 = vector.load %arg1[%c0_151, %c2_152, %c4_153, %c0_154] : memref<1x7x22x512xf32, #tpu.memory_space<vmem>>, vector<1x1x16x512xf32>
    %243 = vector.shape_cast %242 : vector<1x1x16x512xf32> to vector<16x512xf32>
    %c30 = arith.constant 30 : index
    %c0_155 = arith.constant 0 : index
    %244 = vector.load %arg2[%c30, %c0_155] : memref<49x512xf32, #tpu.memory_space<vmem>>, vector<1x512xf32>
    %245 = vector.shape_cast %244 : vector<1x512xf32> to vector<512xf32>
    %246 = vector.shape_cast %245 : vector<512xf32> to vector<1x512xf32>
    %247 = vector.broadcast %246 : vector<1x512xf32> to vector<16x512xf32>
    %248 = arith.mulf %243, %247 : vector<16x512xf32>
    %249 = arith.addf %233, %248 : vector<16x512xf32>
    %c0_156 = arith.constant 0 : index
    %c3_157 = arith.constant 3 : index
    %c4_158 = arith.constant 4 : index
    %c0_159 = arith.constant 0 : index
    %250 = vector.load %arg1[%c0_156, %c3_157, %c4_158, %c0_159] : memref<1x7x22x512xf32, #tpu.memory_space<vmem>>, vector<1x1x16x512xf32>
    %251 = vector.shape_cast %250 : vector<1x1x16x512xf32> to vector<16x512xf32>
    %c31 = arith.constant 31 : index
    %c0_160 = arith.constant 0 : index
    %252 = vector.load %arg2[%c31, %c0_160] : memref<49x512xf32, #tpu.memory_space<vmem>>, vector<1x512xf32>
    %253 = vector.shape_cast %252 : vector<1x512xf32> to vector<512xf32>
    %254 = vector.shape_cast %253 : vector<512xf32> to vector<1x512xf32>
    %255 = vector.broadcast %254 : vector<1x512xf32> to vector<16x512xf32>
    %256 = arith.mulf %251, %255 : vector<16x512xf32>
    %257 = arith.addf %241, %256 : vector<16x512xf32>
    %c0_161 = arith.constant 0 : index
    %c4_162 = arith.constant 4 : index
    %c4_163 = arith.constant 4 : index
    %c0_164 = arith.constant 0 : index
    %258 = vector.load %arg1[%c0_161, %c4_162, %c4_163, %c0_164] : memref<1x7x22x512xf32, #tpu.memory_space<vmem>>, vector<1x1x16x512xf32>
    %259 = vector.shape_cast %258 : vector<1x1x16x512xf32> to vector<16x512xf32>
    %c32 = arith.constant 32 : index
    %c0_165 = arith.constant 0 : index
    %260 = vector.load %arg2[%c32, %c0_165] : memref<49x512xf32, #tpu.memory_space<vmem>>, vector<1x512xf32>
    %261 = vector.shape_cast %260 : vector<1x512xf32> to vector<512xf32>
    %262 = vector.shape_cast %261 : vector<512xf32> to vector<1x512xf32>
    %263 = vector.broadcast %262 : vector<1x512xf32> to vector<16x512xf32>
    %264 = arith.mulf %259, %263 : vector<16x512xf32>
    %265 = arith.addf %249, %264 : vector<16x512xf32>
    %c0_166 = arith.constant 0 : index
    %c5_167 = arith.constant 5 : index
    %c4_168 = arith.constant 4 : index
    %c0_169 = arith.constant 0 : index
    %266 = vector.load %arg1[%c0_166, %c5_167, %c4_168, %c0_169] : memref<1x7x22x512xf32, #tpu.memory_space<vmem>>, vector<1x1x16x512xf32>
    %267 = vector.shape_cast %266 : vector<1x1x16x512xf32> to vector<16x512xf32>
    %c33 = arith.constant 33 : index
    %c0_170 = arith.constant 0 : index
    %268 = vector.load %arg2[%c33, %c0_170] : memref<49x512xf32, #tpu.memory_space<vmem>>, vector<1x512xf32>
    %269 = vector.shape_cast %268 : vector<1x512xf32> to vector<512xf32>
    %270 = vector.shape_cast %269 : vector<512xf32> to vector<1x512xf32>
    %271 = vector.broadcast %270 : vector<1x512xf32> to vector<16x512xf32>
    %272 = arith.mulf %267, %271 : vector<16x512xf32>
    %273 = arith.addf %257, %272 : vector<16x512xf32>
    %c0_171 = arith.constant 0 : index
    %c6_172 = arith.constant 6 : index
    %c4_173 = arith.constant 4 : index
    %c0_174 = arith.constant 0 : index
    %274 = vector.load %arg1[%c0_171, %c6_172, %c4_173, %c0_174] : memref<1x7x22x512xf32, #tpu.memory_space<vmem>>, vector<1x1x16x512xf32>
    %275 = vector.shape_cast %274 : vector<1x1x16x512xf32> to vector<16x512xf32>
    %c34 = arith.constant 34 : index
    %c0_175 = arith.constant 0 : index
    %276 = vector.load %arg2[%c34, %c0_175] : memref<49x512xf32, #tpu.memory_space<vmem>>, vector<1x512xf32>
    %277 = vector.shape_cast %276 : vector<1x512xf32> to vector<512xf32>
    %278 = vector.shape_cast %277 : vector<512xf32> to vector<1x512xf32>
    %279 = vector.broadcast %278 : vector<1x512xf32> to vector<16x512xf32>
    %280 = arith.mulf %275, %279 : vector<16x512xf32>
    %281 = arith.addf %265, %280 : vector<16x512xf32>
    %c0_176 = arith.constant 0 : index
    %c0_177 = arith.constant 0 : index
    %c5_178 = arith.constant 5 : index
    %c0_179 = arith.constant 0 : index
    %282 = vector.load %arg1[%c0_176, %c0_177, %c5_178, %c0_179] : memref<1x7x22x512xf32, #tpu.memory_space<vmem>>, vector<1x1x16x512xf32>
    %283 = vector.shape_cast %282 : vector<1x1x16x512xf32> to vector<16x512xf32>
    %c35 = arith.constant 35 : index
    %c0_180 = arith.constant 0 : index
    %284 = vector.load %arg2[%c35, %c0_180] : memref<49x512xf32, #tpu.memory_space<vmem>>, vector<1x512xf32>
    %285 = vector.shape_cast %284 : vector<1x512xf32> to vector<512xf32>
    %286 = vector.shape_cast %285 : vector<512xf32> to vector<1x512xf32>
    %287 = vector.broadcast %286 : vector<1x512xf32> to vector<16x512xf32>
    %288 = arith.mulf %283, %287 : vector<16x512xf32>
    %289 = arith.addf %273, %288 : vector<16x512xf32>
    %c0_181 = arith.constant 0 : index
    %c1_182 = arith.constant 1 : index
    %c5_183 = arith.constant 5 : index
    %c0_184 = arith.constant 0 : index
    %290 = vector.load %arg1[%c0_181, %c1_182, %c5_183, %c0_184] : memref<1x7x22x512xf32, #tpu.memory_space<vmem>>, vector<1x1x16x512xf32>
    %291 = vector.shape_cast %290 : vector<1x1x16x512xf32> to vector<16x512xf32>
    %c36 = arith.constant 36 : index
    %c0_185 = arith.constant 0 : index
    %292 = vector.load %arg2[%c36, %c0_185] : memref<49x512xf32, #tpu.memory_space<vmem>>, vector<1x512xf32>
    %293 = vector.shape_cast %292 : vector<1x512xf32> to vector<512xf32>
    %294 = vector.shape_cast %293 : vector<512xf32> to vector<1x512xf32>
    %295 = vector.broadcast %294 : vector<1x512xf32> to vector<16x512xf32>
    %296 = arith.mulf %291, %295 : vector<16x512xf32>
    %297 = arith.addf %281, %296 : vector<16x512xf32>
    %c0_186 = arith.constant 0 : index
    %c2_187 = arith.constant 2 : index
    %c5_188 = arith.constant 5 : index
    %c0_189 = arith.constant 0 : index
    %298 = vector.load %arg1[%c0_186, %c2_187, %c5_188, %c0_189] : memref<1x7x22x512xf32, #tpu.memory_space<vmem>>, vector<1x1x16x512xf32>
    %299 = vector.shape_cast %298 : vector<1x1x16x512xf32> to vector<16x512xf32>
    %c37 = arith.constant 37 : index
    %c0_190 = arith.constant 0 : index
    %300 = vector.load %arg2[%c37, %c0_190] : memref<49x512xf32, #tpu.memory_space<vmem>>, vector<1x512xf32>
    %301 = vector.shape_cast %300 : vector<1x512xf32> to vector<512xf32>
    %302 = vector.shape_cast %301 : vector<512xf32> to vector<1x512xf32>
    %303 = vector.broadcast %302 : vector<1x512xf32> to vector<16x512xf32>
    %304 = arith.mulf %299, %303 : vector<16x512xf32>
    %305 = arith.addf %289, %304 : vector<16x512xf32>
    %c0_191 = arith.constant 0 : index
    %c3_192 = arith.constant 3 : index
    %c5_193 = arith.constant 5 : index
    %c0_194 = arith.constant 0 : index
    %306 = vector.load %arg1[%c0_191, %c3_192, %c5_193, %c0_194] : memref<1x7x22x512xf32, #tpu.memory_space<vmem>>, vector<1x1x16x512xf32>
    %307 = vector.shape_cast %306 : vector<1x1x16x512xf32> to vector<16x512xf32>
    %c38 = arith.constant 38 : index
    %c0_195 = arith.constant 0 : index
    %308 = vector.load %arg2[%c38, %c0_195] : memref<49x512xf32, #tpu.memory_space<vmem>>, vector<1x512xf32>
    %309 = vector.shape_cast %308 : vector<1x512xf32> to vector<512xf32>
    %310 = vector.shape_cast %309 : vector<512xf32> to vector<1x512xf32>
    %311 = vector.broadcast %310 : vector<1x512xf32> to vector<16x512xf32>
    %312 = arith.mulf %307, %311 : vector<16x512xf32>
    %313 = arith.addf %297, %312 : vector<16x512xf32>
    %c0_196 = arith.constant 0 : index
    %c4_197 = arith.constant 4 : index
    %c5_198 = arith.constant 5 : index
    %c0_199 = arith.constant 0 : index
    %314 = vector.load %arg1[%c0_196, %c4_197, %c5_198, %c0_199] : memref<1x7x22x512xf32, #tpu.memory_space<vmem>>, vector<1x1x16x512xf32>
    %315 = vector.shape_cast %314 : vector<1x1x16x512xf32> to vector<16x512xf32>
    %c39 = arith.constant 39 : index
    %c0_200 = arith.constant 0 : index
    %316 = vector.load %arg2[%c39, %c0_200] : memref<49x512xf32, #tpu.memory_space<vmem>>, vector<1x512xf32>
    %317 = vector.shape_cast %316 : vector<1x512xf32> to vector<512xf32>
    %318 = vector.shape_cast %317 : vector<512xf32> to vector<1x512xf32>
    %319 = vector.broadcast %318 : vector<1x512xf32> to vector<16x512xf32>
    %320 = arith.mulf %315, %319 : vector<16x512xf32>
    %321 = arith.addf %305, %320 : vector<16x512xf32>
    %c0_201 = arith.constant 0 : index
    %c5_202 = arith.constant 5 : index
    %c5_203 = arith.constant 5 : index
    %c0_204 = arith.constant 0 : index
    %322 = vector.load %arg1[%c0_201, %c5_202, %c5_203, %c0_204] : memref<1x7x22x512xf32, #tpu.memory_space<vmem>>, vector<1x1x16x512xf32>
    %323 = vector.shape_cast %322 : vector<1x1x16x512xf32> to vector<16x512xf32>
    %c40 = arith.constant 40 : index
    %c0_205 = arith.constant 0 : index
    %324 = vector.load %arg2[%c40, %c0_205] : memref<49x512xf32, #tpu.memory_space<vmem>>, vector<1x512xf32>
    %325 = vector.shape_cast %324 : vector<1x512xf32> to vector<512xf32>
    %326 = vector.shape_cast %325 : vector<512xf32> to vector<1x512xf32>
    %327 = vector.broadcast %326 : vector<1x512xf32> to vector<16x512xf32>
    %328 = arith.mulf %323, %327 : vector<16x512xf32>
    %329 = arith.addf %313, %328 : vector<16x512xf32>
    %c0_206 = arith.constant 0 : index
    %c6_207 = arith.constant 6 : index
    %c5_208 = arith.constant 5 : index
    %c0_209 = arith.constant 0 : index
    %330 = vector.load %arg1[%c0_206, %c6_207, %c5_208, %c0_209] : memref<1x7x22x512xf32, #tpu.memory_space<vmem>>, vector<1x1x16x512xf32>
    %331 = vector.shape_cast %330 : vector<1x1x16x512xf32> to vector<16x512xf32>
    %c41 = arith.constant 41 : index
    %c0_210 = arith.constant 0 : index
    %332 = vector.load %arg2[%c41, %c0_210] : memref<49x512xf32, #tpu.memory_space<vmem>>, vector<1x512xf32>
    %333 = vector.shape_cast %332 : vector<1x512xf32> to vector<512xf32>
    %334 = vector.shape_cast %333 : vector<512xf32> to vector<1x512xf32>
    %335 = vector.broadcast %334 : vector<1x512xf32> to vector<16x512xf32>
    %336 = arith.mulf %331, %335 : vector<16x512xf32>
    %337 = arith.addf %321, %336 : vector<16x512xf32>
    %c0_211 = arith.constant 0 : index
    %c0_212 = arith.constant 0 : index
    %c6_213 = arith.constant 6 : index
    %c0_214 = arith.constant 0 : index
    %338 = vector.load %arg1[%c0_211, %c0_212, %c6_213, %c0_214] : memref<1x7x22x512xf32, #tpu.memory_space<vmem>>, vector<1x1x16x512xf32>
    %339 = vector.shape_cast %338 : vector<1x1x16x512xf32> to vector<16x512xf32>
    %c42 = arith.constant 42 : index
    %c0_215 = arith.constant 0 : index
    %340 = vector.load %arg2[%c42, %c0_215] : memref<49x512xf32, #tpu.memory_space<vmem>>, vector<1x512xf32>
    %341 = vector.shape_cast %340 : vector<1x512xf32> to vector<512xf32>
    %342 = vector.shape_cast %341 : vector<512xf32> to vector<1x512xf32>
    %343 = vector.broadcast %342 : vector<1x512xf32> to vector<16x512xf32>
    %344 = arith.mulf %339, %343 : vector<16x512xf32>
    %345 = arith.addf %329, %344 : vector<16x512xf32>
    %c0_216 = arith.constant 0 : index
    %c1_217 = arith.constant 1 : index
    %c6_218 = arith.constant 6 : index
    %c0_219 = arith.constant 0 : index
    %346 = vector.load %arg1[%c0_216, %c1_217, %c6_218, %c0_219] : memref<1x7x22x512xf32, #tpu.memory_space<vmem>>, vector<1x1x16x512xf32>
    %347 = vector.shape_cast %346 : vector<1x1x16x512xf32> to vector<16x512xf32>
    %c43 = arith.constant 43 : index
    %c0_220 = arith.constant 0 : index
    %348 = vector.load %arg2[%c43, %c0_220] : memref<49x512xf32, #tpu.memory_space<vmem>>, vector<1x512xf32>
    %349 = vector.shape_cast %348 : vector<1x512xf32> to vector<512xf32>
    %350 = vector.shape_cast %349 : vector<512xf32> to vector<1x512xf32>
    %351 = vector.broadcast %350 : vector<1x512xf32> to vector<16x512xf32>
    %352 = arith.mulf %347, %351 : vector<16x512xf32>
    %353 = arith.addf %337, %352 : vector<16x512xf32>
    %c0_221 = arith.constant 0 : index
    %c2_222 = arith.constant 2 : index
    %c6_223 = arith.constant 6 : index
    %c0_224 = arith.constant 0 : index
    %354 = vector.load %arg1[%c0_221, %c2_222, %c6_223, %c0_224] : memref<1x7x22x512xf32, #tpu.memory_space<vmem>>, vector<1x1x16x512xf32>
    %355 = vector.shape_cast %354 : vector<1x1x16x512xf32> to vector<16x512xf32>
    %c44 = arith.constant 44 : index
    %c0_225 = arith.constant 0 : index
    %356 = vector.load %arg2[%c44, %c0_225] : memref<49x512xf32, #tpu.memory_space<vmem>>, vector<1x512xf32>
    %357 = vector.shape_cast %356 : vector<1x512xf32> to vector<512xf32>
    %358 = vector.shape_cast %357 : vector<512xf32> to vector<1x512xf32>
    %359 = vector.broadcast %358 : vector<1x512xf32> to vector<16x512xf32>
    %360 = arith.mulf %355, %359 : vector<16x512xf32>
    %361 = arith.addf %345, %360 : vector<16x512xf32>
    %c0_226 = arith.constant 0 : index
    %c3_227 = arith.constant 3 : index
    %c6_228 = arith.constant 6 : index
    %c0_229 = arith.constant 0 : index
    %362 = vector.load %arg1[%c0_226, %c3_227, %c6_228, %c0_229] : memref<1x7x22x512xf32, #tpu.memory_space<vmem>>, vector<1x1x16x512xf32>
    %363 = vector.shape_cast %362 : vector<1x1x16x512xf32> to vector<16x512xf32>
    %c45 = arith.constant 45 : index
    %c0_230 = arith.constant 0 : index
    %364 = vector.load %arg2[%c45, %c0_230] : memref<49x512xf32, #tpu.memory_space<vmem>>, vector<1x512xf32>
    %365 = vector.shape_cast %364 : vector<1x512xf32> to vector<512xf32>
    %366 = vector.shape_cast %365 : vector<512xf32> to vector<1x512xf32>
    %367 = vector.broadcast %366 : vector<1x512xf32> to vector<16x512xf32>
    %368 = arith.mulf %363, %367 : vector<16x512xf32>
    %369 = arith.addf %353, %368 : vector<16x512xf32>
    %c0_231 = arith.constant 0 : index
    %c4_232 = arith.constant 4 : index
    %c6_233 = arith.constant 6 : index
    %c0_234 = arith.constant 0 : index
    %370 = vector.load %arg1[%c0_231, %c4_232, %c6_233, %c0_234] : memref<1x7x22x512xf32, #tpu.memory_space<vmem>>, vector<1x1x16x512xf32>
    %371 = vector.shape_cast %370 : vector<1x1x16x512xf32> to vector<16x512xf32>
    %c46 = arith.constant 46 : index
    %c0_235 = arith.constant 0 : index
    %372 = vector.load %arg2[%c46, %c0_235] : memref<49x512xf32, #tpu.memory_space<vmem>>, vector<1x512xf32>
    %373 = vector.shape_cast %372 : vector<1x512xf32> to vector<512xf32>
    %374 = vector.shape_cast %373 : vector<512xf32> to vector<1x512xf32>
    %375 = vector.broadcast %374 : vector<1x512xf32> to vector<16x512xf32>
    %376 = arith.mulf %371, %375 : vector<16x512xf32>
    %377 = arith.addf %361, %376 : vector<16x512xf32>
    %c0_236 = arith.constant 0 : index
    %c5_237 = arith.constant 5 : index
    %c6_238 = arith.constant 6 : index
    %c0_239 = arith.constant 0 : index
    %378 = vector.load %arg1[%c0_236, %c5_237, %c6_238, %c0_239] : memref<1x7x22x512xf32, #tpu.memory_space<vmem>>, vector<1x1x16x512xf32>
    %379 = vector.shape_cast %378 : vector<1x1x16x512xf32> to vector<16x512xf32>
    %c47 = arith.constant 47 : index
    %c0_240 = arith.constant 0 : index
    %380 = vector.load %arg2[%c47, %c0_240] : memref<49x512xf32, #tpu.memory_space<vmem>>, vector<1x512xf32>
    %381 = vector.shape_cast %380 : vector<1x512xf32> to vector<512xf32>
    %382 = vector.shape_cast %381 : vector<512xf32> to vector<1x512xf32>
    %383 = vector.broadcast %382 : vector<1x512xf32> to vector<16x512xf32>
    %384 = arith.mulf %379, %383 : vector<16x512xf32>
    %385 = arith.addf %369, %384 : vector<16x512xf32>
    %c0_241 = arith.constant 0 : index
    %c6_242 = arith.constant 6 : index
    %c6_243 = arith.constant 6 : index
    %c0_244 = arith.constant 0 : index
    %386 = vector.load %arg1[%c0_241, %c6_242, %c6_243, %c0_244] : memref<1x7x22x512xf32, #tpu.memory_space<vmem>>, vector<1x1x16x512xf32>
    %387 = vector.shape_cast %386 : vector<1x1x16x512xf32> to vector<16x512xf32>
    %c48 = arith.constant 48 : index
    %c0_245 = arith.constant 0 : index
    %388 = vector.load %arg2[%c48, %c0_245] : memref<49x512xf32, #tpu.memory_space<vmem>>, vector<1x512xf32>
    %389 = vector.shape_cast %388 : vector<1x512xf32> to vector<512xf32>
    %390 = vector.shape_cast %389 : vector<512xf32> to vector<1x512xf32>
    %391 = vector.broadcast %390 : vector<1x512xf32> to vector<16x512xf32>
    %392 = arith.mulf %387, %391 : vector<16x512xf32>
    %393 = arith.addf %377, %392 : vector<16x512xf32>
    %394 = arith.addf %393, %385 : vector<16x512xf32>
    %c0_246 = arith.constant 0 : index
    %c0_247 = arith.constant 0 : index
    %395 = vector.load %arg3[%c0_246, %c0_247] : memref<1x512xf32, #tpu.memory_space<vmem>>, vector<1x512xf32>
    %396 = vector.shape_cast %395 : vector<1x512xf32> to vector<512xf32>
    %397 = vector.shape_cast %396 : vector<512xf32> to vector<1x512xf32>
    %398 = vector.broadcast %397 : vector<1x512xf32> to vector<16x512xf32>
    %399 = arith.mulf %394, %398 : vector<16x512xf32>
    %c0_248 = arith.constant 0 : index
    %c0_249 = arith.constant 0 : index
    %400 = vector.load %arg4[%c0_248, %c0_249] : memref<1x512xf32, #tpu.memory_space<vmem>>, vector<1x512xf32>
    %401 = vector.shape_cast %400 : vector<1x512xf32> to vector<512xf32>
    %402 = vector.shape_cast %401 : vector<512xf32> to vector<1x512xf32>
    %403 = vector.broadcast %402 : vector<1x512xf32> to vector<16x512xf32>
    %404 = arith.addf %399, %403 : vector<16x512xf32>
    %c0_250 = arith.constant 0 : index
    %c3_251 = arith.constant 3 : index
    %c3_252 = arith.constant 3 : index
    %c0_253 = arith.constant 0 : index
    %405 = vector.load %arg1[%c0_250, %c3_251, %c3_252, %c0_253] : memref<1x7x22x512xf32, #tpu.memory_space<vmem>>, vector<1x1x16x512xf32>
    %406 = vector.shape_cast %405 : vector<1x1x16x512xf32> to vector<16x512xf32>
    %407 = vector.extract_strided_slice %404 {offsets = [0, 0], sizes = [16, 128], strides = [1, 1]} : vector<16x512xf32> to vector<16x128xf32>
    %408 = arith.truncf %407 : vector<16x128xf32> to vector<16x128xbf16>
    %c0_254 = arith.constant 0 : index
    %c0_255 = arith.constant 0 : index
    %409 = vector.load %arg5[%c0_254, %c0_255] : memref<128x512xbf16, #tpu.memory_space<vmem>>, vector<128x512xbf16>
    %cst_256 = arith.constant dense<0.000000e+00> : vector<16x512xf32>
    %410 = tpu.matmul %408, %409, %cst_256 {dimension_numbers = #tpu.dot_dimension_numbers<[1], [0], [0], [1], [0, 0, 1, 1], [], []>} : vector<16x128xbf16>, vector<128x512xbf16>, vector<16x512xf32> -> vector<16x512xf32>
    %c0_257 = arith.constant 0 : index
    %c0_258 = arith.constant 0 : index
    %411 = vector.load %arg6[%c0_257, %c0_258] : memref<1x512xf32, #tpu.memory_space<vmem>>, vector<1x512xf32>
    %412 = vector.shape_cast %411 : vector<1x512xf32> to vector<512xf32>
    %413 = vector.shape_cast %412 : vector<512xf32> to vector<1x512xf32>
    %414 = vector.broadcast %413 : vector<1x512xf32> to vector<16x512xf32>
    %415 = arith.addf %410, %414 : vector<16x512xf32>
    %cst_259 = arith.constant 0.000000e+00 : f32
    %416 = vector.broadcast %cst_259 : f32 to vector<16x512xf32>
    %417 = arith.maximumf %415, %416 : vector<16x512xf32>
    %418 = arith.truncf %417 : vector<16x512xf32> to vector<16x512xbf16>
    %c0_260 = arith.constant 0 : index
    %c0_261 = arith.constant 0 : index
    %419 = vector.load %arg7[%c0_260, %c0_261] : memref<512x128xbf16, #tpu.memory_space<vmem>>, vector<512x128xbf16>
    %cst_262 = arith.constant dense<0.000000e+00> : vector<16x128xf32>
    %420 = tpu.matmul %418, %419, %cst_262 {dimension_numbers = #tpu.dot_dimension_numbers<[1], [0], [0], [1], [0, 0, 1, 1], [], []>} : vector<16x512xbf16>, vector<512x128xbf16>, vector<16x128xf32> -> vector<16x128xf32>
    %c0_263 = arith.constant 0 : index
    %c0_264 = arith.constant 0 : index
    %421 = vector.load %arg8[%c0_263, %c0_264] : memref<1x128xf32, #tpu.memory_space<vmem>>, vector<1x128xf32>
    %422 = vector.shape_cast %421 : vector<1x128xf32> to vector<128xf32>
    %423 = vector.shape_cast %422 : vector<128xf32> to vector<1x128xf32>
    %424 = vector.broadcast %423 : vector<1x128xf32> to vector<16x128xf32>
    %425 = arith.addf %420, %424 : vector<16x128xf32>
    %c0_265 = arith.constant 0 : index
    %c0_266 = arith.constant 0 : index
    %426 = vector.load %arg9[%c0_265, %c0_266] : memref<1x128xf32, #tpu.memory_space<vmem>>, vector<1x128xf32>
    %427 = vector.shape_cast %426 : vector<1x128xf32> to vector<128xf32>
    %428 = vector.shape_cast %427 : vector<128xf32> to vector<1x128xf32>
    %429 = vector.broadcast %428 : vector<1x128xf32> to vector<16x128xf32>
    %430 = arith.mulf %425, %429 : vector<16x128xf32>
    %431 = vector.extract_strided_slice %406 {offsets = [0, 0], sizes = [16, 128], strides = [1, 1]} : vector<16x512xf32> to vector<16x128xf32>
    %432 = arith.addf %431, %430 : vector<16x128xf32>
    %c0_267 = arith.constant 0 : index
    %c0_268 = arith.constant 0 : index
    %c0_269 = arith.constant 0 : index
    %433 = vector.load %arg10[%c0_267, %c0_268, %c0_269] : memref<1x16x512xf32, #tpu.memory_space<vmem>>, vector<1x16x128xf32>
    %434 = vector.shape_cast %433 : vector<1x16x128xf32> to vector<16x128xf32>
    %435 = vector.shape_cast %432 : vector<16x128xf32> to vector<1x16x128xf32>
    tpu.vector_store %arg10[%c0_267, %c0_268, %c0_269], %435 {strides = array<i32>} : memref<1x16x512xf32, #tpu.memory_space<vmem>>, vector<1x16x128xf32>,
    %436 = vector.extract_strided_slice %404 {offsets = [0, 128], sizes = [16, 128], strides = [1, 1]} : vector<16x512xf32> to vector<16x128xf32>
    %437 = arith.truncf %436 : vector<16x128xf32> to vector<16x128xbf16>
    %c0_270 = arith.constant 0 : index
    %c0_271 = arith.constant 0 : index
    %438 = vector.load %arg5[%c0_270, %c0_271] : memref<128x512xbf16, #tpu.memory_space<vmem>>, vector<128x512xbf16>
    %cst_272 = arith.constant dense<0.000000e+00> : vector<16x512xf32>
    %439 = tpu.matmul %437, %438, %cst_272 {dimension_numbers = #tpu.dot_dimension_numbers<[1], [0], [0], [1], [0, 0, 1, 1], [], []>} : vector<16x128xbf16>, vector<128x512xbf16>, vector<16x512xf32> -> vector<16x512xf32>
    %c0_273 = arith.constant 0 : index
    %c0_274 = arith.constant 0 : index
    %440 = vector.load %arg6[%c0_273, %c0_274] : memref<1x512xf32, #tpu.memory_space<vmem>>, vector<1x512xf32>
    %441 = vector.shape_cast %440 : vector<1x512xf32> to vector<512xf32>
    %442 = vector.shape_cast %441 : vector<512xf32> to vector<1x512xf32>
    %443 = vector.broadcast %442 : vector<1x512xf32> to vector<16x512xf32>
    %444 = arith.addf %439, %443 : vector<16x512xf32>
    %cst_275 = arith.constant 0.000000e+00 : f32
    %445 = vector.broadcast %cst_275 : f32 to vector<16x512xf32>
    %446 = arith.maximumf %444, %445 : vector<16x512xf32>
    %447 = arith.truncf %446 : vector<16x512xf32> to vector<16x512xbf16>
    %c0_276 = arith.constant 0 : index
    %c0_277 = arith.constant 0 : index
    %448 = vector.load %arg7[%c0_276, %c0_277] : memref<512x128xbf16, #tpu.memory_space<vmem>>, vector<512x128xbf16>
    %cst_278 = arith.constant dense<0.000000e+00> : vector<16x128xf32>
    %449 = tpu.matmul %447, %448, %cst_278 {dimension_numbers = #tpu.dot_dimension_numbers<[1], [0], [0], [1], [0, 0, 1, 1], [], []>} : vector<16x512xbf16>, vector<512x128xbf16>, vector<16x128xf32> -> vector<16x128xf32>
    %c0_279 = arith.constant 0 : index
    %c0_280 = arith.constant 0 : index
    %450 = vector.load %arg8[%c0_279, %c0_280] : memref<1x128xf32, #tpu.memory_space<vmem>>, vector<1x128xf32>
    %451 = vector.shape_cast %450 : vector<1x128xf32> to vector<128xf32>
    %452 = vector.shape_cast %451 : vector<128xf32> to vector<1x128xf32>
    %453 = vector.broadcast %452 : vector<1x128xf32> to vector<16x128xf32>
    %454 = arith.addf %449, %453 : vector<16x128xf32>
    %c0_281 = arith.constant 0 : index
    %c0_282 = arith.constant 0 : index
    %455 = vector.load %arg9[%c0_281, %c0_282] : memref<1x128xf32, #tpu.memory_space<vmem>>, vector<1x128xf32>
    %456 = vector.shape_cast %455 : vector<1x128xf32> to vector<128xf32>
    %457 = vector.shape_cast %456 : vector<128xf32> to vector<1x128xf32>
    %458 = vector.broadcast %457 : vector<1x128xf32> to vector<16x128xf32>
    %459 = arith.mulf %454, %458 : vector<16x128xf32>
    %460 = vector.extract_strided_slice %406 {offsets = [0, 128], sizes = [16, 128], strides = [1, 1]} : vector<16x512xf32> to vector<16x128xf32>
    %461 = arith.addf %460, %459 : vector<16x128xf32>
    %c0_283 = arith.constant 0 : index
    %c0_284 = arith.constant 0 : index
    %c128 = arith.constant 128 : index
    %462 = vector.load %arg10[%c0_283, %c0_284, %c128] : memref<1x16x512xf32, #tpu.memory_space<vmem>>, vector<1x16x128xf32>
    %463 = vector.shape_cast %462 : vector<1x16x128xf32> to vector<16x128xf32>
    %464 = vector.shape_cast %461 : vector<16x128xf32> to vector<1x16x128xf32>
    tpu.vector_store %arg10[%c0_283, %c0_284, %c128], %464 {strides = array<i32>} : memref<1x16x512xf32, #tpu.memory_space<vmem>>, vector<1x16x128xf32>,
    %465 = vector.extract_strided_slice %404 {offsets = [0, 256], sizes = [16, 128], strides = [1, 1]} : vector<16x512xf32> to vector<16x128xf32>
    %466 = arith.truncf %465 : vector<16x128xf32> to vector<16x128xbf16>
    %c0_285 = arith.constant 0 : index
    %c0_286 = arith.constant 0 : index
    %467 = vector.load %arg5[%c0_285, %c0_286] : memref<128x512xbf16, #tpu.memory_space<vmem>>, vector<128x512xbf16>
    %cst_287 = arith.constant dense<0.000000e+00> : vector<16x512xf32>
    %468 = tpu.matmul %466, %467, %cst_287 {dimension_numbers = #tpu.dot_dimension_numbers<[1], [0], [0], [1], [0, 0, 1, 1], [], []>} : vector<16x128xbf16>, vector<128x512xbf16>, vector<16x512xf32> -> vector<16x512xf32>
    %c0_288 = arith.constant 0 : index
    %c0_289 = arith.constant 0 : index
    %469 = vector.load %arg6[%c0_288, %c0_289] : memref<1x512xf32, #tpu.memory_space<vmem>>, vector<1x512xf32>
    %470 = vector.shape_cast %469 : vector<1x512xf32> to vector<512xf32>
    %471 = vector.shape_cast %470 : vector<512xf32> to vector<1x512xf32>
    %472 = vector.broadcast %471 : vector<1x512xf32> to vector<16x512xf32>
    %473 = arith.addf %468, %472 : vector<16x512xf32>
    %cst_290 = arith.constant 0.000000e+00 : f32
    %474 = vector.broadcast %cst_290 : f32 to vector<16x512xf32>
    %475 = arith.maximumf %473, %474 : vector<16x512xf32>
    %476 = arith.truncf %475 : vector<16x512xf32> to vector<16x512xbf16>
    %c0_291 = arith.constant 0 : index
    %c0_292 = arith.constant 0 : index
    %477 = vector.load %arg7[%c0_291, %c0_292] : memref<512x128xbf16, #tpu.memory_space<vmem>>, vector<512x128xbf16>
    %cst_293 = arith.constant dense<0.000000e+00> : vector<16x128xf32>
    %478 = tpu.matmul %476, %477, %cst_293 {dimension_numbers = #tpu.dot_dimension_numbers<[1], [0], [0], [1], [0, 0, 1, 1], [], []>} : vector<16x512xbf16>, vector<512x128xbf16>, vector<16x128xf32> -> vector<16x128xf32>
    %c0_294 = arith.constant 0 : index
    %c0_295 = arith.constant 0 : index
    %479 = vector.load %arg8[%c0_294, %c0_295] : memref<1x128xf32, #tpu.memory_space<vmem>>, vector<1x128xf32>
    %480 = vector.shape_cast %479 : vector<1x128xf32> to vector<128xf32>
    %481 = vector.shape_cast %480 : vector<128xf32> to vector<1x128xf32>
    %482 = vector.broadcast %481 : vector<1x128xf32> to vector<16x128xf32>
    %483 = arith.addf %478, %482 : vector<16x128xf32>
    %c0_296 = arith.constant 0 : index
    %c0_297 = arith.constant 0 : index
    %484 = vector.load %arg9[%c0_296, %c0_297] : memref<1x128xf32, #tpu.memory_space<vmem>>, vector<1x128xf32>
    %485 = vector.shape_cast %484 : vector<1x128xf32> to vector<128xf32>
    %486 = vector.shape_cast %485 : vector<128xf32> to vector<1x128xf32>
    %487 = vector.broadcast %486 : vector<1x128xf32> to vector<16x128xf32>
    %488 = arith.mulf %483, %487 : vector<16x128xf32>
    %489 = vector.extract_strided_slice %406 {offsets = [0, 256], sizes = [16, 128], strides = [1, 1]} : vector<16x512xf32> to vector<16x128xf32>
    %490 = arith.addf %489, %488 : vector<16x128xf32>
    %c0_298 = arith.constant 0 : index
    %c0_299 = arith.constant 0 : index
    %c256 = arith.constant 256 : index
    %491 = vector.load %arg10[%c0_298, %c0_299, %c256] : memref<1x16x512xf32, #tpu.memory_space<vmem>>, vector<1x16x128xf32>
    %492 = vector.shape_cast %491 : vector<1x16x128xf32> to vector<16x128xf32>
    %493 = vector.shape_cast %490 : vector<16x128xf32> to vector<1x16x128xf32>
    tpu.vector_store %arg10[%c0_298, %c0_299, %c256], %493 {strides = array<i32>} : memref<1x16x512xf32, #tpu.memory_space<vmem>>, vector<1x16x128xf32>,
    %494 = vector.extract_strided_slice %404 {offsets = [0, 384], sizes = [16, 128], strides = [1, 1]} : vector<16x512xf32> to vector<16x128xf32>
    %495 = arith.truncf %494 : vector<16x128xf32> to vector<16x128xbf16>
    %c0_300 = arith.constant 0 : index
    %c0_301 = arith.constant 0 : index
    %496 = vector.load %arg5[%c0_300, %c0_301] : memref<128x512xbf16, #tpu.memory_space<vmem>>, vector<128x512xbf16>
    %cst_302 = arith.constant dense<0.000000e+00> : vector<16x512xf32>
    %497 = tpu.matmul %495, %496, %cst_302 {dimension_numbers = #tpu.dot_dimension_numbers<[1], [0], [0], [1], [0, 0, 1, 1], [], []>} : vector<16x128xbf16>, vector<128x512xbf16>, vector<16x512xf32> -> vector<16x512xf32>
    %c0_303 = arith.constant 0 : index
    %c0_304 = arith.constant 0 : index
    %498 = vector.load %arg6[%c0_303, %c0_304] : memref<1x512xf32, #tpu.memory_space<vmem>>, vector<1x512xf32>
    %499 = vector.shape_cast %498 : vector<1x512xf32> to vector<512xf32>
    %500 = vector.shape_cast %499 : vector<512xf32> to vector<1x512xf32>
    %501 = vector.broadcast %500 : vector<1x512xf32> to vector<16x512xf32>
    %502 = arith.addf %497, %501 : vector<16x512xf32>
    %cst_305 = arith.constant 0.000000e+00 : f32
    %503 = vector.broadcast %cst_305 : f32 to vector<16x512xf32>
    %504 = arith.maximumf %502, %503 : vector<16x512xf32>
    %505 = arith.truncf %504 : vector<16x512xf32> to vector<16x512xbf16>
    %c0_306 = arith.constant 0 : index
    %c0_307 = arith.constant 0 : index
    %506 = vector.load %arg7[%c0_306, %c0_307] : memref<512x128xbf16, #tpu.memory_space<vmem>>, vector<512x128xbf16>
    %cst_308 = arith.constant dense<0.000000e+00> : vector<16x128xf32>
    %507 = tpu.matmul %505, %506, %cst_308 {dimension_numbers = #tpu.dot_dimension_numbers<[1], [0], [0], [1], [0, 0, 1, 1], [], []>} : vector<16x512xbf16>, vector<512x128xbf16>, vector<16x128xf32> -> vector<16x128xf32>
    %c0_309 = arith.constant 0 : index
    %c0_310 = arith.constant 0 : index
    %508 = vector.load %arg8[%c0_309, %c0_310] : memref<1x128xf32, #tpu.memory_space<vmem>>, vector<1x128xf32>
    %509 = vector.shape_cast %508 : vector<1x128xf32> to vector<128xf32>
    %510 = vector.shape_cast %509 : vector<128xf32> to vector<1x128xf32>
    %511 = vector.broadcast %510 : vector<1x128xf32> to vector<16x128xf32>
    %512 = arith.addf %507, %511 : vector<16x128xf32>
    %c0_311 = arith.constant 0 : index
    %c0_312 = arith.constant 0 : index
    %513 = vector.load %arg9[%c0_311, %c0_312] : memref<1x128xf32, #tpu.memory_space<vmem>>, vector<1x128xf32>
    %514 = vector.shape_cast %513 : vector<1x128xf32> to vector<128xf32>
    %515 = vector.shape_cast %514 : vector<128xf32> to vector<1x128xf32>
    %516 = vector.broadcast %515 : vector<1x128xf32> to vector<16x128xf32>
    %517 = arith.mulf %512, %516 : vector<16x128xf32>
    %518 = vector.extract_strided_slice %406 {offsets = [0, 384], sizes = [16, 128], strides = [1, 1]} : vector<16x512xf32> to vector<16x128xf32>
    %519 = arith.addf %518, %517 : vector<16x128xf32>
    %c0_313 = arith.constant 0 : index
    %c0_314 = arith.constant 0 : index
    %c384 = arith.constant 384 : index
    %520 = vector.load %arg10[%c0_313, %c0_314, %c384] : memref<1x16x512xf32, #tpu.memory_space<vmem>>, vector<1x16x128xf32>
    %521 = vector.shape_cast %520 : vector<1x16x128xf32> to vector<16x128xf32>
    %522 = vector.shape_cast %519 : vector<16x128xf32> to vector<1x16x128xf32>
    tpu.vector_store %arg10[%c0_313, %c0_314, %c384], %522 {strides = array<i32>} : memref<1x16x512xf32, #tpu.memory_space<vmem>>, vector<1x16x128xf32>,
    return
  }
  func.func @transform_0(%arg0: i32) -> (i32, i32, i32, i32) {
    %c0_i32 = arith.constant 0 : i32
    %c0_i32_0 = arith.constant 0 : i32
    %c0_i32_1 = arith.constant 0 : i32
    %c0_i32_2 = arith.constant 0 : i32
    return %arg0, %c0_i32, %c0_i32_0, %c0_i32_1 : i32, i32, i32, i32
  }
  func.func @transform_1(%arg0: i32) -> (i32, i32) {
    %c0_i32 = arith.constant 0 : i32
    %c0_i32_0 = arith.constant 0 : i32
    %c0_i32_1 = arith.constant 0 : i32
    return %c0_i32, %c0_i32_0 : i32, i32
  }
  func.func @transform_2(%arg0: i32) -> (i32, i32) {
    %c0_i32 = arith.constant 0 : i32
    %c0_i32_0 = arith.constant 0 : i32
    %c0_i32_1 = arith.constant 0 : i32
    return %c0_i32, %c0_i32_0 : i32, i32
  }
  func.func @transform_3(%arg0: i32) -> (i32, i32) {
    %c0_i32 = arith.constant 0 : i32
    %c0_i32_0 = arith.constant 0 : i32
    %c0_i32_1 = arith.constant 0 : i32
    return %c0_i32, %c0_i32_0 : i32, i32
  }
  func.func @transform_4(%arg0: i32) -> (i32, i32) {
    %c0_i32 = arith.constant 0 : i32
    %c0_i32_0 = arith.constant 0 : i32
    %c0_i32_1 = arith.constant 0 : i32
    return %c0_i32, %c0_i32_0 : i32, i32
  }
  func.func @transform_5(%arg0: i32) -> (i32, i32) {
    %c0_i32 = arith.constant 0 : i32
    %c0_i32_0 = arith.constant 0 : i32
    %c0_i32_1 = arith.constant 0 : i32
    return %c0_i32, %c0_i32_0 : i32, i32
  }
  func.func @transform_6(%arg0: i32) -> (i32, i32) {
    %c0_i32 = arith.constant 0 : i32
    %c0_i32_0 = arith.constant 0 : i32
    %c0_i32_1 = arith.constant 0 : i32
    return %c0_i32, %c0_i32_0 : i32, i32
  }
  func.func @transform_7(%arg0: i32) -> (i32, i32) {
    %c0_i32 = arith.constant 0 : i32
    %c0_i32_0 = arith.constant 0 : i32
    %c0_i32_1 = arith.constant 0 : i32
    return %c0_i32, %c0_i32_0 : i32, i32
  }
  func.func @transform_8(%arg0: i32) -> (i32, i32) {
    %c0_i32 = arith.constant 0 : i32
    %c0_i32_0 = arith.constant 0 : i32
    %c0_i32_1 = arith.constant 0 : i32
    return %c0_i32, %c0_i32_0 : i32, i32
  }
  func.func @transform_9(%arg0: i32) -> (i32, i32, i32) {
    %c0_i32 = arith.constant 0 : i32
    %c0_i32_0 = arith.constant 0 : i32
    %c0_i32_1 = arith.constant 0 : i32
    return %arg0, %c0_i32, %c0_i32_0 : i32, i32, i32
  }
}

</mosaic_0001>

<bundles_post_ra>
// kernel: ced_forward.1
= control target key start
LH: loop header
LB: loop body
LE: loop exit
PB: predicated region body
PF: predicated region fallthrough
CT: control target
= control target key end

     0   :  { %s8793_s30 = smov 0   ;;  %s11644_s0 = inlined_call_operand.vmem [shape: f32[2,7,22,512], index: 0, kind: input, shape index: {}]   ;;  %s11645_s1 = inlined_call_operand.vmem [shape: f32[49,512], index: 1, kind: input, shape index: {}]   ;;  %s11646_s2 = inlined_call_operand.vmem [shape: f32[1,512], index: 2, kind: input, shape index: {}]   ;;  %s11647_s3 = inlined_call_operand.vmem [shape: f32[1,512], index: 3, kind: input, shape index: {}]   ;;  %s11648_s4 = inlined_call_operand.vmem [shape: bf16[128,512], index: 4, kind: input, shape index: {}]   ;;  %s11649_s5 = inlined_call_operand.vmem [shape: f32[1,512], index: 5, kind: input, shape index: {}]   ;;  %s11650_s6 = inlined_call_operand.vmem [shape: bf16[512,128], index: 6, kind: input, shape index: {}]   ;;  %s11651_s7 = inlined_call_operand.vmem [shape: f32[1,128], index: 7, kind: input, shape index: {}]   ;;  %s11652_s8 = inlined_call_operand.vmem [shape: f32[1,128], index: 8, kind: input, shape index: {}]   ;;  %s11653_s9 = inlined_call_operand.vmem [shape: f32[2,16,512], index: 9, kind: output, shape index: {}]  }
   0x1 LB: > { %s7379_s10 = sadd.s32 4294967295, %s8740_s30   ;;  %p7383_p0 = scmp.ge.s32.totalorder %s8740_s30, 1  ;;  %s8740_s30 = sphi %s8793_s30, %s19_s30  }
   0x2   : > { %p287_p1 = scmp.lt.s32.totalorder %s8740_s30, 3 }
   0x4   : > { %p288_p2 = pnand %p7383_p0, %p287_p1 }
   0x5   : > { %p323_p3 = scmp.lt.s32.totalorder (!%p288_p2), %s7379_s10, 1 }
   0x6   : > { %291 = sbr.rel (%p288_p2) target bundleno = 1305 (0x519), region = 56 }
   0xb   : > { %v8224_v0 = vld [vmem:[%s11648_s4 + $0xe4] ss:$16 sps:$4 sm:$0xff]   ;;  %v8226_v1 = vld [vmem:[%s11648_s4 + $0xec] ss:$16 sps:$4 sm:$0xff]   ;;  %v8742_v2 = vmov 0   ;;  %s11655_s10 = smov (!%p323_p3, %s7379_s10), 1  ;;  %v344_v16 = vlaneseq }
   0xc   : > { %4811 = vmatprep.mubr.bf16.mxu0 %v8742_v2  ;;  %4854 = vmatprep.mubr.bf16.mxu1 %v8742_v2  ;;  %v8228_v3 = vld [vmem:[%s11648_s4 + $0xe0] ss:$16 sps:$4 sm:$0xff]   ;;  %v8229_v4 = vld [vmem:[%s11648_s4 + $0xe8] ss:$16 sps:$4 sm:$0xff]   ;;  %v8230_v5 = vld [vmem:[%s11648_s4 + $0xc4] ss:$16 sps:$4 sm:$0xff]  }
   0xd   : > { %4779 = vmatprep.subr.bf16.mxu0 %v8224_v0  ;;  %4822 = vmatprep.subr.bf16.mxu1 %v8226_v1  ;;  %v8232_v6 = vld [vmem:[%s11648_s4 + $0xcc] ss:$16 sps:$4 sm:$0xff]   ;;  %v8234_v7 = vld [vmem:[%s11648_s4 + $0xc0] ss:$16 sps:$4 sm:$0xff]   ;;  %v8235_v8 = vld [vmem:[%s11648_s4 + $0xc8] ss:$16 sps:$4 sm:$0xff]  }
   0xe   : > { %4780 = vmatpush1.bf16.msra.mxu0 %v8228_v3  ;;  %4823 = vmatpush1.bf16.msra.mxu1 %v8229_v4  ;;  %v8236_v9 = vld [vmem:[%s11648_s4 + $0xa4] ss:$16 sps:$4 sm:$0xff]   ;;  %v8238_v10 = vld [vmem:[%s11648_s4 + $0xac] ss:$16 sps:$4 sm:$0xff]   ;;  %v8240_v11 = vld [vmem:[%s11648_s4 + $0xa0] ss:$16 sps:$4 sm:$0xff]  }
   0xf   : > { %4781 = vmatprep.subr.bf16.mxu0 %v8230_v5  ;;  %4824 = vmatprep.subr.bf16.mxu1 %v8232_v6  ;;  %v8241_v12 = vld [vmem:[%s11648_s4 + $0xa8] ss:$16 sps:$4 sm:$0xff]   ;;  %v8242_v13 = vld [vmem:[%s11648_s4 + $0x84] ss:$16 sps:$4 sm:$0xff]   ;;  %v8244_v14 = vld [vmem:[%s11648_s4 + $0x8c] ss:$16 sps:$4 sm:$0xff]  }
  0x10   : > { %v8246_v15 = vld [vmem:[%s11648_s4 + $0x80] ss:$16 sps:$4 sm:$0xff]   ;;  %v8247_v17 = vld [vmem:[%s11648_s4 + $0x88] ss:$16 sps:$4 sm:$0xff]   ;;  %v8248_v18 = vld [vmem:[%s11648_s4 + $0x64] ss:$16 sps:$4 sm:$0xff]  }
  0x11   : > { %v8250_v19 = vld [vmem:[%s11648_s4 + $0x6c] ss:$16 sps:$4 sm:$0xff]   ;;  %v8252_v20 = vld [vmem:[%s11648_s4 + $0x60] ss:$16 sps:$4 sm:$0xff]   ;;  %v8253_v21 = vld [vmem:[%s11648_s4 + $0x68] ss:$16 sps:$4 sm:$0xff]  }
  0x12   : > { %4782 = vmatpush1.bf16.msra.mxu0 %v8234_v7  ;;  %4825 = vmatpush1.bf16.msra.mxu1 %v8235_v8  ;;  %s8214_s13 = smul.u32 672, %s11655_s10  ;;  %v8870_v22 = vshrl.u32 %v344_v16, 7  ;;  %v8254_v23 = vld [vmem:[%s11648_s4 + $0x44] ss:$16 sps:$4 sm:$0xff]   ;;  %v8256_v24 = vld [vmem:[%s11648_s4 + $0x4c] ss:$16 sps:$4 sm:$0xff]  }
  0x13   : > { %4783 = vmatprep.subr.bf16.mxu0 %v8236_v9  ;;  %4826 = vmatprep.subr.bf16.mxu1 %v8238_v10  ;;  %v8258_v26 = vld [vmem:[%s11648_s4 + $0x40] ss:$16 sps:$4 sm:$0xff]   ;;  %v8259_v27 = vld [vmem:[%s11648_s4 + $0x48] ss:$16 sps:$4 sm:$0xff]   ;;  %v8260_v28 = vld [vmem:[%s11648_s4 + $0x24] ss:$16 sps:$4 sm:$0xff]  }
  0x14   : > { %s8881_s20 = scalar_lea.vmem %s11644_s0, %s8214_s13  ;;  %v8884_v25 = vsub.s32 0, %v8870_v22  ;;  %v8262_v29 = vld [vmem:[%s11648_s4 + $0x2c] ss:$16 sps:$4 sm:$0xff]   ;;  %v8264_v30 = vld [vmem:[%s11648_s4 + $0x20] ss:$16 sps:$4 sm:$0xff]   ;;  %vm723_vm0 = vcmask 1046528  }
  0x15   : > { %v8265_v31 = vld [vmem:[%s11648_s4 + $0x28] ss:$16 sps:$4 sm:$0xff]   ;;  %v334_v32 = vld [vmem:[%s8881_s20] sm:$0xff]  ;;  %v8268_v36 = vld [vmem:[%s11648_s4 + $0xc] ss:$16 sps:$4 sm:$0xff]   ;;  %vm1361_vm1 = vcmask 1045504  }
  0x16   : > { %4784 = vmatpush1.bf16.msra.mxu0 %v8240_v11  ;;  %4827 = vmatpush1.bf16.msra.mxu1 %v8241_v12  ;;  %v8906_v33 = vld [vmem:[%s8881_s20 + $0x20] sm:$0xff]  ;;  %v8271_v52 = vld [vmem:[%s11648_s4 + $0x8] ss:$16 sps:$4 sm:$0xff]   ;;  %vm1999_vm2 = vcmask 1044480   ;;  %vm2637_vm3 = vcmask 1043456   ;;  %vm3275_vm4 = vcmask 1042432  }
  0x17   : > { %4785 = vmatprep.subr.bf16.mxu0 %v8242_v13  ;;  %4828 = vmatprep.subr.bf16.mxu1 %v8244_v14  ;;  %v342_v34 = vld [vmem:[%s11645_s1] ss:$8 sm:$0xf]  ;;  %v8266_v35 = vld [vmem:[%s11648_s4 + $0x4] ss:$16 sps:$4 sm:$0xff]   ;;  %vm3913_vm5 = vcmask 1041408  }
  0x18   : > { %v347_v37 = vrot.slane %v342_v34, %v8884_v25  ;;  %v7387_v38 = vld [vmem:[%s8881_s20 + $0x60] sm:$0xff]  ;;  %s8037_s27 = sshll.u32 %s11655_s10, 6 }
  0x19   : > { %v8920_v39 = vld [vmem:[%s8881_s20 + $0x80] sm:$0xff]  ;;  %s10581_s29 = scalar_lea.vmem %s11653_s9, %s8037_s27 }
  0x1a   : > { %4786 = vmatpush1.bf16.msra.mxu0 %v8246_v15  ;;  %4829 = vmatpush1.bf16.msra.mxu1 %v8247_v17  ;;  %v7395_v40 = vld [vmem:[%s11645_s1 + $0x1] ss:$8 sm:$0xf]  ;;  %v7404_v44 = vld [vmem:[%s11645_s1 + $0x2] ss:$8 sm:$0xf]  ;;  %v364_v45 = vmul.f32 %v347_v37, %v334_v32  ;;  %v368_v46 = vmul.f32 %v347_v37, %v8906_v33 }
  0x1b   : > { %4787 = vmatprep.subr.bf16.mxu0 %v8248_v18  ;;  %4830 = vmatprep.subr.bf16.mxu1 %v8250_v19  ;;  %v395_v41 = vrot.slane %v7395_v40, %v8884_v25  ;;  %v7396_v42 = vld [vmem:[%s8881_s20 + $0xc0] sm:$0xff]  ;;  %v443_v47 = vrot.slane %v7404_v44, %v8884_v25 }
  0x1c   : > { %v8928_v43 = vld [vmem:[%s8881_s20 + $0xe0] sm:$0xff] }
  0x1d   : > { %v7405_v48 = vld [vmem:[%s8881_s20 + $0x120] sm:$0xff]  ;;  %v412_v53 = vmul.f32 %v7387_v38, %v395_v41  ;;  %v416_v54 = vmul.f32 %v8920_v39, %v395_v41  ;;  %v460_v58 = vmul.f32 %v7396_v42, %v443_v47  ;;  %v464_v59 = vmul.f32 %v8928_v43, %v443_v47 }
  0x1e   : > { %4788 = vmatpush1.bf16.msra.mxu0 %v8252_v20  ;;  %4831 = vmatpush1.bf16.msra.mxu1 %v8253_v21  ;;  %v8937_v49 = vld [vmem:[%s8881_s20 + $0x140] sm:$0xff] }
  0x1f   : > { %4789 = vmatprep.subr.bf16.mxu0 %v8254_v23  ;;  %4832 = vmatprep.subr.bf16.mxu1 %v8256_v24  ;;  %v7413_v50 = vld [vmem:[%s11645_s1 + $0x3] ss:$8 sm:$0xf]  ;;  %v7422_v57 = vld [vmem:[%s11645_s1 + $0x4] ss:$8 sm:$0xf]  ;;  %v468_v6 = vadd.f32 %v460_v58, %v364_v45  ;;  %v472_v7 = vadd.f32 %v464_v59, %v368_v46 }
  0x20   : > { %v8270_v51 = vld [vmem:[%s11648_s4] ss:$16 sps:$4 sm:$0xff]   ;;  %v491_v55 = vrot.slane %v7413_v50, %v8884_v25  ;;  %v539_v61 = vrot.slane %v7422_v57, %v8884_v25  ;;  %v7431_v63 = vld [vmem:[%s11645_s1 + $0x5] ss:$8 sm:$0xf] }
  0x21   : > { %v7414_v56 = vld [vmem:[%s8881_s20 + $0x180] sm:$0xff]  ;;  %v587_v4 = vrot.slane %v7431_v63, %v8884_v25 }
  0x22   : > { %4790 = vmatpush1.bf16.msra.mxu0 %v8258_v26  ;;  %4833 = vmatpush1.bf16.msra.mxu1 %v8259_v27  ;;  %v8956_v60 = vld [vmem:[%s8881_s20 + $0x1a0] sm:$0xff]  ;;  %v508_v0 = vmul.f32 %v7405_v48, %v491_v55  ;;  %v512_v1 = vmul.f32 %v8937_v49, %v491_v55  ;;  %v556_v8 = vmul.f32 %v7414_v56, %v539_v61 }
  0x23   : > { %4791 = vmatprep.subr.bf16.mxu0 %v8260_v28  ;;  %4834 = vmatprep.subr.bf16.mxu1 %v8262_v29  ;;  %v7423_v62 = vld [vmem:[%s8881_s20 + $0x1e0] sm:$0xff]  ;;  %v560_v13 = vmul.f32 %v8956_v60, %v539_v61 }
  0x24   : > { %v8965_v3 = vld [vmem:[%s8881_s20 + $0x200] sm:$0xff]  ;;  %v516_v11 = vadd.f32 %v508_v0, %v412_v53  ;;  %v520_v12 = vadd.f32 %v512_v1, %v416_v54  ;;  %v604_v14 = vmul.f32 %v7423_v62, %v587_v4  ;;  %v564_v18 = vadd.f32 %v556_v8, %v468_v6  ;;  %v8272_v6 = vld [vmem:[%s11650_s6 + $0x78] sm:$0xff]  }
  0x25   : > { %v7440_v5 = vld [vmem:[%s11645_s1 + $0x6] ss:$8 sm:$0xf]  ;;  %v7441_v10 = vld [vmem:[%s11645_s1 + $0x7] ss:$8 sm:$0xf]  ;;  %v608_v19 = vmul.f32 %v8965_v3, %v587_v4  ;;  %v568_v26 = vadd.f32 %v560_v13, %v472_v7 }
  0x26   : > { %4792 = vmatpush1.bf16.msra.mxu0 %v8264_v30  ;;  %4835 = vmatpush1.bf16.msra.mxu1 %v8265_v31  ;;  %v7432_v9 = vld [vmem:[%s8881_s20 + $0x240] sm:$0xff]  ;;  %v635_v20 = vrot.slane %v7440_v5, %v8884_v25  ;;  %v682_v21 = vrot.slane %v7441_v10, %v8884_v25  ;;  %v612_v27 = vadd.f32 %v604_v14, %v516_v11  ;;  %v8273_v11 = vld [vmem:[%s11650_s6 + $0xf8] sm:$0xff]  }
  0x27   : > { %4793 = vmatprep.subr.bf16.mxu0 %v8266_v35  ;;  %4836 = vmatprep.subr.bf16.mxu1 %v8268_v36  ;;  %v8977_v15 = vld [vmem:[%s8881_s20 + $0x260] sm:$0xff]  ;;  %v616_v30 = vadd.f32 %v608_v19, %v520_v12 }
  0x28   : > { %v668_v16 = vld [vmem:[%s8881_s20] sm:$0xfe]  ;;  %v672_v17 = vld [vmem:[%s8881_s20 + $0x40] sm:$0x1]  ;;  %v652_v31 = vmul.f32 %v7432_v9, %v635_v20  ;;  %v656_v32 = vmul.f32 %v8977_v15, %v635_v20  ;;  %v703_v35 = vmul.f32 %v682_v21, %v8906_v33 }
  0x29   : > { %v7442_v23 = vld [vmem:[%s8881_s20 + $0x60] sm:$0xfe]  ;;  %v7450_v24 = vld [vmem:[%s11645_s1 + $0x20] ss:$8 sm:$0xf]  ;;  %v699_v34 = vmul.f32 %v682_v21, %v668_v16  ;;  %v707_v36 = vmul.f32 %v682_v21, %v672_v17 }
  0x2a   : > { %4794 = vmatpush1.bf16.msra.mxu0 %v8270_v51  ;;  %4837 = vmatpush1.bf16.msra.mxu1 %v8271_v52  ;;  %v7446_v28 = vld [vmem:[%s8881_s20 + $0xa0] sm:$0x1]  ;;  %v774_v29 = vrot.slane %v7450_v24, %v8884_v25  ;;  %v7459_v40 = vld [vmem:[%s11645_s1 + $0x21] ss:$8 sm:$0xf]  ;;  %v660_v42 = vadd.f32 %v652_v31, %v564_v18  ;;  %v664_v44 = vadd.f32 %v656_v32, %v568_v26  ;;  %v725_v50 = vrot.slane %v703_v35, 1 }
  0x2b   : > { %v7468_v41 = vld [vmem:[%s11645_s1 + $0x22] ss:$8 sm:$0xf]  ;;  %v724_v45 = vrot.slane %v699_v34, 1  ;;  %v736_v51 = vrot.slane %v707_v36, 1  ;;  %v865_v56 = vrot.slane %v7459_v40, %v8884_v25  ;;  %8038 = vmatprep.subr.bf16.mxu0 %v8272_v6  ;;  %8060 = vmatprep.subr.bf16.mxu1 %v8273_v11 }
  0x2c   : > { %v791_v37 = vmul.f32 %v7442_v23, %v774_v29  ;;  %v795_v38 = vmul.f32 %v8920_v39, %v774_v29  ;;  %v799_v46 = vmul.f32 %v7446_v28, %v774_v29  ;;  %v7451_v47 = vld [vmem:[%s8881_s20 + $0xc0] sm:$0xfe]  ;;  %v7455_v54 = vld [vmem:[%s8881_s20 + $0x100] sm:$0x1]  ;;  %v956_v58 = vrot.slane %v7468_v41, %v8884_v25 }
  0x2d   : > { %v7477_v48 = vld [vmem:[%s11645_s1 + $0x23] ss:$8 sm:$0xf]  ;;  %v7486_v61 = vld [vmem:[%s11645_s1 + $0x24] ss:$8 sm:$0xf]  ;;  %v726_v62 = vsel %vm723_vm0, %v724_v45, %v725_v50  ;;  %v737_v63 = vsel %vm723_vm0, %v725_v50, %v736_v51  ;;  %v882_v13 = vmul.f32 %v7451_v47, %v865_v56  ;;  %v886_v14 = vmul.f32 %v8928_v43, %v865_v56 }
  0x2e   : > { %v815_v52 = vrot.slane %v791_v37, 1  ;;  %v816_v53 = vrot.slane %v795_v38, 1  ;;  %v827_v55 = vrot.slane %v799_v46, 1  ;;  %v7460_v57 = vld [vmem:[%s8881_s20 + $0x120] sm:$0xfe]  ;;  %v1047_v59 = vrot.slane %v7477_v48, %v8884_v25 }
  0x2f   : > { %v7464_v1 = vld [vmem:[%s8881_s20 + $0x160] sm:$0x1]  ;;  %v7469_v4 = vld [vmem:[%s8881_s20 + $0x180] sm:$0xfe]  ;;  %v1138_v5 = vrot.slane %v7486_v61, %v8884_v25  ;;  %v752_v7 = vadd.f32 %v726_v62, %v612_v27  ;;  %v756_v8 = vadd.f32 %v737_v63, %v616_v30  ;;  %v890_v16 = vmul.f32 %v7455_v54, %v865_v56 }
  0x30   : > { %v817_v0 = vsel %vm723_vm0, %v815_v52, %v816_v53  ;;  %v828_v9 = vsel %vm723_vm0, %v816_v53, %v827_v55  ;;  %v7473_v17 = vld [vmem:[%s8881_s20 + $0x1c0] sm:$0x1]  ;;  %v973_v18 = vmul.f32 %v7460_v57, %v956_v58  ;;  %v977_v19 = vmul.f32 %v8937_v49, %v956_v58  ;;  %v7478_v28 = vld [vmem:[%s8881_s20 + $0x1e0] sm:$0xfe] }
  0x31   : > { %v843_v10 = vadd.f32 %v817_v0, %v660_v42  ;;  %v847_v12 = vadd.f32 %v828_v9, %v664_v44  ;;  %v981_v20 = vmul.f32 %v7464_v1, %v956_v58  ;;  %v1064_v21 = vmul.f32 %v7469_v4, %v1047_v59  ;;  %v7482_v34 = vld [vmem:[%s8881_s20 + $0x220] sm:$0x1]  ;;  %v7495_v40 = vld [vmem:[%s11645_s1 + $0x25] ss:$8 sm:$0xf] }
  0x32   : > { %v906_v23 = vrot.slane %v882_v13, 1  ;;  %v907_v24 = vrot.slane %v886_v14, 1  ;;  %v918_v26 = vrot.slane %v890_v16, 1  ;;  %v1068_v27 = vmul.f32 %v8956_v60, %v1047_v59  ;;  %v7496_v46 = vld [vmem:[%s11645_s1 + $0x26] ss:$8 sm:$0xf] }
  0x33   : > { %v997_v29 = vrot.slane %v973_v18, 1  ;;  %v998_v30 = vrot.slane %v977_v19, 1  ;;  %v1009_v31 = vrot.slane %v981_v20, 1  ;;  %v1072_v32 = vmul.f32 %v7473_v17, %v1047_v59  ;;  %v7505_v47 = vld [vmem:[%s11645_s1 + $0x27] ss:$8 sm:$0xf] }
  0x34   : > { %v908_v35 = vsel %vm723_vm0, %v906_v23, %v907_v24  ;;  %v919_v36 = vsel %vm723_vm0, %v907_v24, %v918_v26  ;;  %v1088_v37 = vrot.slane %v1064_v21, 1  ;;  %v1089_v38 = vrot.slane %v1068_v27, 1  ;;  %v7487_v57 = vld [vmem:[%s8881_s20 + $0x240] sm:$0xfe]  ;;  %v7491_v58 = vld [vmem:[%s8881_s20 + $0x280] sm:$0x1] }
  0x35   : > { %v934_v41 = vadd.f32 %v908_v35, %v752_v7  ;;  %v938_v42 = vadd.f32 %v919_v36, %v756_v8  ;;  %v999_v44 = vsel %vm723_vm0, %v997_v29, %v998_v30  ;;  %v1010_v45 = vsel %vm723_vm0, %v998_v30, %v1009_v31  ;;  %v1306_v59 = vld [vmem:[%s8881_s20] sm:$0xfc]  ;;  %v1310_v63 = vld [vmem:[%s8881_s20 + $0x40] sm:$0x3] }
  0x36   : > { %v1025_v48 = vadd.f32 %v999_v44, %v843_v10  ;;  %v1029_v50 = vadd.f32 %v1010_v45, %v847_v12  ;;  %v1090_v51 = vsel %vm723_vm0, %v1088_v37, %v1089_v38  ;;  %v1100_v52 = vrot.slane %v1072_v32, 1  ;;  %v7497_v17 = vld [vmem:[%s8881_s20 + $0x60] sm:$0xfc]  ;;  %v7501_v18 = vld [vmem:[%s8881_s20 + $0xa0] sm:$0x3] }
  0x37   : > { %v1116_v53 = vadd.f32 %v1090_v51, %v934_v41  ;;  %v1155_v54 = vmul.f32 %v7478_v28, %v1138_v5  ;;  %v1159_v55 = vmul.f32 %v8965_v3, %v1138_v5  ;;  %v1163_v56 = vmul.f32 %v7482_v34, %v1138_v5  ;;  %v7514_v24 = vld [vmem:[%s11645_s1 + $0x40] ss:$8 sm:$0xf]  ;;  %v7523_v26 = vld [vmem:[%s11645_s1 + $0x41] ss:$8 sm:$0xf] }
  0x38   : > { %v1101_v61 = vsel %vm723_vm0, %v1089_v38, %v1100_v52  ;;  %v1229_v62 = vrot.slane %v7495_v40, %v8884_v25  ;;  %v1320_v0 = vrot.slane %v7496_v46, %v8884_v25  ;;  %v1412_v1 = vrot.slane %v7505_v47, %v8884_v25  ;;  %v7532_v36 = vld [vmem:[%s11645_s1 + $0x42] ss:$8 sm:$0xf]  ;;  %v7541_v37 = vld [vmem:[%s11645_s1 + $0x43] ss:$8 sm:$0xf] }
  0x39   : > { %v1120_v4 = vadd.f32 %v1101_v61, %v938_v42  ;;  %v1179_v6 = vrot.slane %v1155_v54, 1  ;;  %v1180_v7 = vrot.slane %v1159_v55, 1  ;;  %v1191_v8 = vrot.slane %v1163_v56, 1  ;;  %v7550_v44 = vld [vmem:[%s11645_s1 + $0x44] ss:$8 sm:$0xf] }
  0x3a   : > { %v1246_v9 = vmul.f32 %v7487_v57, %v1229_v62  ;;  %v1250_v5 = vmul.f32 %v8977_v15, %v1229_v62  ;;  %v1254_v10 = vmul.f32 %v7491_v58, %v1229_v62  ;;  %v1337_v11 = vmul.f32 %v1320_v0, %v1306_v59  ;;  %v7551_v45 = vld [vmem:[%s11645_s1 + $0x45] ss:$8 sm:$0xf]  ;;  %v7510_v54 = vld [vmem:[%s8881_s20 + $0x100] sm:$0x3] }
  0x3b   : > { %v1181_v12 = vsel %vm723_vm0, %v1179_v6, %v1180_v7  ;;  %v1192_v13 = vsel %vm723_vm0, %v1180_v7, %v1191_v8  ;;  %v1341_v14 = vmul.f32 %v1320_v0, %v8906_v33  ;;  %v1345_v16 = vmul.f32 %v1320_v0, %v1310_v63  ;;  %v7506_v51 = vld [vmem:[%s8881_s20 + $0xc0] sm:$0xfc]  ;;  %v7519_v58 = vld [vmem:[%s8881_s20 + $0x160] sm:$0x3] }
  0x3c   : > { %v1207_v19 = vadd.f32 %v1181_v12, %v1025_v48  ;;  %v1211_v20 = vadd.f32 %v1192_v13, %v1029_v50  ;;  %v1270_v21 = vrot.slane %v1246_v9, 1  ;;  %v1271_v23 = vrot.slane %v1250_v5, 1  ;;  %v7515_v56 = vld [vmem:[%s8881_s20 + $0x120] sm:$0xfc] }
  0x3d   : > { %v1282_v27 = vrot.slane %v1254_v10, 1  ;;  %v1362_v28 = vrot.slane %v1337_v11, 2  ;;  %v1363_v29 = vrot.slane %v1341_v14, 2  ;;  %v1374_v30 = vrot.slane %v1345_v16, 2  ;;  %v7524_v7 = vld [vmem:[%s8881_s20 + $0x180] sm:$0xfc] }
  0x3e   : > { %v1272_v31 = vsel %vm723_vm0, %v1270_v21, %v1271_v23  ;;  %v1429_v32 = vmul.f32 %v7497_v17, %v1412_v1  ;;  %v1433_v34 = vmul.f32 %v8920_v39, %v1412_v1  ;;  %v1437_v35 = vmul.f32 %v7501_v18, %v1412_v1  ;;  %v7528_v11 = vld [vmem:[%s8881_s20 + $0x1c0] sm:$0x3] }
  0x3f   : > { %v1283_v38 = vsel %vm723_vm0, %v1271_v23, %v1282_v27  ;;  %v1298_v40 = vadd.f32 %v1272_v31, %v1116_v53  ;;  %v1364_v41 = vsel %vm1361_vm1, %v1362_v28, %v1363_v29  ;;  %v1375_v42 = vsel %vm1361_vm1, %v1363_v29, %v1374_v30  ;;  %v7533_v27 = vld [vmem:[%s8881_s20 + $0x1e0] sm:$0xfc] }
  0x40   : > { %v1302_v46 = vadd.f32 %v1283_v38, %v1120_v4  ;;  %v1390_v47 = vadd.f32 %v1364_v41, %v1207_v19  ;;  %v1394_v48 = vadd.f32 %v1375_v42, %v1211_v20  ;;  %v1453_v50 = vrot.slane %v1429_v32, 2  ;;  %v7537_v32 = vld [vmem:[%s8881_s20 + $0x220] sm:$0x3]  ;;  %v7542_v38 = vld [vmem:[%s8881_s20 + $0x240] sm:$0xfc] }
  0x41   : > { %v1454_v52 = vrot.slane %v1433_v34, 2  ;;  %v1465_v53 = vrot.slane %v1437_v35, 2  ;;  %v1503_v55 = vrot.slane %v7514_v24, %v8884_v25  ;;  %v1594_v57 = vrot.slane %v7523_v26, %v8884_v25 }
  0x42   : > { %v1685_v59 = vrot.slane %v7532_v36, %v8884_v25  ;;  %v1776_v61 = vrot.slane %v7541_v37, %v8884_v25  ;;  %v1867_v62 = vrot.slane %v7550_v44, %v8884_v25  ;;  %v1958_v63 = vrot.slane %v7551_v45, %v8884_v25  ;;  %v7546_v45 = vld [vmem:[%s8881_s20 + $0x280] sm:$0x3] }
  0x43   : > { %v1455_v0 = vsel %vm1361_vm1, %v1453_v50, %v1454_v52  ;;  %v1466_v1 = vsel %vm1361_vm1, %v1454_v52, %v1465_v53  ;;  %v1520_v4 = vmul.f32 %v7506_v51, %v1503_v55  ;;  %v1524_v6 = vmul.f32 %v8928_v43, %v1503_v55 }
  0x44   : > { %v1481_v8 = vadd.f32 %v1455_v0, %v1298_v40  ;;  %v1485_v9 = vadd.f32 %v1466_v1, %v1302_v46  ;;  %v1528_v5 = vmul.f32 %v7510_v54, %v1503_v55  ;;  %v1611_v10 = vmul.f32 %v7515_v56, %v1594_v57  ;;  %v1944_v46 = vld [vmem:[%s8881_s20] sm:$0xf8] }
  0x45   : > { %v1544_v12 = vrot.slane %v1520_v4, 2  ;;  %v1545_v13 = vrot.slane %v1524_v6, 2  ;;  %v1615_v14 = vmul.f32 %v8937_v49, %v1594_v57  ;;  %v1619_v16 = vmul.f32 %v7519_v58, %v1594_v57  ;;  %v7560_v1 = vld [vmem:[%s11645_s1 + $0x46] ss:$8 sm:$0xf] }
  0x46   : > { %v1556_v17 = vrot.slane %v1528_v5, 2  ;;  %v1635_v18 = vrot.slane %v1611_v10, 2  ;;  %v1702_v19 = vmul.f32 %v7524_v7, %v1685_v59  ;;  %v1706_v20 = vmul.f32 %v8956_v60, %v1685_v59 }
  0x47   : > { %v1546_v21 = vsel %vm1361_vm1, %v1544_v12, %v1545_v13  ;;  %v1636_v23 = vrot.slane %v1615_v14, 2  ;;  %v1647_v24 = vrot.slane %v1619_v16, 2  ;;  %v1710_v26 = vmul.f32 %v7528_v11, %v1685_v59  ;;  %v7578_v11 = vld [vmem:[%s11645_s1 + $0x60] ss:$8 sm:$0xf] }
  0x48   : > { %v1557_v28 = vsel %vm1361_vm1, %v1545_v13, %v1556_v17  ;;  %v1572_v29 = vadd.f32 %v1546_v21, %v1390_v47  ;;  %v1726_v30 = vrot.slane %v1702_v19, 2  ;;  %v1727_v31 = vrot.slane %v1706_v20, 2  ;;  %v7552_v16 = vld [vmem:[%s8881_s20 + $0x60] sm:$0xf8]  ;;  %v7556_v20 = vld [vmem:[%s8881_s20 + $0xa0] sm:$0x7] }
  0x49   : > { %v1576_v34 = vadd.f32 %v1557_v28, %v1394_v48  ;;  %v1637_v35 = vsel %vm1361_vm1, %v1635_v18, %v1636_v23  ;;  %v1648_v36 = vsel %vm1361_vm1, %v1636_v23, %v1647_v24  ;;  %v1738_v37 = vrot.slane %v1710_v26, 2  ;;  %v1948_v48 = vld [vmem:[%s8881_s20 + $0x40] sm:$0x7]  ;;  %v7561_v23 = vld [vmem:[%s8881_s20 + $0xc0] sm:$0xf8] }
  0x4a   : > { %v1663_v40 = vadd.f32 %v1637_v35, %v1481_v8  ;;  %v1667_v41 = vadd.f32 %v1648_v36, %v1485_v9  ;;  %v1728_v42 = vsel %vm1361_vm1, %v1726_v30, %v1727_v31  ;;  %v1793_v44 = vmul.f32 %v7533_v27, %v1776_v61  ;;  %v7569_v8 = vld [vmem:[%s11645_s1 + $0x47] ss:$8 sm:$0xf]  ;;  %v7565_v27 = vld [vmem:[%s8881_s20 + $0x100] sm:$0x7] }
  0x4b   : > { %v1739_v47 = vsel %vm1361_vm1, %v1727_v31, %v1738_v37  ;;  %v1754_v50 = vadd.f32 %v1728_v42, %v1572_v29  ;;  %v1797_v51 = vmul.f32 %v8965_v3, %v1776_v61  ;;  %v1801_v52 = vmul.f32 %v7537_v32, %v1776_v61  ;;  %v7570_v29 = vld [vmem:[%s8881_s20 + $0x120] sm:$0xf8] }
  0x4c   : > { %v1758_v53 = vadd.f32 %v1739_v47, %v1576_v34  ;;  %v1817_v54 = vrot.slane %v1793_v44, 2  ;;  %v1884_v55 = vmul.f32 %v7542_v38, %v1867_v62  ;;  %v1888_v56 = vmul.f32 %v8977_v15, %v1867_v62  ;;  %v7587_v47 = vld [vmem:[%s11645_s1 + $0x61] ss:$8 sm:$0xf] }
  0x4d   : > { %v1818_v57 = vrot.slane %v1797_v51, 2  ;;  %v1829_v58 = vrot.slane %v1801_v52, 2  ;;  %v1892_v59 = vmul.f32 %v7546_v45, %v1867_v62  ;;  %v1975_v0 = vmul.f32 %v1958_v63, %v1944_v46 }
  0x4e   : > { %v1908_v4 = vrot.slane %v1884_v55, 2  ;;  %v1909_v6 = vrot.slane %v1888_v56, 2  ;;  %v1979_v7 = vmul.f32 %v1958_v63, %v8906_v33  ;;  %v1983_v61 = vmul.f32 %v1958_v63, %v1948_v48 }
  0x4f   : > { %v1819_v9 = vsel %vm1361_vm1, %v1817_v54, %v1818_v57  ;;  %v1830_v62 = vsel %vm1361_vm1, %v1818_v57, %v1829_v58  ;;  %v1920_v5 = vrot.slane %v1892_v59, 2  ;;  %v2000_v10 = vrot.slane %v1975_v0, 3  ;;  %v7605_v58 = vld [vmem:[%s11645_s1 + $0x63] ss:$8 sm:$0xf] }
  0x50   : > { %v1845_v12 = vadd.f32 %v1819_v9, %v1663_v40  ;;  %v1849_v13 = vadd.f32 %v1830_v62, %v1667_v41  ;;  %v1910_v63 = vsel %vm1361_vm1, %v1908_v4, %v1909_v6  ;;  %v2001_v14 = vrot.slane %v1979_v7, 3  ;;  %v7574_v41 = vld [vmem:[%s8881_s20 + $0x160] sm:$0x7]  ;;  %v7606_v7 = vld [vmem:[%s11645_s1 + $0x64] ss:$8 sm:$0xf] }
  0x51   : > { %v1921_v17 = vsel %vm1361_vm1, %v1909_v6, %v1920_v5  ;;  %v1936_v18 = vadd.f32 %v1910_v63, %v1754_v50  ;;  %v2012_v19 = vrot.slane %v1983_v61, 3  ;;  %v2050_v21 = vrot.slane %v7560_v1, %v8884_v25  ;;  %v7596_v50 = vld [vmem:[%s11645_s1 + $0x62] ss:$8 sm:$0xf]  ;;  %v7579_v6 = vld [vmem:[%s8881_s20 + $0x180] sm:$0xf8] }
  0x52   : > { %v1940_v24 = vadd.f32 %v1921_v17, %v1758_v53  ;;  %v2002_v26 = vsel %vm1999_vm2, %v2000_v10, %v2001_v14  ;;  %v2141_v28 = vrot.slane %v7569_v8, %v8884_v25  ;;  %v2232_v30 = vrot.slane %v7578_v11, %v8884_v25  ;;  %v7583_v5 = vld [vmem:[%s8881_s20 + $0x1c0] sm:$0x7]  ;;  %v7588_v10 = vld [vmem:[%s8881_s20 + $0x1e0] sm:$0xf8] }
  0x53   : > { %v2013_v31 = vsel %vm1999_vm2, %v2001_v14, %v2012_v19  ;;  %v2028_v32 = vadd.f32 %v2002_v26, %v1845_v12  ;;  %v2067_v34 = vmul.f32 %v7552_v16, %v2050_v21  ;;  %v2071_v35 = vmul.f32 %v8920_v39, %v2050_v21  ;;  %v7592_v63 = vld [vmem:[%s8881_s20 + $0x220] sm:$0x7]  ;;  %v7597_v16 = vld [vmem:[%s8881_s20 + $0x240] sm:$0xf8] }
  0x54   : > { %v2032_v36 = vadd.f32 %v2013_v31, %v1849_v13  ;;  %v2075_v37 = vmul.f32 %v7556_v20, %v2050_v21  ;;  %v2158_v38 = vmul.f32 %v7561_v23, %v2141_v28  ;;  %v2162_v40 = vmul.f32 %v8928_v43, %v2141_v28 }
  0x55   : > { %v2091_v42 = vrot.slane %v2067_v34, 3  ;;  %v2092_v44 = vrot.slane %v2071_v35, 3  ;;  %v2166_v45 = vmul.f32 %v7565_v27, %v2141_v28  ;;  %v2249_v46 = vmul.f32 %v7570_v29, %v2232_v30  ;;  %v7601_v27 = vld [vmem:[%s8881_s20 + $0x280] sm:$0x7] }
  0x56   : > { %v2103_v51 = vrot.slane %v2075_v37, 3  ;;  %v2182_v52 = vrot.slane %v2158_v38, 3  ;;  %v2183_v48 = vrot.slane %v2162_v40, 3  ;;  %v2253_v53 = vmul.f32 %v8937_v49, %v2232_v30  ;;  %v2582_v37 = vld [vmem:[%s8881_s20] sm:$0xf0] }
  0x57   : > { %v2093_v54 = vsel %vm1999_vm2, %v2091_v42, %v2092_v44  ;;  %v2194_v55 = vrot.slane %v2166_v45, 3  ;;  %v2257_v56 = vmul.f32 %v7574_v41, %v2232_v30  ;;  %v2273_v57 = vrot.slane %v2249_v46, 3  ;;  %v2586_v38 = vld [vmem:[%s8881_s20 + $0x40] sm:$0xf] }
  0x58   : > { %v2104_v59 = vsel %vm1999_vm2, %v2092_v44, %v2103_v51  ;;  %v2119_v0 = vadd.f32 %v2093_v54, %v1936_v18  ;;  %v2184_v1 = vsel %vm1999_vm2, %v2182_v52, %v2183_v48  ;;  %v2274_v4 = vrot.slane %v2253_v53, 3  ;;  %v7615_v45 = vld [vmem:[%s11645_s1 + $0x65] ss:$8 sm:$0xf] }
  0x59   : > { %v2123_v61 = vadd.f32 %v2104_v59, %v1940_v24  ;;  %v2195_v8 = vsel %vm1999_vm2, %v2183_v48, %v2194_v55  ;;  %v2210_v9 = vadd.f32 %v2184_v1, %v2028_v32  ;;  %v2285_v62 = vrot.slane %v2257_v56, 3  ;;  %v7624_v52 = vld [vmem:[%s11645_s1 + $0x66] ss:$8 sm:$0xf] }
  0x5a   : > { %v2214_v11 = vadd.f32 %v2195_v8, %v2032_v36  ;;  %v2275_v12 = vsel %vm1999_vm2, %v2273_v57, %v2274_v4  ;;  %v2323_v13 = vrot.slane %v7587_v47, %v8884_v25  ;;  %v2414_v14 = vrot.slane %v7596_v50, %v8884_v25  ;;  %v7633_v56 = vld [vmem:[%s11645_s1 + $0x67] ss:$8 sm:$0xf]  ;;  %v7611_v8 = vld [vmem:[%s8881_s20 + $0xa0] sm:$0xf] }
  0x5b   : > { %v2286_v17 = vsel %vm1999_vm2, %v2274_v4, %v2285_v62  ;;  %v2301_v18 = vadd.f32 %v2275_v12, %v2119_v0  ;;  %v2505_v19 = vrot.slane %v7605_v58, %v8884_v25  ;;  %v2596_v20 = vrot.slane %v7606_v7, %v8884_v25 }
  0x5c   : > { %v2305_v21 = vadd.f32 %v2286_v17, %v2123_v61  ;;  %v2340_v23 = vmul.f32 %v7579_v6, %v2323_v13  ;;  %v2344_v24 = vmul.f32 %v8956_v60, %v2323_v13  ;;  %v2348_v26 = vmul.f32 %v7583_v5, %v2323_v13  ;;  %v7607_v61 = vld [vmem:[%s8881_s20 + $0x60] sm:$0xf0] }
  0x5d   : > { %v2431_v28 = vmul.f32 %v7588_v10, %v2414_v14  ;;  %v2435_v29 = vmul.f32 %v8965_v3, %v2414_v14  ;;  %v2439_v30 = vmul.f32 %v7592_v63, %v2414_v14  ;;  %v2522_v31 = vmul.f32 %v7597_v16, %v2505_v19  ;;  %v7620_v10 = vld [vmem:[%s8881_s20 + $0x100] sm:$0xf] }
  0x5e   : > { %v2364_v32 = vrot.slane %v2340_v23, 3  ;;  %v2365_v34 = vrot.slane %v2344_v24, 3  ;;  %v2376_v35 = vrot.slane %v2348_v26, 3  ;;  %v2526_v36 = vmul.f32 %v8977_v15, %v2505_v19 }
  0x5f   : > { %v2455_v40 = vrot.slane %v2431_v28, 3  ;;  %v2456_v41 = vrot.slane %v2435_v29, 3  ;;  %v2467_v42 = vrot.slane %v2439_v30, 3  ;;  %v2530_v44 = vmul.f32 %v7601_v27, %v2505_v19 }
  0x60   : > { %v2366_v46 = vsel %vm1999_vm2, %v2364_v32, %v2365_v34  ;;  %v2377_v47 = vsel %vm1999_vm2, %v2365_v34, %v2376_v35  ;;  %v2546_v50 = vrot.slane %v2522_v31, 3  ;;  %v2547_v51 = vrot.slane %v2526_v36, 3  ;;  %v7651_v32 = vld [vmem:[%s11645_s1 + $0x81] ss:$8 sm:$0xf] }
  0x61   : > { %v2392_v48 = vadd.f32 %v2366_v46, %v2210_v9  ;;  %v2396_v53 = vadd.f32 %v2377_v47, %v2214_v11  ;;  %v2457_v54 = vsel %vm1999_vm2, %v2455_v40, %v2456_v41  ;;  %v2468_v55 = vsel %vm1999_vm2, %v2456_v41, %v2467_v42  ;;  %v7616_v9 = vld [vmem:[%s8881_s20 + $0xc0] sm:$0xf0] }
  0x62   : > { %v2483_v57 = vadd.f32 %v2457_v54, %v2301_v18  ;;  %v2487_v58 = vadd.f32 %v2468_v55, %v2305_v21  ;;  %v2548_v59 = vsel %vm1999_vm2, %v2546_v50, %v2547_v51  ;;  %v2558_v0 = vrot.slane %v2530_v44, 3  ;;  %v7629_v21 = vld [vmem:[%s8881_s20 + $0x160] sm:$0xf]  ;;  %v7670_v40 = vld [vmem:[%s11645_s1 + $0x84] ss:$8 sm:$0xf] }
  0x63   : > { %v2574_v1 = vadd.f32 %v2548_v59, %v2392_v48  ;;  %v2613_v4 = vmul.f32 %v2596_v20, %v2582_v37  ;;  %v2617_v6 = vmul.f32 %v2596_v20, %v8906_v33  ;;  %v2621_v7 = vmul.f32 %v2596_v20, %v2586_v38  ;;  %v7625_v20 = vld [vmem:[%s8881_s20 + $0x120] sm:$0xf0]  ;;  %v7660_v37 = vld [vmem:[%s11645_s1 + $0x82] ss:$8 sm:$0xf] }
  0x64   : > { %v2559_v62 = vsel %vm1999_vm2, %v2547_v51, %v2558_v0  ;;  %v2688_v5 = vrot.slane %v7615_v45, %v8884_v25  ;;  %v2779_v11 = vrot.slane %v7624_v52, %v8884_v25  ;;  %v2870_v12 = vrot.slane %v7633_v56, %v8884_v25  ;;  %v7661_v38 = vld [vmem:[%s11645_s1 + $0x83] ss:$8 sm:$0xf]  ;;  %v7679_v41 = vld [vmem:[%s11645_s1 + $0x85] ss:$8 sm:$0xf] }
  0x65   : > { %v2578_v13 = vadd.f32 %v2559_v62, %v2396_v53  ;;  %v2638_v63 = vrot.slane %v2613_v4, 4  ;;  %v2639_v14 = vrot.slane %v2617_v6, 4  ;;  %v2650_v16 = vrot.slane %v2621_v7, 4  ;;  %v7634_v47 = vld [vmem:[%s8881_s20 + $0x180] sm:$0xf0] }
  0x66   : > { %v2705_v33 = vmul.f32 %v7607_v61, %v2688_v5  ;;  %v2709_v17 = vmul.f32 %v8920_v39, %v2688_v5  ;;  %v2713_v18 = vmul.f32 %v7611_v8, %v2688_v5  ;;  %v2796_v19 = vmul.f32 %v7616_v9, %v2779_v11  ;;  %v7642_v39 = vld [vmem:[%s11645_s1 + $0x80] ss:$8 sm:$0xf]  ;;  %v7643_v54 = vld [vmem:[%s8881_s20 + $0x1e0] sm:$0xf0] }
  0x67   : > { %v2640_v23 = vsel %vm2637_vm3, %v2638_v63, %v2639_v14  ;;  %v2651_v24 = vsel %vm2637_vm3, %v2639_v14, %v2650_v16  ;;  %v2800_v26 = vmul.f32 %v8928_v43, %v2779_v11  ;;  %v2804_v27 = vmul.f32 %v7620_v10, %v2779_v11  ;;  %v7638_v53 = vld [vmem:[%s8881_s20 + $0x1c0] sm:$0xf]  ;;  %v7652_v7 = vld [vmem:[%s8881_s20 + $0x240] sm:$0xf0] }
  0x68   : > { %v2666_v28 = vadd.f32 %v2640_v23, %v2483_v57  ;;  %v2670_v29 = vadd.f32 %v2651_v24, %v2487_v58  ;;  %v2729_v30 = vrot.slane %v2705_v33, 4  ;;  %v2730_v31 = vrot.slane %v2709_v17, 4  ;;  %v7647_v59 = vld [vmem:[%s8881_s20 + $0x220] sm:$0xf] }
  0x69   : > { %v2741_v34 = vrot.slane %v2713_v18, 4  ;;  %v2820_v35 = vrot.slane %v2796_v19, 4  ;;  %v2821_v36 = vrot.slane %v2800_v26, 4  ;;  %v2832_v43 = vrot.slane %v2804_v27, 4  ;;  %v7656_v61 = vld [vmem:[%s8881_s20 + $0x280] sm:$0xf] }
  0x6a   : > { %v2731_v42 = vsel %vm2637_vm3, %v2729_v30, %v2730_v31  ;;  %v2887_v44 = vmul.f32 %v7625_v20, %v2870_v12  ;;  %v2891_v45 = vmul.f32 %v8937_v49, %v2870_v12  ;;  %v2895_v46 = vmul.f32 %v7629_v21, %v2870_v12  ;;  %v3220_v20 = vld [vmem:[%s8881_s20] sm:$0xe0] }
  0x6b   : > { %v2742_v50 = vsel %vm2637_vm3, %v2730_v31, %v2741_v34  ;;  %v2757_v51 = vadd.f32 %v2731_v42, %v2574_v1  ;;  %v2822_v52 = vsel %vm2637_vm3, %v2820_v35, %v2821_v36  ;;  %v2833_v48 = vsel %vm2637_vm3, %v2821_v36, %v2832_v43  ;;  %v7662_v31 = vld [vmem:[%s8881_s20 + $0x60] sm:$0xe0]  ;;  %v7666_v35 = vld [vmem:[%s8881_s20 + $0xa0] sm:$0x1f] }
  0x6c   : > { %v2761_v55 = vadd.f32 %v2742_v50, %v2578_v13  ;;  %v2848_v56 = vadd.f32 %v2822_v52, %v2666_v28  ;;  %v2852_v57 = vadd.f32 %v2833_v48, %v2670_v29  ;;  %v2911_v58 = vrot.slane %v2887_v44, 4  ;;  %v7671_v36 = vld [vmem:[%s8881_s20 + $0xc0] sm:$0xe0]  ;;  %v7675_v52 = vld [vmem:[%s8881_s20 + $0x100] sm:$0x1f] }
  0x6d   : > { %v2912_v0 = vrot.slane %v2891_v45, 4  ;;  %v2923_v49 = vrot.slane %v2895_v46, 4  ;;  %v2961_v4 = vrot.slane %v7642_v39, %v8884_v25  ;;  %v3052_v6 = vrot.slane %v7651_v32, %v8884_v25 }
  0x6e   : > { %v3143_v1 = vrot.slane %v7660_v37, %v8884_v25  ;;  %v3234_v8 = vrot.slane %v7661_v38, %v8884_v25  ;;  %v3326_v9 = vrot.slane %v7670_v40, %v8884_v25  ;;  %v3417_v62 = vrot.slane %v7679_v41, %v8884_v25 }
  0x6f   : > { %v2913_v5 = vsel %vm2637_vm3, %v2911_v58, %v2912_v0  ;;  %v2924_v10 = vsel %vm2637_vm3, %v2912_v0, %v2923_v49  ;;  %v2978_v11 = vmul.f32 %v7634_v47, %v2961_v4  ;;  %v2982_v12 = vmul.f32 %v8956_v60, %v2961_v4  ;;  %v3224_v60 = vld [vmem:[%s8881_s20 + $0x40] sm:$0x1f] }
  0x70   : > { %v2939_v13 = vadd.f32 %v2913_v5, %v2757_v51  ;;  %v2943_v63 = vadd.f32 %v2924_v10, %v2761_v55  ;;  %v2986_v14 = vmul.f32 %v7638_v53, %v2961_v4  ;;  %v3069_v16 = vmul.f32 %v7643_v54, %v3052_v6  ;;  %v9255_v47 = vld [vmem:[%s8881_s20 + $0x20] sm:$0xff] }
  0x71   : > { %v3002_v33 = vrot.slane %v2978_v11, 4  ;;  %v3003_v17 = vrot.slane %v2982_v12, 4  ;;  %v3073_v18 = vmul.f32 %v8965_v3, %v3052_v6  ;;  %v3077_v19 = vmul.f32 %v7647_v59, %v3052_v6  ;;  %v9260_v55 = vld [vmem:[%s8881_s20 + $0x80] sm:$0xff] }
  0x72   : > { %v3014_v21 = vrot.slane %v2986_v14, 4  ;;  %v3093_v23 = vrot.slane %v3069_v16, 4  ;;  %v3160_v24 = vmul.f32 %v7652_v7, %v3143_v1  ;;  %v3164_v26 = vmul.f32 %v8977_v15, %v3143_v1  ;;  %v7697_v4 = vld [vmem:[%s11645_s1 + $0x87] ss:$8 sm:$0xf] }
  0x73   : > { %v3004_v27 = vsel %vm2637_vm3, %v3002_v33, %v3003_v17  ;;  %v3094_v28 = vrot.slane %v3073_v18, 4  ;;  %v3105_v29 = vrot.slane %v3077_v19, 4  ;;  %v3168_v30 = vmul.f32 %v7656_v61, %v3143_v1  ;;  %v7706_v6 = vld [vmem:[%s11645_s1 + $0xa0] ss:$8 sm:$0xf] }
  0x74   : > { %v3015_v39 = vsel %vm2637_vm3, %v3003_v17, %v3014_v21  ;;  %v3030_v3 = vadd.f32 %v3004_v27, %v2848_v56  ;;  %v3184_v32 = vrot.slane %v3160_v24, 4  ;;  %v3185_v34 = vrot.slane %v3164_v26, 4  ;;  %v9273_v1 = vld [vmem:[%s8881_s20 + $0xe0] sm:$0xff] }
  0x75   : > { %v3034_v43 = vadd.f32 %v3015_v39, %v2852_v57  ;;  %v3095_v37 = vsel %vm2637_vm3, %v3093_v23, %v3094_v28  ;;  %v3106_v15 = vsel %vm2637_vm3, %v3094_v28, %v3105_v29  ;;  %v3196_v38 = vrot.slane %v3168_v30, 4  ;;  %v7688_v57 = vld [vmem:[%s11645_s1 + $0x86] ss:$8 sm:$0xf]  ;;  %v7693_v19 = vld [vmem:[%s8881_s20 + $0x1c0] sm:$0x1f] }
  0x76   : > { %v3121_v40 = vadd.f32 %v3095_v37, %v2939_v13  ;;  %v3125_v41 = vadd.f32 %v3106_v15, %v2943_v63  ;;  %v3186_v42 = vsel %vm2637_vm3, %v3184_v32, %v3185_v34  ;;  %v3251_v44 = vmul.f32 %v3234_v8, %v3220_v20  ;;  %v7680_v10 = vld [vmem:[%s8881_s20 + $0x120] sm:$0xe0]  ;;  %v7684_v63 = vld [vmem:[%s8881_s20 + $0x160] sm:$0x1f] }
  0x77   : > { %v3197_v45 = vsel %vm2637_vm3, %v3185_v34, %v3196_v38  ;;  %v3212_v46 = vadd.f32 %v3186_v42, %v3030_v3  ;;  %v3255_v50 = vmul.f32 %v9255_v47, %v3234_v8  ;;  %v3259_v51 = vmul.f32 %v3234_v8, %v3224_v60  ;;  %v7689_v14 = vld [vmem:[%s8881_s20 + $0x180] sm:$0xe0]  ;;  %v7702_v28 = vld [vmem:[%s8881_s20 + $0x220] sm:$0x1f] }
  0x78   : > { %v3216_v48 = vadd.f32 %v3197_v45, %v3034_v43  ;;  %v3276_v53 = vrot.slane %v3251_v44, 5  ;;  %v3343_v54 = vmul.f32 %v7662_v31, %v3326_v9  ;;  %v3347_v56 = vmul.f32 %v9260_v55, %v3326_v9  ;;  %v7698_v20 = vld [vmem:[%s8881_s20 + $0x1e0] sm:$0xe0]  ;;  %v7715_v42 = vld [vmem:[%s11645_s1 + $0xa1] ss:$8 sm:$0xf] }
  0x79   : > { %v3277_v58 = vrot.slane %v3255_v50, 5  ;;  %v3288_v59 = vrot.slane %v3259_v51, 5  ;;  %v3351_v0 = vmul.f32 %v7666_v35, %v3326_v9  ;;  %v3434_v49 = vmul.f32 %v7671_v36, %v3417_v62  ;;  %v9292_v3 = vld [vmem:[%s8881_s20 + $0x140] sm:$0xff] }
  0x7a   : > { %v3367_v7 = vrot.slane %v3343_v54, 5  ;;  %v3368_v61 = vrot.slane %v3347_v56, 5  ;;  %v3438_v8 = vmul.f32 %v9273_v1, %v3417_v62  ;;  %v3442_v5 = vmul.f32 %v7675_v52, %v3417_v62  ;;  %v9296_v43 = vld [vmem:[%s8881_s20 + $0x1a0] sm:$0xff] }
  0x7b   : > { %v3278_v9 = vsel %vm3275_vm4, %v3276_v53, %v3277_v58  ;;  %v3289_v11 = vsel %vm3275_vm4, %v3277_v58, %v3288_v59  ;;  %v3379_v12 = vrot.slane %v3351_v0, 5  ;;  %v3458_v13 = vrot.slane %v3434_v49, 5  ;;  %v7716_v44 = vld [vmem:[%s11645_s1 + $0xa2] ss:$8 sm:$0xf] }
  0x7c   : > { %v3304_v16 = vadd.f32 %v3278_v9, %v3121_v40  ;;  %v3308_v33 = vadd.f32 %v3289_v11, %v3125_v41  ;;  %v3369_v17 = vsel %vm3275_vm4, %v3367_v7, %v3368_v61  ;;  %v3459_v18 = vrot.slane %v3438_v8, 5  ;;  %v9306_v51 = vld [vmem:[%s8881_s20 + $0x200] sm:$0xff] }
  0x7d   : > { %v3380_v62 = vsel %vm3275_vm4, %v3368_v61, %v3379_v12  ;;  %v3395_v21 = vadd.f32 %v3369_v17, %v3212_v46  ;;  %v3470_v23 = vrot.slane %v3442_v5, 5  ;;  %v3508_v24 = vrot.slane %v7688_v57, %v8884_v25  ;;  %v7734_v53 = vld [vmem:[%s11645_s1 + $0xa4] ss:$8 sm:$0xf]  ;;  %v7707_v59 = vld [vmem:[%s8881_s20 + $0x240] sm:$0xe0] }
  0x7e   : > { %v3399_v26 = vadd.f32 %v3380_v62, %v3216_v48  ;;  %v3460_v60 = vsel %vm3275_vm4, %v3458_v13, %v3459_v18  ;;  %v3599_v27 = vrot.slane %v7697_v4, %v8884_v25  ;;  %v3690_v29 = vrot.slane %v7706_v6, %v8884_v25  ;;  %v7725_v48 = vld [vmem:[%s11645_s1 + $0xa3] ss:$8 sm:$0xf]  ;;  %v3858_v61 = vld [vmem:[%s8881_s20] sm:$0xc0] }
  0x7f   : > { %v3471_v30 = vsel %vm3275_vm4, %v3459_v18, %v3470_v23  ;;  %v3486_v31 = vadd.f32 %v3460_v60, %v3304_v16  ;;  %v3525_v39 = vmul.f32 %v7680_v10, %v3508_v24  ;;  %v3529_v32 = vmul.f32 %v9292_v3, %v3508_v24  ;;  %v7711_v0 = vld [vmem:[%s8881_s20 + $0x280] sm:$0x1f]  ;;  %v7717_v5 = vld [vmem:[%s8881_s20 + $0x60] sm:$0xc0] }
  0x80   : > { %v3490_v34 = vadd.f32 %v3471_v30, %v3308_v33  ;;  %v3533_v35 = vmul.f32 %v7684_v63, %v3508_v24  ;;  %v3616_v36 = vmul.f32 %v7689_v14, %v3599_v27  ;;  %v3620_v37 = vmul.f32 %v9296_v43, %v3599_v27  ;;  %v3862_v8 = vld [vmem:[%s8881_s20 + $0x40] sm:$0x3f] }
  0x81   : > { %v3549_v15 = vrot.slane %v3525_v39, 5  ;;  %v3550_v38 = vrot.slane %v3529_v32, 5  ;;  %v3624_v40 = vmul.f32 %v7693_v19, %v3599_v27  ;;  %v3707_v41 = vmul.f32 %v7698_v20, %v3690_v29  ;;  %v7721_v33 = vld [vmem:[%s8881_s20 + $0xa0] sm:$0x3f] }
  0x82   : > { %v3561_v45 = vrot.slane %v3533_v35, 5  ;;  %v3640_v46 = vrot.slane %v3616_v36, 5  ;;  %v3641_v50 = vrot.slane %v3620_v37, 5  ;;  %v3711_v52 = vmul.f32 %v9306_v51, %v3690_v29  ;;  %v9332_v23 = vld [vmem:[%s8881_s20 + $0x260] sm:$0xff] }
  0x83   : > { %v3551_v54 = vsel %vm3275_vm4, %v3549_v15, %v3550_v38  ;;  %v3652_v56 = vrot.slane %v3624_v40, 5  ;;  %v3715_v57 = vmul.f32 %v7702_v28, %v3690_v29  ;;  %v3731_v58 = vrot.slane %v3707_v41, 5  ;;  %v7730_v35 = vld [vmem:[%s8881_s20 + $0x100] sm:$0x3f] }
  0x84   : > { %v3562_v49 = vsel %vm3275_vm4, %v3550_v38, %v3561_v45  ;;  %v3577_v4 = vadd.f32 %v3551_v54, %v3395_v21  ;;  %v3642_v6 = vsel %vm3275_vm4, %v3640_v46, %v3641_v50  ;;  %v3732_v7 = vrot.slane %v3711_v52, 5  ;;  %v7752_v40 = vld [vmem:[%s11645_s1 + $0xa6] ss:$8 sm:$0xf] }
  0x85   : > { %v3581_v10 = vadd.f32 %v3562_v49, %v3399_v26  ;;  %v3653_v9 = vsel %vm3275_vm4, %v3641_v50, %v3652_v56  ;;  %v3668_v11 = vadd.f32 %v3642_v6, %v3486_v31  ;;  %v3743_v12 = vrot.slane %v3715_v57, 5  ;;  %v7761_v45 = vld [vmem:[%s11645_s1 + $0xa7] ss:$8 sm:$0xf]  ;;  %v7748_v57 = vld [vmem:[%s8881_s20 + $0x1c0] sm:$0x3f] }
  0x86   : > { %v3672_v13 = vadd.f32 %v3653_v9, %v3490_v34  ;;  %v3733_v63 = vsel %vm3275_vm4, %v3731_v58, %v3732_v7  ;;  %v3781_v14 = vrot.slane %v7715_v42, %v8884_v25  ;;  %v3872_v16 = vrot.slane %v7716_v44, %v8884_v25  ;;  %v7726_v34 = vld [vmem:[%s8881_s20 + $0xc0] sm:$0xc0] }
  0x87   : > { %v3744_v17 = vsel %vm3275_vm4, %v3732_v7, %v3743_v12  ;;  %v3759_v18 = vadd.f32 %v3733_v63, %v3577_v4  ;;  %v3964_v19 = vrot.slane %v7725_v48, %v8884_v25  ;;  %v4055_v20 = vrot.slane %v7734_v53, %v8884_v25  ;;  %v7735_v52 = vld [vmem:[%s8881_s20 + $0x120] sm:$0xc0]  ;;  %v7739_v48 = vld [vmem:[%s8881_s20 + $0x160] sm:$0x3f] }
  0x88   : > { %v3763_v62 = vadd.f32 %v3744_v17, %v3581_v10  ;;  %v3798_v21 = vmul.f32 %v7707_v59, %v3781_v14  ;;  %v3802_v24 = vmul.f32 %v9332_v23, %v3781_v14  ;;  %v3806_v26 = vmul.f32 %v7711_v0, %v3781_v14  ;;  %v7744_v53 = vld [vmem:[%s8881_s20 + $0x180] sm:$0xc0]  ;;  %v7757_v12 = vld [vmem:[%s8881_s20 + $0x220] sm:$0x3f] }
  0x89   : > { %v3889_v60 = vmul.f32 %v3872_v16, %v3858_v61  ;;  %v3893_v27 = vmul.f32 %v9255_v47, %v3872_v16  ;;  %v3897_v28 = vmul.f32 %v3872_v16, %v3862_v8  ;;  %v3981_v29 = vmul.f32 %v7717_v5, %v3964_v19  ;;  %v7743_v47 = vld [vmem:[%s11645_s1 + $0xa5] ss:$8 sm:$0xf]  ;;  %v7753_v9 = vld [vmem:[%s8881_s20 + $0x1e0] sm:$0xc0] }
  0x8a   : > { %v3822_v30 = vrot.slane %v3798_v21, 5  ;;  %v3823_v31 = vrot.slane %v3802_v24, 5  ;;  %v3834_v39 = vrot.slane %v3806_v26, 5  ;;  %v3985_v32 = vmul.f32 %v9260_v55, %v3964_v19 }
  0x8b   : > { %v3914_v36 = vrot.slane %v3889_v60, 6  ;;  %v3915_v37 = vrot.slane %v3893_v27, 6  ;;  %v3926_v15 = vrot.slane %v3897_v28, 6  ;;  %v3989_v38 = vmul.f32 %v7721_v33, %v3964_v19 }
  0x8c   : > { %v3824_v55 = vsel %vm3275_vm4, %v3822_v30, %v3823_v31  ;;  %v3835_v41 = vsel %vm3275_vm4, %v3823_v31, %v3834_v39  ;;  %v4005_v42 = vrot.slane %v3981_v29, 6  ;;  %v4006_v44 = vrot.slane %v3985_v32, 6  ;;  %v7762_v31 = vld [vmem:[%s8881_s20 + $0x240] sm:$0xc0] }
  0x8d   : > { %v3916_v46 = vsel %vm3913_vm5, %v3914_v36, %v3915_v37  ;;  %v3927_v50 = vsel %vm3913_vm5, %v3915_v37, %v3926_v15  ;;  %v3850_v54 = vadd.f32 %v3824_v55, %v3668_v11  ;;  %v4017_v56 = vrot.slane %v3989_v38, 6 }
  0x8e   : > { %v3854_v58 = vadd.f32 %v3835_v41, %v3672_v13  ;;  %v4072_v59 = vmul.f32 %v7726_v34, %v4055_v20  ;;  %v4076_v0 = vmul.f32 %v9273_v1, %v4055_v20  ;;  %v4080_v49 = vmul.f32 %v7730_v35, %v4055_v20  ;;  %v7766_v34 = vld [vmem:[%s8881_s20 + $0x280] sm:$0x3f] }
  0x8f   : > { %v3942_v4 = vadd.f32 %v3916_v46, %v3759_v18  ;;  %v3946_v6 = vadd.f32 %v3927_v50, %v3763_v62  ;;  %v4146_v7 = vrot.slane %v7743_v47, %v8884_v25  ;;  %v4237_v61 = vrot.slane %v7752_v40, %v8884_v25  ;;  %v4504_v50 = vld [vmem:[%s11646_s2] sm:$0xf] }
  0x90   : > { %v4096_v8 = vrot.slane %v4072_v59, 6  ;;  %v4097_v5 = vrot.slane %v4076_v0, 6  ;;  %v4108_v10 = vrot.slane %v4080_v49, 6  ;;  %v4328_v11 = vrot.slane %v7761_v45, %v8884_v25 }
  0x91   : > { %v4163_v63 = vmul.f32 %v7735_v52, %v4146_v7  ;;  %v4167_v13 = vmul.f32 %v9292_v3, %v4146_v7  ;;  %v4171_v14 = vmul.f32 %v7739_v48, %v4146_v7  ;;  %v4254_v16 = vmul.f32 %v7744_v53, %v4237_v61  ;;  %v7770_v3 = vld [vmem:[%s11645_s1 + $0xc0] ss:$8 sm:$0xf] }
  0x92   : > { %v4007_v1 = vsel %vm3913_vm5, %v4005_v42, %v4006_v44  ;;  %v4018_v33 = vsel %vm3913_vm5, %v4006_v44, %v4017_v56  ;;  %v4258_v17 = vmul.f32 %v9296_v43, %v4237_v61  ;;  %v4262_v18 = vmul.f32 %v7748_v57, %v4237_v61 }
  0x93   : > { %v4098_v19 = vsel %vm3913_vm5, %v4096_v8, %v4097_v5  ;;  %v4109_v20 = vsel %vm3913_vm5, %v4097_v5, %v4108_v10  ;;  %v4187_v62 = vrot.slane %v4163_v63, 6  ;;  %v4188_v21 = vrot.slane %v4167_v13, 6  ;;  %v8274_v63 = vld [vmem:[%s11650_s6 + $0x38] sm:$0xff]  }
  0x94   : > { %v4199_v24 = vrot.slane %v4171_v14, 6  ;;  %v4278_v26 = vrot.slane %v4254_v16, 6  ;;  %v4279_v60 = vrot.slane %v4258_v17, 6  ;;  %v4290_v27 = vrot.slane %v4262_v18, 6  ;;  %v8275_v13 = vld [vmem:[%s11650_s6 + $0xb8] sm:$0xff]   ;;  %v8276_v16 = vld [vmem:[%s11650_s6 + $0x70] sm:$0xff]  }
  0x95   : > { %v4033_v28 = vadd.f32 %v4007_v1, %v3850_v54  ;;  %v4345_v29 = vmul.f32 %v7753_v9, %v4328_v11  ;;  %v4349_v43 = vmul.f32 %v9306_v51, %v4328_v11  ;;  %v4353_v30 = vmul.f32 %v7757_v12, %v4328_v11  ;;  %v8277_v1 = vld [vmem:[%s11650_s6 + $0xf0] sm:$0xff]  }
  0x96   : > { %v4037_v39 = vadd.f32 %v4018_v33, %v3854_v58  ;;  %v4189_v32 = vsel %vm3913_vm5, %v4187_v62, %v4188_v21  ;;  %v4124_v35 = vadd.f32 %v4098_v19, %v3942_v4  ;;  %v4128_v36 = vadd.f32 %v4109_v20, %v3946_v6  ;;  %v4534_v58 = vld [vmem:[%s11647_s3] sm:$0xf]  ;;  %v8278_v17 = vld [vmem:[%s11650_s6 + $0x30] sm:$0xff]   ;;  %v8280_v19 = vld [vmem:[%s11650_s6 + $0x68] sm:$0xff]  }
  0x97   : > { %v4200_v37 = vsel %vm3913_vm5, %v4188_v21, %v4199_v24  ;;  %v4369_v15 = vrot.slane %v4345_v29, 6  ;;  %v4280_v38 = vsel %vm3913_vm5, %v4278_v26, %v4279_v60  ;;  %v4370_v47 = vrot.slane %v4349_v43, 6  ;;  %v8279_v18 = vld [vmem:[%s11650_s6 + $0xb0] sm:$0xff]   ;;  %v8281_v20 = vld [vmem:[%s11650_s6 + $0xe8] sm:$0xff]   ;;  %v8285_v24 = vld [vmem:[%s11650_s6 + $0xe0] sm:$0xff]  }
  0x98   : > { %v4381_v40 = vrot.slane %v4353_v30, 6  ;;  %v4419_v55 = vrot.slane %v7770_v3, %v8884_v25  ;;  %v4215_v41 = vadd.f32 %v4189_v32, %v4033_v28  ;;  %v4291_v51 = vsel %vm3913_vm5, %v4279_v60, %v4290_v27  ;;  %v8282_v62 = vld [vmem:[%s11650_s6 + $0x28] sm:$0xff]   ;;  %v8284_v3 = vld [vmem:[%s11650_s6 + $0x60] sm:$0xff]   ;;  %v8288_v27 = vld [vmem:[%s11650_s6 + $0x58] sm:$0xff]  }
  0x99   : > { %v4219_v42 = vadd.f32 %v4200_v37, %v4037_v39  ;;  %v4371_v44 = vsel %vm3913_vm5, %v4369_v15, %v4370_v47  ;;  %v4306_v52 = vadd.f32 %v4280_v38, %v4124_v35  ;;  %v4310_v54 = vadd.f32 %v4291_v51, %v4128_v36  ;;  %v8283_v21 = vld [vmem:[%s11650_s6 + $0xa8] sm:$0xff]   ;;  %v8286_v26 = vld [vmem:[%s11650_s6 + $0x20] sm:$0xff]   ;;  %v8289_v28 = vld [vmem:[%s11650_s6 + $0xd8] sm:$0xff]  }
  0x9a   : > { %v4436_v45 = vmul.f32 %v7762_v31, %v4419_v55  ;;  %v4440_v46 = vmul.f32 %v9332_v23, %v4419_v55  ;;  %v4382_v48 = vsel %vm3913_vm5, %v4370_v47, %v4381_v40  ;;  %v4444_v53 = vmul.f32 %v7766_v34, %v4419_v55  ;;  %v8287_v60 = vld [vmem:[%s11650_s6 + $0xa0] sm:$0xff]   ;;  %v8290_v29 = vld [vmem:[%s11650_s6 + $0x18] sm:$0xff]   ;;  %v8292_v30 = vld [vmem:[%s11650_s6 + $0x50] sm:$0xff]  }
  0x9b   : > { %v4397_v59 = vadd.f32 %v4371_v44, %v4215_v41  ;;  %v4401_v49 = vadd.f32 %v4382_v48, %v4219_v42  ;;  %v4509_v7 = vrot.slane %v4504_v50, %v8884_v25  ;;  %v4539_v5 = vrot.slane %v4534_v58, %v8884_v25  ;;  %v8291_v43 = vld [vmem:[%s11650_s6 + $0x98] sm:$0xff]   ;;  %v8293_v31 = vld [vmem:[%s11650_s6 + $0xd0] sm:$0xff]   ;;  %v8296_v34 = vld [vmem:[%s11650_s6 + $0x48] sm:$0xff]  }
  0x9c   : > { %v4460_v56 = vrot.slane %v4436_v45, 6  ;;  %v4461_v57 = vrot.slane %v4440_v46, 6  ;;  %v4472_v0 = vrot.slane %v4444_v53, 6  ;;  %v8294_v39 = vld [vmem:[%s11650_s6 + $0x10] sm:$0xff]   ;;  %v8297_v35 = vld [vmem:[%s11650_s6 + $0xc8] sm:$0xff]   ;;  %v8300_v15 = vld [vmem:[%s11650_s6 + $0x40] sm:$0xff]  }
  0x9d   : > { %v8295_v32 = vld [vmem:[%s11650_s6 + $0x90] sm:$0xff]   ;;  %v8298_v36 = vld [vmem:[%s11650_s6 + $0x8] sm:$0xff]   ;;  %v8301_v38 = vld [vmem:[%s11650_s6 + $0xc0] sm:$0xff]   ;;  %v9483_v55 = vsub.s32 1, %v8870_v22 }
  0x9e   : > { %v4462_v23 = vsel %vm3913_vm5, %v4460_v56, %v4461_v57  ;;  %v4473_v4 = vsel %vm3913_vm5, %v4461_v57, %v4472_v0  ;;  %v8299_v37 = vld [vmem:[%s11650_s6 + $0x88] sm:$0xff]   ;;  %v8302_v47 = vld [vmem:[%s11650_s6] sm:$0xff]  }
  0x9f   : > { %v4488_v6 = vadd.f32 %v4462_v23, %v4306_v52  ;;  %v4492_v61 = vadd.f32 %v4473_v4, %v4310_v54  ;;  %v8303_v40 = vld [vmem:[%s11650_s6 + $0x80] sm:$0xff]   ;;  %v8309_v51 = vld [vmem:[%s11648_s4 + $0xec] ss:$16 sps:$4 sm:$0xff]  }
  0xa0   : > { %v8306_v41 = vld [vmem:[%s11648_s4 + $0xe4] ss:$16 sps:$4 sm:$0xff]   ;;  %v8551_v42 = vld [vmem:[%s11645_s1] ss:$8 sm:$0xf] }
  0xa1   : > { %v4496_v8 = vadd.f32 %v4488_v6, %v4397_v59  ;;  %v4500_v10 = vadd.f32 %v4492_v61, %v4401_v49  ;;  %v351_v44 = vrot.slane %v8551_v42, %v9483_v55  ;;  %v8552_v45 = vld [vmem:[%s11645_s1 + $0x2] ss:$8 sm:$0xf]  ;;  %v8553_v54 = vld [vmem:[%s11645_s1 + $0x1] ss:$8 sm:$0xf] }
  0xa2   : > { %v447_v46 = vrot.slane %v8552_v45, %v9483_v55  ;;  %v335_v50 = vld [vmem:[%s8881_s20 + $0x8] sm:$0xff]  ;;  %v399_v56 = vrot.slane %v8553_v54, %v9483_v55 }
  0xa3   : > { %v4526_v9 = vmul.f32 %v4509_v7, %v4496_v8  ;;  %v4530_v12 = vmul.f32 %v4509_v7, %v4500_v10  ;;  %v7397_v52 = vld [vmem:[%s8881_s20 + $0xc8] sm:$0xff]  ;;  %v365_v57 = vmul.f32 %v351_v44, %v335_v50 }
  0xa4   : > { %v9502_v48 = vld [vmem:[%s8881_s20 + $0x28] sm:$0xff]  ;;  %v461_v59 = vmul.f32 %v7397_v52, %v447_v46 }
  0xa5   : > { %v4556_v11 = vadd.f32 %v4539_v5, %v4526_v9  ;;  %v4560_v14 = vadd.f32 %v4539_v5, %v4530_v12  ;;  %v9505_v53 = vld [vmem:[%s8881_s20 + $0xe8] sm:$0xff]  ;;  %v369_v23 = vmul.f32 %v351_v44, %v9502_v48 }
  0xa6   : > { %v7388_v58 = vld [vmem:[%s8881_s20 + $0x68] sm:$0xff]  ;;  %v465_v6 = vmul.f32 %v9505_v53, %v447_v46 }
  0xa7   : > { %v4564_v33 = vpack.c.bf16 %v4560_v14, %v4556_v11  ;;  %v8554_v0 = vld [vmem:[%s11645_s1 + $0x3] ss:$8 sm:$0xf]  ;;  %v8555_v61 = vld [vmem:[%s11645_s1 + $0x4] ss:$8 sm:$0xf] }
  0xa8   : > { %v495_v49 = vrot.slane %v8554_v0, %v9483_v55  ;;  %v9518_v4 = vld [vmem:[%s8881_s20 + $0x88] sm:$0xff]  ;;  %v543_v8 = vrot.slane %v8555_v61, %v9483_v55 }
  0xa9   : > { %4812 = vmatmul.mubr.bf16.vlgmr.msra.gmra.mxu0 %v4564_v33  ;;  %4855 = vmatmul.mubr.bf16.vlgmr.msra.gmra.mxu1 %v4564_v33  ;;  %v7406_v7 = vld [vmem:[%s8881_s20 + $0x128] sm:$0xff]  ;;  %v469_v33 = vadd.f32 %v461_v59, %v365_v57 }
  0xaa   : > { %8039 = vmatpush3.bf16.msra.mxu0 %v8274_v63  ;;  %8061 = vmatpush3.bf16.msra.mxu1 %v8275_v13  ;;  %v9527_v5 = vld [vmem:[%s8881_s20 + $0x148] sm:$0xff]  ;;  %v413_v63 = vmul.f32 %v7388_v58, %v399_v56 }
  0xab   : > { %8040 = vmatprep.subr.bf16.mxu0 %v8276_v16  ;;  %8062 = vmatprep.subr.bf16.mxu1 %v8277_v1  ;;  %v7415_v10 = vld [vmem:[%s8881_s20 + $0x188] sm:$0xff]  ;;  %v417_v1 = vmul.f32 %v9518_v4, %v399_v56 }
  0xac   : > { %v9531_v9 = vld [vmem:[%s8881_s20 + $0x1a8] sm:$0xff] }
  0xad   : > { %v8556_v12 = vld [vmem:[%s11645_s1 + $0x7] ss:$8 sm:$0xf]  ;;  %v8557_v14 = vld [vmem:[%s11645_s1 + $0x20] ss:$8 sm:$0xf] }
  0xae   : > { %8041 = vmatpush3.bf16.msra.mxu0 %v8278_v17  ;;  %8063 = vmatpush3.bf16.msra.mxu1 %v8279_v18  ;;  %v686_v11 = vrot.slane %v8556_v12, %v9483_v55  ;;  %v669_v13 = vld [vmem:[%s8881_s20 + $0x8] sm:$0xfe]  ;;  %v778_v16 = vrot.slane %v8557_v14, %v9483_v55  ;;  %v509_v17 = vmul.f32 %v7406_v7, %v495_v49  ;;  %v7456_v46 = vld [vmem:[%s8881_s20 + $0x108] sm:$0x1] }
  0xaf   : > { %8042 = vmatprep.subr.bf16.mxu0 %v8280_v19  ;;  %8064 = vmatprep.subr.bf16.mxu1 %v8281_v20  ;;  %v8558_v18 = vld [vmem:[%s11645_s1 + $0x5] ss:$8 sm:$0xf]  ;;  %v673_v20 = vld [vmem:[%s8881_s20 + $0x48] sm:$0x1] }
  0xb0   : > { %v591_v19 = vrot.slane %v8558_v18, %v9483_v55  ;;  %v7452_v45 = vld [vmem:[%s8881_s20 + $0xc8] sm:$0xfe]  ;;  %v7465_v0 = vld [vmem:[%s8881_s20 + $0x168] sm:$0x1] }
  0xb1   : > { %v8561_v50 = vld [vmem:[%s11645_s1 + $0x22] ss:$8 sm:$0xf]  ;;  %v8562_v12 = vld [vmem:[%s11645_s1 + $0x23] ss:$8 sm:$0xf] }
  0xb2   : > { %8043 = vmatpush3.bf16.msra.mxu0 %v8282_v62  ;;  %8065 = vmatpush3.bf16.msra.mxu1 %v8283_v21  ;;  %v7443_v62 = vld [vmem:[%s8881_s20 + $0x68] sm:$0xfe]  ;;  %v7447_v21 = vld [vmem:[%s8881_s20 + $0xa8] sm:$0x1]  ;;  %v960_v52 = vrot.slane %v8561_v50, %v9483_v55 }
  0xb3   : > { %8044 = vmatprep.subr.bf16.mxu0 %v8284_v3  ;;  %8066 = vmatprep.subr.bf16.mxu1 %v8285_v24  ;;  %v473_v3 = vadd.f32 %v465_v6, %v369_v23  ;;  %v513_v24 = vmul.f32 %v9527_v5, %v495_v49  ;;  %v7461_v59 = vld [vmem:[%s8881_s20 + $0x128] sm:$0xfe] }
  0xb4   : > { %v978_v14 = vmul.f32 %v9527_v5, %v960_v52 }
  0xb6   : > { %8045 = vmatpush3.bf16.msra.mxu0 %v8286_v26  ;;  %8067 = vmatpush3.bf16.msra.mxu1 %v8287_v60  ;;  %v557_v26 = vmul.f32 %v7415_v10, %v543_v8  ;;  %v561_v60 = vmul.f32 %v9531_v9, %v543_v8 }
  0xb7   : > { %8046 = vmatprep.subr.bf16.mxu0 %v8288_v27  ;;  %8068 = vmatprep.subr.bf16.mxu1 %v8289_v28  ;;  %v7424_v27 = vld [vmem:[%s8881_s20 + $0x1e8] sm:$0xff] }
  0xb8   : > { %v9554_v28 = vld [vmem:[%s8881_s20 + $0x208] sm:$0xff]  ;;  %v565_v42 = vadd.f32 %v557_v26, %v469_v33  ;;  %v569_v44 = vadd.f32 %v561_v60, %v473_v3 }
  0xb9   : > { %v7474_v3 = vld [vmem:[%s8881_s20 + $0x1c8] sm:$0x1]  ;;  %v8563_v26 = vld [vmem:[%s11645_s1 + $0x24] ss:$8 sm:$0xf] }
  0xba   : > { %8047 = vmatpush3.bf16.msra.mxu0 %v8290_v29  ;;  %8069 = vmatpush3.bf16.msra.mxu1 %v8291_v43  ;;  %v8559_v29 = vld [vmem:[%s11645_s1 + $0x6] ss:$8 sm:$0xf]  ;;  %v1142_v60 = vrot.slane %v8563_v26, %v9483_v55 }
  0xbb   : > { %8048 = vmatprep.subr.bf16.mxu0 %v8292_v30  ;;  %8070 = vmatprep.subr.bf16.mxu1 %v8293_v31  ;;  %v639_v43 = vrot.slane %v8559_v29, %v9483_v55  ;;  %v700_v30 = vmul.f32 %v686_v11, %v669_v13  ;;  %v704_v31 = vmul.f32 %v686_v11, %v9502_v48 }
  0xbc   : > { %v974_v13 = vmul.f32 %v7461_v59, %v960_v52 }
  0xbd   : > { %v727_v57 = vrot.slane %v700_v30, 1  ;;  %v728_v58 = vrot.slane %v704_v31, 1  ;;  %v7483_v31 = vld [vmem:[%s8881_s20 + $0x228] sm:$0x1] }
  0xbe   : > { %8049 = vmatpush3.bf16.msra.mxu0 %v8294_v39  ;;  %8071 = vmatpush3.bf16.msra.mxu1 %v8295_v32  ;;  %v7433_v39 = vld [vmem:[%s8881_s20 + $0x248] sm:$0xff] }
  0xbf   : > { %8050 = vmatprep.subr.bf16.mxu0 %v8296_v34  ;;  %8072 = vmatprep.subr.bf16.mxu1 %v8297_v35  ;;  %v9563_v32 = vld [vmem:[%s8881_s20 + $0x268] sm:$0xff]  ;;  %v708_v34 = vmul.f32 %v686_v11, %v673_v20  ;;  %v792_v35 = vmul.f32 %v7443_v62, %v778_v16  ;;  %v653_v54 = vmul.f32 %v7433_v39, %v639_v43  ;;  %v1000_v39 = vrot.slane %v974_v13, 1 }
  0xc0   : > { %v657_v56 = vmul.f32 %v9563_v32, %v639_v43  ;;  %v1051_v11 = vrot.slane %v8562_v12, %v9483_v55 }
  0xc1   : > { %v738_v49 = vrot.slane %v708_v34, 1  ;;  %v818_v23 = vrot.slane %v792_v35, 1  ;;  %v1001_v34 = vrot.slane %v978_v14, 1 }
  0xc2   : > { %8051 = vmatpush3.bf16.msra.mxu0 %v8298_v36  ;;  %8073 = vmatpush3.bf16.msra.mxu1 %v8299_v37  ;;  %v796_v36 = vmul.f32 %v9518_v4, %v778_v16  ;;  %v800_v37 = vmul.f32 %v7447_v21, %v778_v16  ;;  %v982_v16 = vmul.f32 %v7465_v0, %v960_v52 }
  0xc3   : > { %8052 = vmatprep.subr.bf16.mxu0 %v8300_v15  ;;  %8074 = vmatprep.subr.bf16.mxu1 %v8301_v38  ;;  %v517_v15 = vadd.f32 %v509_v17, %v413_v63  ;;  %v605_v38 = vmul.f32 %v7424_v27, %v591_v19  ;;  %v661_v17 = vadd.f32 %v653_v54, %v565_v42 }
  0xc4   : > { %v819_v6 = vrot.slane %v796_v36, 1  ;;  %v829_v7 = vrot.slane %v800_v37, 1  ;;  %v665_v18 = vadd.f32 %v657_v56, %v569_v44  ;;  %v739_v20 = vsel %vm723_vm0, %v728_v58, %v738_v49  ;;  %v7488_v44 = vld [vmem:[%s8881_s20 + $0x248] sm:$0xfe] }
  0xc5   : > { %v613_v63 = vadd.f32 %v605_v38, %v517_v15  ;;  %v1011_v35 = vrot.slane %v982_v16, 1  ;;  %v1069_v36 = vmul.f32 %v9531_v9, %v1051_v11  ;;  %v1073_v38 = vmul.f32 %v7474_v3, %v1051_v11  ;;  %v8567_v3 = vld [vmem:[%s11645_s1 + $0x40] ss:$8 sm:$0xf] }
  0xc6   : > { %8053 = vmatpush3.bf16.msra.mxu0 %v8302_v47  ;;  %8075 = vmatpush3.bf16.msra.mxu1 %v8303_v40  ;;  %v609_v47 = vmul.f32 %v9554_v28, %v591_v19  ;;  %v8560_v40 = vld [vmem:[%s11645_s1 + $0x21] ss:$8 sm:$0xf]  ;;  %v729_v19 = vsel %vm723_vm0, %v727_v57, %v728_v58  ;;  %v820_v62 = vsel %vm723_vm0, %v818_v23, %v819_v6  ;;  %v1307_v58 = vld [vmem:[%s8881_s20 + $0x8] sm:$0xfc] }
  0xc7   : > { %5469 = vmatprep.subr.bf16.mxu0 %v8306_v41  ;;  %5512 = vmatprep.subr.bf16.mxu1 %v8309_v51  ;;  %v869_v41 = vrot.slane %v8560_v40, %v9483_v55  ;;  %v521_v51 = vadd.f32 %v513_v24, %v417_v1  ;;  %v7470_v1 = vld [vmem:[%s8881_s20 + $0x188] sm:$0xfe]  ;;  %v830_v21 = vsel %vm723_vm0, %v819_v6, %v829_v7  ;;  %v1092_v23 = vrot.slane %v1069_v36, 1 }
  0xc8   : > { %v7479_v24 = vld [vmem:[%s8881_s20 + $0x1e8] sm:$0xfe]  ;;  %v1065_v30 = vmul.f32 %v7470_v1, %v1051_v11  ;;  %v753_v37 = vadd.f32 %v729_v19, %v613_v63  ;;  %v1164_v42 = vmul.f32 %v7483_v31, %v1142_v60  ;;  %v844_v52 = vadd.f32 %v820_v62, %v661_v17 }
  0xc9   : > { %v883_v61 = vmul.f32 %v7452_v45, %v869_v41  ;;  %v887_v8 = vmul.f32 %v9505_v53, %v869_v41  ;;  %v891_v10 = vmul.f32 %v7456_v46, %v869_v41  ;;  %v617_v33 = vadd.f32 %v609_v47, %v521_v51  ;;  %v8564_v47 = vld [vmem:[%s11645_s1 + $0x25] ss:$8 sm:$0xf]  ;;  %v7492_v45 = vld [vmem:[%s8881_s20 + $0x288] sm:$0x1] }
  0xca   : > { %v1233_v40 = vrot.slane %v8564_v47, %v9483_v55  ;;  %v1156_v41 = vmul.f32 %v7479_v24, %v1142_v60  ;;  %v1160_v51 = vmul.f32 %v9554_v28, %v1142_v60  ;;  %v8565_v46 = vld [vmem:[%s11645_s1 + $0x26] ss:$8 sm:$0xf]  ;;  %v848_v54 = vadd.f32 %v830_v21, %v665_v18  ;;  %v1311_v6 = vld [vmem:[%s8881_s20 + $0x48] sm:$0x3] }
  0xcb   : > { %v909_v27 = vrot.slane %v883_v61, 1  ;;  %v910_v29 = vrot.slane %v887_v8, 1  ;;  %v920_v43 = vrot.slane %v891_v10, 1  ;;  %v757_v15 = vadd.f32 %v739_v20, %v617_v33  ;;  %v8566_v33 = vld [vmem:[%s11645_s1 + $0x27] ss:$8 sm:$0xf] }
  0xcc   : > { %v1324_v50 = vrot.slane %v8565_v46, %v9483_v55  ;;  %v1002_v59 = vsel %vm723_vm0, %v1000_v39, %v1001_v34  ;;  %v1012_v0 = vsel %vm723_vm0, %v1001_v34, %v1011_v35  ;;  %v1091_v49 = vrot.slane %v1065_v30, 1  ;;  %v7498_v62 = vld [vmem:[%s8881_s20 + $0x68] sm:$0xfc]  ;;  %v7502_v21 = vld [vmem:[%s8881_s20 + $0xa8] sm:$0x3] }
  0xcd   : > { %v911_v56 = vsel %vm723_vm0, %v909_v27, %v910_v29  ;;  %v921_v57 = vsel %vm723_vm0, %v910_v29, %v920_v43  ;;  %v1102_v7 = vrot.slane %v1073_v38, 1  ;;  %v1247_v61 = vmul.f32 %v7488_v44, %v1233_v40  ;;  %v7507_v43 = vld [vmem:[%s8881_s20 + $0xc8] sm:$0xfc]  ;;  %v7511_v30 = vld [vmem:[%s8881_s20 + $0x108] sm:$0x3] }
  0xce   : > { %v1251_v8 = vmul.f32 %v9563_v32, %v1233_v40  ;;  %v1255_v10 = vmul.f32 %v7492_v45, %v1233_v40  ;;  %v1182_v12 = vrot.slane %v1156_v41, 1  ;;  %v1183_v11 = vrot.slane %v1160_v51, 1  ;;  %v8568_v45 = vld [vmem:[%s11645_s1 + $0x41] ss:$8 sm:$0xf] }
  0xcf   : > { %v1193_v63 = vrot.slane %v1164_v42, 1  ;;  %v1338_v13 = vmul.f32 %v1324_v50, %v1307_v58  ;;  %v935_v14 = vadd.f32 %v911_v56, %v753_v37  ;;  %v1342_v16 = vmul.f32 %v1324_v50, %v9502_v48 }
  0xd0   : > { %v1346_v1 = vmul.f32 %v1324_v50, %v1311_v6  ;;  %v1416_v17 = vrot.slane %v8566_v33, %v9483_v55  ;;  %v939_v18 = vadd.f32 %v921_v57, %v757_v15  ;;  %v1026_v19 = vadd.f32 %v1002_v59, %v844_v52  ;;  %v8569_v50 = vld [vmem:[%s11645_s1 + $0x42] ss:$8 sm:$0xf] }
  0xd1   : > { %v1030_v20 = vadd.f32 %v1012_v0, %v848_v54  ;;  %v1507_v24 = vrot.slane %v8567_v3, %v9483_v55  ;;  %v1093_v26 = vsel %vm723_vm0, %v1091_v49, %v1092_v23  ;;  %v1103_v60 = vsel %vm723_vm0, %v1092_v23, %v1102_v7  ;;  %v7516_v59 = vld [vmem:[%s8881_s20 + $0x128] sm:$0xfc]  ;;  %v7520_v0 = vld [vmem:[%s8881_s20 + $0x168] sm:$0x3] }
  0xd2   : > { %v1273_v27 = vrot.slane %v1247_v61, 1  ;;  %v1274_v29 = vrot.slane %v1251_v8, 1  ;;  %v1184_v31 = vsel %vm723_vm0, %v1182_v12, %v1183_v11  ;;  %v1194_v39 = vsel %vm723_vm0, %v1183_v11, %v1193_v63  ;;  %v7525_v49 = vld [vmem:[%s8881_s20 + $0x188] sm:$0xfc]  ;;  %v7529_v8 = vld [vmem:[%s8881_s20 + $0x1c8] sm:$0x3] }
  0xd3   : > { %v1284_v34 = vrot.slane %v1255_v10, 1  ;;  %v1365_v35 = vrot.slane %v1338_v13, 2  ;;  %v1366_v36 = vrot.slane %v1342_v16, 2  ;;  %v1376_v37 = vrot.slane %v1346_v1, 2 }
  0xd4   : > { %v1430_v15 = vmul.f32 %v7498_v62, %v1416_v17  ;;  %v1434_v38 = vmul.f32 %v9518_v4, %v1416_v17  ;;  %v1438_v47 = vmul.f32 %v7502_v21, %v1416_v17  ;;  %v1521_v40 = vmul.f32 %v7507_v43, %v1507_v24  ;;  %v7538_v43 = vld [vmem:[%s8881_s20 + $0x228] sm:$0x3] }
  0xd5   : > { %v1525_v41 = vmul.f32 %v9505_v53, %v1507_v24  ;;  %v1529_v51 = vmul.f32 %v7511_v30, %v1507_v24  ;;  %v1117_v42 = vadd.f32 %v1093_v26, %v935_v14  ;;  %v1121_v44 = vadd.f32 %v1103_v60, %v939_v18  ;;  %v7534_v26 = vld [vmem:[%s8881_s20 + $0x1e8] sm:$0xfc] }
  0xd6   : > { %v1598_v46 = vrot.slane %v8568_v45, %v9483_v55  ;;  %v1689_v52 = vrot.slane %v8569_v50, %v9483_v55  ;;  %v1208_v54 = vadd.f32 %v1184_v31, %v1026_v19  ;;  %v1212_v56 = vadd.f32 %v1194_v39, %v1030_v20  ;;  %v8570_v19 = vld [vmem:[%s11645_s1 + $0x43] ss:$8 sm:$0xf]  ;;  %v8571_v30 = vld [vmem:[%s11645_s1 + $0x44] ss:$8 sm:$0xf] }
  0xd7   : > { %v1275_v57 = vsel %vm723_vm0, %v1273_v27, %v1274_v29  ;;  %v1285_v58 = vsel %vm723_vm0, %v1274_v29, %v1284_v34  ;;  %v1367_v23 = vsel %vm1361_vm1, %v1365_v35, %v1366_v36  ;;  %v1377_v6 = vsel %vm1361_vm1, %v1366_v36, %v1376_v37  ;;  %v7543_v37 = vld [vmem:[%s8881_s20 + $0x248] sm:$0xfc] }
  0xd8   : > { %v1456_v7 = vrot.slane %v1430_v15, 2  ;;  %v1457_v61 = vrot.slane %v1434_v38, 2  ;;  %v1467_v10 = vrot.slane %v1438_v47, 2  ;;  %v1547_v12 = vrot.slane %v1521_v40, 2 }
  0xd9   : > { %v1548_v11 = vrot.slane %v1525_v41, 2  ;;  %v1558_v63 = vrot.slane %v1529_v51, 2  ;;  %v1612_v13 = vmul.f32 %v7516_v59, %v1598_v46  ;;  %v1616_v14 = vmul.f32 %v9527_v5, %v1598_v46  ;;  %v7547_v41 = vld [vmem:[%s8881_s20 + $0x288] sm:$0x3] }
  0xda   : > { %v1620_v16 = vmul.f32 %v7520_v0, %v1598_v46  ;;  %v1703_v1 = vmul.f32 %v7525_v49, %v1689_v52  ;;  %v1299_v33 = vadd.f32 %v1275_v57, %v1117_v42  ;;  %v1707_v17 = vmul.f32 %v9531_v9, %v1689_v52  ;;  %v8572_v45 = vld [vmem:[%s11645_s1 + $0x45] ss:$8 sm:$0xf]  ;;  %v1949_v57 = vld [vmem:[%s8881_s20 + $0x48] sm:$0x7] }
  0xdb   : > { %v1711_v18 = vmul.f32 %v7529_v8, %v1689_v52  ;;  %v1780_v20 = vrot.slane %v8570_v19, %v9483_v55  ;;  %v1303_v62 = vadd.f32 %v1285_v58, %v1121_v44  ;;  %v1391_v21 = vadd.f32 %v1367_v23, %v1208_v54  ;;  %v8573_v58 = vld [vmem:[%s11645_s1 + $0x46] ss:$8 sm:$0xf] }
  0xdc   : > { %v1395_v3 = vadd.f32 %v1377_v6, %v1212_v56  ;;  %v1458_v24 = vsel %vm1361_vm1, %v1456_v7, %v1457_v61  ;;  %v1468_v60 = vsel %vm1361_vm1, %v1457_v61, %v1467_v10  ;;  %v1549_v27 = vsel %vm1361_vm1, %v1547_v12, %v1548_v11  ;;  %v1945_v56 = vld [vmem:[%s8881_s20 + $0x8] sm:$0xf8] }
  0xdd   : > { %v1559_v29 = vsel %vm1361_vm1, %v1548_v11, %v1558_v63  ;;  %v1871_v31 = vrot.slane %v8571_v30, %v9483_v55  ;;  %v1638_v39 = vrot.slane %v1612_v13, 2  ;;  %v1639_v34 = vrot.slane %v1616_v14, 2  ;;  %v7553_v7 = vld [vmem:[%s8881_s20 + $0x68] sm:$0xf8]  ;;  %v7557_v11 = vld [vmem:[%s8881_s20 + $0xa8] sm:$0x7] }
  0xde   : > { %v1649_v35 = vrot.slane %v1620_v16, 2  ;;  %v1729_v36 = vrot.slane %v1703_v1, 2  ;;  %v1730_v15 = vrot.slane %v1707_v17, 2  ;;  %v1740_v38 = vrot.slane %v1711_v18, 2 }
  0xdf   : > { %v1794_v47 = vmul.f32 %v7534_v26, %v1780_v20  ;;  %v1798_v40 = vmul.f32 %v9554_v28, %v1780_v20  ;;  %v1482_v51 = vadd.f32 %v1458_v24, %v1299_v33  ;;  %v1486_v42 = vadd.f32 %v1468_v60, %v1303_v62 }
  0xe0   : > { %v1802_v44 = vmul.f32 %v7538_v43, %v1780_v20  ;;  %v1962_v46 = vrot.slane %v8572_v45, %v9483_v55  ;;  %v1573_v50 = vadd.f32 %v1549_v27, %v1391_v21  ;;  %v1885_v52 = vmul.f32 %v7543_v37, %v1871_v31  ;;  %v8574_v21 = vld [vmem:[%s11645_s1 + $0x47] ss:$8 sm:$0xf]  ;;  %v8575_v43 = vld [vmem:[%s11645_s1 + $0x60] ss:$8 sm:$0xf] }
  0xe1   : > { %v1889_v54 = vmul.f32 %v9563_v32, %v1871_v31  ;;  %v2054_v59 = vrot.slane %v8573_v58, %v9483_v55  ;;  %v1577_v0 = vadd.f32 %v1559_v29, %v1395_v3  ;;  %v1640_v49 = vsel %vm1361_vm1, %v1638_v39, %v1639_v34  ;;  %v7562_v27 = vld [vmem:[%s8881_s20 + $0xc8] sm:$0xf8]  ;;  %v7566_v29 = vld [vmem:[%s8881_s20 + $0x108] sm:$0x7] }
  0xe2   : > { %v1650_v23 = vsel %vm1361_vm1, %v1639_v34, %v1649_v35  ;;  %v1893_v6 = vmul.f32 %v7547_v41, %v1871_v31  ;;  %v1731_v61 = vsel %vm1361_vm1, %v1729_v36, %v1730_v15  ;;  %v1741_v8 = vsel %vm1361_vm1, %v1730_v15, %v1740_v38  ;;  %v7571_v36 = vld [vmem:[%s8881_s20 + $0x128] sm:$0xf8]  ;;  %v7575_v37 = vld [vmem:[%s8881_s20 + $0x168] sm:$0x7] }
  0xe3   : > { %v1820_v10 = vrot.slane %v1794_v47, 2  ;;  %v1821_v12 = vrot.slane %v1798_v40, 2  ;;  %v1831_v63 = vrot.slane %v1802_v44, 2  ;;  %v1976_v13 = vmul.f32 %v1962_v46, %v1945_v56  ;;  %v8576_v58 = vld [vmem:[%s11645_s1 + $0x61] ss:$8 sm:$0xf] }
  0xe4   : > { %v1980_v14 = vmul.f32 %v1962_v46, %v9502_v48  ;;  %v1984_v16 = vmul.f32 %v1962_v46, %v1949_v57  ;;  %v1911_v1 = vrot.slane %v1885_v52, 2  ;;  %v1912_v33 = vrot.slane %v1889_v54, 2 }
  0xe5   : > { %v2068_v17 = vmul.f32 %v7553_v7, %v2054_v59  ;;  %v2072_v18 = vmul.f32 %v9518_v4, %v2054_v59  ;;  %v1664_v19 = vadd.f32 %v1640_v49, %v1482_v51  ;;  %v1922_v20 = vrot.slane %v1893_v6, 2  ;;  %v7580_v6 = vld [vmem:[%s8881_s20 + $0x188] sm:$0xf8]  ;;  %v7584_v7 = vld [vmem:[%s8881_s20 + $0x1c8] sm:$0x7] }
  0xe6   : > { %v2076_v62 = vmul.f32 %v7557_v11, %v2054_v59  ;;  %v2145_v3 = vrot.slane %v8574_v21, %v9483_v55  ;;  %v1668_v24 = vadd.f32 %v1650_v23, %v1486_v42  ;;  %v1755_v26 = vadd.f32 %v1731_v61, %v1573_v50  ;;  %v8577_v61 = vld [vmem:[%s11645_s1 + $0x62] ss:$8 sm:$0xf] }
  0xe7   : > { %v1759_v60 = vadd.f32 %v1741_v8, %v1577_v0  ;;  %v2236_v30 = vrot.slane %v8575_v43, %v9483_v55  ;;  %v1822_v31 = vsel %vm1361_vm1, %v1820_v10, %v1821_v12  ;;  %v1832_v39 = vsel %vm1361_vm1, %v1821_v12, %v1831_v63 }
  0xe8   : > { %v2003_v34 = vrot.slane %v1976_v13, 3  ;;  %v2004_v35 = vrot.slane %v1980_v14, 3  ;;  %v1913_v15 = vsel %vm1361_vm1, %v1911_v1, %v1912_v33  ;;  %v2014_v38 = vrot.slane %v1984_v16, 3  ;;  %v7589_v13 = vld [vmem:[%s8881_s20 + $0x1e8] sm:$0xf8] }
  0xe9   : > { %v2094_v47 = vrot.slane %v2068_v17, 3  ;;  %v2095_v40 = vrot.slane %v2072_v18, 3  ;;  %v1923_v41 = vsel %vm1361_vm1, %v1912_v33, %v1922_v20  ;;  %v2105_v51 = vrot.slane %v2076_v62, 3  ;;  %v7593_v17 = vld [vmem:[%s8881_s20 + $0x228] sm:$0x7] }
  0xea   : > { %v2159_v42 = vmul.f32 %v7562_v27, %v2145_v3  ;;  %v2163_v44 = vmul.f32 %v9505_v53, %v2145_v3  ;;  %v2167_v45 = vmul.f32 %v7566_v29, %v2145_v3  ;;  %v2250_v46 = vmul.f32 %v7571_v36, %v2236_v30  ;;  %v8578_v62 = vld [vmem:[%s11645_s1 + $0x63] ss:$8 sm:$0xf] }
  0xeb   : > { %v2254_v50 = vmul.f32 %v9527_v5, %v2236_v30  ;;  %v2258_v52 = vmul.f32 %v7575_v37, %v2236_v30  ;;  %v1846_v54 = vadd.f32 %v1822_v31, %v1664_v19  ;;  %v1850_v56 = vadd.f32 %v1832_v39, %v1668_v24  ;;  %v7598_v27 = vld [vmem:[%s8881_s20 + $0x248] sm:$0xf8]  ;;  %v7602_v31 = vld [vmem:[%s8881_s20 + $0x288] sm:$0x7] }
  0xec   : > { %v1937_v57 = vadd.f32 %v1913_v15, %v1755_v26  ;;  %v2327_v59 = vrot.slane %v8576_v58, %v9483_v55  ;;  %v1941_v0 = vadd.f32 %v1923_v41, %v1759_v60  ;;  %v2005_v49 = vsel %vm1999_vm2, %v2003_v34, %v2004_v35  ;;  %v8579_v39 = vld [vmem:[%s11645_s1 + $0x64] ss:$8 sm:$0xf] }
  0xed   : > { %v2015_v23 = vsel %vm1999_vm2, %v2004_v35, %v2014_v38  ;;  %v2418_v8 = vrot.slane %v8577_v61, %v9483_v55  ;;  %v2096_v10 = vsel %vm1999_vm2, %v2094_v47, %v2095_v40  ;;  %v2106_v12 = vsel %vm1999_vm2, %v2095_v40, %v2105_v51  ;;  %v2583_v38 = vld [vmem:[%s8881_s20 + $0x8] sm:$0xf0]  ;;  %v2587_v47 = vld [vmem:[%s8881_s20 + $0x48] sm:$0xf] }
  0xee   : > { %v2185_v11 = vrot.slane %v2159_v42, 3  ;;  %v2186_v63 = vrot.slane %v2163_v44, 3  ;;  %v2196_v14 = vrot.slane %v2167_v45, 3  ;;  %v2276_v16 = vrot.slane %v2250_v46, 3 }
  0xef   : > { %v2277_v1 = vrot.slane %v2254_v50, 3  ;;  %v2287_v33 = vrot.slane %v2258_v52, 3  ;;  %v2341_v18 = vmul.f32 %v7580_v6, %v2327_v59  ;;  %v2345_v19 = vmul.f32 %v9531_v9, %v2327_v59 }
  0xf0   : > { %v2349_v20 = vmul.f32 %v7584_v7, %v2327_v59  ;;  %v2509_v21 = vrot.slane %v8578_v62, %v9483_v55  ;;  %v2029_v3 = vadd.f32 %v2005_v49, %v1846_v54  ;;  %v2033_v24 = vadd.f32 %v2015_v23, %v1850_v56  ;;  %v8581_v23 = vld [vmem:[%s11645_s1 + $0x66] ss:$8 sm:$0xf] }
  0xf1   : > { %v2432_v26 = vmul.f32 %v7589_v13, %v2418_v8  ;;  %v2436_v60 = vmul.f32 %v9554_v28, %v2418_v8  ;;  %v2120_v29 = vadd.f32 %v2096_v10, %v1937_v57  ;;  %v2124_v43 = vadd.f32 %v2106_v12, %v1941_v0  ;;  %v8580_v0 = vld [vmem:[%s11645_s1 + $0x65] ss:$8 sm:$0xf] }
  0xf2   : > { %v2440_v30 = vmul.f32 %v7593_v17, %v2418_v8  ;;  %v2600_v34 = vrot.slane %v8579_v39, %v9483_v55  ;;  %v2187_v35 = vsel %vm1999_vm2, %v2185_v11, %v2186_v63  ;;  %v2197_v36 = vsel %vm1999_vm2, %v2186_v63, %v2196_v14  ;;  %v7608_v12 = vld [vmem:[%s8881_s20 + $0x68] sm:$0xf0]  ;;  %v7612_v11 = vld [vmem:[%s8881_s20 + $0xa8] sm:$0xf] }
  0xf3   : > { %v2278_v37 = vsel %vm1999_vm2, %v2276_v16, %v2277_v1  ;;  %v2288_v15 = vsel %vm1999_vm2, %v2277_v1, %v2287_v33  ;;  %v2367_v40 = vrot.slane %v2341_v18, 3  ;;  %v2368_v41 = vrot.slane %v2345_v19, 3  ;;  %v7617_v63 = vld [vmem:[%s8881_s20 + $0xc8] sm:$0xf0]  ;;  %v7621_v33 = vld [vmem:[%s8881_s20 + $0x108] sm:$0xf] }
  0xf4   : > { %v2378_v51 = vrot.slane %v2349_v20, 3  ;;  %v2523_v42 = vmul.f32 %v7598_v27, %v2509_v21  ;;  %v2458_v44 = vrot.slane %v2432_v26, 3  ;;  %v2459_v45 = vrot.slane %v2436_v60, 3 }
  0xf5   : > { %v2527_v46 = vmul.f32 %v9563_v32, %v2509_v21  ;;  %v2531_v50 = vmul.f32 %v7602_v31, %v2509_v21  ;;  %v2469_v52 = vrot.slane %v2440_v30, 3  ;;  %v2614_v54 = vmul.f32 %v2600_v34, %v2583_v38 }
  0xf6   : > { %v2618_v56 = vmul.f32 %v2600_v34, %v9502_v48  ;;  %v2622_v57 = vmul.f32 %v2600_v34, %v2587_v47  ;;  %v2211_v58 = vadd.f32 %v2187_v35, %v2029_v3  ;;  %v2215_v59 = vadd.f32 %v2197_v36, %v2033_v24  ;;  %v7626_v34 = vld [vmem:[%s8881_s20 + $0x128] sm:$0xf0]  ;;  %v8583_v35 = vld [vmem:[%s11645_s1 + $0x80] ss:$8 sm:$0xf] }
  0xf7   : > { %v2692_v49 = vrot.slane %v8580_v0, %v9483_v55  ;;  %v2783_v6 = vrot.slane %v8581_v23, %v9483_v55  ;;  %v2302_v7 = vadd.f32 %v2278_v37, %v2120_v29  ;;  %v2306_v61 = vadd.f32 %v2288_v15, %v2124_v43  ;;  %v8582_v29 = vld [vmem:[%s11645_s1 + $0x67] ss:$8 sm:$0xf]  ;;  %v8584_v0 = vld [vmem:[%s11645_s1 + $0x81] ss:$8 sm:$0xf] }
  0xf8   : > { %v2369_v8 = vsel %vm1999_vm2, %v2367_v40, %v2368_v41  ;;  %v2379_v10 = vsel %vm1999_vm2, %v2368_v41, %v2378_v51  ;;  %v2460_v13 = vsel %vm1999_vm2, %v2458_v44, %v2459_v45  ;;  %v2549_v14 = vrot.slane %v2523_v42, 3  ;;  %v7630_v40 = vld [vmem:[%s8881_s20 + $0x168] sm:$0xf]  ;;  %v7635_v41 = vld [vmem:[%s8881_s20 + $0x188] sm:$0xf0] }
  0xf9   : > { %v2550_v16 = vrot.slane %v2527_v46, 3  ;;  %v2560_v1 = vrot.slane %v2531_v50, 3  ;;  %v2470_v17 = vsel %vm1999_vm2, %v2459_v45, %v2469_v52  ;;  %v2641_v18 = vrot.slane %v2614_v54, 4 }
  0xfa   : > { %v2642_v19 = vrot.slane %v2618_v56, 4  ;;  %v2652_v20 = vrot.slane %v2622_v57, 4  ;;  %v2706_v62 = vmul.f32 %v7608_v12, %v2692_v49  ;;  %v2710_v21 = vmul.f32 %v9518_v4, %v2692_v49  ;;  %v7639_v56 = vld [vmem:[%s8881_s20 + $0x1c8] sm:$0xf] }
  0xfb   : > { %v2714_v3 = vmul.f32 %v7612_v11, %v2692_v49  ;;  %v2797_v24 = vmul.f32 %v7617_v63, %v2783_v6  ;;  %v2393_v26 = vadd.f32 %v2369_v8, %v2211_v58  ;;  %v2801_v60 = vmul.f32 %v9505_v53, %v2783_v6  ;;  %v7644_v8 = vld [vmem:[%s8881_s20 + $0x1e8] sm:$0xf0]  ;;  %v7648_v63 = vld [vmem:[%s8881_s20 + $0x228] sm:$0xf] }
  0xfc   : > { %v2805_v27 = vmul.f32 %v7621_v33, %v2783_v6  ;;  %v2874_v43 = vrot.slane %v8582_v29, %v9483_v55  ;;  %v2397_v30 = vadd.f32 %v2379_v10, %v2215_v59  ;;  %v2484_v31 = vadd.f32 %v2460_v13, %v2302_v7  ;;  %v8585_v13 = vld [vmem:[%s11645_s1 + $0x82] ss:$8 sm:$0xf] }
  0xfd   : > { %v2488_v39 = vadd.f32 %v2470_v17, %v2306_v61  ;;  %v2965_v36 = vrot.slane %v8583_v35, %v9483_v55  ;;  %v2551_v37 = vsel %vm1999_vm2, %v2549_v14, %v2550_v16  ;;  %v2561_v15 = vsel %vm1999_vm2, %v2550_v16, %v2560_v1 }
  0xfe   : > { %v2643_v38 = vsel %vm2637_vm3, %v2641_v18, %v2642_v19  ;;  %v2653_v47 = vsel %vm2637_vm3, %v2642_v19, %v2652_v20  ;;  %v2732_v51 = vrot.slane %v2706_v62, 4  ;;  %v2733_v42 = vrot.slane %v2710_v21, 4  ;;  %v7653_v18 = vld [vmem:[%s8881_s20 + $0x248] sm:$0xf0] }
  0xff   : > { %v2743_v44 = vrot.slane %v2714_v3, 4  ;;  %v2823_v45 = vrot.slane %v2797_v24, 4  ;;  %v2824_v46 = vrot.slane %v2801_v60, 4  ;;  %v2834_v50 = vrot.slane %v2805_v27, 4  ;;  %v7657_v3 = vld [vmem:[%s8881_s20 + $0x288] sm:$0xf] }
 0x100   : > { %v2888_v52 = vmul.f32 %v7626_v34, %v2874_v43  ;;  %v2892_v54 = vmul.f32 %v9527_v5, %v2874_v43  ;;  %v2896_v57 = vmul.f32 %v7630_v40, %v2874_v43  ;;  %v2979_v58 = vmul.f32 %v7635_v41, %v2965_v36  ;;  %v8586_v27 = vld [vmem:[%s11645_s1 + $0x83] ss:$8 sm:$0xf]  ;;  %v3221_v34 = vld [vmem:[%s8881_s20 + $0x8] sm:$0xe0] }
 0x101   : > { %v2983_v59 = vmul.f32 %v9531_v9, %v2965_v36  ;;  %v3056_v49 = vrot.slane %v8584_v0, %v9483_v55  ;;  %v2575_v23 = vadd.f32 %v2551_v37, %v2393_v26  ;;  %v2579_v6 = vadd.f32 %v2561_v15, %v2397_v30  ;;  %v3225_v15 = vld [vmem:[%s8881_s20 + $0x48] sm:$0x1f] }
 0x102   : > { %v2667_v7 = vadd.f32 %v2643_v38, %v2484_v31  ;;  %v2671_v61 = vadd.f32 %v2653_v47, %v2488_v39  ;;  %v2734_v10 = vsel %vm2637_vm3, %v2732_v51, %v2733_v42  ;;  %v2744_v12 = vsel %vm2637_vm3, %v2733_v42, %v2743_v44  ;;  %v8587_v38 = vld [vmem:[%s11645_s1 + $0x84] ss:$8 sm:$0xf]  ;;  %v7663_v44 = vld [vmem:[%s8881_s20 + $0x68] sm:$0xe0] }
 0x103   : > { %v2987_v11 = vmul.f32 %v7639_v56, %v2965_v36  ;;  %v3147_v14 = vrot.slane %v8585_v13, %v9483_v55  ;;  %v2825_v16 = vsel %vm2637_vm3, %v2823_v45, %v2824_v46  ;;  %v2835_v1 = vsel %vm2637_vm3, %v2824_v46, %v2834_v50  ;;  %v7667_v0 = vld [vmem:[%s8881_s20 + $0xa8] sm:$0x1f] }
 0x104   : > { %v2914_v33 = vrot.slane %v2888_v52, 4  ;;  %v2915_v17 = vrot.slane %v2892_v54, 4  ;;  %v2925_v19 = vrot.slane %v2896_v57, 4  ;;  %v3005_v20 = vrot.slane %v2979_v58, 4 }
 0x105   : > { %v3006_v62 = vrot.slane %v2983_v59, 4  ;;  %v3070_v21 = vmul.f32 %v7644_v8, %v3056_v49  ;;  %v2758_v24 = vadd.f32 %v2734_v10, %v2575_v23  ;;  %v3074_v26 = vmul.f32 %v9554_v28, %v3056_v49  ;;  %v8588_v8 = vld [vmem:[%s11645_s1 + $0x85] ss:$8 sm:$0xf] }
 0x106   : > { %v3078_v60 = vmul.f32 %v7648_v63, %v3056_v49  ;;  %v3238_v29 = vrot.slane %v8586_v27, %v9483_v55  ;;  %v2762_v43 = vadd.f32 %v2744_v12, %v2579_v6  ;;  %v3016_v30 = vrot.slane %v2987_v11, 4  ;;  %v9823_v12 = vld [vmem:[%s11649_s5] sm:$0xf] }
 0x107   : > { %v3161_v31 = vmul.f32 %v7653_v18, %v3147_v14  ;;  %v3165_v39 = vmul.f32 %v9563_v32, %v3147_v14  ;;  %v2849_v35 = vadd.f32 %v2825_v16, %v2667_v7  ;;  %v2853_v36 = vadd.f32 %v2835_v1, %v2671_v61  ;;  %v7672_v16 = vld [vmem:[%s8881_s20 + $0xc8] sm:$0xe0] }
 0x108   : > { %v3169_v37 = vmul.f32 %v7657_v3, %v3147_v14  ;;  %v3330_v47 = vrot.slane %v8587_v38, %v9483_v55  ;;  %v2916_v40 = vsel %vm2637_vm3, %v2914_v33, %v2915_v17  ;;  %v2926_v41 = vsel %vm2637_vm3, %v2915_v17, %v2925_v19  ;;  %v8589_v3 = vld [vmem:[%s11645_s1 + $0x86] ss:$8 sm:$0xf] }
 0x109   : > { %v3007_v51 = vsel %vm2637_vm3, %v3005_v20, %v3006_v62  ;;  %v3096_v42 = vrot.slane %v3070_v21, 4  ;;  %v3097_v45 = vrot.slane %v3074_v26, 4  ;;  %v3107_v46 = vrot.slane %v3078_v60, 4  ;;  %v7676_v21 = vld [vmem:[%s8881_s20 + $0x108] sm:$0x1f] }
 0x10a   : > { %v3252_v50 = vmul.f32 %v3238_v29, %v3221_v34  ;;  %v3256_v52 = vmul.f32 %v3238_v29, %v9502_v48  ;;  %v3017_v54 = vsel %vm2637_vm3, %v3006_v62, %v3016_v30  ;;  %v3187_v56 = vrot.slane %v3161_v31, 4  ;;  %v7685_v34 = vld [vmem:[%s8881_s20 + $0x168] sm:$0x1f] }
 0x10b   : > { %v3188_v57 = vrot.slane %v3165_v39, 4  ;;  %v3260_v58 = vmul.f32 %v3238_v29, %v3225_v15  ;;  %v3198_v59 = vrot.slane %v3169_v37, 4  ;;  %v3344_v49 = vmul.f32 %v7663_v44, %v3330_v47  ;;  %v8591_v44 = vld [vmem:[%s11645_s1 + $0xa0] ss:$8 sm:$0xf] }
 0x10c   : > { %v3348_v23 = vmul.f32 %v9518_v4, %v3330_v47  ;;  %v2940_v6 = vadd.f32 %v2916_v40, %v2758_v24  ;;  %v2944_v7 = vadd.f32 %v2926_v41, %v2762_v43  ;;  %v3031_v61 = vadd.f32 %v3007_v51, %v2849_v35  ;;  %v7681_v43 = vld [vmem:[%s8881_s20 + $0x128] sm:$0xe0] }
 0x10d   : > { %v3421_v10 = vrot.slane %v8588_v8, %v9483_v55  ;;  %v3035_v11 = vadd.f32 %v3017_v54, %v2853_v36  ;;  %v3098_v63 = vsel %vm2637_vm3, %v3096_v42, %v3097_v45  ;;  %v3279_v13 = vrot.slane %v3252_v50, 5  ;;  %v8590_v35 = vld [vmem:[%s11645_s1 + $0x87] ss:$8 sm:$0xf] }
 0x10e   : > { %v3280_v14 = vrot.slane %v3256_v52, 5  ;;  %v3108_v1 = vsel %vm2637_vm3, %v3097_v45, %v3107_v46  ;;  %v3189_v33 = vsel %vm2637_vm3, %v3187_v56, %v3188_v57  ;;  %v3290_v17 = vrot.slane %v3260_v58, 5  ;;  %v7690_v40 = vld [vmem:[%s8881_s20 + $0x188] sm:$0xe0] }
 0x10f   : > { %v3352_v18 = vmul.f32 %v7667_v0, %v3330_v47  ;;  %v3199_v19 = vsel %vm2637_vm3, %v3188_v57, %v3198_v59  ;;  %v3370_v20 = vrot.slane %v3344_v49, 5  ;;  %v3371_v62 = vrot.slane %v3348_v23, 5  ;;  %v7699_v56 = vld [vmem:[%s8881_s20 + $0x1e8] sm:$0xe0]  ;;  %v7703_v49 = vld [vmem:[%s8881_s20 + $0x228] sm:$0x1f] }
 0x110   : > { %v3512_v24 = vrot.slane %v8589_v3, %v9483_v55  ;;  %v9837_v26 = vrot.slane %v9823_v12, %v8884_v25  ;;  %v3122_v60 = vadd.f32 %v3098_v63, %v2940_v6  ;;  %v3435_v27 = vmul.f32 %v7672_v16, %v3421_v10 }
 0x111   : > { %v3439_v29 = vmul.f32 %v9505_v53, %v3421_v10  ;;  %v3126_v30 = vadd.f32 %v3108_v1, %v2944_v7  ;;  %v3213_v31 = vadd.f32 %v3189_v33, %v3031_v61  ;;  %v3281_v39 = vsel %vm3275_vm4, %v3279_v13, %v3280_v14  ;;  %v7694_v53 = vld [vmem:[%s8881_s20 + $0x1c8] sm:$0x1f]  ;;  %v7708_v13 = vld [vmem:[%s8881_s20 + $0x248] sm:$0xe0] }
 0x112   : > { %v3603_v36 = vrot.slane %v8590_v35, %v9483_v55  ;;  %v3217_v37 = vadd.f32 %v3199_v19, %v3035_v11  ;;  %v3291_v15 = vsel %vm3275_vm4, %v3280_v14, %v3290_v17  ;;  %v3381_v38 = vrot.slane %v3352_v18, 5  ;;  %v8592_v7 = vld [vmem:[%s11645_s1 + $0xa1] ss:$8 sm:$0xf] }
 0x113   : > { %v3443_v47 = vmul.f32 %v7676_v21, %v3421_v10  ;;  %v3372_v41 = vsel %vm3275_vm4, %v3370_v20, %v3371_v62  ;;  %v3526_v51 = vmul.f32 %v7681_v43, %v3512_v24  ;;  %v3530_v42 = vmul.f32 %v9527_v5, %v3512_v24  ;;  %v8593_v33 = vld [vmem:[%s11645_s1 + $0xa2] ss:$8 sm:$0xf]  ;;  %v3859_v21 = vld [vmem:[%s8881_s20 + $0x8] sm:$0xc0] }
 0x114   : > { %v3694_v45 = vrot.slane %v8591_v44, %v9483_v55  ;;  %v3305_v46 = vadd.f32 %v3281_v39, %v3122_v60  ;;  %v3461_v50 = vrot.slane %v3435_v27, 5  ;;  %v3462_v52 = vrot.slane %v3439_v29, 5  ;;  %v3863_v27 = vld [vmem:[%s8881_s20 + $0x48] sm:$0x3f] }
 0x115   : > { %v3534_v54 = vmul.f32 %v7685_v34, %v3512_v24  ;;  %v3309_v57 = vadd.f32 %v3291_v15, %v3126_v30  ;;  %v3617_v58 = vmul.f32 %v7690_v40, %v3603_v36  ;;  %v3621_v59 = vmul.f32 %v9531_v9, %v3603_v36  ;;  %v7712_v9 = vld [vmem:[%s8881_s20 + $0x288] sm:$0x1f] }
 0x116   : > { %v3625_v0 = vmul.f32 %v7694_v53, %v3603_v36  ;;  %v3382_v5 = vsel %vm3275_vm4, %v3371_v62, %v3381_v38  ;;  %v3396_v23 = vadd.f32 %v3372_v41, %v3213_v31  ;;  %v3472_v6 = vrot.slane %v3443_v47, 5  ;;  %v8594_v41 = vld [vmem:[%s11645_s1 + $0xa3] ss:$8 sm:$0xf] }
 0x117   : > { %v3785_v61 = vrot.slane %v8592_v7, %v9483_v55  ;;  %v3552_v8 = vrot.slane %v3526_v51, 5  ;;  %v3553_v10 = vrot.slane %v3530_v42, 5  ;;  %v3708_v11 = vmul.f32 %v7699_v56, %v3694_v45  ;;  %v8595_v56 = vld [vmem:[%s11645_s1 + $0xa4] ss:$8 sm:$0xf] }
 0x118   : > { %v3712_v63 = vmul.f32 %v9554_v28, %v3694_v45  ;;  %v3463_v14 = vsel %vm3275_vm4, %v3461_v50, %v3462_v52  ;;  %v3563_v16 = vrot.slane %v3534_v54, 5  ;;  %v3716_v1 = vmul.f32 %v7703_v49, %v3694_v45 }
 0x119   : > { %v3876_v17 = vrot.slane %v8593_v33, %v9483_v55  ;;  %v3400_v18 = vadd.f32 %v3382_v5, %v3217_v37  ;;  %v3643_v19 = vrot.slane %v3617_v58, 5  ;;  %v3644_v20 = vrot.slane %v3621_v59, 5  ;;  %v7722_v5 = vld [vmem:[%s8881_s20 + $0xa8] sm:$0x3f] }
 0x11a   : > { %v3654_v62 = vrot.slane %v3625_v0, 5  ;;  %v3473_v28 = vsel %vm3275_vm4, %v3462_v52, %v3472_v6  ;;  %v3799_v3 = vmul.f32 %v7708_v13, %v3785_v61  ;;  %v3803_v24 = vmul.f32 %v9563_v32, %v3785_v61 }
 0x11b   : > { %v3807_v60 = vmul.f32 %v7712_v9, %v3785_v61  ;;  %v3487_v29 = vadd.f32 %v3463_v14, %v3305_v46  ;;  %v3554_v43 = vsel %vm3275_vm4, %v3552_v8, %v3553_v10  ;;  %v3734_v30 = vrot.slane %v3708_v11, 5  ;;  %v7718_v46 = vld [vmem:[%s8881_s20 + $0x68] sm:$0xc0] }
 0x11c   : > { %v3735_v31 = vrot.slane %v3712_v63, 5  ;;  %v3564_v39 = vsel %vm3275_vm4, %v3553_v10, %v3563_v16  ;;  %v3745_v34 = vrot.slane %v3716_v1, 5  ;;  %v3890_v35 = vmul.f32 %v3876_v17, %v3859_v21  ;;  %v7731_v1 = vld [vmem:[%s8881_s20 + $0x108] sm:$0x3f]  ;;  %v7736_v21 = vld [vmem:[%s8881_s20 + $0x128] sm:$0xc0] }
 0x11d   : > { %v3894_v36 = vmul.f32 %v3876_v17, %v9502_v48  ;;  %v3491_v37 = vadd.f32 %v3473_v28, %v3309_v57  ;;  %v3645_v15 = vsel %vm3275_vm4, %v3643_v19, %v3644_v20  ;;  %v3655_v38 = vsel %vm3275_vm4, %v3644_v20, %v3654_v62 }
 0x11e   : > { %v3898_v32 = vmul.f32 %v3876_v17, %v3863_v27  ;;  %v3825_v47 = vrot.slane %v3799_v3, 5  ;;  %v3826_v40 = vrot.slane %v3803_v24, 5  ;;  %v3836_v53 = vrot.slane %v3807_v60, 5  ;;  %v8597_v27 = vld [vmem:[%s11645_s1 + $0xa6] ss:$8 sm:$0xf] }
 0x11f   : > { %v3968_v51 = vrot.slane %v8594_v41, %v9483_v55  ;;  %v9886_v42 = vsub.s32 2, %v8870_v22  ;;  %v3578_v48 = vadd.f32 %v3554_v43, %v3396_v23  ;;  %v3582_v44 = vadd.f32 %v3564_v39, %v3400_v18  ;;  %v7727_v23 = vld [vmem:[%s8881_s20 + $0xc8] sm:$0xc0] }
 0x120   : > { %v3736_v45 = vsel %vm3275_vm4, %v3734_v30, %v3735_v31  ;;  %v3746_v50 = vsel %vm3275_vm4, %v3735_v31, %v3745_v34  ;;  %v3917_v52 = vrot.slane %v3890_v35, 6  ;;  %v3918_v54 = vrot.slane %v3894_v36, 6  ;;  %v8599_v31 = vld [vmem:[%s8881_s20 + $0xe8] sm:$0xff] }
 0x121   : > { %v4059_v57 = vrot.slane %v8595_v56, %v9483_v55  ;;  %v9896_v58 = vsub.s32 3, %v8870_v22  ;;  %v3669_v59 = vadd.f32 %v3645_v15, %v3487_v29  ;;  %v3673_v0 = vadd.f32 %v3655_v38, %v3491_v37  ;;  %v8600_v35 = vld [vmem:[%s11645_s1 + $0xc0] ss:$8 sm:$0xf] }
 0x122   : > { %v3928_v49 = vrot.slane %v3898_v32, 6  ;;  %v3827_v6 = vsel %vm3275_vm4, %v3825_v47, %v3826_v40  ;;  %v3837_v7 = vsel %vm3275_vm4, %v3826_v40, %v3836_v53  ;;  %v3982_v61 = vmul.f32 %v7718_v46, %v3968_v51 }
 0x123   : > { %v9903_v8 = vmul.f32 %v9518_v4, %v3968_v51  ;;  %v4610_v10 = vrot.slane %v9823_v12, %v9886_v42  ;;  %v4606_v22 = vrot.slane %v9823_v12, %v9483_v55  ;;  %v3760_v11 = vadd.f32 %v3736_v45, %v3578_v48  ;;  %v8596_v4 = vld [vmem:[%s11645_s1 + $0xa5] ss:$8 sm:$0xf]  ;;  %v7745_v45 = vld [vmem:[%s8881_s20 + $0x188] sm:$0xc0] }
 0x124   : > { %v3764_v63 = vadd.f32 %v3746_v50, %v3582_v44  ;;  %v3919_v14 = vsel %vm3913_vm5, %v3917_v52, %v3918_v54  ;;  %v9910_v16 = vmul.f32 %v7722_v5, %v3968_v51  ;;  %v9913_v33 = vmul.f32 %v7727_v23, %v4059_v57  ;;  %v7740_v44 = vld [vmem:[%s8881_s20 + $0x168] sm:$0x3f] }
 0x125   : > { %v4150_v17 = vrot.slane %v8596_v4, %v9483_v55  ;;  %v4614_v18 = vrot.slane %v9823_v12, %v9896_v58  ;;  %v9921_v19 = vadd.f32 %v3827_v6, %v3669_v59  ;;  %v9923_v20 = vadd.f32 %v3837_v7, %v3673_v0  ;;  %v8598_v12 = vld [vmem:[%s11645_s1 + $0xa7] ss:$8 sm:$0xf]  ;;  %v7749_v6 = vld [vmem:[%s8881_s20 + $0x1c8] sm:$0x3f] }
 0x126   : > { %v3929_v62 = vsel %vm3913_vm5, %v3918_v54, %v3928_v49  ;;  %v4008_v24 = vrot.slane %v3982_v61, 6  ;;  %v4009_v60 = vrot.slane %v9903_v8, 6  ;;  %v4241_v29 = vrot.slane %v8597_v27, %v9483_v55  ;;  %v7758_v27 = vld [vmem:[%s8881_s20 + $0x228] sm:$0x3f] }
 0x127   : > { %v9936_v43 = vrot.slane %v8598_v12, %v9483_v55  ;;  %v9938_v30 = vadd.f32 %v3919_v14, %v3760_v11  ;;  %v4077_v39 = vmul.f32 %v8599_v31, %v4059_v57  ;;  %v4081_v34 = vmul.f32 %v7731_v1, %v4059_v57  ;;  %v8601_v57 = vld [vmem:[%s8881_s20 + $0x148] sm:$0xff]  ;;  %v8312_v1 = vld [vmem:[%s11648_s4 + $0xc4] ss:$16 sps:$4 sm:$0xff]  }
 0x128   : > { %v9945_v36 = vrot.slane %v8600_v35, %v9483_v55  ;;  %v9947_v38 = vadd.f32 %v3929_v62, %v3764_v63  ;;  %v4019_v32 = vrot.slane %v9910_v16, 6  ;;  %v4099_v47 = vrot.slane %v9913_v33, 6  ;;  %v8602_v33 = vld [vmem:[%s8881_s20 + $0x1a8] sm:$0xff] }
 0x129   : > { %v9951_v40 = vmul.f32 %v7736_v21, %v4150_v17  ;;  %v4010_v56 = vsel %vm3913_vm5, %v4008_v24, %v4009_v60  ;;  %v9959_v59 = vmul.f32 %v8601_v57, %v4150_v17  ;;  %v4100_v5 = vrot.slane %v4077_v39, 6  ;;  %v7767_v35 = vld [vmem:[%s8881_s20 + $0x288] sm:$0x3f] }
 0x12a   : > { %v4110_v23 = vrot.slane %v4081_v34, 6  ;;  %v4172_v8 = vmul.f32 %v7740_v44, %v4150_v17  ;;  %v4255_v11 = vmul.f32 %v7745_v45, %v4241_v29  ;;  %v4259_v4 = vmul.f32 %v8602_v33, %v4241_v29  ;;  %v8313_v44 = vld [vmem:[%s11648_s4 + $0xc8] ss:$16 sps:$4 sm:$0xff]  }
 0x12b   : > { %v4263_v17 = vmul.f32 %v7749_v6, %v4241_v29  ;;  %v4190_v24 = vrot.slane %v9951_v40, 6  ;;  %v4101_v39 = vsel %vm3913_vm5, %v4099_v47, %v4100_v5  ;;  %v4191_v34 = vrot.slane %v9959_v59, 6  ;;  %v7763_v29 = vld [vmem:[%s8881_s20 + $0x248] sm:$0xc0] }
 0x12c   : > { %v4437_v45 = vmul.f32 %v7763_v29, %v9945_v36  ;;  %v4034_v57 = vadd.f32 %v4010_v56, %v9921_v19  ;;  %v8605_v29 = vld [vmem:[%s11646_s2] sm:$0xf] }
 0x12d   : > { %v4292_v40 = vrot.slane %v4263_v17, 6  ;;  %v8330_v17 = vld [vmem:[%s11648_s4 + $0x64] ss:$16 sps:$4 sm:$0xff]  }
 0x169   : > { %v4813_v13 = vpop.f32.mrf.mxu0  ;;  %v4856_v9 = vpop.f32.mrf.mxu1 }
 0x16a   : > { %v4814_v46 = vadd.f32 %v4813_v13, %v9837_v26  ;;  %v4857_v50 = vadd.f32 %v4856_v9, %v4610_v10  ;;  %v8304_v9 = vld [vmem:[%s11648_s4 + $0xe0] ss:$16 sps:$4 sm:$0xff]  }
 0x16b   : > { %v4815_v28 = vpop.f32.mrf.mxu0  ;;  %v4858_v3 = vpop.f32.mrf.mxu1 }
 0x16c   : > { %v4816_v53 = vadd.f32 %v4815_v28, %v4606_v22  ;;  %v4859_v41 = vadd.f32 %v4858_v3, %v4614_v18  ;;  %v4865_v14 = vmax.f32 %v4814_v46, 0.0  ;;  %v4867_v16 = vmax.f32 %v4857_v50, 0.0  ;;  %v8315_v28 = vld [vmem:[%s11648_s4 + $0xcc] ss:$16 sps:$4 sm:$0xff]  }
 0x16d   : > { %v4817_v37 = vpop.f32.mrf.mxu0  ;;  %v4860_v15 = vpop.f32.mrf.mxu1  ;;  %v4020_v3 = vsel %vm3913_vm5, %v4009_v60, %v4019_v32  ;;  %v4282_v32 = vrot.slane %v4259_v4, 6  ;;  %v8604_v46 = vld [vmem:[%s8881_s20 + $0x268] sm:$0xff] }
 0x16e   : > { %v4818_v51 = vadd.f32 %v4817_v37, %v9837_v26  ;;  %v4861_v48 = vadd.f32 %v4860_v15, %v4610_v10  ;;  %v4866_v26 = vmax.f32 %v4816_v53, 0.0  ;;  %v4868_v10 = vmax.f32 %v4859_v41, 0.0  ;;  %v8603_v41 = vld [vmem:[%s8881_s20 + $0x208] sm:$0xff] }
 0x16f   : > { %v4819_v52 = vpop.f32.mrf.mxu0  ;;  %v4862_v54 = vpop.f32.mrf.mxu1  ;;  %v4111_v37 = vsel %vm3913_vm5, %v4100_v5, %v4110_v23  ;;  %v4201_v15 = vrot.slane %v4172_v8, 6  ;;  %v4281_v53 = vrot.slane %v4255_v11, 6  ;;  %v4350_v47 = vmul.f32 %v8603_v41, %v9936_v43  ;;  %v8316_v23 = vld [vmem:[%s11648_s4 + $0xa0] ss:$16 sps:$4 sm:$0xff]   ;;  %v8324_v11 = vld [vmem:[%s11648_s4 + $0x84] ss:$16 sps:$4 sm:$0xff]  }
 0x170   : > { %v4820_v0 = vadd.f32 %v4819_v52, %v4606_v22  ;;  %v4863_v49 = vadd.f32 %v4862_v54, %v4614_v18  ;;  %v4869_v7 = vmax.f32 %v4818_v51, 0.0  ;;  %v4871_v61 = vmax.f32 %v4861_v48, 0.0  ;;  %v8307_v22 = vld [vmem:[%s11648_s4 + $0xe8] ss:$16 sps:$4 sm:$0xff]   ;;  %v7754_v18 = vld [vmem:[%s8881_s20 + $0x1e8] sm:$0xc0] }
 0x171   : > { %v4346_v60 = vmul.f32 %v7754_v18, %v9936_v43  ;;  %v4354_v51 = vmul.f32 %v7758_v27, %v9936_v43  ;;  %v8310_v48 = vld [vmem:[%s11648_s4 + $0xc0] ss:$16 sps:$4 sm:$0xff]   ;;  %v4441_v50 = vmul.f32 %v8604_v46, %v9945_v36  ;;  %v4445_v52 = vmul.f32 %v7767_v35, %v9945_v36  ;;  %v8318_v43 = vld [vmem:[%s11648_s4 + $0xa4] ss:$16 sps:$4 sm:$0xff]   ;;  %v8321_v54 = vld [vmem:[%s11648_s4 + $0xac] ss:$16 sps:$4 sm:$0xff]  }
 0x172   : > { %v4870_v63 = vmax.f32 %v4820_v0, 0.0  ;;  %v4872_v13 = vmax.f32 %v4863_v49, 0.0  ;;  %v4873_v12 = vpack.c.bf16 %v4869_v7, %v4865_v14  ;;  %v4875_v31 = vpack.c.bf16 %v4871_v61, %v4867_v16  ;;  %v8322_v14 = vld [vmem:[%s11648_s4 + $0x80] ss:$16 sps:$4 sm:$0xff]   ;;  %v8325_v16 = vld [vmem:[%s11648_s4 + $0x88] ss:$16 sps:$4 sm:$0xff]  }
 0x173   : > { %v4038_v59 = vadd.f32 %v4020_v3, %v9923_v20  ;;  %v4125_v0 = vadd.f32 %v4101_v39, %v9938_v30  ;;  %v4129_v36 = vadd.f32 %v4111_v37, %v9947_v38  ;;  %v4192_v49 = vsel %vm3913_vm5, %v4190_v24, %v4191_v34  ;;  %v8319_v38 = vld [vmem:[%s11648_s4 + $0xa8] ss:$16 sps:$4 sm:$0xff]   ;;  %v8333_v18 = vld [vmem:[%s11648_s4 + $0x6c] ss:$16 sps:$4 sm:$0xff]   ;;  %v8328_v24 = vld [vmem:[%s11648_s4 + $0x60] ss:$16 sps:$4 sm:$0xff]  }
 0x174   : > { %v4874_v62 = vpack.c.bf16 %v4870_v63, %v4866_v26  ;;  %v4876_v21 = vpack.c.bf16 %v4872_v13, %v4868_v10  ;;  %v4202_v5 = vsel %vm3913_vm5, %v4191_v34, %v4201_v15  ;;  %v4283_v19 = vsel %vm3913_vm5, %v4281_v53, %v4282_v32  ;;  %v8327_v26 = vld [vmem:[%s11648_s4 + $0x8c] ss:$16 sps:$4 sm:$0xff]   ;;  %v8331_v27 = vld [vmem:[%s11648_s4 + $0x68] ss:$16 sps:$4 sm:$0xff]   ;;  %v8334_v37 = vld [vmem:[%s11648_s4 + $0x40] ss:$16 sps:$4 sm:$0xff]  }
 0x175   : > { %v4293_v20 = vsel %vm3913_vm5, %v4282_v32, %v4292_v40  ;;  %v4372_v56 = vrot.slane %v4346_v60, 6  ;;  %v4373_v30 = vrot.slane %v4350_v47, 6  ;;  %v4383_v6 = vrot.slane %v4354_v51, 6  ;;  %v8337_v15 = vld [vmem:[%s11648_s4 + $0x48] ss:$16 sps:$4 sm:$0xff]  }
 0x176   : > { %5172 = vmatprep.mubr.bf16.mxu0 %v4874_v62  ;;  %5213 = vmatprep.mubr.bf16.mxu1 %v4876_v21  ;;  %v4463_v7 = vrot.slane %v4437_v45, 6  ;;  %v4464_v61 = vrot.slane %v4441_v50, 6  ;;  %v4474_v8 = vrot.slane %v4445_v52, 6  ;;  %v4216_v10 = vadd.f32 %v4192_v49, %v4034_v57  ;;  %v8342_v53 = vld [vmem:[%s11648_s4 + $0x24] ss:$16 sps:$4 sm:$0xff]   ;;  %v8352_v57 = vld [vmem:[%s11650_s6 + $0x78] sm:$0xff]  }
 0x177   : > { %5173 = vmatmul.mubr.bf16.vlgmr.msra.gmra.mxu0 %v4873_v12  ;;  %5214 = vmatmul.mubr.bf16.vlgmr.msra.gmra.mxu1 %v4875_v31  ;;  %v4220_v63 = vadd.f32 %v4202_v5, %v4038_v59  ;;  %v4307_v13 = vadd.f32 %v4283_v19, %v4125_v0  ;;  %v8336_v12 = vld [vmem:[%s11648_s4 + $0x44] ss:$16 sps:$4 sm:$0xff]   ;;  %v8339_v31 = vld [vmem:[%s11648_s4 + $0x4c] ss:$16 sps:$4 sm:$0xff]   ;;  %v4513_v35 = vrot.slane %v8605_v29, %v9483_v55  ;;  %v8606_v41 = vld [vmem:[%s11647_s3] sm:$0xf] }
 0x178   : > { %5470 = vmatpush1.bf16.msra.mxu0 %v8304_v9  ;;  %5513 = vmatpush1.bf16.msra.mxu1 %v8307_v22  ;;  %v4311_v9 = vadd.f32 %v4293_v20, %v4129_v36  ;;  %v4374_v22 = vsel %vm3913_vm5, %v4372_v56, %v4373_v30  ;;  %v4465_v33 = vsel %vm3913_vm5, %v4463_v7, %v4464_v61  ;;  %v8345_v60 = vld [vmem:[%s11648_s4 + $0x2c] ss:$16 sps:$4 sm:$0xff]   ;;  %v8340_v51 = vld [vmem:[%s11648_s4 + $0x20] ss:$16 sps:$4 sm:$0xff]  }
 0x179   : > { %5471 = vmatprep.subr.bf16.mxu0 %v8312_v1  ;;  %5514 = vmatprep.subr.bf16.mxu1 %v8315_v28  ;;  %v4384_v1 = vsel %vm3913_vm5, %v4373_v30, %v4383_v6  ;;  %v4475_v4 = vsel %vm3913_vm5, %v4464_v61, %v4474_v8  ;;  %v4398_v62 = vadd.f32 %v4374_v22, %v4216_v10  ;;  %v8351_v45 = vld [vmem:[%s11648_s4 + $0xc] ss:$16 sps:$4 sm:$0xff]   ;;  %v8346_v52 = vld [vmem:[%s11648_s4] ss:$16 sps:$4 sm:$0xff]  }
 0x17a   : > { %5501 = vmatprep.mubr.bf16.mxu0 %v8742_v2  ;;  %5544 = vmatprep.mubr.bf16.mxu1 %v8742_v2  ;;  %v4402_v21 = vadd.f32 %v4384_v1, %v4220_v63  ;;  %v4489_v28 = vadd.f32 %v4465_v33, %v4307_v13  ;;  %v4493_v3 = vadd.f32 %v4475_v4, %v4311_v9  ;;  %v8353_v59 = vld [vmem:[%s11650_s6 + $0xf8] sm:$0xff]   ;;  %v8356_v49 = vld [vmem:[%s11650_s6 + $0x70] sm:$0xff]   ;;  %v8360_v20 = vld [vmem:[%s11650_s6 + $0x68] sm:$0xff]  }
 0x17b   : > { %v4543_v47 = vrot.slane %v8606_v41, %v9483_v55  ;;  %v8354_v0 = vld [vmem:[%s11650_s6 + $0x38] sm:$0xff]   ;;  %v8357_v5 = vld [vmem:[%s11650_s6 + $0xf0] sm:$0xff]   ;;  %v8361_v56 = vld [vmem:[%s11650_s6 + $0xe8] sm:$0xff]  }
 0x17c   : > { %5472 = vmatpush1.bf16.msra.mxu0 %v8310_v48  ;;  %5515 = vmatpush1.bf16.msra.mxu1 %v8313_v44  ;;  %v4497_v39 = vadd.f32 %v4489_v28, %v4398_v62  ;;  %v4501_v34 = vadd.f32 %v4493_v3, %v4402_v21  ;;  %v8343_v48 = vld [vmem:[%s11648_s4 + $0x28] ss:$16 sps:$4 sm:$0xff]   ;;  %v8348_v44 = vld [vmem:[%s11648_s4 + $0x4] ss:$16 sps:$4 sm:$0xff]  }
 0x17d   : > { %5473 = vmatprep.subr.bf16.mxu0 %v8318_v43  ;;  %5516 = vmatprep.subr.bf16.mxu1 %v8321_v54  ;;  %v8349_v43 = vld [vmem:[%s11648_s4 + $0x8] ss:$16 sps:$4 sm:$0xff]   ;;  %v8359_v19 = vld [vmem:[%s11650_s6 + $0xb0] sm:$0xff]   ;;  %v8364_v6 = vld [vmem:[%s11650_s6 + $0x60] sm:$0xff]  }
 0x17e   : > { %v4527_v32 = vmul.f32 %v4513_v35, %v4497_v39  ;;  %v4531_v40 = vmul.f32 %v4513_v35, %v4501_v34  ;;  %v8355_v36 = vld [vmem:[%s11650_s6 + $0xb8] sm:$0xff]   ;;  %v8362_v30 = vld [vmem:[%s11650_s6 + $0x28] sm:$0xff]   ;;  %v8365_v7 = vld [vmem:[%s11650_s6 + $0xe0] sm:$0xff]  }
 0x17f   : > { %v8366_v61 = vld [vmem:[%s11650_s6 + $0x20] sm:$0xff]   ;;  %v8370_v10 = vld [vmem:[%s11650_s6 + $0x18] sm:$0xff]   ;;  %v8372_v13 = vld [vmem:[%s11650_s6 + $0x50] sm:$0xff]  }
 0x180   : > { %5474 = vmatpush1.bf16.msra.mxu0 %v8316_v23  ;;  %5517 = vmatpush1.bf16.msra.mxu1 %v8319_v38  ;;  %v4557_v46 = vadd.f32 %v4543_v47, %v4527_v32  ;;  %v4561_v50 = vadd.f32 %v4543_v47, %v4531_v40  ;;  %v8358_v23 = vld [vmem:[%s11650_s6 + $0x30] sm:$0xff]   ;;  %v8363_v38 = vld [vmem:[%s11650_s6 + $0xa8] sm:$0xff]   ;;  %v8367_v8 = vld [vmem:[%s11650_s6 + $0xa0] sm:$0xff]  }
 0x181   : > { %5475 = vmatprep.subr.bf16.mxu0 %v8324_v11  ;;  %5518 = vmatprep.subr.bf16.mxu1 %v8327_v26  ;;  %v8368_v11 = vld [vmem:[%s11650_s6 + $0x58] sm:$0xff]   ;;  %v8373_v9 = vld [vmem:[%s11650_s6 + $0xd0] sm:$0xff]   ;;  %v8377_v1 = vld [vmem:[%s11650_s6 + $0xc8] sm:$0xff]  }
 0x182   : > { %v5254_v54 = vpack.c.bf16 %v4561_v50, %v4557_v46  ;;  %v8369_v26 = vld [vmem:[%s11650_s6 + $0xd8] sm:$0xff]   ;;  %v8374_v22 = vld [vmem:[%s11650_s6 + $0x10] sm:$0xff]   ;;  %v8378_v33 = vld [vmem:[%s11650_s6 + $0x8] sm:$0xff]  }
 0x183   : > { %v8371_v63 = vld [vmem:[%s11650_s6 + $0x98] sm:$0xff]   ;;  %v8379_v4 = vld [vmem:[%s11650_s6 + $0x88] sm:$0xff]   ;;  %v8382_v62 = vld [vmem:[%s11650_s6] sm:$0xff]  }
 0x184   : > { %5476 = vmatpush1.bf16.msra.mxu0 %v8322_v14  ;;  %5519 = vmatpush1.bf16.msra.mxu1 %v8325_v16  ;;  %v8375_v14 = vld [vmem:[%s11650_s6 + $0x90] sm:$0xff]   ;;  %v8376_v16 = vld [vmem:[%s11650_s6 + $0x48] sm:$0xff]   ;;  %v8383_v21 = vld [vmem:[%s11650_s6 + $0x80] sm:$0xff]  }
 0x185   : > { %5477 = vmatprep.subr.bf16.mxu0 %v8330_v17  ;;  %5520 = vmatprep.subr.bf16.mxu1 %v8333_v18  ;;  %v8380_v17 = vld [vmem:[%s11650_s6 + $0x40] sm:$0xff]   ;;  %v336_v28 = vld [vmem:[%s8881_s20 + $0x10] sm:$0xff]  ;;  %v8389_v39 = vld [vmem:[%s11648_s4 + $0xec] ss:$16 sps:$4 sm:$0xff]  }
 0x186   : > { %v8381_v18 = vld [vmem:[%s11650_s6 + $0xc0] sm:$0xff]   ;;  %v7398_v34 = vld [vmem:[%s8881_s20 + $0xd0] sm:$0xff] }
 0x187   : > { %v8607_v3 = vld [vmem:[%s11645_s1] ss:$8 sm:$0xf]  ;;  %v8609_v35 = vld [vmem:[%s11645_s1 + $0x1] ss:$8 sm:$0xf] }
 0x188   : > { %5478 = vmatpush1.bf16.msra.mxu0 %v8328_v24  ;;  %5521 = vmatpush1.bf16.msra.mxu1 %v8331_v27  ;;  %v355_v24 = vrot.slane %v8607_v3, %v9886_v42  ;;  %v8608_v27 = vld [vmem:[%s11645_s1 + $0x2] ss:$8 sm:$0xf]  ;;  %v8611_v41 = vld [vmem:[%s11645_s1 + $0x7] ss:$8 sm:$0xf] }
 0x189   : > { %5479 = vmatprep.subr.bf16.mxu0 %v8336_v12  ;;  %5522 = vmatprep.subr.bf16.mxu1 %v8339_v31  ;;  %v451_v12 = vrot.slane %v8608_v27, %v9886_v42  ;;  %v8386_v31 = vld [vmem:[%s11648_s4 + $0xe4] ss:$16 sps:$4 sm:$0xff]   ;;  %v690_v47 = vrot.slane %v8611_v41, %v9886_v42  ;;  %v8612_v46 = vld [vmem:[%s11645_s1 + $0x20] ss:$8 sm:$0xf] }
 0x18a   : > { %v10205_v29 = vld [vmem:[%s8881_s20 + $0x30] sm:$0xff]  ;;  %v782_v50 = vrot.slane %v8612_v46, %v9886_v42 }
 0x18b   : > { %v7389_v32 = vld [vmem:[%s8881_s20 + $0x70] sm:$0xff] }
 0x18c   : > { %5480 = vmatpush1.bf16.msra.mxu0 %v8334_v37  ;;  %5523 = vmatpush1.bf16.msra.mxu1 %v8337_v15  ;;  %v403_v37 = vrot.slane %v8609_v35, %v9886_v42  ;;  %v10212_v15 = vld [vmem:[%s8881_s20 + $0xf0] sm:$0xff] }
 0x18d   : > { %5481 = vmatprep.subr.bf16.mxu0 %v8342_v53  ;;  %5524 = vmatprep.subr.bf16.mxu1 %v8345_v60  ;;  %v8610_v53 = vld [vmem:[%s11645_s1 + $0x3] ss:$8 sm:$0xf]  ;;  %v8617_v35 = vld [vmem:[%s11645_s1 + $0x22] ss:$8 sm:$0xf] }
 0x18e   : > { %v499_v60 = vrot.slane %v8610_v53, %v9886_v42  ;;  %v7407_v40 = vld [vmem:[%s8881_s20 + $0x130] sm:$0xff] }
 0x18f   : > { %v7453_v27 = vld [vmem:[%s8881_s20 + $0xd0] sm:$0xfe] }
 0x190   : > { %5482 = vmatpush1.bf16.msra.mxu0 %v8340_v51  ;;  %5525 = vmatpush1.bf16.msra.mxu1 %v8343_v48  ;;  %v366_v51 = vmul.f32 %v355_v24, %v336_v28  ;;  %v10225_v48 = vld [vmem:[%s8881_s20 + $0x90] sm:$0xff] }
 0x191   : > { %5483 = vmatprep.subr.bf16.mxu0 %v8348_v44  ;;  %5526 = vmatprep.subr.bf16.mxu1 %v8351_v45  ;;  %v462_v44 = vmul.f32 %v7398_v34, %v451_v12  ;;  %v10228_v45 = vld [vmem:[%s8881_s20 + $0x150] sm:$0xff] }
 0x192   : > { %v7457_v34 = vld [vmem:[%s8881_s20 + $0x110] sm:$0x1]  ;;  %v7462_v41 = vld [vmem:[%s8881_s20 + $0x130] sm:$0xfe] }
 0x194   : > { %5484 = vmatpush1.bf16.msra.mxu0 %v8346_v52  ;;  %5527 = vmatpush1.bf16.msra.mxu1 %v8349_v43  ;;  %v370_v52 = vmul.f32 %v355_v24, %v10205_v29  ;;  %v466_v43 = vmul.f32 %v10212_v15, %v451_v12 }
 0x195   : > { %8082 = vmatprep.subr.bf16.mxu0 %v8352_v57  ;;  %8104 = vmatprep.subr.bf16.mxu1 %v8353_v59  ;;  %v414_v59 = vmul.f32 %v7389_v32, %v403_v37 }
 0x197   : > { %5502 = vmatmul.mubr.bf16.vlgmr.msra.gmra.mxu0 %v5254_v54  ;;  %5545 = vmatmul.mubr.bf16.vlgmr.msra.gmra.mxu1 %v5254_v54  ;;  %v8613_v54 = vld [vmem:[%s11645_s1 + $0x4] ss:$8 sm:$0xf] }
 0x198   : > { %8083 = vmatpush3.bf16.msra.mxu0 %v8354_v0  ;;  %8105 = vmatpush3.bf16.msra.mxu1 %v8355_v36  ;;  %v547_v57 = vrot.slane %v8613_v54, %v9886_v42  ;;  %v510_v0 = vmul.f32 %v7407_v40, %v499_v60  ;;  %v7416_v36 = vld [vmem:[%s8881_s20 + $0x190] sm:$0xff] }
 0x199   : > { %8084 = vmatprep.subr.bf16.mxu0 %v8356_v49  ;;  %8106 = vmatprep.subr.bf16.mxu1 %v8357_v5  ;;  %v10242_v49 = vld [vmem:[%s8881_s20 + $0x1b0] sm:$0xff]  ;;  %v418_v5 = vmul.f32 %v10225_v48, %v403_v37  ;;  %v964_v37 = vrot.slane %v8617_v35, %v9886_v42 }
 0x19c   : > { %8085 = vmatpush3.bf16.msra.mxu0 %v8358_v23  ;;  %8107 = vmatpush3.bf16.msra.mxu1 %v8359_v19  ;;  %v514_v23 = vmul.f32 %v10228_v45, %v499_v60  ;;  %v8614_v19 = vld [vmem:[%s11645_s1 + $0x5] ss:$8 sm:$0xf] }
 0x19d   : > { %8086 = vmatprep.subr.bf16.mxu0 %v8360_v20  ;;  %8108 = vmatprep.subr.bf16.mxu1 %v8361_v56  ;;  %v595_v20 = vrot.slane %v8614_v19, %v9886_v42  ;;  %v670_v56 = vld [vmem:[%s8881_s20 + $0x10] sm:$0xfe] }
 0x19e   : > { %v8619_v19 = vld [vmem:[%s11645_s1 + $0x24] ss:$8 sm:$0xf] }
 0x1a0   : > { %8087 = vmatpush3.bf16.msra.mxu0 %v8362_v30  ;;  %8109 = vmatpush3.bf16.msra.mxu1 %v8363_v38  ;;  %v674_v30 = vld [vmem:[%s8881_s20 + $0x50] sm:$0x1]  ;;  %v705_v38 = vmul.f32 %v690_v47, %v10205_v29 }
 0x1a1   : > { %8088 = vmatprep.subr.bf16.mxu0 %v8364_v6  ;;  %8110 = vmatprep.subr.bf16.mxu1 %v8365_v7  ;;  %v7444_v6 = vld [vmem:[%s8881_s20 + $0x70] sm:$0xfe]  ;;  %v470_v7 = vadd.f32 %v462_v44, %v366_v51 }
 0x1a2   : > { %v731_v3 = vrot.slane %v705_v38, 1 }
 0x1a4   : > { %8089 = vmatpush3.bf16.msra.mxu0 %v8366_v61  ;;  %8111 = vmatpush3.bf16.msra.mxu1 %v8367_v8  ;;  %v7425_v61 = vld [vmem:[%s8881_s20 + $0x1f0] sm:$0xff] }
 0x1a5   : > { %8090 = vmatprep.subr.bf16.mxu0 %v8368_v11  ;;  %8112 = vmatprep.subr.bf16.mxu1 %v8369_v26  ;;  %v8615_v8 = vld [vmem:[%s11645_s1 + $0x6] ss:$8 sm:$0xf]  ;;  %v7448_v26 = vld [vmem:[%s8881_s20 + $0xb0] sm:$0x1]  ;;  %v606_v28 = vmul.f32 %v7425_v61, %v595_v20 }
 0x1a6   : > { %v643_v11 = vrot.slane %v8615_v8, %v9886_v42  ;;  %v801_v24 = vmul.f32 %v7448_v26, %v782_v50  ;;  %v7480_v61 = vld [vmem:[%s8881_s20 + $0x1f0] sm:$0xfe] }
 0x1a8   : > { %8091 = vmatpush3.bf16.msra.mxu0 %v8370_v10  ;;  %8113 = vmatpush3.bf16.msra.mxu1 %v8371_v63  ;;  %v797_v10 = vmul.f32 %v10225_v48, %v782_v50  ;;  %v474_v63 = vadd.f32 %v466_v43, %v370_v52  ;;  %v831_v43 = vrot.slane %v801_v24, 1 }
 0x1a9   : > { %8092 = vmatprep.subr.bf16.mxu0 %v8372_v13  ;;  %8114 = vmatprep.subr.bf16.mxu1 %v8373_v9  ;;  %v558_v13 = vmul.f32 %v7416_v36, %v547_v57  ;;  %v562_v9 = vmul.f32 %v10242_v49, %v547_v57  ;;  %v8618_v57 = vld [vmem:[%s11645_s1 + $0x23] ss:$8 sm:$0xf]  ;;  %v975_v36 = vmul.f32 %v7462_v41, %v964_v37 }
 0x1ab   : > { %v566_v53 = vadd.f32 %v558_v13, %v470_v7  ;;  %v570_v60 = vadd.f32 %v562_v9, %v474_v63  ;;  %v7475_v7 = vld [vmem:[%s8881_s20 + $0x1d0] sm:$0x1] }
 0x1ac   : > { %8093 = vmatpush3.bf16.msra.mxu0 %v8374_v22  ;;  %8115 = vmatpush3.bf16.msra.mxu1 %v8375_v14  ;;  %v10263_v22 = vld [vmem:[%s8881_s20 + $0x210] sm:$0xff] }
 0x1ad   : > { %8094 = vmatprep.subr.bf16.mxu0 %v8376_v16  ;;  %8116 = vmatprep.subr.bf16.mxu1 %v8377_v1  ;;  %v7434_v14 = vld [vmem:[%s8881_s20 + $0x250] sm:$0xff]  ;;  %v610_v12 = vmul.f32 %v10263_v22, %v595_v20  ;;  %v1146_v20 = vrot.slane %v8619_v19, %v9886_v42 }
 0x1ae   : > { %v8616_v16 = vld [vmem:[%s11645_s1 + $0x21] ss:$8 sm:$0xf]  ;;  %v7484_v63 = vld [vmem:[%s8881_s20 + $0x230] sm:$0x1] }
 0x1af   : > { %v873_v1 = vrot.slane %v8616_v16, %v9886_v42  ;;  %v7499_v19 = vld [vmem:[%s8881_s20 + $0x70] sm:$0xfc] }
 0x1b0   : > { %8095 = vmatpush3.bf16.msra.mxu0 %v8378_v33  ;;  %8117 = vmatpush3.bf16.msra.mxu1 %v8379_v4  ;;  %v518_v33 = vadd.f32 %v510_v0, %v414_v59  ;;  %v10271_v4 = vld [vmem:[%s8881_s20 + $0x270] sm:$0xff]  ;;  %v1055_v59 = vrot.slane %v8618_v57, %v9886_v42 }
 0x1b1   : > { %8096 = vmatprep.subr.bf16.mxu0 %v8380_v17  ;;  %8118 = vmatprep.subr.bf16.mxu1 %v8381_v18  ;;  %v701_v17 = vmul.f32 %v690_v47, %v670_v56  ;;  %v709_v18 = vmul.f32 %v690_v47, %v674_v30  ;;  %v658_v32 = vmul.f32 %v10271_v4, %v643_v11  ;;  %v8622_v57 = vld [vmem:[%s11645_s1 + $0x27] ss:$8 sm:$0xf] }
 0x1b2   : > { %v888_v40 = vmul.f32 %v10212_v15, %v873_v1  ;;  %v884_v46 = vmul.f32 %v7453_v27, %v873_v1  ;;  %v614_v52 = vadd.f32 %v606_v28, %v518_v33  ;;  %v892_v54 = vmul.f32 %v7457_v34, %v873_v1 }
 0x1b3   : > { %v730_v47 = vrot.slane %v701_v17, 1  ;;  %v740_v51 = vrot.slane %v709_v18, 1  ;;  %v666_v30 = vadd.f32 %v658_v32, %v570_v60  ;;  %v1070_v16 = vmul.f32 %v10242_v49, %v1055_v59  ;;  %v7493_v60 = vld [vmem:[%s8881_s20 + $0x290] sm:$0x1]  ;;  %v1308_v32 = vld [vmem:[%s8881_s20 + $0x10] sm:$0xfc] }
 0x1b4   : > { %8097 = vmatpush3.bf16.msra.mxu0 %v8382_v62  ;;  %8119 = vmatpush3.bf16.msra.mxu1 %v8383_v21  ;;  %v793_v62 = vmul.f32 %v7444_v6, %v782_v50  ;;  %v522_v21 = vadd.f32 %v514_v23, %v418_v5  ;;  %v7466_v50 = vld [vmem:[%s8881_s20 + $0x170] sm:$0x1]  ;;  %v979_v5 = vmul.f32 %v10228_v45, %v964_v37  ;;  %v7471_v23 = vld [vmem:[%s8881_s20 + $0x190] sm:$0xfe]  ;;  %v913_v38 = vrot.slane %v888_v40, 1 }
 0x1b5   : > { %6159 = vmatprep.subr.bf16.mxu0 %v8386_v31  ;;  %6202 = vmatprep.subr.bf16.mxu1 %v8389_v39  ;;  %v654_v31 = vmul.f32 %v7434_v14, %v643_v11  ;;  %v822_v39 = vrot.slane %v797_v10, 1  ;;  %v983_v6 = vmul.f32 %v7466_v50, %v964_v37  ;;  %v732_v8 = vsel %vm723_vm0, %v730_v47, %v731_v3  ;;  %v8621_v40 = vld [vmem:[%s11645_s1 + $0x26] ss:$8 sm:$0xf]  ;;  %v1312_v50 = vld [vmem:[%s8881_s20 + $0x50] sm:$0x3] }
 0x1b6   : > { %v821_v44 = vrot.slane %v793_v62, 1  ;;  %v618_v0 = vadd.f32 %v610_v12, %v522_v21  ;;  %v741_v11 = vsel %vm723_vm0, %v731_v3, %v740_v51  ;;  %v912_v10 = vrot.slane %v884_v46, 1 }
 0x1b7   : > { %v662_v56 = vadd.f32 %v654_v31, %v566_v53  ;;  %v832_v13 = vsel %vm723_vm0, %v822_v39, %v831_v43  ;;  %v922_v9 = vrot.slane %v892_v54, 1  ;;  %v1066_v14 = vmul.f32 %v7471_v23, %v1055_v59  ;;  %v7489_v31 = vld [vmem:[%s8881_s20 + $0x250] sm:$0xfe] }
 0x1b8   : > { %v823_v26 = vsel %vm723_vm0, %v821_v44, %v822_v39  ;;  %v1003_v1 = vrot.slane %v975_v36, 1  ;;  %v1004_v33 = vrot.slane %v979_v5, 1  ;;  %v1074_v17 = vmul.f32 %v7475_v7, %v1055_v59  ;;  %v8620_v39 = vld [vmem:[%s11645_s1 + $0x25] ss:$8 sm:$0xf] }
 0x1b9   : > { %v1157_v18 = vmul.f32 %v7480_v61, %v1146_v20  ;;  %v754_v62 = vadd.f32 %v732_v8, %v614_v52  ;;  %v1013_v21 = vrot.slane %v983_v6, 1  ;;  %v1161_v28 = vmul.f32 %v10263_v22, %v1146_v20  ;;  %v7503_v8 = vld [vmem:[%s8881_s20 + $0xb0] sm:$0x3] }
 0x1ba   : > { %v1165_v3 = vmul.f32 %v7484_v63, %v1146_v20  ;;  %v758_v24 = vadd.f32 %v741_v11, %v618_v0  ;;  %v845_v27 = vadd.f32 %v823_v26, %v662_v56  ;;  %v849_v12 = vadd.f32 %v832_v13, %v666_v30  ;;  %v8623_v11 = vld [vmem:[%s11645_s1 + $0x40] ss:$8 sm:$0xf] }
 0x1bb   : > { %v1237_v34 = vrot.slane %v8620_v39, %v9886_v42  ;;  %v914_v35 = vsel %vm723_vm0, %v912_v10, %v913_v38  ;;  %v923_v37 = vsel %vm723_vm0, %v913_v38, %v922_v9  ;;  %v1094_v53 = vrot.slane %v1066_v14, 1  ;;  %v7508_v14 = vld [vmem:[%s8881_s20 + $0xd0] sm:$0xfc] }
 0x1bc   : > { %v1328_v41 = vrot.slane %v8621_v40, %v9886_v42  ;;  %v1005_v47 = vsel %vm723_vm0, %v1003_v1, %v1004_v33  ;;  %v1095_v51 = vrot.slane %v1070_v16, 1  ;;  %v1104_v44 = vrot.slane %v1074_v17, 1 }
 0x1bd   : > { %v1185_v46 = vrot.slane %v1157_v18, 1  ;;  %v1014_v52 = vsel %vm723_vm0, %v1004_v33, %v1013_v21  ;;  %v1186_v43 = vrot.slane %v1161_v28, 1  ;;  %v1195_v54 = vrot.slane %v1165_v3, 1  ;;  %v7512_v18 = vld [vmem:[%s8881_s20 + $0x110] sm:$0x3] }
 0x1be   : > { %v1420_v59 = vrot.slane %v8622_v57, %v9886_v42  ;;  %v936_v0 = vadd.f32 %v914_v35, %v754_v62  ;;  %v1248_v36 = vmul.f32 %v7489_v31, %v1237_v34  ;;  %v1252_v5 = vmul.f32 %v10271_v4, %v1237_v34  ;;  %v8624_v31 = vld [vmem:[%s11645_s1 + $0x41] ss:$8 sm:$0xf] }
 0x1bf   : > { %v1256_v23 = vmul.f32 %v7493_v60, %v1237_v34  ;;  %v940_v20 = vadd.f32 %v923_v37, %v758_v24  ;;  %v1339_v56 = vmul.f32 %v1328_v41, %v1308_v32  ;;  %v1343_v30 = vmul.f32 %v1328_v41, %v10205_v29  ;;  %v8625_v60 = vld [vmem:[%s11645_s1 + $0x42] ss:$8 sm:$0xf]  ;;  %v7530_v57 = vld [vmem:[%s8881_s20 + $0x1d0] sm:$0x3] }
 0x1c0   : > { %v1347_v38 = vmul.f32 %v1328_v41, %v1312_v50  ;;  %v1027_v6 = vadd.f32 %v1005_v47, %v845_v27  ;;  %v1031_v7 = vadd.f32 %v1014_v52, %v849_v12  ;;  %v1096_v61 = vsel %vm723_vm0, %v1094_v53, %v1095_v51  ;;  %v7517_v53 = vld [vmem:[%s8881_s20 + $0x130] sm:$0xfc] }
 0x1c1   : > { %v1511_v26 = vrot.slane %v8623_v11, %v9886_v42  ;;  %v1105_v10 = vsel %vm723_vm0, %v1095_v51, %v1104_v44  ;;  %v1187_v63 = vsel %vm723_vm0, %v1185_v46, %v1186_v43  ;;  %v1196_v13 = vsel %vm723_vm0, %v1186_v43, %v1195_v54  ;;  %v7521_v44 = vld [vmem:[%s8881_s20 + $0x170] sm:$0x3]  ;;  %v7526_v46 = vld [vmem:[%s8881_s20 + $0x190] sm:$0xfc] }
 0x1c2   : > { %v1431_v9 = vmul.f32 %v7499_v19, %v1420_v59  ;;  %v1276_v16 = vrot.slane %v1248_v36, 1  ;;  %v1277_v1 = vrot.slane %v1252_v5, 1  ;;  %v1286_v33 = vrot.slane %v1256_v23, 1 }
 0x1c3   : > { %v1435_v17 = vmul.f32 %v10225_v48, %v1420_v59  ;;  %v1368_v62 = vrot.slane %v1339_v56, 2  ;;  %v1369_v21 = vrot.slane %v1343_v30, 2  ;;  %v1378_v28 = vrot.slane %v1347_v38, 2 }
 0x1c4   : > { %v1439_v3 = vmul.f32 %v7503_v8, %v1420_v59  ;;  %v1118_v24 = vadd.f32 %v1096_v61, %v936_v0  ;;  %v1522_v27 = vmul.f32 %v7508_v14, %v1511_v26  ;;  %v1526_v12 = vmul.f32 %v10212_v15, %v1511_v26 }
 0x1c5   : > { %v1602_v39 = vrot.slane %v8624_v31, %v9886_v42  ;;  %v1122_v34 = vadd.f32 %v1105_v10, %v940_v20  ;;  %v1209_v35 = vadd.f32 %v1187_v63, %v1027_v6  ;;  %v1530_v37 = vmul.f32 %v7512_v18, %v1511_v26  ;;  %v7535_v10 = vld [vmem:[%s8881_s20 + $0x1f0] sm:$0xfc]  ;;  %v7539_v63 = vld [vmem:[%s8881_s20 + $0x230] sm:$0x3] }
 0x1c6   : > { %v1693_v32 = vrot.slane %v8625_v60, %v9886_v42  ;;  %v1213_v40 = vadd.f32 %v1196_v13, %v1031_v7  ;;  %v1278_v41 = vsel %vm723_vm0, %v1276_v16, %v1277_v1  ;;  %v1287_v47 = vsel %vm723_vm0, %v1277_v1, %v1286_v33  ;;  %v8626_v7 = vld [vmem:[%s11645_s1 + $0x43] ss:$8 sm:$0xf]  ;;  %v8627_v13 = vld [vmem:[%s11645_s1 + $0x44] ss:$8 sm:$0xf] }
 0x1c7   : > { %v1459_v51 = vrot.slane %v1431_v9, 2  ;;  %v1370_v50 = vsel %vm1361_vm1, %v1368_v62, %v1369_v21  ;;  %v1379_v52 = vsel %vm1361_vm1, %v1369_v21, %v1378_v28  ;;  %v1460_v43 = vrot.slane %v1435_v17, 2  ;;  %v7544_v17 = vld [vmem:[%s8881_s20 + $0x250] sm:$0xfc] }
 0x1c8   : > { %v1469_v54 = vrot.slane %v1439_v3, 2  ;;  %v1550_v59 = vrot.slane %v1522_v27, 2  ;;  %v1551_v0 = vrot.slane %v1526_v12, 2  ;;  %v1613_v36 = vmul.f32 %v7517_v53, %v1602_v39  ;;  %v7548_v3 = vld [vmem:[%s8881_s20 + $0x290] sm:$0x3] }
 0x1c9   : > { %v1617_v5 = vmul.f32 %v10228_v45, %v1602_v39  ;;  %v1560_v23 = vrot.slane %v1530_v37, 2  ;;  %v1621_v19 = vmul.f32 %v7521_v44, %v1602_v39  ;;  %v1704_v20 = vmul.f32 %v7526_v46, %v1693_v32  ;;  %v8628_v37 = vld [vmem:[%s11645_s1 + $0x45] ss:$8 sm:$0xf] }
 0x1ca   : > { %v1708_v56 = vmul.f32 %v10242_v49, %v1693_v32  ;;  %v1300_v30 = vadd.f32 %v1278_v41, %v1118_v24  ;;  %v1304_v38 = vadd.f32 %v1287_v47, %v1122_v34  ;;  %v1712_v6 = vmul.f32 %v7530_v57, %v1693_v32  ;;  %v1946_v47 = vld [vmem:[%s8881_s20 + $0x10] sm:$0xf8] }
 0x1cb   : > { %v1784_v61 = vrot.slane %v8626_v7, %v9886_v42  ;;  %v1392_v8 = vadd.f32 %v1370_v50, %v1209_v35  ;;  %v1396_v11 = vadd.f32 %v1379_v52, %v1213_v40  ;;  %v1461_v26 = vsel %vm1361_vm1, %v1459_v51, %v1460_v43  ;;  %v1950_v50 = vld [vmem:[%s8881_s20 + $0x50] sm:$0x7]  ;;  %v7554_v52 = vld [vmem:[%s8881_s20 + $0x70] sm:$0xf8] }
 0x1cc   : > { %v1875_v9 = vrot.slane %v8627_v13, %v9886_v42  ;;  %v1470_v14 = vsel %vm1361_vm1, %v1460_v43, %v1469_v54  ;;  %v1552_v16 = vsel %vm1361_vm1, %v1550_v59, %v1551_v0  ;;  %v1641_v1 = vrot.slane %v1613_v36, 2  ;;  %v8629_v43 = vld [vmem:[%s11645_s1 + $0x46] ss:$8 sm:$0xf] }
 0x1cd   : > { %v1642_v33 = vrot.slane %v1617_v5, 2  ;;  %v1561_v18 = vsel %vm1361_vm1, %v1551_v0, %v1560_v23  ;;  %v1651_v62 = vrot.slane %v1621_v19, 2  ;;  %v1732_v21 = vrot.slane %v1704_v20, 2  ;;  %v7558_v5 = vld [vmem:[%s8881_s20 + $0xb0] sm:$0x7] }
 0x1ce   : > { %v1733_v28 = vrot.slane %v1708_v56, 2  ;;  %v1742_v24 = vrot.slane %v1712_v6, 2  ;;  %v1795_v27 = vmul.f32 %v7535_v10, %v1784_v61  ;;  %v1799_v12 = vmul.f32 %v10263_v22, %v1784_v61  ;;  %v8630_v7 = vld [vmem:[%s11645_s1 + $0x47] ss:$8 sm:$0xf] }
 0x1cf   : > { %v1803_v31 = vmul.f32 %v7539_v63, %v1784_v61  ;;  %v1483_v39 = vadd.f32 %v1461_v26, %v1300_v30  ;;  %v1886_v34 = vmul.f32 %v7544_v17, %v1875_v9  ;;  %v1890_v35 = vmul.f32 %v10271_v4, %v1875_v9  ;;  %v7563_v63 = vld [vmem:[%s8881_s20 + $0xd0] sm:$0xf8] }
 0x1d0   : > { %v1966_v53 = vrot.slane %v8628_v37, %v9886_v42  ;;  %v1487_v60 = vadd.f32 %v1470_v14, %v1304_v38  ;;  %v1574_v32 = vadd.f32 %v1552_v16, %v1392_v8  ;;  %v1578_v40 = vadd.f32 %v1561_v18, %v1396_v11  ;;  %v7567_v16 = vld [vmem:[%s8881_s20 + $0x110] sm:$0x7] }
 0x1d1   : > { %v1894_v41 = vmul.f32 %v7548_v3, %v1875_v9  ;;  %v1643_v51 = vsel %vm1361_vm1, %v1641_v1, %v1642_v33  ;;  %v1652_v44 = vsel %vm1361_vm1, %v1642_v33, %v1651_v62  ;;  %v1734_v46 = vsel %vm1361_vm1, %v1732_v21, %v1733_v28  ;;  %v8631_v1 = vld [vmem:[%s11645_s1 + $0x60] ss:$8 sm:$0xf] }
 0x1d2   : > { %v2058_v54 = vrot.slane %v8629_v43, %v9886_v42  ;;  %v1743_v57 = vsel %vm1361_vm1, %v1733_v28, %v1742_v24  ;;  %v1823_v59 = vrot.slane %v1795_v27, 2  ;;  %v1824_v0 = vrot.slane %v1799_v12, 2  ;;  %v7572_v28 = vld [vmem:[%s8881_s20 + $0x130] sm:$0xf8] }
 0x1d3   : > { %v1833_v36 = vrot.slane %v1803_v31, 2  ;;  %v1914_v23 = vrot.slane %v1886_v34, 2  ;;  %v1915_v19 = vrot.slane %v1890_v35, 2  ;;  %v1977_v20 = vmul.f32 %v1966_v53, %v1946_v47  ;;  %v7576_v31 = vld [vmem:[%s8881_s20 + $0x170] sm:$0x7] }
 0x1d4   : > { %v1981_v56 = vmul.f32 %v1966_v53, %v10205_v29  ;;  %v1665_v30 = vadd.f32 %v1643_v51, %v1483_v39  ;;  %v1924_v38 = vrot.slane %v1894_v41, 2  ;;  %v1985_v6 = vmul.f32 %v1966_v53, %v1950_v50  ;;  %v7585_v50 = vld [vmem:[%s8881_s20 + $0x1d0] sm:$0x7] }
 0x1d5   : > { %v2149_v61 = vrot.slane %v8630_v7, %v9886_v42  ;;  %v1669_v8 = vadd.f32 %v1652_v44, %v1487_v60  ;;  %v2069_v11 = vmul.f32 %v7554_v52, %v2058_v54  ;;  %v2073_v26 = vmul.f32 %v10225_v48, %v2058_v54  ;;  %v8633_v52 = vld [vmem:[%s11645_s1 + $0x62] ss:$8 sm:$0xf] }
 0x1d6   : > { %v2077_v10 = vmul.f32 %v7558_v5, %v2058_v54  ;;  %v1756_v13 = vadd.f32 %v1734_v46, %v1574_v32  ;;  %v1760_v9 = vadd.f32 %v1743_v57, %v1578_v40  ;;  %v1825_v14 = vsel %vm1361_vm1, %v1823_v59, %v1824_v0  ;;  %v8632_v40 = vld [vmem:[%s11645_s1 + $0x61] ss:$8 sm:$0xf]  ;;  %v7581_v46 = vld [vmem:[%s8881_s20 + $0x190] sm:$0xf8] }
 0x1d7   : > { %v2240_v33 = vrot.slane %v8631_v1, %v9886_v42  ;;  %v1834_v17 = vsel %vm1361_vm1, %v1824_v0, %v1833_v36  ;;  %v1916_v18 = vsel %vm1361_vm1, %v1914_v23, %v1915_v19  ;;  %v2006_v62 = vrot.slane %v1977_v20, 3  ;;  %v7590_v36 = vld [vmem:[%s8881_s20 + $0x1f0] sm:$0xf8] }
 0x1d8   : > { %v2007_v21 = vrot.slane %v1981_v56, 3  ;;  %v1925_v3 = vsel %vm1361_vm1, %v1915_v19, %v1924_v38  ;;  %v2016_v24 = vrot.slane %v1985_v6, 3  ;;  %v2160_v27 = vmul.f32 %v7563_v63, %v2149_v61  ;;  %v7594_v56 = vld [vmem:[%s8881_s20 + $0x230] sm:$0x7] }
 0x1d9   : > { %v2164_v12 = vmul.f32 %v10212_v15, %v2149_v61  ;;  %v2097_v39 = vrot.slane %v2069_v11, 3  ;;  %v2098_v34 = vrot.slane %v2073_v26, 3  ;;  %v2107_v35 = vrot.slane %v2077_v10, 3 }
 0x1da   : > { %v2168_v37 = vmul.f32 %v7567_v16, %v2149_v61  ;;  %v1847_v53 = vadd.f32 %v1825_v14, %v1665_v30  ;;  %v1851_v60 = vadd.f32 %v1834_v17, %v1669_v8  ;;  %v2251_v32 = vmul.f32 %v7572_v28, %v2240_v33  ;;  %v7599_v17 = vld [vmem:[%s8881_s20 + $0x250] sm:$0xf8] }
 0x1db   : > { %v2331_v41 = vrot.slane %v8632_v40, %v9886_v42  ;;  %v1938_v47 = vadd.f32 %v1916_v18, %v1756_v13  ;;  %v2255_v51 = vmul.f32 %v10228_v45, %v2240_v33  ;;  %v2259_v44 = vmul.f32 %v7576_v31, %v2240_v33  ;;  %v7603_v18 = vld [vmem:[%s8881_s20 + $0x290] sm:$0x7] }
 0x1dc   : > { %v2422_v43 = vrot.slane %v8633_v52, %v9886_v42  ;;  %v1942_v54 = vadd.f32 %v1925_v3, %v1760_v9  ;;  %v2008_v57 = vsel %vm1999_vm2, %v2006_v62, %v2007_v21  ;;  %v2017_v59 = vsel %vm1999_vm2, %v2007_v21, %v2016_v24  ;;  %v8634_v9 = vld [vmem:[%s11645_s1 + $0x63] ss:$8 sm:$0xf]  ;;  %v8635_v62 = vld [vmem:[%s11645_s1 + $0x64] ss:$8 sm:$0xf] }
 0x1dd   : > { %v2188_v0 = vrot.slane %v2160_v27, 3  ;;  %v2099_v5 = vsel %vm1999_vm2, %v2097_v39, %v2098_v34  ;;  %v2108_v23 = vsel %vm1999_vm2, %v2098_v34, %v2107_v35  ;;  %v2189_v19 = vrot.slane %v2164_v12, 3  ;;  %v2584_v12 = vld [vmem:[%s8881_s20 + $0x10] sm:$0xf0] }
 0x1de   : > { %v2198_v20 = vrot.slane %v2168_v37, 3  ;;  %v2279_v30 = vrot.slane %v2251_v32, 3  ;;  %v2342_v38 = vmul.f32 %v7581_v46, %v2331_v41  ;;  %v2346_v6 = vmul.f32 %v10242_v49, %v2331_v41  ;;  %v2588_v37 = vld [vmem:[%s8881_s20 + $0x50] sm:$0xf] }
 0x1df   : > { %v2350_v7 = vmul.f32 %v7585_v50, %v2331_v41  ;;  %v2280_v61 = vrot.slane %v2255_v51, 3  ;;  %v2289_v8 = vrot.slane %v2259_v44, 3  ;;  %v2433_v11 = vmul.f32 %v7590_v36, %v2422_v43  ;;  %v8636_v44 = vld [vmem:[%s11645_s1 + $0x65] ss:$8 sm:$0xf] }
 0x1e0   : > { %v2437_v26 = vmul.f32 %v10263_v22, %v2422_v43  ;;  %v2030_v10 = vadd.f32 %v2008_v57, %v1847_v53  ;;  %v2034_v63 = vadd.f32 %v2017_v59, %v1851_v60  ;;  %v2441_v13 = vmul.f32 %v7594_v56, %v2422_v43  ;;  %v7609_v57 = vld [vmem:[%s8881_s20 + $0x70] sm:$0xf0] }
 0x1e1   : > { %v2513_v14 = vrot.slane %v8634_v9, %v9886_v42  ;;  %v2121_v16 = vadd.f32 %v2099_v5, %v1938_v47  ;;  %v2125_v1 = vadd.f32 %v2108_v23, %v1942_v54  ;;  %v2190_v33 = vsel %vm1999_vm2, %v2188_v0, %v2189_v19  ;;  %v7613_v5 = vld [vmem:[%s8881_s20 + $0xb0] sm:$0xf]  ;;  %v8637_v23 = vld [vmem:[%s11645_s1 + $0x66] ss:$8 sm:$0xf] }
 0x1e2   : > { %v2604_v21 = vrot.slane %v8635_v62, %v9886_v42  ;;  %v2199_v28 = vsel %vm1999_vm2, %v2189_v19, %v2198_v20  ;;  %v2370_v3 = vrot.slane %v2342_v38, 3  ;;  %v2371_v24 = vrot.slane %v2346_v6, 3  ;;  %v7618_v6 = vld [vmem:[%s8881_s20 + $0xd0] sm:$0xf0] }
 0x1e3   : > { %v2380_v27 = vrot.slane %v2350_v7, 3  ;;  %v2281_v31 = vsel %vm1999_vm2, %v2279_v30, %v2280_v61  ;;  %v2290_v39 = vsel %vm1999_vm2, %v2280_v61, %v2289_v8  ;;  %v2461_v34 = vrot.slane %v2433_v11, 3 }
 0x1e4   : > { %v2462_v35 = vrot.slane %v2437_v26, 3  ;;  %v2471_v53 = vrot.slane %v2441_v13, 3  ;;  %v2524_v60 = vmul.f32 %v7599_v17, %v2513_v14  ;;  %v2528_v32 = vmul.f32 %v10271_v4, %v2513_v14  ;;  %v7627_v17 = vld [vmem:[%s8881_s20 + $0x130] sm:$0xf0] }
 0x1e5   : > { %v2532_v40 = vmul.f32 %v7603_v18, %v2513_v14  ;;  %v2212_v41 = vadd.f32 %v2190_v33, %v2030_v10  ;;  %v2615_v47 = vmul.f32 %v2604_v21, %v2584_v12  ;;  %v2619_v51 = vmul.f32 %v2604_v21, %v10205_v29 }
 0x1e6   : > { %v2696_v46 = vrot.slane %v8636_v44, %v9886_v42  ;;  %v2216_v50 = vadd.f32 %v2199_v28, %v2034_v63  ;;  %v2303_v52 = vadd.f32 %v2281_v31, %v2121_v16  ;;  %v2372_v43 = vsel %vm1999_vm2, %v2370_v3, %v2371_v24  ;;  %v8638_v63 = vld [vmem:[%s11645_s1 + $0x67] ss:$8 sm:$0xf]  ;;  %v7622_v16 = vld [vmem:[%s8881_s20 + $0x110] sm:$0xf] }
 0x1e7   : > { %v2623_v54 = vmul.f32 %v2604_v21, %v2588_v37  ;;  %v2307_v59 = vadd.f32 %v2290_v39, %v2125_v1  ;;  %v2381_v0 = vsel %vm1999_vm2, %v2371_v24, %v2380_v27  ;;  %v2463_v36 = vsel %vm1999_vm2, %v2461_v34, %v2462_v35  ;;  %v7631_v28 = vld [vmem:[%s8881_s20 + $0x170] sm:$0xf] }
 0x1e8   : > { %v2787_v19 = vrot.slane %v8637_v23, %v9886_v42  ;;  %v2472_v20 = vsel %vm1999_vm2, %v2462_v35, %v2471_v53  ;;  %v2552_v56 = vrot.slane %v2524_v60, 3  ;;  %v2553_v30 = vrot.slane %v2528_v32, 3  ;;  %v8639_v3 = vld [vmem:[%s11645_s1 + $0x80] ss:$8 sm:$0xf] }
 0x1e9   : > { %v2562_v38 = vrot.slane %v2532_v40, 3  ;;  %v2644_v7 = vrot.slane %v2615_v47, 4  ;;  %v2645_v61 = vrot.slane %v2619_v51, 4  ;;  %v2707_v8 = vmul.f32 %v7609_v57, %v2696_v46  ;;  %v7636_v60 = vld [vmem:[%s8881_s20 + $0x190] sm:$0xf0] }
 0x1ea   : > { %v2711_v11 = vmul.f32 %v10225_v48, %v2696_v46  ;;  %v2654_v26 = vrot.slane %v2623_v54, 4  ;;  %v2715_v10 = vmul.f32 %v7613_v5, %v2696_v46  ;;  %v2878_v13 = vrot.slane %v8638_v63, %v9886_v42  ;;  %v8641_v5 = vld [vmem:[%s11645_s1 + $0x82] ss:$8 sm:$0xf] }
 0x1eb   : > { %v2394_v9 = vadd.f32 %v2372_v43, %v2212_v41  ;;  %v2398_v14 = vadd.f32 %v2381_v0, %v2216_v50  ;;  %v2798_v1 = vmul.f32 %v7618_v6, %v2787_v19  ;;  %v2802_v33 = vmul.f32 %v10212_v15, %v2787_v19  ;;  %v7640_v50 = vld [vmem:[%s8881_s20 + $0x1d0] sm:$0xf]  ;;  %v7645_v0 = vld [vmem:[%s8881_s20 + $0x1f0] sm:$0xf0] }
 0x1ec   : > { %v2485_v18 = vadd.f32 %v2463_v36, %v2303_v52  ;;  %v2489_v62 = vadd.f32 %v2472_v20, %v2307_v59  ;;  %v2554_v21 = vsel %vm1999_vm2, %v2552_v56, %v2553_v30  ;;  %v2969_v24 = vrot.slane %v8639_v3, %v9886_v42  ;;  %v8640_v52 = vld [vmem:[%s11645_s1 + $0x81] ss:$8 sm:$0xf] }
 0x1ed   : > { %v2563_v27 = vsel %vm1999_vm2, %v2553_v30, %v2562_v38  ;;  %v2646_v12 = vsel %vm2637_vm3, %v2644_v7, %v2645_v61  ;;  %v2735_v31 = vrot.slane %v2707_v8, 4  ;;  %v2736_v39 = vrot.slane %v2711_v11, 4  ;;  %v7649_v36 = vld [vmem:[%s8881_s20 + $0x230] sm:$0xf]  ;;  %v7654_v38 = vld [vmem:[%s8881_s20 + $0x250] sm:$0xf0] }
 0x1ee   : > { %v2655_v34 = vsel %vm2637_vm3, %v2645_v61, %v2654_v26  ;;  %v2745_v35 = vrot.slane %v2715_v10, 4  ;;  %v2806_v37 = vmul.f32 %v7622_v16, %v2787_v19  ;;  %v2889_v53 = vmul.f32 %v7627_v17, %v2878_v13 }
 0x1ef   : > { %v2826_v32 = vrot.slane %v2798_v1, 4  ;;  %v2827_v40 = vrot.slane %v2802_v33, 4  ;;  %v2893_v41 = vmul.f32 %v10228_v45, %v2878_v13  ;;  %v2897_v47 = vmul.f32 %v7631_v28, %v2878_v13  ;;  %v7658_v13 = vld [vmem:[%s8881_s20 + $0x290] sm:$0xf] }
 0x1f0   : > { %v2576_v51 = vadd.f32 %v2554_v21, %v2394_v9  ;;  %v2580_v44 = vadd.f32 %v2563_v27, %v2398_v14  ;;  %v2668_v46 = vadd.f32 %v2646_v12, %v2485_v18  ;;  %v3060_v43 = vrot.slane %v8640_v52, %v9886_v42  ;;  %v3222_v12 = vld [vmem:[%s8881_s20 + $0x10] sm:$0xe0] }
 0x1f1   : > { %v2737_v54 = vsel %vm2637_vm3, %v2735_v31, %v2736_v39  ;;  %v2980_v57 = vmul.f32 %v7636_v60, %v2969_v24  ;;  %v2984_v59 = vmul.f32 %v10242_v49, %v2969_v24  ;;  %v3151_v23 = vrot.slane %v8641_v5, %v9886_v42  ;;  %v3226_v31 = vld [vmem:[%s8881_s20 + $0x50] sm:$0x1f] }
 0x1f2   : > { %v2672_v19 = vadd.f32 %v2655_v34, %v2489_v62  ;;  %v2746_v20 = vsel %vm2637_vm3, %v2736_v39, %v2745_v35  ;;  %v2836_v56 = vrot.slane %v2806_v37, 4  ;;  %v2917_v30 = vrot.slane %v2889_v53, 4  ;;  %v8642_v62 = vld [vmem:[%s11645_s1 + $0x83] ss:$8 sm:$0xf] }
 0x1f3   : > { %v2828_v6 = vsel %vm2637_vm3, %v2826_v32, %v2827_v40  ;;  %v2918_v7 = vrot.slane %v2893_v41, 4  ;;  %v2927_v61 = vrot.slane %v2897_v47, 4  ;;  %v2988_v8 = vmul.f32 %v7640_v50, %v2969_v24  ;;  %v8643_v37 = vld [vmem:[%s11645_s1 + $0x84] ss:$8 sm:$0xf] }
 0x1f4   : > { %v2759_v11 = vadd.f32 %v2737_v54, %v2576_v51  ;;  %v3071_v26 = vmul.f32 %v7645_v0, %v3060_v43  ;;  %v3075_v10 = vmul.f32 %v10263_v22, %v3060_v43  ;;  %v3079_v63 = vmul.f32 %v7649_v36, %v3060_v43  ;;  %v7664_v47 = vld [vmem:[%s8881_s20 + $0x70] sm:$0xe0]  ;;  %v7668_v54 = vld [vmem:[%s8881_s20 + $0xb0] sm:$0x1f] }
 0x1f5   : > { %v3008_v9 = vrot.slane %v2980_v57, 4  ;;  %v3009_v14 = vrot.slane %v2984_v59, 4  ;;  %v3162_v16 = vmul.f32 %v7654_v38, %v3151_v23  ;;  %v3166_v1 = vmul.f32 %v10271_v4, %v3151_v23  ;;  %v8644_v36 = vld [vmem:[%s11645_s1 + $0x85] ss:$8 sm:$0xf] }
 0x1f6   : > { %v2763_v33 = vadd.f32 %v2746_v20, %v2580_v44  ;;  %v2837_v17 = vsel %vm2637_vm3, %v2827_v40, %v2836_v56  ;;  %v2850_v18 = vadd.f32 %v2828_v6, %v2668_v46  ;;  %v3242_v21 = vrot.slane %v8642_v62, %v9886_v42 }
 0x1f7   : > { %v2919_v28 = vsel %vm2637_vm3, %v2917_v30, %v2918_v7  ;;  %v2928_v3 = vsel %vm2637_vm3, %v2918_v7, %v2927_v61  ;;  %v3018_v24 = vrot.slane %v2988_v8, 4  ;;  %v3170_v27 = vmul.f32 %v7658_v13, %v3151_v23  ;;  %v7803_v23 = vld [vmem:[%s11651_s7] ss:$0 sm:$0xff] }
 0x1f8   : > { %v3099_v39 = vrot.slane %v3071_v26, 4  ;;  %v3100_v34 = vrot.slane %v3075_v10, 4  ;;  %v3109_v35 = vrot.slane %v3079_v63, 4  ;;  %v3334_v53 = vrot.slane %v8643_v37, %v9886_v42  ;;  %v7682_v37 = vld [vmem:[%s8881_s20 + $0x130] sm:$0xe0] }
 0x1f9   : > { %v2854_v60 = vadd.f32 %v2837_v17, %v2672_v19  ;;  %v3010_v32 = vsel %vm2637_vm3, %v3008_v9, %v3009_v14  ;;  %v3190_v40 = vrot.slane %v3162_v16, 4  ;;  %v3191_v41 = vrot.slane %v3166_v1, 4  ;;  %v8645_v17 = vld [vmem:[%s11645_s1 + $0x86] ss:$8 sm:$0xf] }
 0x1fa   : > { %v2941_v46 = vadd.f32 %v2919_v28, %v2759_v11  ;;  %v3253_v50 = vmul.f32 %v3242_v21, %v3222_v12  ;;  %v3257_v52 = vmul.f32 %v3242_v21, %v10205_v29  ;;  %v3261_v43 = vmul.f32 %v3242_v21, %v3226_v31  ;;  %v7677_v12 = vld [vmem:[%s8881_s20 + $0x110] sm:$0x1f] }
 0x1fb   : > { %v2945_v57 = vadd.f32 %v2928_v3, %v2763_v33  ;;  %v3019_v59 = vsel %vm2637_vm3, %v3009_v14, %v3018_v24  ;;  %v3200_v0 = vrot.slane %v3170_v27, 4  ;;  %v3425_v5 = vrot.slane %v8644_v36, %v9886_v42  ;;  %v7673_v33 = vld [vmem:[%s8881_s20 + $0xd0] sm:$0xe0] }
 0x1fc   : > { %v3032_v56 = vadd.f32 %v3010_v32, %v2850_v18  ;;  %v3101_v29 = vsel %vm2637_vm3, %v3099_v39, %v3100_v34  ;;  %v3110_v30 = vsel %vm2637_vm3, %v3100_v34, %v3109_v35  ;;  %v3345_v38 = vmul.f32 %v7664_v47, %v3334_v53  ;;  %v7836_v18 = vld [vmem:[%s11652_s8] ss:$0 sm:$0xff]  ;;  %v8646_v36 = vld [vmem:[%s11645_s1 + $0x87] ss:$8 sm:$0xf] }
 0x1fd   : > { %v3192_v7 = vsel %vm2637_vm3, %v3190_v40, %v3191_v41  ;;  %v3349_v61 = vmul.f32 %v10225_v48, %v3334_v53  ;;  %v3353_v8 = vmul.f32 %v7668_v54, %v3334_v53  ;;  %v3036_v10 = vadd.f32 %v3019_v59, %v2854_v60  ;;  %v7686_v53 = vld [vmem:[%s8881_s20 + $0x170] sm:$0x1f] }
 0x1fe   : > { %v3282_v63 = vrot.slane %v3253_v50, 5  ;;  %v3283_v13 = vrot.slane %v3257_v52, 5  ;;  %v3292_v9 = vrot.slane %v3261_v43, 5  ;;  %v3201_v1 = vsel %vm2637_vm3, %v3191_v41, %v3200_v0 }
 0x1ff   : > { %v3516_v48 = vrot.slane %v8645_v17, %v9886_v42  ;;  %v3123_v28 = vadd.f32 %v3101_v29, %v2941_v46  ;;  %v3127_v3 = vadd.f32 %v3110_v30, %v2945_v57  ;;  %v3214_v24 = vadd.f32 %v3192_v7, %v3032_v56  ;;  %v7695_v30 = vld [vmem:[%s8881_s20 + $0x1d0] sm:$0x1f] }
 0x200   : > { %v3373_v27 = vrot.slane %v3345_v38, 5  ;;  %v3374_v34 = vrot.slane %v3349_v61, 5  ;;  %v3383_v35 = vrot.slane %v3353_v8, 5  ;;  %v3218_v60 = vadd.f32 %v3201_v1, %v3036_v10  ;;  %v8647_v38 = vld [vmem:[%s11645_s1 + $0xa0] ss:$8 sm:$0xf] }
 0x201   : > { %v3284_v32 = vsel %vm3275_vm4, %v3282_v63, %v3283_v13  ;;  %v3293_v40 = vsel %vm3275_vm4, %v3283_v13, %v3292_v9  ;;  %v3436_v41 = vmul.f32 %v7673_v33, %v3425_v5  ;;  %v3440_v46 = vmul.f32 %v10212_v15, %v3425_v5 }
 0x202   : > { %v3444_v50 = vmul.f32 %v7677_v12, %v3425_v5  ;;  %v3527_v52 = vmul.f32 %v7682_v37, %v3516_v48  ;;  %v3531_v43 = vmul.f32 %v10228_v45, %v3516_v48  ;;  %v3535_v54 = vmul.f32 %v7686_v53, %v3516_v48  ;;  %v8649_v48 = vld [vmem:[%s11645_s1 + $0xa1] ss:$8 sm:$0xf] }
 0x203   : > { %v3375_v59 = vsel %vm3275_vm4, %v3373_v27, %v3374_v34  ;;  %v3384_v0 = vsel %vm3275_vm4, %v3374_v34, %v3383_v35  ;;  %v3306_v15 = vadd.f32 %v3284_v32, %v3123_v28  ;;  %v10551_v5 = vadd.f32 %v3293_v40, %v3127_v3  ;;  %v8651_v27 = vld [vmem:[%s8881_s20 + $0x140] sm:$0xff]  ;;  %v7709_v34 = vld [vmem:[%s8881_s20 + $0x250] sm:$0xe0]  ;;  %v7713_v32 = vld [vmem:[%s8881_s20 + $0x290] sm:$0x1f] }
 0x204   : > { %v3464_v56 = vrot.slane %v3436_v41, 5  ;;  %v3465_v29 = vrot.slane %v3440_v46, 5  ;;  %v3397_v7 = vadd.f32 %v3375_v59, %v3214_v24  ;;  %v3401_v61 = vadd.f32 %v3384_v0, %v3218_v60 }
 0x205   : > { %v3474_v8 = vrot.slane %v3444_v50, 5  ;;  %v3556_v63 = vrot.slane %v3531_v43, 5  ;;  %v3565_v13 = vrot.slane %v3535_v54, 5  ;;  %v3864_v54 = vld [vmem:[%s8881_s20 + $0x50] sm:$0x3f] }
 0x207   : > { %v3566_v53 = vsel %vm3275_vm4, %v3556_v63, %v3565_v13 }
 0x237   : > { %v8054_v51 = vpop.f32.mrf.mxu0  ;;  %v8076_v44 = vpop.f32.mrf.mxu1 }
 0x239   : > { %v8055_v19 = vpop.f32.mrf.mxu0  ;;  %v8077_v20 = vpop.f32.mrf.mxu1 }
 0x23a   : > { %v8056_v6 = vadd.f32 %v8055_v19, %v8054_v51  ;;  %v8078_v16 = vadd.f32 %v8077_v20, %v8076_v44  ;;  %v7691_v20 = vld [vmem:[%s8881_s20 + $0x190] sm:$0xe0] }
 0x23b   : > { %v8057_v11 = vpop.f32.mrf.mxu0  ;;  %v8079_v26 = vpop.f32.mrf.mxu1 }
 0x23c   : > { %v5175_v14 = vadd.f32 %v8056_v6, %v7803_v23  ;;  %v3698_v6 = vrot.slane %v8647_v38, %v9886_v42 }
 0x23d   : > { %v8058_v62 = vpop.f32.mrf.mxu0  ;;  %v8080_v21 = vpop.f32.mrf.mxu1 }
 0x23e   : > { %v5216_v31 = vadd.f32 %v8078_v16, %v5175_v14  ;;  %v8059_v39 = vadd.f32 %v8058_v62, %v8057_v11  ;;  %v8081_v44 = vadd.f32 %v8080_v21, %v8079_v26  ;;  %v3555_v11 = vrot.slane %v3527_v52, 5  ;;  %v7700_v26 = vld [vmem:[%s8881_s20 + $0x1f0] sm:$0xe0]  ;;  %v7704_v14 = vld [vmem:[%s8881_s20 + $0x230] sm:$0x1f] }
 0x23f   : > { %v8648_v16 = vld [vmem:[%s8881_s20 + $0x120] sm:$0xf8]  ;;  %v8650_v21 = vld [vmem:[%s8881_s20 + $0x160] sm:$0x7]  ;;  %v3709_v3 = vmul.f32 %v7700_v26, %v3698_v6  ;;  %v3713_v24 = vmul.f32 %v10263_v22, %v3698_v6 }
 0x240   : > { %v5229_v47 = vmul.f32 %v7836_v18, %v5216_v31  ;;  %v5178_v51 = vadd.f32 %v8059_v39, %v7803_v23  ;;  %v3607_v23 = vrot.slane %v8646_v36, %v9886_v42  ;;  %v3475_v31 = vsel %vm3275_vm4, %v3465_v29, %v3474_v8  ;;  %v7719_v8 = vld [vmem:[%s8881_s20 + $0x70] sm:$0xc0] }
 0x241   : > { %v3717_v39 = vmul.f32 %v7704_v14, %v3698_v6  ;;  %v3557_v37 = vsel %vm3275_vm4, %v3555_v11, %v3556_v63  ;;  %v3737_v50 = vrot.slane %v3709_v3, 5  ;;  %v3738_v52 = vrot.slane %v3713_v24, 5  ;;  %v5287_v3 = vld [vmem:[%s11649_s5] sm:$0xf] }
 0x242   : > { %v5219_v57 = vadd.f32 %v8081_v44, %v5178_v51  ;;  %v5233_v19 = vrot.slane %v5229_v47, 5  ;;  %v3618_v9 = vmul.f32 %v7691_v20, %v3607_v23  ;;  %v3622_v33 = vmul.f32 %v10242_v49, %v3607_v23  ;;  %v3860_v47 = vld [vmem:[%s8881_s20 + $0x10] sm:$0xc0]  ;;  %v8652_v51 = vld [vmem:[%s11645_s1 + $0xa2] ss:$8 sm:$0xf] }
 0x243   : > { %v3626_v17 = vmul.f32 %v7695_v30, %v3607_v23  ;;  %v3466_v49 = vsel %vm3275_vm4, %v3464_v56, %v3465_v29  ;;  %v3880_v44 = vrot.slane %v8652_v51, %v9886_v42  ;;  %v3747_v0 = vrot.slane %v3717_v39, 5  ;;  %v8653_v20 = vld [vmem:[%s11645_s1 + $0xa3] ss:$8 sm:$0xf] }
 0x244   : > { %v5230_v45 = vmul.f32 %v7836_v18, %v5219_v57  ;;  %v5239_v1 = vadd.f32 %v8648_v16, %v5233_v19  ;;  %v3789_v18 = vrot.slane %v8649_v48, %v9886_v42  ;;  %v3646_v60 = vrot.slane %v3618_v9, 5  ;;  %v8654_v30 = vld [vmem:[%s8881_s20 + $0x30] sm:$0xff] }
 0x245   : > { %v3647_v41 = vrot.slane %v3622_v33, 5  ;;  %v3656_v46 = vrot.slane %v3626_v17, 5  ;;  %v3488_v23 = vadd.f32 %v3466_v49, %v3306_v15  ;;  %v3492_v56 = vadd.f32 %v3475_v31, %v10551_v5 }
 0x246   : > { %v5234_v10 = vrot.slane %v5230_v45, 5  ;;  %v5245_v40 = vrot.slane %v5239_v1, 3  ;;  %v3800_v43 = vmul.f32 %v7709_v34, %v3789_v18  ;;  %v3804_v36 = vmul.f32 %v10271_v4, %v3789_v18  ;;  %v8655_v1 = vld [vmem:[%s8881_s20 + $0x90] sm:$0xff] }
 0x247   : > { %v3972_v45 = vrot.slane %v8653_v20, %v9886_v42  ;;  %v3891_v29 = vmul.f32 %v3880_v44, %v3860_v47  ;;  %v3895_v38 = vmul.f32 %v8654_v30, %v3880_v44  ;;  %v3899_v6 = vmul.f32 %v3880_v44, %v3864_v54 }
 0x248   : > { %v5235_v62 = vsel %vm3275_vm4, %v5233_v19, %v5234_v10  ;;  %v5241_v28 = vadd.f32 %v8650_v21, %v5234_v10  ;;  %v3808_v19 = vmul.f32 %v7713_v32, %v3789_v18  ;;  %v3579_v4 = vadd.f32 %v3557_v37, %v3397_v7  ;;  %v7723_v10 = vld [vmem:[%s8881_s20 + $0xb0] sm:$0x3f]  ;;  %v7728_v21 = vld [vmem:[%s8881_s20 + $0xd0] sm:$0xc0] }
 0x249   : > { %v5240_v12 = vadd.f32 %v8651_v27, %v5235_v62  ;;  %v3583_v11 = vadd.f32 %v3566_v53, %v3401_v61  ;;  %v3648_v26 = vsel %vm3275_vm4, %v3646_v60, %v3647_v41  ;;  %v3828_v15 = vrot.slane %v3800_v43, 5  ;;  %v8656_v7 = vld [vmem:[%s11645_s1 + $0xa4] ss:$8 sm:$0xf] }
 0x24a   : > { %v5248_v35 = vrot.slane %v5241_v28, 3  ;;  %v3657_v63 = vsel %vm3275_vm4, %v3647_v41, %v3656_v46  ;;  %v3739_v13 = vsel %vm3275_vm4, %v3737_v50, %v3738_v52  ;;  %v3748_v9 = vsel %vm3275_vm4, %v3738_v52, %v3747_v0  ;;  %v8657_v41 = vld [vmem:[%s8881_s20 + $0xf0] sm:$0xff] }
 0x24b   : > { %v5246_v22 = vrot.slane %v5240_v12, 3  ;;  %v3829_v5 = vrot.slane %v3804_v36, 5  ;;  %v3838_v14 = vrot.slane %v3808_v19, 5  ;;  %v3983_v16 = vmul.f32 %v7719_v8, %v3972_v45  ;;  %v7741_v8 = vld [vmem:[%s8881_s20 + $0x170] sm:$0x3f] }
 0x24c   : > { %v3987_v33 = vmul.f32 %v8655_v1, %v3972_v45  ;;  %v4063_v61 = vrot.slane %v8656_v7, %v9886_v42  ;;  %v3920_v17 = vrot.slane %v3891_v29, 6  ;;  %v3921_v48 = vrot.slane %v3895_v38, 6 }
 0x24d   : > { %v5247_v57 = vsel %vm1999_vm2, %v5245_v40, %v5246_v22  ;;  %v5249_v59 = vsel %vm1999_vm2, %v5246_v22, %v5248_v35  ;;  %v3930_v18 = vrot.slane %v3899_v6, 6  ;;  %v3991_v62 = vmul.f32 %v7723_v10, %v3972_v45  ;;  %v7732_v35 = vld [vmem:[%s8881_s20 + $0x110] sm:$0x3f]  ;;  %v7737_v45 = vld [vmem:[%s8881_s20 + $0x130] sm:$0xc0] }
 0x24e   : > { %5252 = vst [vmem:[%s10581_s29] sm:$0xff] %v5247_v57  ;;  %5253 = vst [vmem:[%s10581_s29 + $0x20] sm:$0xff] %v5249_v59  ;;  %v3670_v28 = vadd.f32 %v3648_v26, %v3488_v23  ;;  %v3674_v24 = vadd.f32 %v3657_v63, %v3492_v56  ;;  %v3761_v27 = vadd.f32 %v3739_v13, %v3579_v4  ;;  %v4011_v39 = vrot.slane %v3983_v16, 6  ;;  %v8658_v59 = vld [vmem:[%s11645_s1 + $0xa5] ss:$8 sm:$0xf] }
 0x24f   : > { %v3765_v12 = vadd.f32 %v3748_v9, %v3583_v11  ;;  %v3830_v49 = vsel %vm3275_vm4, %v3828_v15, %v3829_v5  ;;  %v3839_v31 = vsel %vm3275_vm4, %v3829_v5, %v3838_v14  ;;  %v4012_v34 = vrot.slane %v3987_v33, 6  ;;  %v8659_v4 = vld [vmem:[%s11645_s1 + $0xa6] ss:$8 sm:$0xf] }
 0x250   : > { %v10618_v37 = vmul.f32 %v7728_v21, %v4063_v61  ;;  %v3922_v32 = vsel %vm3913_vm5, %v3920_v17, %v3921_v48  ;;  %v3931_v40 = vsel %vm3913_vm5, %v3921_v48, %v3930_v18  ;;  %v4021_v22 = vrot.slane %v3991_v62, 6  ;;  %v7746_v13 = vld [vmem:[%s8881_s20 + $0x190] sm:$0xc0]  ;;  %v7750_v62 = vld [vmem:[%s8881_s20 + $0x1d0] sm:$0x3f] }
 0x251   : > { %v10623_v47 = vmul.f32 %v8657_v41, %v4063_v61  ;;  %v5292_v51 = vrot.slane %v5287_v3, %v8884_v25  ;;  %v5296_v44 = vrot.slane %v5287_v3, %v9483_v55  ;;  %v5304_v46 = vrot.slane %v5287_v3, %v9896_v58  ;;  %v8660_v17 = vld [vmem:[%s8881_s20 + $0x150] sm:$0xff] }
 0x252   : > { %v5300_v50 = vrot.slane %v5287_v3, %v9886_v42  ;;  %v10629_v54 = vadd.f32 %v3830_v49, %v3670_v28  ;;  %v4082_v57 = vmul.f32 %v7732_v35, %v4063_v61  ;;  %v4154_v0 = vrot.slane %v8658_v59, %v9886_v42 }
 0x253   : > { %v10635_v36 = vadd.f32 %v3839_v31, %v3674_v24  ;;  %v10637_v23 = vadd.f32 %v3922_v32, %v3761_v27  ;;  %v10639_v19 = vadd.f32 %v3931_v40, %v3765_v12  ;;  %v10642_v20 = vsel %vm3913_vm5, %v4011_v39, %v4012_v34  ;;  %v8661_v24 = vld [vmem:[%s11645_s1 + $0xa7] ss:$8 sm:$0xf] }
 0x254   : > { %v10646_v30 = vsel %vm3913_vm5, %v4012_v34, %v4021_v22  ;;  %v4102_v38 = vrot.slane %v10618_v37, 6  ;;  %v4103_v6 = vrot.slane %v10623_v47, 6  ;;  %v4245_v11 = vrot.slane %v8659_v4, %v9886_v42  ;;  %v8384_v34 = vld [vmem:[%s11648_s4 + $0xe0] ss:$16 sps:$4 sm:$0xff]   ;;  %v7755_v22 = vld [vmem:[%s8881_s20 + $0x1f0] sm:$0xc0] }
 0x255   : > { %v4112_v1 = vrot.slane %v4082_v57, 6  ;;  %v10656_v33 = vmul.f32 %v7737_v45, %v4154_v0  ;;  %v10659_v48 = vmul.f32 %v8660_v17, %v4154_v0  ;;  %v10661_v18 = vmul.f32 %v7741_v8, %v4154_v0 }
 0x256   : > { %v10664_v3 = vmul.f32 %v7746_v13, %v4245_v11  ;;  %v4336_v27 = vrot.slane %v8661_v24, %v9886_v42  ;;  %v4264_v40 = vmul.f32 %v7750_v62, %v4245_v11  ;;  %v8390_v13 = vld [vmem:[%s11648_s4 + $0xc0] ss:$16 sps:$4 sm:$0xff]   ;;  %v4039_v17 = vadd.f32 %v10646_v30, %v10635_v36 }
 0x257   : > { %v5503_v53 = vpop.f32.mrf.mxu0  ;;  %v5546_v60 = vpop.f32.mrf.mxu1  ;;  %v4113_v0 = vsel %vm3913_vm5, %v4103_v6, %v4112_v1  ;;  %v4193_v45 = vrot.slane %v10656_v33, 6  ;;  %v4203_v8 = vrot.slane %v10661_v18, 6  ;;  %v8398_v33 = vld [vmem:[%s11648_s4 + $0xa4] ss:$16 sps:$4 sm:$0xff]  }
 0x258   : > { %v5504_v9 = vadd.f32 %v5503_v53, %v5292_v51  ;;  %v5547_v5 = vadd.f32 %v5546_v60, %v5300_v50  ;;  %v8387_v53 = vld [vmem:[%s11648_s4 + $0xe8] ss:$16 sps:$4 sm:$0xff]   ;;  %v8662_v60 = vld [vmem:[%s8881_s20 + $0x1b0] sm:$0xff]  ;;  %v4284_v4 = vrot.slane %v10664_v3, 6  ;;  %v4130_v18 = vadd.f32 %v4113_v0, %v10639_v19 }
 0x259   : > { %v5505_v52 = vpop.f32.mrf.mxu0  ;;  %v5548_v43 = vpop.f32.mrf.mxu1  ;;  %v4260_v32 = vmul.f32 %v8662_v60, %v4245_v11  ;;  %v4347_v11 = vmul.f32 %v7755_v22, %v4336_v27  ;;  %v8399_v19 = vld [vmem:[%s11648_s4 + $0xa8] ss:$16 sps:$4 sm:$0xff]  }
 0x25a   : > { %v5506_v26 = vadd.f32 %v5505_v52, %v5296_v44  ;;  %v5549_v15 = vadd.f32 %v5548_v43, %v5304_v46  ;;  %v5555_v35 = vmax.f32 %v5504_v9, 0.0  ;;  %v5557_v37 = vmax.f32 %v5547_v5, 0.0  ;;  %v8663_v52 = vld [vmem:[%s11645_s1 + $0xc0] ss:$8 sm:$0xf] }
 0x25b   : > { %v5507_v56 = vpop.f32.mrf.mxu0  ;;  %v5550_v29 = vpop.f32.mrf.mxu1  ;;  %v4427_v43 = vrot.slane %v8663_v52, %v9886_v42  ;;  %v8393_v9 = vld [vmem:[%s11648_s4 + $0xc8] ss:$16 sps:$4 sm:$0xff]   ;;  %v8408_v52 = vld [vmem:[%s11648_s4 + $0x60] ss:$16 sps:$4 sm:$0xff]  }
 0x25c   : > { %v5508_v10 = vadd.f32 %v5507_v56, %v5292_v51  ;;  %v5551_v63 = vadd.f32 %v5550_v29, %v5300_v50  ;;  %v5556_v12 = vmax.f32 %v5506_v26, 0.0  ;;  %v5558_v49 = vmax.f32 %v5549_v15, 0.0  ;;  %v8392_v51 = vld [vmem:[%s11648_s4 + $0xc4] ss:$16 sps:$4 sm:$0xff]   ;;  %v8405_v60 = vld [vmem:[%s11648_s4 + $0x88] ss:$16 sps:$4 sm:$0xff]  }
 0x25d   : > { %v5509_v14 = vpop.f32.mrf.mxu0  ;;  %v5552_v16 = vpop.f32.mrf.mxu1  ;;  %v7759_v50 = vld [vmem:[%s8881_s20 + $0x230] sm:$0x3f]  ;;  %v7764_v56 = vld [vmem:[%s8881_s20 + $0x250] sm:$0xc0]  ;;  %v4285_v26 = vrot.slane %v4260_v32, 6  ;;  %v4294_v15 = vrot.slane %v4264_v40, 6 }
 0x25e   : > { %v5510_v7 = vadd.f32 %v5509_v14, %v5296_v44  ;;  %v5553_v61 = vadd.f32 %v5552_v16, %v5304_v46  ;;  %v5559_v21 = vmax.f32 %v5508_v10, 0.0  ;;  %v5561_v28 = vmax.f32 %v5551_v63, 0.0  ;;  %v8395_v44 = vld [vmem:[%s11648_s4 + $0xcc] ss:$16 sps:$4 sm:$0xff]   ;;  %v7768_v29 = vld [vmem:[%s8881_s20 + $0x290] sm:$0x3f] }
 0x25f   : > { %v4104_v46 = vsel %vm3913_vm5, %v4102_v38, %v4103_v6  ;;  %v4194_v38 = vrot.slane %v10659_v48, 6  ;;  %v8664_v10 = vld [vmem:[%s8881_s20 + $0x210] sm:$0xff]  ;;  %v4355_v63 = vmul.f32 %v7759_v50, %v4336_v27  ;;  %v4438_v5 = vmul.f32 %v7764_v56, %v4427_v43  ;;  %v8666_v56 = vld [vmem:[%s11646_s2] sm:$0xf] }
 0x260   : > { %v5560_v31 = vmax.f32 %v5510_v7, 0.0  ;;  %v5562_v39 = vmax.f32 %v5553_v61, 0.0  ;;  %v5563_v57 = vpack.c.bf16 %v5559_v21, %v5555_v35  ;;  %v5565_v59 = vpack.c.bf16 %v5561_v28, %v5557_v37  ;;  %v8665_v14 = vld [vmem:[%s8881_s20 + $0x270] sm:$0xff]  ;;  %v8401_v7 = vld [vmem:[%s11648_s4 + $0xac] ss:$16 sps:$4 sm:$0xff]  }
 0x261   : > { %v4351_v6 = vmul.f32 %v8664_v10, %v4336_v27  ;;  %v4442_v16 = vmul.f32 %v8665_v14, %v4427_v43  ;;  %v4446_v1 = vmul.f32 %v7768_v29, %v4427_v43  ;;  %v4035_v61 = vadd.f32 %v10642_v20, %v10629_v54  ;;  %v8396_v28 = vld [vmem:[%s11648_s4 + $0xa0] ss:$16 sps:$4 sm:$0xff]   ;;  %v8411_v43 = vld [vmem:[%s11648_s4 + $0x68] ss:$16 sps:$4 sm:$0xff]  }
 0x262   : > { %v5564_v41 = vpack.c.bf16 %v5560_v31, %v5556_v12  ;;  %v5566_v47 = vpack.c.bf16 %v5562_v39, %v5558_v49  ;;  %v4126_v48 = vadd.f32 %v4104_v46, %v10637_v23  ;;  %v4195_v62 = vsel %vm3913_vm5, %v4193_v45, %v4194_v38  ;;  %v8404_v12 = vld [vmem:[%s11648_s4 + $0x84] ss:$16 sps:$4 sm:$0xff]   ;;  %v8407_v49 = vld [vmem:[%s11648_s4 + $0x8c] ss:$16 sps:$4 sm:$0xff]   ;;  %v8667_v10 = vld [vmem:[%s11647_s3] sm:$0xf] }
 0x263   : > { %v4204_v21 = vsel %vm3913_vm5, %v4194_v38, %v4203_v8  ;;  %v4286_v54 = vsel %vm3913_vm5, %v4284_v4, %v4285_v26  ;;  %v4295_v36 = vsel %vm3913_vm5, %v4285_v26, %v4294_v15  ;;  %v4375_v20 = vrot.slane %v4347_v11, 6  ;;  %v8414_v38 = vld [vmem:[%s11648_s4 + $0x40] ss:$16 sps:$4 sm:$0xff]   ;;  %v8417_v8 = vld [vmem:[%s11648_s4 + $0x48] ss:$16 sps:$4 sm:$0xff]  }
 0x264   : > { %5862 = vmatprep.mubr.bf16.mxu0 %v5564_v41  ;;  %5903 = vmatprep.mubr.bf16.mxu1 %v5566_v47  ;;  %v4376_v23 = vrot.slane %v4351_v6, 6  ;;  %v4385_v30 = vrot.slane %v4355_v63, 6  ;;  %v4466_v3 = vrot.slane %v4438_v5, 6  ;;  %v4467_v24 = vrot.slane %v4442_v16, 6  ;;  %v8410_v41 = vld [vmem:[%s11648_s4 + $0x64] ss:$16 sps:$4 sm:$0xff]  }
 0x265   : > { %5863 = vmatmul.mubr.bf16.vlgmr.msra.gmra.mxu0 %v5563_v57  ;;  %5904 = vmatmul.mubr.bf16.vlgmr.msra.gmra.mxu1 %v5565_v59  ;;  %v4476_v27 = vrot.slane %v4446_v1, 6  ;;  %v4217_v31 = vadd.f32 %v4195_v62, %v4035_v61  ;;  %v4221_v39 = vadd.f32 %v4204_v21, %v4039_v17  ;;  %v4312_v35 = vadd.f32 %v4295_v36, %v4130_v18  ;;  %v8413_v47 = vld [vmem:[%s11648_s4 + $0x6c] ss:$16 sps:$4 sm:$0xff]   ;;  %v8416_v57 = vld [vmem:[%s11648_s4 + $0x44] ss:$16 sps:$4 sm:$0xff]  }
 0x266   : > { %6160 = vmatpush1.bf16.msra.mxu0 %v8384_v34  ;;  %6203 = vmatpush1.bf16.msra.mxu1 %v8387_v53  ;;  %v4308_v34 = vadd.f32 %v4286_v54, %v4126_v48  ;;  %v4377_v37 = vsel %vm3913_vm5, %v4375_v20, %v4376_v23  ;;  %v8402_v53 = vld [vmem:[%s11648_s4 + $0x80] ss:$16 sps:$4 sm:$0xff]   ;;  %v4386_v32 = vsel %vm3913_vm5, %v4376_v23, %v4385_v30  ;;  %v8419_v59 = vld [vmem:[%s11648_s4 + $0x4c] ss:$16 sps:$4 sm:$0xff]   ;;  %v8422_v4 = vld [vmem:[%s11648_s4 + $0x24] ss:$16 sps:$4 sm:$0xff]  }
 0x267   : > { %6161 = vmatprep.subr.bf16.mxu0 %v8392_v51  ;;  %6204 = vmatprep.subr.bf16.mxu1 %v8395_v44  ;;  %v4468_v40 = vsel %vm3913_vm5, %v4466_v3, %v4467_v24  ;;  %v4477_v22 = vsel %vm3913_vm5, %v4467_v24, %v4476_v27  ;;  %v4399_v51 = vadd.f32 %v4377_v37, %v4217_v31  ;;  %v8425_v11 = vld [vmem:[%s11648_s4 + $0x2c] ss:$16 sps:$4 sm:$0xff]   ;;  %v8420_v63 = vld [vmem:[%s11648_s4 + $0x20] ss:$16 sps:$4 sm:$0xff]  }
 0x268   : > { %6191 = vmatprep.mubr.bf16.mxu0 %v8742_v2  ;;  %6234 = vmatprep.mubr.bf16.mxu1 %v8742_v2  ;;  %v4403_v44 = vadd.f32 %v4386_v32, %v4221_v39  ;;  %v4490_v46 = vadd.f32 %v4468_v40, %v4308_v34  ;;  %v4494_v50 = vadd.f32 %v4477_v22, %v4312_v35  ;;  %v8431_v5 = vld [vmem:[%s11648_s4 + $0xc] ss:$16 sps:$4 sm:$0xff]   ;;  %v8426_v1 = vld [vmem:[%s11648_s4] ss:$16 sps:$4 sm:$0xff]  }
 0x269   : > { %v4517_v29 = vrot.slane %v8666_v56, %v9886_v42  ;;  %v4547_v6 = vrot.slane %v8667_v10, %v9886_v42  ;;  %v8432_v61 = vld [vmem:[%s11650_s6 + $0x78] sm:$0xff]   ;;  %v8436_v62 = vld [vmem:[%s11650_s6 + $0x70] sm:$0xff]   ;;  %v8440_v36 = vld [vmem:[%s11650_s6 + $0x68] sm:$0xff]  }
 0x26a   : > { %6162 = vmatpush1.bf16.msra.mxu0 %v8390_v13  ;;  %6205 = vmatpush1.bf16.msra.mxu1 %v8393_v9  ;;  %v4498_v0 = vadd.f32 %v4490_v46, %v4399_v51  ;;  %v4502_v45 = vadd.f32 %v4494_v50, %v4403_v44  ;;  %v8423_v13 = vld [vmem:[%s11648_s4 + $0x28] ss:$16 sps:$4 sm:$0xff]   ;;  %v8428_v9 = vld [vmem:[%s11648_s4 + $0x4] ss:$16 sps:$4 sm:$0xff]  }
 0x26b   : > { %6163 = vmatprep.subr.bf16.mxu0 %v8398_v33  ;;  %6206 = vmatprep.subr.bf16.mxu1 %v8401_v7  ;;  %v8429_v33 = vld [vmem:[%s11648_s4 + $0x8] ss:$16 sps:$4 sm:$0xff]   ;;  %v8437_v21 = vld [vmem:[%s11650_s6 + $0xf0] sm:$0xff]   ;;  %v8444_v30 = vld [vmem:[%s11650_s6 + $0x60] sm:$0xff]  }
 0x26c   : > { %v4528_v26 = vmul.f32 %v4517_v29, %v4498_v0  ;;  %v4532_v15 = vmul.f32 %v4517_v29, %v4502_v45  ;;  %v8433_v17 = vld [vmem:[%s11650_s6 + $0xf8] sm:$0xff]   ;;  %v8439_v54 = vld [vmem:[%s11650_s6 + $0xb0] sm:$0xff]   ;;  %v8441_v20 = vld [vmem:[%s11650_s6 + $0xe8] sm:$0xff]  }
 0x26d   : > { %v8434_v48 = vld [vmem:[%s11650_s6 + $0x38] sm:$0xff]   ;;  %v8442_v23 = vld [vmem:[%s11650_s6 + $0x28] sm:$0xff]   ;;  %v8445_v3 = vld [vmem:[%s11650_s6 + $0xe0] sm:$0xff]  }
 0x26e   : > { %6164 = vmatpush1.bf16.msra.mxu0 %v8396_v28  ;;  %6207 = vmatpush1.bf16.msra.mxu1 %v8399_v19  ;;  %v4558_v14 = vadd.f32 %v4547_v6, %v4528_v26  ;;  %v4562_v16 = vadd.f32 %v4547_v6, %v4532_v15  ;;  %v8435_v18 = vld [vmem:[%s11650_s6 + $0xb8] sm:$0xff]   ;;  %v8438_v28 = vld [vmem:[%s11650_s6 + $0x30] sm:$0xff]   ;;  %v8443_v19 = vld [vmem:[%s11650_s6 + $0xa8] sm:$0xff]  }
 0x26f   : > { %6165 = vmatprep.subr.bf16.mxu0 %v8404_v12  ;;  %6208 = vmatprep.subr.bf16.mxu1 %v8407_v49  ;;  %v8446_v24 = vld [vmem:[%s11650_s6 + $0x20] sm:$0xff]   ;;  %v8448_v12 = vld [vmem:[%s11650_s6 + $0x58] sm:$0xff]   ;;  %v8452_v34 = vld [vmem:[%s11650_s6 + $0x50] sm:$0xff]  }
 0x270   : > { %v5944_v7 = vpack.c.bf16 %v4562_v16, %v4558_v14  ;;  %v8447_v27 = vld [vmem:[%s11650_s6 + $0xa0] sm:$0xff]   ;;  %v8449_v49 = vld [vmem:[%s11650_s6 + $0xd8] sm:$0xff]   ;;  %v8453_v35 = vld [vmem:[%s11650_s6 + $0xd0] sm:$0xff]  }
 0x271   : > { %v8450_v31 = vld [vmem:[%s11650_s6 + $0x18] sm:$0xff]   ;;  %v8454_v37 = vld [vmem:[%s11650_s6 + $0x10] sm:$0xff]   ;;  %v8457_v32 = vld [vmem:[%s11650_s6 + $0xc8] sm:$0xff]  }
 0x272   : > { %6166 = vmatpush1.bf16.msra.mxu0 %v8402_v53  ;;  %6209 = vmatpush1.bf16.msra.mxu1 %v8405_v60  ;;  %v8451_v39 = vld [vmem:[%s11650_s6 + $0x98] sm:$0xff]   ;;  %v8455_v53 = vld [vmem:[%s11650_s6 + $0x90] sm:$0xff]   ;;  %v8456_v60 = vld [vmem:[%s11650_s6 + $0x48] sm:$0xff]  }
 0x273   : > { %6167 = vmatprep.subr.bf16.mxu0 %v8410_v41  ;;  %6210 = vmatprep.subr.bf16.mxu1 %v8413_v47  ;;  %v8458_v40 = vld [vmem:[%s11650_s6 + $0x8] sm:$0xff]   ;;  %v8460_v41 = vld [vmem:[%s11650_s6 + $0x40] sm:$0xff]   ;;  %v337_v46 = vld [vmem:[%s8881_s20 + $0x18] sm:$0xff] }
 0x274   : > { %v8459_v22 = vld [vmem:[%s11650_s6 + $0x88] sm:$0xff]   ;;  %v8461_v47 = vld [vmem:[%s11650_s6 + $0xc0] sm:$0xff]   ;;  %v7399_v45 = vld [vmem:[%s8881_s20 + $0xd8] sm:$0xff] }
 0x275   : > { %v8462_v51 = vld [vmem:[%s11650_s6] sm:$0xff]   ;;  %v8469_v0 = vld [vmem:[%s11648_s4 + $0xec] ss:$16 sps:$4 sm:$0xff]  }
 0x276   : > { %6168 = vmatpush1.bf16.msra.mxu0 %v8408_v52  ;;  %6211 = vmatpush1.bf16.msra.mxu1 %v8411_v43  ;;  %v8463_v44 = vld [vmem:[%s11650_s6 + $0x80] sm:$0xff]   ;;  %v10914_v56 = vld [vmem:[%s8881_s20 + $0x38] sm:$0xff] }
 0x277   : > { %6169 = vmatprep.subr.bf16.mxu0 %v8416_v57  ;;  %6212 = vmatprep.subr.bf16.mxu1 %v8419_v59  ;;  %v8668_v50 = vld [vmem:[%s11645_s1] ss:$8 sm:$0xf]  ;;  %v8669_v43 = vld [vmem:[%s11645_s1 + $0x2] ss:$8 sm:$0xf] }
 0x278   : > { %v359_v52 = vrot.slane %v8668_v50, %v9896_v58  ;;  %v455_v57 = vrot.slane %v8669_v43, %v9896_v58  ;;  %v8466_v59 = vld [vmem:[%s11648_s4 + $0xe4] ss:$16 sps:$4 sm:$0xff]   ;;  %v8670_v29 = vld [vmem:[%s11645_s1 + $0x1] ss:$8 sm:$0xf] }
 0x279   : > { %v7390_v26 = vld [vmem:[%s8881_s20 + $0x78] sm:$0xff] }
 0x27a   : > { %6170 = vmatpush1.bf16.msra.mxu0 %v8414_v38  ;;  %6213 = vmatpush1.bf16.msra.mxu1 %v8417_v8  ;;  %v407_v38 = vrot.slane %v8670_v29, %v9896_v58  ;;  %v10921_v8 = vld [vmem:[%s8881_s20 + $0xf8] sm:$0xff] }
 0x27b   : > { %6171 = vmatprep.subr.bf16.mxu0 %v8422_v4  ;;  %6214 = vmatprep.subr.bf16.mxu1 %v8425_v11  ;;  %v8671_v4 = vld [vmem:[%s11645_s1 + $0x3] ss:$8 sm:$0xf]  ;;  %v8672_v10 = vld [vmem:[%s11645_s1 + $0x7] ss:$8 sm:$0xf] }
 0x27c   : > { %v503_v11 = vrot.slane %v8671_v4, %v9896_v58  ;;  %v7408_v15 = vld [vmem:[%s8881_s20 + $0x138] sm:$0xff]  ;;  %v694_v6 = vrot.slane %v8672_v10, %v9896_v58 }
 0x27d   : > { %v8673_v14 = vld [vmem:[%s11645_s1 + $0x20] ss:$8 sm:$0xf]  ;;  %v7454_v43 = vld [vmem:[%s8881_s20 + $0xd8] sm:$0xfe] }
 0x27e   : > { %6172 = vmatpush1.bf16.msra.mxu0 %v8420_v63  ;;  %6215 = vmatpush1.bf16.msra.mxu1 %v8423_v13  ;;  %v367_v63 = vmul.f32 %v359_v52, %v337_v46  ;;  %v10934_v13 = vld [vmem:[%s8881_s20 + $0x98] sm:$0xff]  ;;  %v786_v16 = vrot.slane %v8673_v14, %v9896_v58 }
 0x27f   : > { %6173 = vmatprep.subr.bf16.mxu0 %v8428_v9  ;;  %6216 = vmatprep.subr.bf16.mxu1 %v8431_v5  ;;  %v463_v9 = vmul.f32 %v7399_v45, %v455_v57  ;;  %v10937_v5 = vld [vmem:[%s8881_s20 + $0x158] sm:$0xff] }
 0x280   : > { %v7458_v45 = vld [vmem:[%s8881_s20 + $0x118] sm:$0x1]  ;;  %v8678_v29 = vld [vmem:[%s11645_s1 + $0x22] ss:$8 sm:$0xf] }
 0x281   : > { %v7463_v10 = vld [vmem:[%s8881_s20 + $0x138] sm:$0xfe] }
 0x282   : > { %6174 = vmatpush1.bf16.msra.mxu0 %v8426_v1  ;;  %6217 = vmatpush1.bf16.msra.mxu1 %v8429_v33  ;;  %v371_v1 = vmul.f32 %v359_v52, %v10914_v56  ;;  %v467_v33 = vmul.f32 %v10921_v8, %v455_v57 }
 0x283   : > { %8126 = vmatprep.subr.bf16.mxu0 %v8432_v61  ;;  %8148 = vmatprep.subr.bf16.mxu1 %v8433_v17  ;;  %v415_v17 = vmul.f32 %v7390_v26, %v407_v38 }
 0x285   : > { %6192 = vmatmul.mubr.bf16.vlgmr.msra.gmra.mxu0 %v5944_v7  ;;  %6235 = vmatmul.mubr.bf16.vlgmr.msra.gmra.mxu1 %v5944_v7  ;;  %v8674_v7 = vld [vmem:[%s11645_s1 + $0x4] ss:$8 sm:$0xf] }
 0x286   : > { %8127 = vmatpush3.bf16.msra.mxu0 %v8434_v48  ;;  %8149 = vmatpush3.bf16.msra.mxu1 %v8435_v18  ;;  %v551_v61 = vrot.slane %v8674_v7, %v9896_v58  ;;  %v511_v48 = vmul.f32 %v7408_v15, %v503_v11  ;;  %v7417_v18 = vld [vmem:[%s8881_s20 + $0x198] sm:$0xff] }
 0x287   : > { %8128 = vmatprep.subr.bf16.mxu0 %v8436_v62  ;;  %8150 = vmatprep.subr.bf16.mxu1 %v8437_v21  ;;  %v10951_v62 = vld [vmem:[%s8881_s20 + $0x1b8] sm:$0xff]  ;;  %v419_v21 = vmul.f32 %v10934_v13, %v407_v38  ;;  %v968_v38 = vrot.slane %v8678_v29, %v9896_v58 }
 0x28a   : > { %8129 = vmatpush3.bf16.msra.mxu0 %v8438_v28  ;;  %8151 = vmatpush3.bf16.msra.mxu1 %v8439_v54  ;;  %v515_v28 = vmul.f32 %v10937_v5, %v503_v11  ;;  %v8675_v54 = vld [vmem:[%s11645_s1 + $0x5] ss:$8 sm:$0xf] }
 0x28b   : > { %8130 = vmatprep.subr.bf16.mxu0 %v8440_v36  ;;  %8152 = vmatprep.subr.bf16.mxu1 %v8441_v20  ;;  %v599_v36 = vrot.slane %v8675_v54, %v9896_v58  ;;  %v671_v20 = vld [vmem:[%s8881_s20 + $0x18] sm:$0xfe] }
 0x28c   : > { %v8680_v54 = vld [vmem:[%s11645_s1 + $0x24] ss:$8 sm:$0xf] }
 0x28e   : > { %8131 = vmatpush3.bf16.msra.mxu0 %v8442_v23  ;;  %8153 = vmatpush3.bf16.msra.mxu1 %v8443_v19  ;;  %v675_v23 = vld [vmem:[%s8881_s20 + $0x58] sm:$0x1]  ;;  %v706_v19 = vmul.f32 %v694_v6, %v10914_v56 }
 0x28f   : > { %8132 = vmatprep.subr.bf16.mxu0 %v8444_v30  ;;  %8154 = vmatprep.subr.bf16.mxu1 %v8445_v3  ;;  %v7445_v30 = vld [vmem:[%s8881_s20 + $0x78] sm:$0xfe]  ;;  %v471_v3 = vadd.f32 %v463_v9, %v367_v63 }
 0x290   : > { %v734_v50 = vrot.slane %v706_v19, 1 }
 0x292   : > { %8133 = vmatpush3.bf16.msra.mxu0 %v8446_v24  ;;  %8155 = vmatpush3.bf16.msra.mxu1 %v8447_v27  ;;  %v7426_v24 = vld [vmem:[%s8881_s20 + $0x1f8] sm:$0xff] }
 0x293   : > { %8134 = vmatprep.subr.bf16.mxu0 %v8448_v12  ;;  %8156 = vmatprep.subr.bf16.mxu1 %v8449_v49  ;;  %v8676_v27 = vld [vmem:[%s11645_s1 + $0x6] ss:$8 sm:$0xf]  ;;  %v7449_v49 = vld [vmem:[%s8881_s20 + $0xb8] sm:$0x1]  ;;  %v607_v46 = vmul.f32 %v7426_v24, %v599_v36 }
 0x294   : > { %v647_v12 = vrot.slane %v8676_v27, %v9896_v58  ;;  %v802_v52 = vmul.f32 %v7449_v49, %v786_v16  ;;  %v7481_v24 = vld [vmem:[%s8881_s20 + $0x1f8] sm:$0xfe] }
 0x296   : > { %8135 = vmatpush3.bf16.msra.mxu0 %v8450_v31  ;;  %8157 = vmatpush3.bf16.msra.mxu1 %v8451_v39  ;;  %v798_v31 = vmul.f32 %v10934_v13, %v786_v16  ;;  %v475_v39 = vadd.f32 %v467_v33, %v371_v1  ;;  %v833_v33 = vrot.slane %v802_v52, 1 }
 0x297   : > { %8136 = vmatprep.subr.bf16.mxu0 %v8452_v34  ;;  %8158 = vmatprep.subr.bf16.mxu1 %v8453_v35  ;;  %v559_v34 = vmul.f32 %v7417_v18, %v551_v61  ;;  %v563_v35 = vmul.f32 %v10951_v62, %v551_v61  ;;  %v8679_v61 = vld [vmem:[%s11645_s1 + $0x23] ss:$8 sm:$0xf]  ;;  %v976_v18 = vmul.f32 %v7463_v10, %v968_v38 }
 0x299   : > { %v567_v4 = vadd.f32 %v559_v34, %v471_v3  ;;  %v571_v11 = vadd.f32 %v563_v35, %v475_v39  ;;  %v7476_v3 = vld [vmem:[%s8881_s20 + $0x1d8] sm:$0x1] }
 0x29a   : > { %8137 = vmatpush3.bf16.msra.mxu0 %v8454_v37  ;;  %8159 = vmatpush3.bf16.msra.mxu1 %v8455_v53  ;;  %v10972_v37 = vld [vmem:[%s8881_s20 + $0x218] sm:$0xff] }
 0x29b   : > { %8138 = vmatprep.subr.bf16.mxu0 %v8456_v60  ;;  %8160 = vmatprep.subr.bf16.mxu1 %v8457_v32  ;;  %v7435_v53 = vld [vmem:[%s8881_s20 + $0x258] sm:$0xff]  ;;  %v611_v57 = vmul.f32 %v10972_v37, %v599_v36  ;;  %v1150_v36 = vrot.slane %v8680_v54, %v9896_v58 }
 0x29c   : > { %v8677_v60 = vld [vmem:[%s11645_s1 + $0x21] ss:$8 sm:$0xf]  ;;  %v7485_v39 = vld [vmem:[%s8881_s20 + $0x238] sm:$0x1] }
 0x29d   : > { %v877_v32 = vrot.slane %v8677_v60, %v9896_v58  ;;  %v7500_v54 = vld [vmem:[%s8881_s20 + $0x78] sm:$0xfc] }
 0x29e   : > { %8139 = vmatpush3.bf16.msra.mxu0 %v8458_v40  ;;  %8161 = vmatpush3.bf16.msra.mxu1 %v8459_v22  ;;  %v519_v40 = vadd.f32 %v511_v48, %v415_v17  ;;  %v10980_v22 = vld [vmem:[%s8881_s20 + $0x278] sm:$0xff]  ;;  %v1059_v17 = vrot.slane %v8679_v61, %v9896_v58 }
 0x29f   : > { %8140 = vmatprep.subr.bf16.mxu0 %v8460_v41  ;;  %8162 = vmatprep.subr.bf16.mxu1 %v8461_v47  ;;  %v702_v41 = vmul.f32 %v694_v6, %v671_v20  ;;  %v710_v47 = vmul.f32 %v694_v6, %v675_v23  ;;  %v659_v26 = vmul.f32 %v10980_v22, %v647_v12  ;;  %v8683_v61 = vld [vmem:[%s11645_s1 + $0x27] ss:$8 sm:$0xf] }
 0x2a0   : > { %v889_v15 = vmul.f32 %v10921_v8, %v877_v32  ;;  %v885_v14 = vmul.f32 %v7454_v43, %v877_v32  ;;  %v615_v1 = vadd.f32 %v607_v46, %v519_v40  ;;  %v893_v7 = vmul.f32 %v7458_v45, %v877_v32 }
 0x2a1   : > { %v733_v6 = vrot.slane %v702_v41, 1  ;;  %v742_v63 = vrot.slane %v710_v47, 1  ;;  %v667_v23 = vadd.f32 %v659_v26, %v571_v11  ;;  %v1071_v60 = vmul.f32 %v10951_v62, %v1059_v17  ;;  %v7494_v11 = vld [vmem:[%s8881_s20 + $0x298] sm:$0x1]  ;;  %v1309_v26 = vld [vmem:[%s8881_s20 + $0x18] sm:$0xfc] }
 0x2a2   : > { %8141 = vmatpush3.bf16.msra.mxu0 %v8462_v51  ;;  %8163 = vmatpush3.bf16.msra.mxu1 %v8463_v44  ;;  %v794_v51 = vmul.f32 %v7445_v30, %v786_v16  ;;  %v523_v44 = vadd.f32 %v515_v28, %v419_v21  ;;  %v7467_v16 = vld [vmem:[%s8881_s20 + $0x178] sm:$0x1]  ;;  %v980_v21 = vmul.f32 %v10937_v5, %v968_v38  ;;  %v7472_v28 = vld [vmem:[%s8881_s20 + $0x198] sm:$0xfe]  ;;  %v916_v19 = vrot.slane %v889_v15, 1 }
 0x2a3   : > { %6849 = vmatprep.subr.bf16.mxu0 %v8466_v59  ;;  %6892 = vmatprep.subr.bf16.mxu1 %v8469_v0  ;;  %v655_v59 = vmul.f32 %v7435_v53, %v647_v12  ;;  %v825_v0 = vrot.slane %v798_v31, 1  ;;  %v984_v30 = vmul.f32 %v7467_v16, %v968_v38  ;;  %v735_v27 = vsel %vm723_vm0, %v733_v6, %v734_v50  ;;  %v8682_v15 = vld [vmem:[%s11645_s1 + $0x26] ss:$8 sm:$0xf]  ;;  %v1313_v16 = vld [vmem:[%s8881_s20 + $0x58] sm:$0x3] }
 0x2a4   : > { %v824_v9 = vrot.slane %v794_v51, 1  ;;  %v619_v48 = vadd.f32 %v611_v57, %v523_v44  ;;  %v743_v12 = vsel %vm723_vm0, %v734_v50, %v742_v63  ;;  %v915_v31 = vrot.slane %v885_v14, 1 }
 0x2a5   : > { %v663_v20 = vadd.f32 %v655_v59, %v567_v4  ;;  %v834_v34 = vsel %vm723_vm0, %v825_v0, %v833_v33  ;;  %v924_v35 = vrot.slane %v893_v7, 1  ;;  %v1067_v53 = vmul.f32 %v7472_v28, %v1059_v17  ;;  %v7490_v59 = vld [vmem:[%s8881_s20 + $0x258] sm:$0xfe] }
 0x2a6   : > { %v826_v49 = vsel %vm723_vm0, %v824_v9, %v825_v0  ;;  %v1006_v32 = vrot.slane %v976_v18, 1  ;;  %v1007_v40 = vrot.slane %v980_v21, 1  ;;  %v1075_v41 = vmul.f32 %v7476_v3, %v1059_v17  ;;  %v8681_v0 = vld [vmem:[%s11645_s1 + $0x25] ss:$8 sm:$0xf] }
 0x2a7   : > { %v1158_v47 = vmul.f32 %v7481_v24, %v1150_v36  ;;  %v755_v51 = vadd.f32 %v735_v27, %v615_v1  ;;  %v1015_v44 = vrot.slane %v984_v30, 1  ;;  %v1162_v46 = vmul.f32 %v10972_v37, %v1150_v36  ;;  %v7504_v27 = vld [vmem:[%s8881_s20 + $0xb8] sm:$0x3] }
 0x2a8   : > { %v1166_v50 = vmul.f32 %v7485_v39, %v1150_v36  ;;  %v759_v52 = vadd.f32 %v743_v12, %v619_v48  ;;  %v846_v43 = vadd.f32 %v826_v49, %v663_v20  ;;  %v850_v57 = vadd.f32 %v834_v34, %v667_v23  ;;  %v8684_v12 = vld [vmem:[%s11645_s1 + $0x40] ss:$8 sm:$0xf] }
 0x2a9   : > { %v1241_v45 = vrot.slane %v8681_v0, %v9896_v58  ;;  %v917_v29 = vsel %vm723_vm0, %v915_v31, %v916_v19  ;;  %v925_v38 = vsel %vm723_vm0, %v916_v19, %v924_v35  ;;  %v1097_v4 = vrot.slane %v1067_v53, 1  ;;  %v7509_v53 = vld [vmem:[%s8881_s20 + $0xd8] sm:$0xfc] }
 0x2aa   : > { %v1332_v10 = vrot.slane %v8682_v15, %v9896_v58  ;;  %v1008_v6 = vsel %vm723_vm0, %v1006_v32, %v1007_v40  ;;  %v1098_v63 = vrot.slane %v1071_v60, 1  ;;  %v1106_v9 = vrot.slane %v1075_v41, 1 }
 0x2ab   : > { %v1188_v14 = vrot.slane %v1158_v47, 1  ;;  %v1016_v1 = vsel %vm723_vm0, %v1007_v40, %v1015_v44  ;;  %v1189_v33 = vrot.slane %v1162_v46, 1  ;;  %v1197_v7 = vrot.slane %v1166_v50, 1  ;;  %v7513_v47 = vld [vmem:[%s8881_s20 + $0x118] sm:$0x3] }
 0x2ac   : > { %v1424_v17 = vrot.slane %v8683_v61, %v9896_v58  ;;  %v937_v48 = vadd.f32 %v917_v29, %v755_v51  ;;  %v1249_v18 = vmul.f32 %v7490_v59, %v1241_v45  ;;  %v1253_v21 = vmul.f32 %v10980_v22, %v1241_v45  ;;  %v8685_v59 = vld [vmem:[%s11645_s1 + $0x41] ss:$8 sm:$0xf] }
 0x2ad   : > { %v1257_v28 = vmul.f32 %v7494_v11, %v1241_v45  ;;  %v941_v36 = vadd.f32 %v925_v38, %v759_v52  ;;  %v1340_v20 = vmul.f32 %v1332_v10, %v1309_v26  ;;  %v1344_v23 = vmul.f32 %v1332_v10, %v10914_v56  ;;  %v8686_v11 = vld [vmem:[%s11645_s1 + $0x42] ss:$8 sm:$0xf]  ;;  %v7531_v61 = vld [vmem:[%s8881_s20 + $0x1d8] sm:$0x3] }
 0x2ae   : > { %v1348_v19 = vmul.f32 %v1332_v10, %v1313_v16  ;;  %v1028_v30 = vadd.f32 %v1008_v6, %v846_v43  ;;  %v1032_v3 = vadd.f32 %v1016_v1, %v850_v57  ;;  %v1099_v24 = vsel %vm723_vm0, %v1097_v4, %v1098_v63  ;;  %v7518_v4 = vld [vmem:[%s8881_s20 + $0x138] sm:$0xfc] }
 0x2af   : > { %v1515_v49 = vrot.slane %v8684_v12, %v9896_v58  ;;  %v1107_v31 = vsel %vm723_vm0, %v1098_v63, %v1106_v9  ;;  %v1190_v39 = vsel %vm723_vm0, %v1188_v14, %v1189_v33  ;;  %v1198_v34 = vsel %vm723_vm0, %v1189_v33, %v1197_v7  ;;  %v7522_v9 = vld [vmem:[%s8881_s20 + $0x178] sm:$0x3]  ;;  %v7527_v14 = vld [vmem:[%s8881_s20 + $0x198] sm:$0xfc] }
 0x2b0   : > { %v1432_v35 = vmul.f32 %v7500_v54, %v1424_v17  ;;  %v1279_v60 = vrot.slane %v1249_v18, 1  ;;  %v1280_v32 = vrot.slane %v1253_v21, 1  ;;  %v1288_v40 = vrot.slane %v1257_v28, 1 }
 0x2b1   : > { %v1436_v41 = vmul.f32 %v10934_v13, %v1424_v17  ;;  %v1371_v51 = vrot.slane %v1340_v20, 2  ;;  %v1372_v44 = vrot.slane %v1344_v23, 2  ;;  %v1380_v46 = vrot.slane %v1348_v19, 2 }
 0x2b2   : > { %v1440_v50 = vmul.f32 %v7504_v27, %v1424_v17  ;;  %v1119_v52 = vadd.f32 %v1099_v24, %v937_v48  ;;  %v1523_v43 = vmul.f32 %v7509_v53, %v1515_v49  ;;  %v1527_v57 = vmul.f32 %v10921_v8, %v1515_v49 }
 0x2b3   : > { %v1606_v0 = vrot.slane %v8685_v59, %v9896_v58  ;;  %v1123_v45 = vadd.f32 %v1107_v31, %v941_v36  ;;  %v1210_v29 = vadd.f32 %v1190_v39, %v1028_v30  ;;  %v1531_v38 = vmul.f32 %v7513_v47, %v1515_v49  ;;  %v7536_v31 = vld [vmem:[%s8881_s20 + $0x1f8] sm:$0xfc]  ;;  %v7540_v39 = vld [vmem:[%s8881_s20 + $0x238] sm:$0x3] }
 0x2b4   : > { %v1697_v26 = vrot.slane %v8686_v11, %v9896_v58  ;;  %v1214_v15 = vadd.f32 %v1198_v34, %v1032_v3  ;;  %v1281_v10 = vsel %vm723_vm0, %v1279_v60, %v1280_v32  ;;  %v1289_v6 = vsel %vm723_vm0, %v1280_v32, %v1288_v40  ;;  %v8687_v3 = vld [vmem:[%s11645_s1 + $0x43] ss:$8 sm:$0xf]  ;;  %v8688_v34 = vld [vmem:[%s11645_s1 + $0x44] ss:$8 sm:$0xf] }
 0x2b5   : > { %v1462_v63 = vrot.slane %v1432_v35, 2  ;;  %v1373_v16 = vsel %vm1361_vm1, %v1371_v51, %v1372_v44  ;;  %v1381_v1 = vsel %vm1361_vm1, %v1372_v44, %v1380_v46  ;;  %v1463_v33 = vrot.slane %v1436_v41, 2  ;;  %v7545_v41 = vld [vmem:[%s8881_s20 + $0x258] sm:$0xfc] }
 0x2b6   : > { %v1471_v7 = vrot.slane %v1440_v50, 2  ;;  %v1553_v17 = vrot.slane %v1523_v43, 2  ;;  %v1554_v48 = vrot.slane %v1527_v57, 2  ;;  %v1614_v18 = vmul.f32 %v7518_v4, %v1606_v0  ;;  %v7549_v50 = vld [vmem:[%s8881_s20 + $0x298] sm:$0x3] }
 0x2b7   : > { %v1618_v21 = vmul.f32 %v10937_v5, %v1606_v0  ;;  %v1562_v28 = vrot.slane %v1531_v38, 2  ;;  %v1622_v54 = vmul.f32 %v7522_v9, %v1606_v0  ;;  %v1705_v36 = vmul.f32 %v7527_v14, %v1697_v26  ;;  %v8689_v38 = vld [vmem:[%s11645_s1 + $0x45] ss:$8 sm:$0xf] }
 0x2b8   : > { %v1709_v20 = vmul.f32 %v10951_v62, %v1697_v26  ;;  %v1301_v23 = vadd.f32 %v1281_v10, %v1119_v52  ;;  %v1305_v19 = vadd.f32 %v1289_v6, %v1123_v45  ;;  %v1713_v30 = vmul.f32 %v7531_v61, %v1697_v26  ;;  %v1947_v6 = vld [vmem:[%s8881_s20 + $0x18] sm:$0xf8] }
 0x2b9   : > { %v1788_v24 = vrot.slane %v8687_v3, %v9896_v58  ;;  %v1393_v27 = vadd.f32 %v1373_v16, %v1210_v29  ;;  %v1397_v12 = vadd.f32 %v1381_v1, %v1214_v15  ;;  %v1464_v49 = vsel %vm1361_vm1, %v1462_v63, %v1463_v33  ;;  %v1951_v16 = vld [vmem:[%s8881_s20 + $0x58] sm:$0x7]  ;;  %v7555_v1 = vld [vmem:[%s8881_s20 + $0x78] sm:$0xf8] }
 0x2ba   : > { %v1879_v35 = vrot.slane %v8688_v34, %v9896_v58  ;;  %v1472_v53 = vsel %vm1361_vm1, %v1463_v33, %v1471_v7  ;;  %v1555_v60 = vsel %vm1361_vm1, %v1553_v17, %v1554_v48  ;;  %v1644_v32 = vrot.slane %v1614_v18, 2  ;;  %v8690_v33 = vld [vmem:[%s11645_s1 + $0x46] ss:$8 sm:$0xf] }
 0x2bb   : > { %v1645_v40 = vrot.slane %v1618_v21, 2  ;;  %v1563_v47 = vsel %vm1361_vm1, %v1554_v48, %v1562_v28  ;;  %v1653_v51 = vrot.slane %v1622_v54, 2  ;;  %v1735_v44 = vrot.slane %v1705_v36, 2  ;;  %v7559_v21 = vld [vmem:[%s8881_s20 + $0xb8] sm:$0x7] }
 0x2bc   : > { %v1736_v46 = vrot.slane %v1709_v20, 2  ;;  %v1744_v52 = vrot.slane %v1713_v30, 2  ;;  %v1796_v43 = vmul.f32 %v7536_v31, %v1788_v24  ;;  %v1800_v57 = vmul.f32 %v10972_v37, %v1788_v24  ;;  %v8691_v3 = vld [vmem:[%s11645_s1 + $0x47] ss:$8 sm:$0xf] }
 0x2bd   : > { %v1804_v59 = vmul.f32 %v7540_v39, %v1788_v24  ;;  %v1484_v0 = vadd.f32 %v1464_v49, %v1301_v23  ;;  %v1887_v45 = vmul.f32 %v7545_v41, %v1879_v35  ;;  %v1891_v29 = vmul.f32 %v10980_v22, %v1879_v35  ;;  %v7564_v39 = vld [vmem:[%s8881_s20 + $0xd8] sm:$0xf8] }
 0x2be   : > { %v1970_v4 = vrot.slane %v8689_v38, %v9896_v58  ;;  %v1488_v11 = vadd.f32 %v1472_v53, %v1305_v19  ;;  %v1575_v26 = vadd.f32 %v1555_v60, %v1393_v27  ;;  %v1579_v15 = vadd.f32 %v1563_v47, %v1397_v12  ;;  %v7568_v60 = vld [vmem:[%s8881_s20 + $0x118] sm:$0x7] }
 0x2bf   : > { %v1895_v10 = vmul.f32 %v7549_v50, %v1879_v35  ;;  %v1646_v63 = vsel %vm1361_vm1, %v1644_v32, %v1645_v40  ;;  %v1654_v9 = vsel %vm1361_vm1, %v1645_v40, %v1653_v51  ;;  %v1737_v14 = vsel %vm1361_vm1, %v1735_v44, %v1736_v46  ;;  %v8692_v32 = vld [vmem:[%s11645_s1 + $0x60] ss:$8 sm:$0xf] }
 0x2c0   : > { %v2062_v7 = vrot.slane %v8690_v33, %v9896_v58  ;;  %v1745_v61 = vsel %vm1361_vm1, %v1736_v46, %v1744_v52  ;;  %v1826_v17 = vrot.slane %v1796_v43, 2  ;;  %v1827_v48 = vrot.slane %v1800_v57, 2  ;;  %v7573_v46 = vld [vmem:[%s8881_s20 + $0x138] sm:$0xf8] }
 0x2c1   : > { %v1835_v18 = vrot.slane %v1804_v59, 2  ;;  %v1917_v28 = vrot.slane %v1887_v45, 2  ;;  %v1918_v54 = vrot.slane %v1891_v29, 2  ;;  %v1978_v36 = vmul.f32 %v1970_v4, %v1947_v6  ;;  %v7577_v59 = vld [vmem:[%s8881_s20 + $0x178] sm:$0x7] }
 0x2c2   : > { %v1982_v20 = vmul.f32 %v1970_v4, %v10914_v56  ;;  %v1666_v23 = vadd.f32 %v1646_v63, %v1484_v0  ;;  %v1926_v19 = vrot.slane %v1895_v10, 2  ;;  %v1986_v30 = vmul.f32 %v1970_v4, %v1951_v16  ;;  %v7586_v16 = vld [vmem:[%s8881_s20 + $0x1d8] sm:$0x7] }
 0x2c3   : > { %v2153_v24 = vrot.slane %v8691_v3, %v9896_v58  ;;  %v1670_v27 = vadd.f32 %v1654_v9, %v1488_v11  ;;  %v2070_v12 = vmul.f32 %v7555_v1, %v2062_v7  ;;  %v2074_v49 = vmul.f32 %v10934_v13, %v2062_v7  ;;  %v8694_v1 = vld [vmem:[%s11645_s1 + $0x62] ss:$8 sm:$0xf] }
 0x2c4   : > { %v2078_v31 = vmul.f32 %v7559_v21, %v2062_v7  ;;  %v1757_v34 = vadd.f32 %v1737_v14, %v1575_v26  ;;  %v1761_v35 = vadd.f32 %v1745_v61, %v1579_v15  ;;  %v1828_v53 = vsel %vm1361_vm1, %v1826_v17, %v1827_v48  ;;  %v8693_v15 = vld [vmem:[%s11645_s1 + $0x61] ss:$8 sm:$0xf]  ;;  %v7582_v14 = vld [vmem:[%s8881_s20 + $0x198] sm:$0xf8] }
 0x2c5   : > { %v2244_v40 = vrot.slane %v8692_v32, %v9896_v58  ;;  %v1836_v41 = vsel %vm1361_vm1, %v1827_v48, %v1835_v18  ;;  %v1919_v47 = vsel %vm1361_vm1, %v1917_v28, %v1918_v54  ;;  %v2009_v51 = vrot.slane %v1978_v36, 3  ;;  %v7591_v18 = vld [vmem:[%s8881_s20 + $0x1f8] sm:$0xf8] }
 0x2c6   : > { %v2010_v44 = vrot.slane %v1982_v20, 3  ;;  %v1927_v50 = vsel %vm1361_vm1, %v1918_v54, %v1926_v19  ;;  %v2018_v52 = vrot.slane %v1986_v30, 3  ;;  %v2161_v43 = vmul.f32 %v7564_v39, %v2153_v24  ;;  %v7595_v20 = vld [vmem:[%s8881_s20 + $0x238] sm:$0x7] }
 0x2c7   : > { %v2165_v57 = vmul.f32 %v10921_v8, %v2153_v24  ;;  %v2100_v0 = vrot.slane %v2070_v12, 3  ;;  %v2101_v45 = vrot.slane %v2074_v49, 3  ;;  %v2109_v29 = vrot.slane %v2078_v31, 3 }
 0x2c8   : > { %v2169_v38 = vmul.f32 %v7568_v60, %v2153_v24  ;;  %v1848_v4 = vadd.f32 %v1828_v53, %v1666_v23  ;;  %v1852_v11 = vadd.f32 %v1836_v41, %v1670_v27  ;;  %v2252_v26 = vmul.f32 %v7573_v46, %v2244_v40  ;;  %v7600_v41 = vld [vmem:[%s8881_s20 + $0x258] sm:$0xf8] }
 0x2c9   : > { %v2335_v10 = vrot.slane %v8693_v15, %v9896_v58  ;;  %v1939_v6 = vadd.f32 %v1919_v47, %v1757_v34  ;;  %v2256_v63 = vmul.f32 %v10937_v5, %v2244_v40  ;;  %v2260_v9 = vmul.f32 %v7577_v59, %v2244_v40  ;;  %v7604_v47 = vld [vmem:[%s8881_s20 + $0x298] sm:$0x7] }
 0x2ca   : > { %v2426_v33 = vrot.slane %v8694_v1, %v9896_v58  ;;  %v1943_v7 = vadd.f32 %v1927_v50, %v1761_v35  ;;  %v2011_v61 = vsel %vm1999_vm2, %v2009_v51, %v2010_v44  ;;  %v2019_v17 = vsel %vm1999_vm2, %v2010_v44, %v2018_v52  ;;  %v8695_v35 = vld [vmem:[%s11645_s1 + $0x63] ss:$8 sm:$0xf]  ;;  %v8696_v51 = vld [vmem:[%s11645_s1 + $0x64] ss:$8 sm:$0xf] }
 0x2cb   : > { %v2191_v48 = vrot.slane %v2161_v43, 3  ;;  %v2102_v21 = vsel %vm1999_vm2, %v2100_v0, %v2101_v45  ;;  %v2110_v28 = vsel %vm1999_vm2, %v2101_v45, %v2109_v29  ;;  %v2192_v54 = vrot.slane %v2165_v57, 3  ;;  %v2585_v57 = vld [vmem:[%s8881_s20 + $0x18] sm:$0xf0] }
 0x2cc   : > { %v2200_v36 = vrot.slane %v2169_v38, 3  ;;  %v2282_v23 = vrot.slane %v2252_v26, 3  ;;  %v2343_v19 = vmul.f32 %v7582_v14, %v2335_v10  ;;  %v2347_v30 = vmul.f32 %v10951_v62, %v2335_v10  ;;  %v2589_v38 = vld [vmem:[%s8881_s20 + $0x58] sm:$0xf] }
 0x2cd   : > { %v2351_v3 = vmul.f32 %v7586_v16, %v2335_v10  ;;  %v2283_v24 = vrot.slane %v2256_v63, 3  ;;  %v2291_v27 = vrot.slane %v2260_v9, 3  ;;  %v2434_v12 = vmul.f32 %v7591_v18, %v2426_v33  ;;  %v8697_v9 = vld [vmem:[%s11645_s1 + $0x65] ss:$8 sm:$0xf] }
 0x2ce   : > { %v2438_v49 = vmul.f32 %v10972_v37, %v2426_v33  ;;  %v2031_v31 = vadd.f32 %v2011_v61, %v1848_v4  ;;  %v2035_v39 = vadd.f32 %v2019_v17, %v1852_v11  ;;  %v2442_v34 = vmul.f32 %v7595_v20, %v2426_v33  ;;  %v7610_v61 = vld [vmem:[%s8881_s20 + $0x78] sm:$0xf0] }
 0x2cf   : > { %v2517_v53 = vrot.slane %v8695_v35, %v9896_v58  ;;  %v2122_v60 = vadd.f32 %v2102_v21, %v1939_v6  ;;  %v2126_v32 = vadd.f32 %v2110_v28, %v1943_v7  ;;  %v2193_v40 = vsel %vm1999_vm2, %v2191_v48, %v2192_v54  ;;  %v7614_v21 = vld [vmem:[%s8881_s20 + $0xb8] sm:$0xf]  ;;  %v8698_v28 = vld [vmem:[%s11645_s1 + $0x66] ss:$8 sm:$0xf] }
 0x2d0   : > { %v2608_v44 = vrot.slane %v8696_v51, %v9896_v58  ;;  %v2201_v46 = vsel %vm1999_vm2, %v2192_v54, %v2200_v36  ;;  %v2373_v50 = vrot.slane %v2343_v19, 3  ;;  %v2374_v52 = vrot.slane %v2347_v30, 3  ;;  %v7619_v30 = vld [vmem:[%s8881_s20 + $0xd8] sm:$0xf0] }
 0x2d1   : > { %v2382_v43 = vrot.slane %v2351_v3, 3  ;;  %v2284_v59 = vsel %vm1999_vm2, %v2282_v23, %v2283_v24  ;;  %v2292_v0 = vsel %vm1999_vm2, %v2283_v24, %v2291_v27  ;;  %v2464_v45 = vrot.slane %v2434_v12, 3 }
 0x2d2   : > { %v2465_v29 = vrot.slane %v2438_v49, 3  ;;  %v2473_v4 = vrot.slane %v2442_v34, 3  ;;  %v2525_v11 = vmul.f32 %v7600_v41, %v2517_v53  ;;  %v2529_v26 = vmul.f32 %v10980_v22, %v2517_v53  ;;  %v7628_v41 = vld [vmem:[%s8881_s20 + $0x138] sm:$0xf0] }
 0x2d3   : > { %v2533_v15 = vmul.f32 %v7604_v47, %v2517_v53  ;;  %v2213_v10 = vadd.f32 %v2193_v40, %v2031_v31  ;;  %v2616_v6 = vmul.f32 %v2608_v44, %v2585_v57  ;;  %v2620_v63 = vmul.f32 %v2608_v44, %v10914_v56 }
 0x2d4   : > { %v2700_v14 = vrot.slane %v8697_v9, %v9896_v58  ;;  %v2217_v16 = vadd.f32 %v2201_v46, %v2035_v39  ;;  %v2304_v1 = vadd.f32 %v2284_v59, %v2122_v60  ;;  %v2375_v33 = vsel %vm1999_vm2, %v2373_v50, %v2374_v52  ;;  %v8699_v39 = vld [vmem:[%s11645_s1 + $0x67] ss:$8 sm:$0xf]  ;;  %v7623_v60 = vld [vmem:[%s8881_s20 + $0x118] sm:$0xf] }
 0x2d5   : > { %v2624_v7 = vmul.f32 %v2608_v44, %v2589_v38  ;;  %v2308_v17 = vadd.f32 %v2292_v0, %v2126_v32  ;;  %v2383_v48 = vsel %vm1999_vm2, %v2374_v52, %v2382_v43  ;;  %v2466_v18 = vsel %vm1999_vm2, %v2464_v45, %v2465_v29  ;;  %v7632_v46 = vld [vmem:[%s8881_s20 + $0x178] sm:$0xf] }
 0x2d6   : > { %v2791_v54 = vrot.slane %v8698_v28, %v9896_v58  ;;  %v2474_v36 = vsel %vm1999_vm2, %v2465_v29, %v2473_v4  ;;  %v2555_v20 = vrot.slane %v2525_v11, 3  ;;  %v2556_v23 = vrot.slane %v2529_v26, 3  ;;  %v8700_v50 = vld [vmem:[%s11645_s1 + $0x80] ss:$8 sm:$0xf] }
 0x2d7   : > { %v2564_v19 = vrot.slane %v2533_v15, 3  ;;  %v2647_v3 = vrot.slane %v2616_v6, 4  ;;  %v2648_v24 = vrot.slane %v2620_v63, 4  ;;  %v2708_v27 = vmul.f32 %v7610_v61, %v2700_v14  ;;  %v7637_v11 = vld [vmem:[%s8881_s20 + $0x198] sm:$0xf0] }
 0x2d8   : > { %v2712_v12 = vmul.f32 %v10934_v13, %v2700_v14  ;;  %v2656_v49 = vrot.slane %v2624_v7, 4  ;;  %v2716_v31 = vmul.f32 %v7614_v21, %v2700_v14  ;;  %v2882_v34 = vrot.slane %v8699_v39, %v9896_v58  ;;  %v8702_v21 = vld [vmem:[%s11645_s1 + $0x82] ss:$8 sm:$0xf] }
 0x2d9   : > { %v2395_v35 = vadd.f32 %v2375_v33, %v2213_v10  ;;  %v2399_v53 = vadd.f32 %v2383_v48, %v2217_v16  ;;  %v2799_v32 = vmul.f32 %v7619_v30, %v2791_v54  ;;  %v2803_v40 = vmul.f32 %v10921_v8, %v2791_v54  ;;  %v7641_v16 = vld [vmem:[%s8881_s20 + $0x1d8] sm:$0xf]  ;;  %v7646_v48 = vld [vmem:[%s8881_s20 + $0x1f8] sm:$0xf0] }
 0x2da   : > { %v2486_v47 = vadd.f32 %v2466_v18, %v2304_v1  ;;  %v2490_v51 = vadd.f32 %v2474_v36, %v2308_v17  ;;  %v2557_v44 = vsel %vm1999_vm2, %v2555_v20, %v2556_v23  ;;  %v2973_v52 = vrot.slane %v8700_v50, %v9896_v58  ;;  %v8701_v1 = vld [vmem:[%s11645_s1 + $0x81] ss:$8 sm:$0xf] }
 0x2db   : > { %v2565_v43 = vsel %vm1999_vm2, %v2556_v23, %v2564_v19  ;;  %v2649_v57 = vsel %vm2637_vm3, %v2647_v3, %v2648_v24  ;;  %v2738_v59 = vrot.slane %v2708_v27, 4  ;;  %v2739_v0 = vrot.slane %v2712_v12, 4  ;;  %v7650_v18 = vld [vmem:[%s8881_s20 + $0x238] sm:$0xf]  ;;  %v7655_v19 = vld [vmem:[%s8881_s20 + $0x258] sm:$0xf0] }
 0x2dc   : > { %v2657_v45 = vsel %vm2637_vm3, %v2648_v24, %v2656_v49  ;;  %v2747_v29 = vrot.slane %v2716_v31, 4  ;;  %v2807_v38 = vmul.f32 %v7623_v60, %v2791_v54  ;;  %v2890_v4 = vmul.f32 %v7628_v41, %v2882_v34 }
 0x2dd   : > { %v2829_v26 = vrot.slane %v2799_v32, 4  ;;  %v2830_v15 = vrot.slane %v2803_v40, 4  ;;  %v2894_v10 = vmul.f32 %v10937_v5, %v2882_v34  ;;  %v2898_v6 = vmul.f32 %v7632_v46, %v2882_v34  ;;  %v7659_v34 = vld [vmem:[%s8881_s20 + $0x298] sm:$0xf] }
 0x2de   : > { %v2577_v63 = vadd.f32 %v2557_v44, %v2395_v35  ;;  %v2581_v9 = vadd.f32 %v2565_v43, %v2399_v53  ;;  %v2669_v14 = vadd.f32 %v2649_v57, %v2486_v47  ;;  %v3064_v33 = vrot.slane %v8701_v1, %v9896_v58  ;;  %v3223_v57 = vld [vmem:[%s8881_s20 + $0x18] sm:$0xe0] }
 0x2df   : > { %v2740_v7 = vsel %vm2637_vm3, %v2738_v59, %v2739_v0  ;;  %v2981_v61 = vmul.f32 %v7637_v11, %v2973_v52  ;;  %v2985_v17 = vmul.f32 %v10951_v62, %v2973_v52  ;;  %v3155_v28 = vrot.slane %v8702_v21, %v9896_v58  ;;  %v3227_v59 = vld [vmem:[%s8881_s20 + $0x58] sm:$0x1f] }
 0x2e0   : > { %v2673_v54 = vadd.f32 %v2657_v45, %v2490_v51  ;;  %v2748_v36 = vsel %vm2637_vm3, %v2739_v0, %v2747_v29  ;;  %v2838_v20 = vrot.slane %v2807_v38, 4  ;;  %v2920_v23 = vrot.slane %v2890_v4, 4  ;;  %v8703_v51 = vld [vmem:[%s11645_s1 + $0x83] ss:$8 sm:$0xf] }
 0x2e1   : > { %v2831_v30 = vsel %vm2637_vm3, %v2829_v26, %v2830_v15  ;;  %v2921_v3 = vrot.slane %v2894_v10, 4  ;;  %v2929_v24 = vrot.slane %v2898_v6, 4  ;;  %v2989_v27 = vmul.f32 %v7641_v16, %v2973_v52  ;;  %v8704_v38 = vld [vmem:[%s11645_s1 + $0x84] ss:$8 sm:$0xf] }
 0x2e2   : > { %v2760_v12 = vadd.f32 %v2740_v7, %v2577_v63  ;;  %v3072_v49 = vmul.f32 %v7646_v48, %v3064_v33  ;;  %v3076_v31 = vmul.f32 %v10972_v37, %v3064_v33  ;;  %v3080_v39 = vmul.f32 %v7650_v18, %v3064_v33  ;;  %v7665_v6 = vld [vmem:[%s8881_s20 + $0x78] sm:$0xe0]  ;;  %v7669_v7 = vld [vmem:[%s8881_s20 + $0xb8] sm:$0x1f] }
 0x2e3   : > { %v3011_v35 = vrot.slane %v2981_v61, 4  ;;  %v3012_v53 = vrot.slane %v2985_v17, 4  ;;  %v3163_v60 = vmul.f32 %v7655_v19, %v3155_v28  ;;  %v3167_v32 = vmul.f32 %v10980_v22, %v3155_v28  ;;  %v8705_v18 = vld [vmem:[%s11645_s1 + $0x85] ss:$8 sm:$0xf] }
 0x2e4   : > { %v2764_v40 = vadd.f32 %v2748_v36, %v2581_v9  ;;  %v2839_v41 = vsel %vm2637_vm3, %v2830_v15, %v2838_v20  ;;  %v2851_v47 = vadd.f32 %v2831_v30, %v2669_v14  ;;  %v3246_v44 = vrot.slane %v8703_v51, %v9896_v58 }
 0x2e5   : > { %v2922_v46 = vsel %vm2637_vm3, %v2920_v23, %v2921_v3  ;;  %v2930_v50 = vsel %vm2637_vm3, %v2921_v3, %v2929_v24  ;;  %v3020_v52 = vrot.slane %v2989_v27, 4  ;;  %v3171_v43 = vmul.f32 %v7659_v34, %v3155_v28  ;;  %v7869_v28 = vld [vmem:[%s11651_s7] ss:$0 sm:$0xff] }
 0x2e6   : > { %v3102_v0 = vrot.slane %v3072_v49, 4  ;;  %v3103_v45 = vrot.slane %v3076_v31, 4  ;;  %v3111_v29 = vrot.slane %v3080_v39, 4  ;;  %v3338_v4 = vrot.slane %v8704_v38, %v9896_v58  ;;  %v7683_v38 = vld [vmem:[%s8881_s20 + $0x138] sm:$0xe0] }
 0x2e7   : > { %v2855_v11 = vadd.f32 %v2839_v41, %v2673_v54  ;;  %v3013_v26 = vsel %vm2637_vm3, %v3011_v35, %v3012_v53  ;;  %v3193_v15 = vrot.slane %v3163_v60, 4  ;;  %v3194_v10 = vrot.slane %v3167_v32, 4  ;;  %v8706_v41 = vld [vmem:[%s11645_s1 + $0x86] ss:$8 sm:$0xf] }
 0x2e8   : > { %v2942_v14 = vadd.f32 %v2922_v46, %v2760_v12  ;;  %v3254_v16 = vmul.f32 %v3246_v44, %v3223_v57  ;;  %v3258_v1 = vmul.f32 %v3246_v44, %v10914_v56  ;;  %v3262_v33 = vmul.f32 %v3246_v44, %v3227_v59  ;;  %v7678_v57 = vld [vmem:[%s8881_s20 + $0x118] sm:$0x1f] }
 0x2e9   : > { %v2946_v61 = vadd.f32 %v2930_v50, %v2764_v40  ;;  %v3021_v17 = vsel %vm2637_vm3, %v3012_v53, %v3020_v52  ;;  %v3202_v48 = vrot.slane %v3171_v43, 4  ;;  %v3429_v21 = vrot.slane %v8705_v18, %v9896_v58  ;;  %v7674_v40 = vld [vmem:[%s8881_s20 + $0xd8] sm:$0xe0] }
 0x2ea   : > { %v3033_v20 = vadd.f32 %v3013_v26, %v2851_v47  ;;  %v3104_v56 = vsel %vm2637_vm3, %v3102_v0, %v3103_v45  ;;  %v3112_v23 = vsel %vm2637_vm3, %v3103_v45, %v3111_v29  ;;  %v3346_v19 = vmul.f32 %v7665_v6, %v3338_v4  ;;  %v7902_v47 = vld [vmem:[%s11652_s8] ss:$0 sm:$0xff]  ;;  %v8707_v18 = vld [vmem:[%s11645_s1 + $0x87] ss:$8 sm:$0xf] }
 0x2eb   : > { %v3195_v3 = vsel %vm2637_vm3, %v3193_v15, %v3194_v10  ;;  %v3350_v24 = vmul.f32 %v10934_v13, %v3338_v4  ;;  %v3354_v27 = vmul.f32 %v7669_v7, %v3338_v4  ;;  %v3037_v31 = vadd.f32 %v3021_v17, %v2855_v11  ;;  %v7687_v4 = vld [vmem:[%s8881_s20 + $0x178] sm:$0x1f] }
 0x2ec   : > { %v3285_v39 = vrot.slane %v3254_v16, 5  ;;  %v3286_v34 = vrot.slane %v3258_v1, 5  ;;  %v3294_v35 = vrot.slane %v3262_v33, 5  ;;  %v3203_v32 = vsel %vm2637_vm3, %v3194_v10, %v3202_v48 }
 0x2ed   : > { %v3520_v13 = vrot.slane %v8706_v41, %v9896_v58  ;;  %v3124_v46 = vadd.f32 %v3104_v56, %v2942_v14  ;;  %v3128_v50 = vadd.f32 %v3112_v23, %v2946_v61  ;;  %v3215_v52 = vadd.f32 %v3195_v3, %v3033_v20  ;;  %v7696_v23 = vld [vmem:[%s8881_s20 + $0x1d8] sm:$0x1f] }
 0x2ee   : > { %v3376_v43 = vrot.slane %v3346_v19, 5  ;;  %v3377_v45 = vrot.slane %v3350_v24, 5  ;;  %v3385_v29 = vrot.slane %v3354_v27, 5  ;;  %v3219_v11 = vadd.f32 %v3203_v32, %v3037_v31  ;;  %v8708_v19 = vld [vmem:[%s11645_s1 + $0xa0] ss:$8 sm:$0xf] }
 0x2ef   : > { %v3287_v26 = vsel %vm3275_vm4, %v3285_v39, %v3286_v34  ;;  %v3295_v15 = vsel %vm3275_vm4, %v3286_v34, %v3294_v35  ;;  %v3437_v10 = vmul.f32 %v7674_v40, %v3429_v21  ;;  %v3441_v14 = vmul.f32 %v10921_v8, %v3429_v21 }
 0x2f0   : > { %v3445_v16 = vmul.f32 %v7678_v57, %v3429_v21  ;;  %v3528_v1 = vmul.f32 %v7683_v38, %v3520_v13  ;;  %v3532_v33 = vmul.f32 %v10937_v5, %v3520_v13  ;;  %v3536_v7 = vmul.f32 %v7687_v4, %v3520_v13  ;;  %v8710_v13 = vld [vmem:[%s11645_s1 + $0xa1] ss:$8 sm:$0xf] }
 0x2f1   : > { %v3378_v17 = vsel %vm3275_vm4, %v3376_v43, %v3377_v45  ;;  %v3386_v48 = vsel %vm3275_vm4, %v3377_v45, %v3385_v29  ;;  %v3307_v8 = vadd.f32 %v3287_v26, %v3124_v46  ;;  %v3311_v21 = vadd.f32 %v3295_v15, %v3128_v50  ;;  %v8712_v43 = vld [vmem:[%s8881_s20 + $0x148] sm:$0xff]  ;;  %v7710_v45 = vld [vmem:[%s8881_s20 + $0x258] sm:$0xe0]  ;;  %v7714_v26 = vld [vmem:[%s8881_s20 + $0x298] sm:$0x1f] }
 0x2f2   : > { %v3467_v5 = vrot.slane %v3437_v10, 5  ;;  %v3468_v56 = vrot.slane %v3441_v14, 5  ;;  %v3398_v3 = vadd.f32 %v3378_v17, %v3215_v52  ;;  %v3402_v24 = vadd.f32 %v3386_v48, %v3219_v11 }
 0x2f3   : > { %v3476_v27 = vrot.slane %v3445_v16, 5  ;;  %v3559_v39 = vrot.slane %v3532_v33, 5  ;;  %v3567_v34 = vrot.slane %v3536_v7, 5  ;;  %v3865_v7 = vld [vmem:[%s8881_s20 + $0x58] sm:$0x3f] }
 0x2f5   : > { %v3568_v4 = vsel %vm3275_vm4, %v3559_v39, %v3567_v34 }
 0x325   : > { %v8098_v63 = vpop.f32.mrf.mxu0  ;;  %v8120_v9 = vpop.f32.mrf.mxu1 }
 0x327   : > { %v8099_v54 = vpop.f32.mrf.mxu0  ;;  %v8121_v36 = vpop.f32.mrf.mxu1 }
 0x328   : > { %v8100_v30 = vadd.f32 %v8099_v54, %v8098_v63  ;;  %v8122_v60 = vadd.f32 %v8121_v36, %v8120_v9  ;;  %v7692_v36 = vld [vmem:[%s8881_s20 + $0x198] sm:$0xe0] }
 0x329   : > { %v8101_v12 = vpop.f32.mrf.mxu0  ;;  %v8123_v49 = vpop.f32.mrf.mxu1 }
 0x32a   : > { %v5865_v53 = vadd.f32 %v8100_v30, %v7869_v28  ;;  %v3702_v30 = vrot.slane %v8708_v19, %v9896_v58 }
 0x32b   : > { %v8102_v51 = vpop.f32.mrf.mxu0  ;;  %v8124_v44 = vpop.f32.mrf.mxu1 }
 0x32c   : > { %v5906_v59 = vadd.f32 %v8122_v60, %v5865_v53  ;;  %v8103_v0 = vadd.f32 %v8102_v51, %v8101_v12  ;;  %v8125_v9 = vadd.f32 %v8124_v44, %v8123_v49  ;;  %v3558_v12 = vrot.slane %v3528_v1, 5  ;;  %v7701_v49 = vld [vmem:[%s8881_s20 + $0x1f8] sm:$0xe0]  ;;  %v7705_v53 = vld [vmem:[%s8881_s20 + $0x238] sm:$0x1f] }
 0x32d   : > { %v8709_v60 = vld [vmem:[%s8881_s20 + $0x128] sm:$0xf8]  ;;  %v8711_v44 = vld [vmem:[%s8881_s20 + $0x168] sm:$0x7]  ;;  %v3710_v50 = vmul.f32 %v7701_v49, %v3702_v30  ;;  %v3714_v52 = vmul.f32 %v10972_v37, %v3702_v30 }
 0x32e   : > { %v5919_v6 = vmul.f32 %v7902_v47, %v5906_v59  ;;  %v5868_v63 = vadd.f32 %v8103_v0, %v7869_v28  ;;  %v3611_v28 = vrot.slane %v8707_v18, %v9896_v58  ;;  %v3477_v59 = vsel %vm3275_vm4, %v3468_v56, %v3476_v27  ;;  %v7720_v27 = vld [vmem:[%s8881_s20 + $0x78] sm:$0xc0] }
 0x32f   : > { %v3718_v0 = vmul.f32 %v7705_v53, %v3702_v30  ;;  %v3560_v38 = vsel %vm3275_vm4, %v3558_v12, %v3559_v39  ;;  %v3740_v16 = vrot.slane %v3710_v50, 5  ;;  %v3741_v1 = vrot.slane %v3714_v52, 5  ;;  %v5977_v50 = vld [vmem:[%s11649_s5] sm:$0xf] }
 0x330   : > { %v5909_v61 = vadd.f32 %v8125_v9, %v5868_v63  ;;  %v5923_v54 = vrot.slane %v5919_v6, 5  ;;  %v3619_v35 = vmul.f32 %v7692_v36, %v3611_v28  ;;  %v3623_v40 = vmul.f32 %v10951_v62, %v3611_v28  ;;  %v3861_v6 = vld [vmem:[%s8881_s20 + $0x18] sm:$0xc0]  ;;  %v8713_v63 = vld [vmem:[%s11645_s1 + $0xa2] ss:$8 sm:$0xf] }
 0x331   : > { %v3627_v41 = vmul.f32 %v7696_v23, %v3611_v28  ;;  %v3469_v62 = vsel %vm3275_vm4, %v3467_v5, %v3468_v56  ;;  %v3884_v9 = vrot.slane %v8713_v63, %v9896_v58  ;;  %v3749_v48 = vrot.slane %v3718_v0, 5  ;;  %v8714_v36 = vld [vmem:[%s11645_s1 + $0xa3] ss:$8 sm:$0xf] }
 0x332   : > { %v5920_v20 = vmul.f32 %v7902_v47, %v5909_v61  ;;  %v5929_v32 = vadd.f32 %v8709_v60, %v5923_v54  ;;  %v3793_v47 = vrot.slane %v8710_v13, %v9896_v58  ;;  %v3649_v11 = vrot.slane %v3619_v35, 5  ;;  %v8715_v23 = vld [vmem:[%s8881_s20 + $0x38] sm:$0xff] }
 0x333   : > { %v3650_v10 = vrot.slane %v3623_v40, 5  ;;  %v3658_v14 = vrot.slane %v3627_v41, 5  ;;  %v3489_v28 = vadd.f32 %v3469_v62, %v3307_v8  ;;  %v3493_v5 = vadd.f32 %v3477_v59, %v3311_v21  ;;  %v7724_v8 = vld [vmem:[%s8881_s20 + $0xb8] sm:$0x3f] }
 0x334   : > { %v5924_v31 = vrot.slane %v5920_v20, 5  ;;  %v5935_v15 = vrot.slane %v5929_v32, 3  ;;  %v3801_v33 = vmul.f32 %v7710_v45, %v3793_v47  ;;  %v3805_v18 = vmul.f32 %v10980_v22, %v3793_v47  ;;  %v8716_v32 = vld [vmem:[%s8881_s20 + $0x98] sm:$0xff] }
 0x335   : > { %v3976_v20 = vrot.slane %v8714_v36, %v9896_v58  ;;  %v3892_v56 = vmul.f32 %v3884_v9, %v3861_v6  ;;  %v3896_v19 = vmul.f32 %v8715_v23, %v3884_v9  ;;  %v3900_v30 = vmul.f32 %v3884_v9, %v3865_v7 }
 0x336   : > { %v5925_v51 = vsel %vm3275_vm4, %v5923_v54, %v5924_v31  ;;  %v5931_v46 = vadd.f32 %v8711_v44, %v5924_v31  ;;  %v3809_v54 = vmul.f32 %v7714_v26, %v3793_v47  ;;  %v3580_v12 = vadd.f32 %v3560_v38, %v3398_v3  ;;  %v8717_v3 = vld [vmem:[%s11645_s1 + $0xa4] ss:$8 sm:$0xf]  ;;  %v7729_v44 = vld [vmem:[%s8881_s20 + $0xd8] sm:$0xc0] }
 0x337   : > { %v5930_v57 = vadd.f32 %v8712_v43, %v5925_v51  ;;  %v3584_v22 = vadd.f32 %v3568_v4, %v3402_v24  ;;  %v3651_v49 = vsel %vm3275_vm4, %v3649_v11, %v3650_v10  ;;  %v3831_v31 = vrot.slane %v3801_v33, 5 }
 0x338   : > { %v5938_v29 = vrot.slane %v5931_v46, 3  ;;  %v3659_v39 = vsel %vm3275_vm4, %v3650_v10, %v3658_v14  ;;  %v3742_v34 = vsel %vm3275_vm4, %v3740_v16, %v3741_v1  ;;  %v3750_v35 = vsel %vm3275_vm4, %v3741_v1, %v3749_v48  ;;  %v8718_v10 = vld [vmem:[%s8881_s20 + $0xf8] sm:$0xff] }
 0x339   : > { %v5936_v37 = vrot.slane %v5930_v57, 3  ;;  %v3832_v21 = vrot.slane %v3805_v18, 5  ;;  %v3840_v53 = vrot.slane %v3809_v54, 5  ;;  %v3984_v60 = vmul.f32 %v7720_v27, %v3976_v20  ;;  %v7742_v27 = vld [vmem:[%s8881_s20 + $0x178] sm:$0x3f] }
 0x33a   : > { %v3988_v40 = vmul.f32 %v8716_v32, %v3976_v20  ;;  %v4067_v24 = vrot.slane %v8717_v3, %v9896_v58  ;;  %v3923_v41 = vrot.slane %v3892_v56, 6  ;;  %v3924_v13 = vrot.slane %v3896_v19, 6 }
 0x33b   : > { %v5937_v61 = vsel %vm1999_vm2, %v5935_v15, %v5936_v37  ;;  %v5939_v17 = vsel %vm1999_vm2, %v5936_v37, %v5938_v29  ;;  %v3932_v47 = vrot.slane %v3900_v30, 6  ;;  %v3992_v51 = vmul.f32 %v7724_v8, %v3976_v20  ;;  %v7733_v29 = vld [vmem:[%s8881_s20 + $0x118] sm:$0x3f]  ;;  %v7738_v20 = vld [vmem:[%s8881_s20 + $0x138] sm:$0xc0] }
 0x33c   : > { %5942 = vst [vmem:[%s10581_s29 + $0x8] sm:$0xff] %v5937_v61  ;;  %5943 = vst [vmem:[%s10581_s29 + $0x28] sm:$0xff] %v5939_v17  ;;  %v3671_v46 = vadd.f32 %v3651_v49, %v3489_v28  ;;  %v3675_v52 = vadd.f32 %v3659_v39, %v3493_v5  ;;  %v3762_v43 = vadd.f32 %v3742_v34, %v3580_v12  ;;  %v4014_v0 = vrot.slane %v3984_v60, 6  ;;  %v8719_v17 = vld [vmem:[%s11645_s1 + $0xa5] ss:$8 sm:$0xf] }
 0x33d   : > { %v3766_v57 = vadd.f32 %v3750_v35, %v3584_v22  ;;  %v3833_v62 = vsel %vm3275_vm4, %v3831_v31, %v3832_v21  ;;  %v3841_v59 = vsel %vm3275_vm4, %v3832_v21, %v3840_v53  ;;  %v4015_v45 = vrot.slane %v3988_v40, 6  ;;  %v8720_v12 = vld [vmem:[%s11645_s1 + $0xa6] ss:$8 sm:$0xf] }
 0x33e   : > { %v11318_v38 = vmul.f32 %v7729_v44, %v4067_v24  ;;  %v3925_v26 = vsel %vm3913_vm5, %v3923_v41, %v3924_v13  ;;  %v3933_v15 = vsel %vm3913_vm5, %v3924_v13, %v3932_v47  ;;  %v4023_v37 = vrot.slane %v3992_v51, 6  ;;  %v7747_v34 = vld [vmem:[%s8881_s20 + $0x198] sm:$0xc0]  ;;  %v7751_v51 = vld [vmem:[%s8881_s20 + $0x1d8] sm:$0x3f] }
 0x33f   : > { %v11323_v6 = vmul.f32 %v8718_v10, %v4067_v24  ;;  %v5982_v63 = vrot.slane %v5977_v50, %v8884_v25  ;;  %v5986_v9 = vrot.slane %v5977_v50, %v9483_v55  ;;  %v5994_v14 = vrot.slane %v5977_v50, %v9896_v58  ;;  %v11359_v41 = vld [vmem:[%s8881_s20 + $0x158] sm:$0xff] }
 0x340   : > { %v5990_v16 = vrot.slane %v5977_v50, %v9886_v42  ;;  %v11329_v7 = vadd.f32 %v3833_v62, %v3671_v46  ;;  %v4083_v61 = vmul.f32 %v7733_v29, %v4067_v24  ;;  %v4158_v48 = vrot.slane %v8719_v17, %v9896_v58 }
 0x341   : > { %v11335_v18 = vadd.f32 %v3841_v59, %v3675_v52  ;;  %v11337_v28 = vadd.f32 %v3925_v26, %v3762_v43  ;;  %v11339_v54 = vadd.f32 %v3933_v15, %v3766_v57  ;;  %v11342_v36 = vsel %vm3913_vm5, %v4014_v0, %v4015_v45  ;;  %v8722_v52 = vld [vmem:[%s11645_s1 + $0xa7] ss:$8 sm:$0xf] }
 0x342   : > { %v11346_v23 = vsel %vm3913_vm5, %v4015_v45, %v4023_v37  ;;  %v4105_v19 = vrot.slane %v11318_v38, 6  ;;  %v4106_v30 = vrot.slane %v11323_v6, 6  ;;  %v4249_v22 = vrot.slane %v8720_v12, %v9896_v58  ;;  %v8464_v45 = vld [vmem:[%s11648_s4 + $0xe0] ss:$16 sps:$4 sm:$0xff]   ;;  %v7756_v37 = vld [vmem:[%s8881_s20 + $0x1f8] sm:$0xc0] }
 0x343   : > { %v4114_v32 = vrot.slane %v4083_v61, 6  ;;  %v11356_v40 = vmul.f32 %v7738_v20, %v4158_v48  ;;  %v11362_v13 = vmul.f32 %v11359_v41, %v4158_v48  ;;  %v11364_v47 = vmul.f32 %v7742_v27, %v4158_v48 }
 0x344   : > { %v11367_v50 = vmul.f32 %v7747_v34, %v4249_v22  ;;  %v4340_v43 = vrot.slane %v8722_v52, %v9896_v58  ;;  %v4265_v15 = vmul.f32 %v7751_v51, %v4249_v22  ;;  %v8470_v34 = vld [vmem:[%s11648_s4 + $0xc0] ss:$16 sps:$4 sm:$0xff]  }
 0x345   : > { %v6193_v4 = vpop.f32.mrf.mxu0  ;;  %v6236_v11 = vpop.f32.mrf.mxu1  ;;  %v4115_v48 = vsel %vm3913_vm5, %v4106_v30, %v4114_v32  ;;  %v4196_v20 = vrot.slane %v11356_v40, 6  ;;  %v4205_v27 = vrot.slane %v11364_v47, 6  ;;  %v8478_v40 = vld [vmem:[%s11648_s4 + $0xa4] ss:$16 sps:$4 sm:$0xff]  }
 0x346   : > { %v6194_v35 = vadd.f32 %v6193_v4, %v5982_v63  ;;  %v6237_v21 = vadd.f32 %v6236_v11, %v5990_v16  ;;  %v8467_v4 = vld [vmem:[%s11648_s4 + $0xe8] ss:$16 sps:$4 sm:$0xff]   ;;  %v4287_v12 = vrot.slane %v11367_v50, 6  ;;  %v4131_v51 = vadd.f32 %v4115_v48, %v11339_v54  ;;  %v8476_v50 = vld [vmem:[%s11648_s4 + $0xa0] ss:$16 sps:$4 sm:$0xff]  }
 0x347   : > { %v6195_v1 = vpop.f32.mrf.mxu0  ;;  %v6238_v33 = vpop.f32.mrf.mxu1  ;;  %v8723_v11 = vld [vmem:[%s8881_s20 + $0x1b8] sm:$0xff] }
 0x348   : > { %v6196_v49 = vadd.f32 %v6195_v1, %v5986_v9  ;;  %v6239_v31 = vadd.f32 %v6238_v33, %v5994_v14  ;;  %v6245_v29 = vmax.f32 %v6194_v35, 0.0  ;;  %v6247_v38 = vmax.f32 %v6237_v21, 0.0  ;;  %v8724_v1 = vld [vmem:[%s11645_s1 + $0xc0] ss:$8 sm:$0xf] }
 0x349   : > { %v6197_v5 = vpop.f32.mrf.mxu0  ;;  %v6240_v56 = vpop.f32.mrf.mxu1  ;;  %v4261_v26 = vmul.f32 %v8723_v11, %v4249_v22  ;;  %v4431_v33 = vrot.slane %v8724_v1, %v9896_v58  ;;  %v4348_v22 = vmul.f32 %v7756_v37, %v4340_v43  ;;  %v8473_v35 = vld [vmem:[%s11648_s4 + $0xc8] ss:$16 sps:$4 sm:$0xff]   ;;  %v8488_v1 = vld [vmem:[%s11648_s4 + $0x60] ss:$16 sps:$4 sm:$0xff]  }
 0x34a   : > { %v6198_v8 = vadd.f32 %v6197_v5, %v5982_v63  ;;  %v6241_v39 = vadd.f32 %v6240_v56, %v5990_v16  ;;  %v6246_v57 = vmax.f32 %v6196_v49, 0.0  ;;  %v6248_v62 = vmax.f32 %v6239_v31, 0.0  ;;  %v8472_v63 = vld [vmem:[%s11648_s4 + $0xc4] ss:$16 sps:$4 sm:$0xff]   ;;  %v7760_v16 = vld [vmem:[%s8881_s20 + $0x238] sm:$0x3f] }
 0x34b   : > { %v6199_v53 = vpop.f32.mrf.mxu0  ;;  %v6242_v60 = vpop.f32.mrf.mxu1  ;;  %v7765_v5 = vld [vmem:[%s8881_s20 + $0x258] sm:$0xc0]  ;;  %v7769_v56 = vld [vmem:[%s8881_s20 + $0x298] sm:$0x3f]  ;;  %v4288_v49 = vrot.slane %v4261_v26, 6  ;;  %v4296_v31 = vrot.slane %v4265_v15, 6 }
 0x34c   : > { %v6200_v3 = vadd.f32 %v6199_v53, %v5986_v9  ;;  %v6243_v24 = vadd.f32 %v6242_v60, %v5994_v14  ;;  %v6249_v44 = vmax.f32 %v6198_v8, 0.0  ;;  %v6251_v46 = vmax.f32 %v6241_v39, 0.0  ;;  %v8475_v9 = vld [vmem:[%s11648_s4 + $0xcc] ss:$16 sps:$4 sm:$0xff]   ;;  %v8485_v11 = vld [vmem:[%s11648_s4 + $0x88] ss:$16 sps:$4 sm:$0xff]  }
 0x34d   : > { %v4107_v14 = vsel %vm3913_vm5, %v4105_v19, %v4106_v30  ;;  %v4197_v19 = vrot.slane %v11362_v13, 6  ;;  %v8725_v8 = vld [vmem:[%s8881_s20 + $0x218] sm:$0xff]  ;;  %v4356_v39 = vmul.f32 %v7760_v16, %v4340_v43  ;;  %v4439_v21 = vmul.f32 %v7765_v5, %v4431_v33  ;;  %v8727_v5 = vld [vmem:[%s11646_s2] sm:$0xf] }
 0x34e   : > { %v6250_v59 = vmax.f32 %v6200_v3, 0.0  ;;  %v6252_v0 = vmax.f32 %v6243_v24, 0.0  ;;  %v6253_v61 = vpack.c.bf16 %v6249_v44, %v6245_v29  ;;  %v6255_v17 = vpack.c.bf16 %v6251_v46, %v6247_v38  ;;  %v8726_v53 = vld [vmem:[%s8881_s20 + $0x278] sm:$0xff] }
 0x34f   : > { %v4352_v30 = vmul.f32 %v8725_v8, %v4340_v43  ;;  %v4443_v60 = vmul.f32 %v8726_v53, %v4431_v33  ;;  %v4447_v32 = vmul.f32 %v7769_v56, %v4431_v33  ;;  %v8481_v3 = vld [vmem:[%s11648_s4 + $0xac] ss:$16 sps:$4 sm:$0xff]   ;;  %v4036_v24 = vadd.f32 %v11342_v36, %v11329_v7  ;;  %v8491_v33 = vld [vmem:[%s11648_s4 + $0x68] ss:$16 sps:$4 sm:$0xff]   ;;  %v8728_v8 = vld [vmem:[%s11647_s3] sm:$0xf] }
 0x350   : > { %v6254_v10 = vpack.c.bf16 %v6250_v59, %v6246_v57  ;;  %v6256_v6 = vpack.c.bf16 %v6252_v0, %v6248_v62  ;;  %v4040_v13 = vadd.f32 %v11346_v23, %v11335_v18  ;;  %v4127_v47 = vadd.f32 %v4107_v14, %v11337_v28  ;;  %v8484_v57 = vld [vmem:[%s11648_s4 + $0x84] ss:$16 sps:$4 sm:$0xff]   ;;  %v8487_v62 = vld [vmem:[%s11648_s4 + $0x8c] ss:$16 sps:$4 sm:$0xff]  }
 0x351   : > { %v4198_v44 = vsel %vm3913_vm5, %v4196_v20, %v4197_v19  ;;  %v4206_v46 = vsel %vm3913_vm5, %v4197_v19, %v4205_v27  ;;  %v4289_v7 = vsel %vm3913_vm5, %v4287_v12, %v4288_v49  ;;  %v4297_v18 = vsel %vm3913_vm5, %v4288_v49, %v4296_v31  ;;  %v8494_v19 = vld [vmem:[%s11648_s4 + $0x40] ss:$16 sps:$4 sm:$0xff]   ;;  %v8497_v27 = vld [vmem:[%s11648_s4 + $0x48] ss:$16 sps:$4 sm:$0xff]   ;;  %v8502_v12 = vld [vmem:[%s11648_s4 + $0x24] ss:$16 sps:$4 sm:$0xff]  }
 0x352   : > { %6552 = vmatprep.mubr.bf16.mxu0 %v6254_v10  ;;  %6593 = vmatprep.mubr.bf16.mxu1 %v6256_v6  ;;  %v4378_v36 = vrot.slane %v4348_v22, 6  ;;  %v4379_v28 = vrot.slane %v4352_v30, 6  ;;  %v4387_v54 = vrot.slane %v4356_v39, 6  ;;  %v4469_v23 = vrot.slane %v4439_v21, 6  ;;  %v8490_v10 = vld [vmem:[%s11648_s4 + $0x64] ss:$16 sps:$4 sm:$0xff]  }
 0x353   : > { %6553 = vmatmul.mubr.bf16.vlgmr.msra.gmra.mxu0 %v6253_v61  ;;  %6594 = vmatmul.mubr.bf16.vlgmr.msra.gmra.mxu1 %v6255_v17  ;;  %v4470_v52 = vrot.slane %v4443_v60, 6  ;;  %v4478_v43 = vrot.slane %v4447_v32, 6  ;;  %v4218_v59 = vadd.f32 %v4198_v44, %v4036_v24  ;;  %v4222_v0 = vadd.f32 %v4206_v46, %v4040_v13  ;;  %v8493_v6 = vld [vmem:[%s11648_s4 + $0x6c] ss:$16 sps:$4 sm:$0xff]   ;;  %v8496_v61 = vld [vmem:[%s11648_s4 + $0x44] ss:$16 sps:$4 sm:$0xff]  }
 0x354   : > { %6850 = vmatpush1.bf16.msra.mxu0 %v8464_v45  ;;  %6893 = vmatpush1.bf16.msra.mxu1 %v8467_v4  ;;  %v4309_v45 = vadd.f32 %v4289_v7, %v4127_v47  ;;  %v4313_v29 = vadd.f32 %v4297_v18, %v4131_v51  ;;  %v4380_v38 = vsel %vm3913_vm5, %v4378_v36, %v4379_v28  ;;  %v8482_v4 = vld [vmem:[%s11648_s4 + $0x80] ss:$16 sps:$4 sm:$0xff]   ;;  %v8499_v17 = vld [vmem:[%s11648_s4 + $0x4c] ss:$16 sps:$4 sm:$0xff]  }
 0x355   : > { %6851 = vmatprep.subr.bf16.mxu0 %v8472_v63  ;;  %6894 = vmatprep.subr.bf16.mxu1 %v8475_v9  ;;  %v4388_v26 = vsel %vm3913_vm5, %v4379_v28, %v4387_v54  ;;  %v4471_v15 = vsel %vm3913_vm5, %v4469_v23, %v4470_v52  ;;  %v4479_v37 = vsel %vm3913_vm5, %v4470_v52, %v4478_v43  ;;  %v8505_v22 = vld [vmem:[%s11648_s4 + $0x2c] ss:$16 sps:$4 sm:$0xff]   ;;  %v8500_v39 = vld [vmem:[%s11648_s4 + $0x20] ss:$16 sps:$4 sm:$0xff]  }
 0x356   : > { %6881 = vmatprep.mubr.bf16.mxu0 %v8742_v2  ;;  %6924 = vmatprep.mubr.bf16.mxu1 %v8742_v2  ;;  %v8479_v2 = vld [vmem:[%s11648_s4 + $0xa8] ss:$16 sps:$4 sm:$0xff]   ;;  %v4400_v63 = vadd.f32 %v4380_v38, %v4218_v59  ;;  %v4404_v9 = vadd.f32 %v4388_v26, %v4222_v0  ;;  %v4491_v14 = vadd.f32 %v4471_v15, %v4309_v45  ;;  %v8511_v21 = vld [vmem:[%s11648_s4 + $0xc] ss:$16 sps:$4 sm:$0xff]   ;;  %v8506_v32 = vld [vmem:[%s11648_s4] ss:$16 sps:$4 sm:$0xff]  }
 0x357   : > { %v4495_v16 = vadd.f32 %v4479_v37, %v4313_v29  ;;  %v4521_v56 = vrot.slane %v8727_v5, %v9896_v58  ;;  %v4551_v30 = vrot.slane %v8728_v8, %v9896_v58  ;;  %v8512_v24 = vld [vmem:[%s11650_s6 + $0x78] sm:$0xff]   ;;  %v8516_v44 = vld [vmem:[%s11650_s6 + $0x70] sm:$0xff]   ;;  %v8520_v18 = vld [vmem:[%s11650_s6 + $0x68] sm:$0xff]  }
 0x358   : > { %6852 = vmatpush1.bf16.msra.mxu0 %v8470_v34  ;;  %6895 = vmatpush1.bf16.msra.mxu1 %v8473_v35  ;;  %v4499_v48 = vadd.f32 %v4491_v14, %v4400_v63  ;;  %v8503_v34 = vld [vmem:[%s11648_s4 + $0x28] ss:$16 sps:$4 sm:$0xff]   ;;  %v8508_v35 = vld [vmem:[%s11648_s4 + $0x4] ss:$16 sps:$4 sm:$0xff]  }
 0x359   : > { %6853 = vmatprep.subr.bf16.mxu0 %v8478_v40  ;;  %6896 = vmatprep.subr.bf16.mxu1 %v8481_v3  ;;  %v4503_v20 = vadd.f32 %v4495_v16, %v4404_v9  ;;  %v8509_v40 = vld [vmem:[%s11648_s4 + $0x8] ss:$16 sps:$4 sm:$0xff]   ;;  %v8517_v46 = vld [vmem:[%s11650_s6 + $0xf0] sm:$0xff]   ;;  %v8524_v54 = vld [vmem:[%s11650_s6 + $0x60] sm:$0xff]  }
 0x35a   : > { %v4529_v49 = vmul.f32 %v4521_v56, %v4499_v48  ;;  %v8513_v13 = vld [vmem:[%s11650_s6 + $0xf8] sm:$0xff]   ;;  %v8519_v7 = vld [vmem:[%s11650_s6 + $0xb0] sm:$0xff]   ;;  %v8521_v36 = vld [vmem:[%s11650_s6 + $0xe8] sm:$0xff]  }
 0x35b   : > { %v4533_v31 = vmul.f32 %v4521_v56, %v4503_v20  ;;  %v8514_v47 = vld [vmem:[%s11650_s6 + $0x38] sm:$0xff]   ;;  %v8522_v28 = vld [vmem:[%s11650_s6 + $0x28] sm:$0xff]   ;;  %v8525_v23 = vld [vmem:[%s11650_s6 + $0xe0] sm:$0xff]  }
 0x35c   : > { %6854 = vmatpush1.bf16.msra.mxu0 %v8476_v50  ;;  %6897 = vmatpush1.bf16.msra.mxu1 %v8479_v2  ;;  %v4559_v53 = vadd.f32 %v4551_v30, %v4529_v49  ;;  %v8515_v51 = vld [vmem:[%s11650_s6 + $0xb8] sm:$0xff]   ;;  %v8518_v50 = vld [vmem:[%s11650_s6 + $0x30] sm:$0xff]   ;;  %v8523_v2 = vld [vmem:[%s11650_s6 + $0xa8] sm:$0xff]  }
 0x35d   : > { %6855 = vmatprep.subr.bf16.mxu0 %v8484_v57  ;;  %6898 = vmatprep.subr.bf16.mxu1 %v8487_v62  ;;  %v4563_v60 = vadd.f32 %v4551_v30, %v4533_v31  ;;  %v8526_v52 = vld [vmem:[%s11650_s6 + $0x20] sm:$0xff]   ;;  %v8528_v57 = vld [vmem:[%s11650_s6 + $0x58] sm:$0xff]   ;;  %v8532_v45 = vld [vmem:[%s11650_s6 + $0x50] sm:$0xff]  }
 0x35e   : > { %v8527_v43 = vld [vmem:[%s11650_s6 + $0xa0] sm:$0xff]   ;;  %v8529_v62 = vld [vmem:[%s11650_s6 + $0xd8] sm:$0xff]   ;;  %v8533_v29 = vld [vmem:[%s11650_s6 + $0xd0] sm:$0xff]  }
 0x35f   : > { %v6634_v3 = vpack.c.bf16 %v4563_v60, %v4559_v53  ;;  %v8530_v59 = vld [vmem:[%s11650_s6 + $0x18] sm:$0xff]   ;;  %v8534_v38 = vld [vmem:[%s11650_s6 + $0x10] sm:$0xff]   ;;  %v8537_v26 = vld [vmem:[%s11650_s6 + $0xc8] sm:$0xff]  }
 0x360   : > { %6856 = vmatpush1.bf16.msra.mxu0 %v8482_v4  ;;  %6899 = vmatpush1.bf16.msra.mxu1 %v8485_v11  ;;  %v8531_v0 = vld [vmem:[%s11650_s6 + $0x98] sm:$0xff]   ;;  %v8535_v4 = vld [vmem:[%s11650_s6 + $0x90] sm:$0xff]   ;;  %v8536_v11 = vld [vmem:[%s11650_s6 + $0x48] sm:$0xff]  }
 0x361   : > { %6857 = vmatprep.subr.bf16.mxu0 %v8490_v10  ;;  %6900 = vmatprep.subr.bf16.mxu1 %v8493_v6  ;;  %v8538_v15 = vld [vmem:[%s11650_s6 + $0x8] sm:$0xff]   ;;  %v8540_v10 = vld [vmem:[%s11650_s6 + $0x40] sm:$0xff]   ;;  %v8729_v53 = vld [vmem:[%s8881_s20 + $0x130] sm:$0xf8] }
 0x362   : > { %v8539_v37 = vld [vmem:[%s11650_s6 + $0x88] sm:$0xff]   ;;  %v8541_v6 = vld [vmem:[%s11650_s6 + $0xc0] sm:$0xff]  }
 0x363   : > { %v8542_v63 = vld [vmem:[%s11650_s6] sm:$0xff]  }
 0x364   : > { %6858 = vmatpush1.bf16.msra.mxu0 %v8488_v1  ;;  %6901 = vmatpush1.bf16.msra.mxu1 %v8491_v33  ;;  %v8543_v9 = vld [vmem:[%s11650_s6 + $0x80] sm:$0xff]  }
 0x365   : > { %6859 = vmatprep.subr.bf16.mxu0 %v8496_v61  ;;  %6902 = vmatprep.subr.bf16.mxu1 %v8499_v17  ;;  %v11603_v1 = vld [vmem:[%s11651_s7] ss:$0 sm:$0xff] }
 0x368   : > { %6860 = vmatpush1.bf16.msra.mxu0 %v8494_v19  ;;  %6903 = vmatpush1.bf16.msra.mxu1 %v8497_v27  ;;  %v11609_v19 = vld [vmem:[%s11652_s8] ss:$0 sm:$0xff] }
 0x369   : > { %6861 = vmatprep.subr.bf16.mxu0 %v8502_v12  ;;  %6904 = vmatprep.subr.bf16.mxu1 %v8505_v22 }
 0x36c   : > { %6862 = vmatpush1.bf16.msra.mxu0 %v8500_v39  ;;  %6905 = vmatpush1.bf16.msra.mxu1 %v8503_v34 }
 0x36d   : > { %6863 = vmatprep.subr.bf16.mxu0 %v8508_v35  ;;  %6906 = vmatprep.subr.bf16.mxu1 %v8511_v21 }
 0x370   : > { %6864 = vmatpush1.bf16.msra.mxu0 %v8506_v32  ;;  %6907 = vmatpush1.bf16.msra.mxu1 %v8509_v40  ;;  %v8730_v40 = vld [vmem:[%s8881_s20 + $0x170] sm:$0x7] }
 0x371   : > { %8170 = vmatprep.subr.bf16.mxu0 %v8512_v24  ;;  %8192 = vmatprep.subr.bf16.mxu1 %v8513_v13  ;;  %v8731_v24 = vld [vmem:[%s8881_s20 + $0x150] sm:$0xff] }
 0x373   : > { %6882 = vmatmul.mubr.bf16.vlgmr.msra.gmra.mxu0 %v6634_v3  ;;  %6925 = vmatmul.mubr.bf16.vlgmr.msra.gmra.mxu1 %v6634_v3 }
 0x374   : > { %8171 = vmatpush3.bf16.msra.mxu0 %v8514_v47  ;;  %8193 = vmatpush3.bf16.msra.mxu1 %v8515_v51 }
 0x375   : > { %8172 = vmatprep.subr.bf16.mxu0 %v8516_v44  ;;  %8194 = vmatprep.subr.bf16.mxu1 %v8517_v46 }
 0x378   : > { %8173 = vmatpush3.bf16.msra.mxu0 %v8518_v50  ;;  %8195 = vmatpush3.bf16.msra.mxu1 %v8519_v7  ;;  %v6667_v7 = vld [vmem:[%s11649_s5] sm:$0xf] }
 0x379   : > { %8174 = vmatprep.subr.bf16.mxu0 %v8520_v18  ;;  %8196 = vmatprep.subr.bf16.mxu1 %v8521_v36 }
 0x37c   : > { %8175 = vmatpush3.bf16.msra.mxu0 %v8522_v28  ;;  %8197 = vmatpush3.bf16.msra.mxu1 %v8523_v2  ;;  %v6676_v28 = vrot.slane %v6667_v7, %v9483_v55  ;;  %v6684_v2 = vrot.slane %v6667_v7, %v9896_v58 }
 0x37d   : > { %8176 = vmatprep.subr.bf16.mxu0 %v8524_v54  ;;  %8198 = vmatprep.subr.bf16.mxu1 %v8525_v23  ;;  %v6672_v54 = vrot.slane %v6667_v7, %v8884_v25  ;;  %v6680_v23 = vrot.slane %v6667_v7, %v9886_v42 }
 0x380   : > { %8177 = vmatpush3.bf16.msra.mxu0 %v8526_v52  ;;  %8199 = vmatpush3.bf16.msra.mxu1 %v8527_v43 }
 0x381   : > { %8178 = vmatprep.subr.bf16.mxu0 %v8528_v57  ;;  %8200 = vmatprep.subr.bf16.mxu1 %v8529_v62 }
 0x384   : > { %8179 = vmatpush3.bf16.msra.mxu0 %v8530_v59  ;;  %8201 = vmatpush3.bf16.msra.mxu1 %v8531_v0 }
 0x385   : > { %8180 = vmatprep.subr.bf16.mxu0 %v8532_v45  ;;  %8202 = vmatprep.subr.bf16.mxu1 %v8533_v29 }
 0x388   : > { %8181 = vmatpush3.bf16.msra.mxu0 %v8534_v38  ;;  %8203 = vmatpush3.bf16.msra.mxu1 %v8535_v4 }
 0x389   : > { %8182 = vmatprep.subr.bf16.mxu0 %v8536_v11  ;;  %8204 = vmatprep.subr.bf16.mxu1 %v8537_v26 }
 0x38c   : > { %8183 = vmatpush3.bf16.msra.mxu0 %v8538_v15  ;;  %8205 = vmatpush3.bf16.msra.mxu1 %v8539_v37 }
 0x38d   : > { %8184 = vmatprep.subr.bf16.mxu0 %v8540_v10  ;;  %8206 = vmatprep.subr.bf16.mxu1 %v8541_v6 }
 0x390   : > { %8185 = vmatpush3.bf16.msra.mxu0 %v8542_v63  ;;  %8207 = vmatpush3.bf16.msra.mxu1 %v8543_v9 }
 0x413   : > { %v8142_v14 = vpop.f32.mrf.mxu0  ;;  %v8164_v16 = vpop.f32.mrf.mxu1 }
 0x415   : > { %v8143_v33 = vpop.f32.mrf.mxu0  ;;  %v8165_v61 = vpop.f32.mrf.mxu1 }
 0x416   : > { %v8144_v17 = vadd.f32 %v8143_v33, %v8142_v14  ;;  %v8166_v56 = vadd.f32 %v8165_v61, %v8164_v16 }
 0x417   : > { %v8145_v48 = vpop.f32.mrf.mxu0  ;;  %v8167_v20 = vpop.f32.mrf.mxu1 }
 0x418   : > { %v6555_v5 = vadd.f32 %v8144_v17, %v11603_v1 }
 0x419   : > { %v8146_v27 = vpop.f32.mrf.mxu0  ;;  %v8168_v12 = vpop.f32.mrf.mxu1 }
 0x41a   : > { %v6596_v22 = vadd.f32 %v8166_v56, %v6555_v5  ;;  %v8147_v49 = vadd.f32 %v8146_v27, %v8145_v48  ;;  %v8169_v30 = vadd.f32 %v8168_v12, %v8167_v20 }
 0x41c   : > { %v6609_v31 = vmul.f32 %v11609_v19, %v6596_v22  ;;  %v6558_v8 = vadd.f32 %v8147_v49, %v11603_v1 }
 0x41e   : > { %v6599_v39 = vadd.f32 %v8169_v30, %v6558_v8  ;;  %v6613_v34 = vrot.slane %v6609_v31, 5 }
 0x420   : > { %v6610_v35 = vmul.f32 %v11609_v19, %v6599_v39  ;;  %v6619_v60 = vadd.f32 %v8729_v53, %v6613_v34 }
 0x422   : > { %v6614_v21 = vrot.slane %v6610_v35, 5  ;;  %v6625_v51 = vrot.slane %v6619_v60, 3 }
 0x424   : > { %v6615_v32 = vsel %vm3275_vm4, %v6613_v34, %v6614_v21  ;;  %v6621_v3 = vadd.f32 %v8730_v40, %v6614_v21 }
 0x425   : > { %v6620_v13 = vadd.f32 %v8731_v24, %v6615_v32 }
 0x426   : > { %v6628_v47 = vrot.slane %v6621_v3, 3  ;;  %v8732_v3 = vld [vmem:[%s8881_s20 + $0x138] sm:$0xf8] }
 0x427   : > { %v6626_v44 = vrot.slane %v6620_v13, 3 }
 0x429   : > { %v6627_v46 = vsel %vm1999_vm2, %v6625_v51, %v6626_v44  ;;  %v6629_v50 = vsel %vm1999_vm2, %v6626_v44, %v6628_v47  ;;  %v8733_v47 = vld [vmem:[%s8881_s20 + $0x178] sm:$0x7] }
 0x42a   : > { %6632 = vst [vmem:[%s10581_s29 + $0x10] sm:$0xff] %v6627_v46  ;;  %6633 = vst [vmem:[%s10581_s29 + $0x30] sm:$0xff] %v6629_v50 }
 0x433   : > { %v6883_v18 = vpop.f32.mrf.mxu0  ;;  %v6926_v36 = vpop.f32.mrf.mxu1 }
 0x434   : > { %v6884_v38 = vadd.f32 %v6883_v18, %v6672_v54  ;;  %v6927_v4 = vadd.f32 %v6926_v36, %v6680_v23 }
 0x435   : > { %v6885_v52 = vpop.f32.mrf.mxu0  ;;  %v6928_v43 = vpop.f32.mrf.mxu1 }
 0x436   : > { %v6886_v59 = vadd.f32 %v6885_v52, %v6676_v28  ;;  %v6929_v0 = vadd.f32 %v6928_v43, %v6684_v2  ;;  %v6935_v63 = vmax.f32 %v6884_v38, 0.0  ;;  %v6937_v9 = vmax.f32 %v6927_v4, 0.0 }
 0x437   : > { %v6887_v57 = vpop.f32.mrf.mxu0  ;;  %v6930_v62 = vpop.f32.mrf.mxu1 }
 0x438   : > { %v6888_v45 = vadd.f32 %v6887_v57, %v6672_v54  ;;  %v6931_v29 = vadd.f32 %v6930_v62, %v6680_v23  ;;  %v6936_v10 = vmax.f32 %v6886_v59, 0.0  ;;  %v6938_v25 = vmax.f32 %v6929_v0, 0.0 }
 0x439   : > { %v6889_v11 = vpop.f32.mrf.mxu0  ;;  %v6932_v26 = vpop.f32.mrf.mxu1 }
 0x43a   : > { %v6890_v15 = vadd.f32 %v6889_v11, %v6676_v28  ;;  %v6933_v55 = vadd.f32 %v6932_v26, %v6684_v2  ;;  %v6939_v37 = vmax.f32 %v6888_v45, 0.0  ;;  %v6941_v58 = vmax.f32 %v6931_v29, 0.0 }
 0x43c   : > { %v6940_v6 = vmax.f32 %v6890_v15, 0.0  ;;  %v6942_v42 = vmax.f32 %v6933_v55, 0.0  ;;  %v6943_v33 = vpack.c.bf16 %v6939_v37, %v6935_v63  ;;  %v6945_v61 = vpack.c.bf16 %v6941_v58, %v6937_v9 }
 0x43e   : > { %v6944_v14 = vpack.c.bf16 %v6940_v6, %v6936_v10  ;;  %v6946_v16 = vpack.c.bf16 %v6942_v42, %v6938_v25 }
 0x440   : > { %7242 = vmatprep.mubr.bf16.mxu0 %v6944_v14  ;;  %7283 = vmatprep.mubr.bf16.mxu1 %v6946_v16 }
 0x441   : > { %7243 = vmatmul.mubr.bf16.vlgmr.msra.gmra.mxu0 %v6943_v33  ;;  %7284 = vmatmul.mubr.bf16.vlgmr.msra.gmra.mxu1 %v6945_v61 }
 0x501   : > { %v8186_v17 = vpop.f32.mrf.mxu0  ;;  %v8208_v48 = vpop.f32.mrf.mxu1 }
 0x503   : > { %v8187_v20 = vpop.f32.mrf.mxu0  ;;  %v8209_v5 = vpop.f32.mrf.mxu1 }
 0x504   : > { %v8188_v56 = vadd.f32 %v8187_v20, %v8186_v17  ;;  %v8210_v49 = vadd.f32 %v8209_v5, %v8208_v48 }
 0x505   : > { %v8189_v27 = vpop.f32.mrf.mxu0  ;;  %v8211_v12 = vpop.f32.mrf.mxu1 }
 0x506   : > { %v7245_v22 = vadd.f32 %v8188_v56, %v11603_v1 }
 0x507   : > { %v8190_v31 = vpop.f32.mrf.mxu0  ;;  %v8212_v8 = vpop.f32.mrf.mxu1 }
 0x508   : > { %v7286_v30 = vadd.f32 %v8210_v49, %v7245_v22  ;;  %v8191_v39 = vadd.f32 %v8190_v31, %v8189_v27  ;;  %v8213_v21 = vadd.f32 %v8212_v8, %v8211_v12 }
 0x50a   : > { %v7299_v34 = vmul.f32 %v11609_v19, %v7286_v30  ;;  %v7248_v35 = vadd.f32 %v8191_v39, %v11603_v1 }
 0x50c   : > { %v7289_v53 = vadd.f32 %v8213_v21, %v7248_v35  ;;  %v7303_v60 = vrot.slane %v7299_v34, 5 }
 0x50e   : > { %v7300_v32 = vmul.f32 %v11609_v19, %v7289_v53  ;;  %v7309_v24 = vadd.f32 %v8732_v3, %v7303_v60 }
 0x510   : > { %v7304_v40 = vrot.slane %v7300_v32, 5  ;;  %v7315_v50 = vrot.slane %v7309_v24, 3 }
 0x512   : > { %v7305_v13 = vsel %vm3275_vm4, %v7303_v60, %v7304_v40  ;;  %v7311_v51 = vadd.f32 %v8733_v47, %v7304_v40 }
 0x513   : > { %v7310_v44 = vadd.f32 %v11359_v41, %v7305_v13 }
 0x514   : > { %v7318_v46 = vrot.slane %v7311_v51, 3 }
 0x515   : > { %v7316_v7 = vrot.slane %v7310_v44, 3 }
 0x517   : > { %v7317_v1 = vsel %vm1999_vm2, %v7315_v50, %v7316_v7  ;;  %v7319_v18 = vsel %vm1999_vm2, %v7316_v7, %v7318_v46 }
 0x518   : > { %7322 = vst [vmem:[%s10581_s29 + $0x18] sm:$0xff] %v7317_v1  ;;  %7323 = vst [vmem:[%s10581_s29 + $0x38] sm:$0xff] %v7319_v18 }
 0x519 PF: > { %s19_s30 = sadd.s32 1, %s8740_s30  }
 0x51a   : > { %p16_p4 = scmp.ge.s32.totalorder %s19_s30, 4  }
 0x51c   :  { %18 = sbr.rel (!%p16_p4) target bundleno = 1 (0x1), region = 140 }

</bundles_post_ra>
